<compile_context>
chip_gen: v6e
topology: v6e:2x2x1
jax: 0.10.0
libtpu: 0.0.40
codegen_flags: <defaults>
</compile_context>

<pallas_src>
import math
import functools

import jax
import jax.numpy as jnp
from jax.experimental import pallas as pl
from jax.experimental.pallas import tpu as pltpu

LANE = 128
LN_EPS = 1e-5
NEG_INF = -1e9


def _round_up(x, m):
    return ((x + m - 1) // m) * m


# ----------------------------- in-kernel building blocks ---------------------

def _mha(xq, xkv, mmul, madd, w_ref, b_all, w0, head_rows):
    """Multi-head attention on VMEM-resident activations.

    xq:  (Sq, Dp) f32    xkv: (Sk, Dp) f32
    mmul/madd: (1, Sk) or (Sq, Sk) f32 such that  s*mmul + madd  ==
               masked_fill(mask == 0, -1e9)(s / sqrt(d_k))  exactly.
    w_ref: stacked (N, Dp, Dp) bf16 weights; indices w0..w0+3 are [wq, wk, wv, wo].
    b_all: (N, Dp) f32 biases (already loaded into vregs).
    head_rows: precomputed (1, Dp) f32 lane masks, one per head (hoisted constants).
    """
    xq_b = xq.astype(jnp.bfloat16)
    xkv_b = xkv.astype(jnp.bfloat16)
    q = jnp.dot(xq_b, w_ref[w0 + 0], preferred_element_type=jnp.float32) + b_all[w0 + 0:w0 + 1]
    k = jnp.dot(xkv_b, w_ref[w0 + 1], preferred_element_type=jnp.float32) + b_all[w0 + 1:w0 + 2]
    v = jnp.dot(xkv_b, w_ref[w0 + 2], preferred_element_type=jnp.float32) + b_all[w0 + 2:w0 + 3]

    kT = k.T.astype(jnp.bfloat16)                      # (Dp, Sk): ONE transpose per attention
    Sq, Dp = q.shape
    concat = jnp.zeros((Sq, Dp), jnp.float32)
    for hrow in head_rows:                             # static unroll (H small)
        qh = (q * hrow).astype(jnp.bfloat16)           # f32 head-mask, then single bf16 cast
        s = jnp.dot(qh, kT, preferred_element_type=jnp.float32)
        s = s * mmul + madd                            # folded scale + masked_fill(-1e9)
        s = s - jnp.max(s, axis=-1, keepdims=True)
        p = jnp.exp(s)
        p = p * pl.reciprocal(jnp.sum(p, axis=-1, keepdims=True), approx=True)
        vh = (v * hrow).astype(jnp.bfloat16)           # per-head V in its own lanes
        concat = concat + jnp.dot(p.astype(jnp.bfloat16), vh,
                                  preferred_element_type=jnp.float32)

    return (jnp.dot(concat.astype(jnp.bfloat16), w_ref[w0 + 3],
                    preferred_element_type=jnp.float32) + b_all[w0 + 3:w0 + 4])


def _add_layernorm(x, y, gamma, beta, fmask, inv_d):
    """LayerNorm(x + y) over the first d_model (un-padded) features, eps=1e-5."""
    z = x + y
    mean = jnp.sum(z * fmask, axis=-1, keepdims=True) * inv_d
    zc = (z - mean) * fmask
    var = jnp.sum(zc * zc, axis=-1, keepdims=True) * inv_d
    return zc * jax.lax.rsqrt(var + LN_EPS) * gamma + beta   # pad lanes stay exactly 0


def _ffn(x, w1, b1, w2, b2):
    """relu(x @ W1 + b1) @ W2 + b2, bf16 matmuls / f32 accumulate."""
    h = jnp.dot(x.astype(jnp.bfloat16), w1, preferred_element_type=jnp.float32) + b1
    h = jnp.maximum(h, 0.0)
    return jnp.dot(h.astype(jnp.bfloat16), w2, preferred_element_type=jnp.float32) + b2


# ----------------------------- fully fused transformer kernel ----------------

def _transformer_kernel(src_x_ref, tgt_x_ref, smul_ref, sadd_ref, tmul_ref, tadd_ref,
                        e_aw_ref, e_ab_ref, e_w1_ref, e_b1_ref, e_w2_ref, e_b2_ref,
                        e_g_ref, e_bt_ref,
                        d_aw_ref, d_ab_ref, d_w1_ref, d_b1_ref, d_w2_ref, d_b2_ref,
                        d_g_ref, d_bt_ref, fcw_ref, fcb_ref,
                        out_ref, *, num_heads, d_k, d_model, num_layers):
    Dp = src_x_ref.shape[-1]

    # ---- hoisted per-kernel constants, shared by every layer / attention ----
    lane = jax.lax.broadcasted_iota(jnp.int32, (1, Dp), 1)
    head_rows = [((lane >= h * d_k) & (lane < (h + 1) * d_k)).astype(jnp.float32)
                 for h in range(num_heads)]
    fmask = (lane < d_model).astype(jnp.float32)
    inv_d = jnp.float32(1.0 / d_model)

    # Small parameter tensors: load once, slice with static indices.
    e_ab = e_ab_ref[...]; e_b1 = e_b1_ref[...]; e_b2 = e_b2_ref[...]
    e_g = e_g_ref[...];   e_bt = e_bt_ref[...]
    d_ab = d_ab_ref[...]; d_b1 = d_b1_ref[...]; d_b2 = d_b2_ref[...]
    d_g = d_g_ref[...];   d_bt = d_bt_ref[...]

    src_mmul = smul_ref[0]     # (1, Ss)
    src_madd = sadd_ref[0]     # (1, Ss)
    tgt_mmul = tmul_ref[0]     # (St, St)
    tgt_madd = tadd_ref[0]     # (St, St)

    # ------------------------------ encoder stack ----------------------------
    enc = src_x_ref[0]                                        # (Ss, Dp) f32
    for li in range(num_layers):                              # static unroll (L small)
        attn = _mha(enc, enc, src_mmul, src_madd, e_aw_ref, e_ab, 4 * li, head_rows)
        enc = _add_layernorm(enc, attn, e_g[2 * li:2 * li + 1], e_bt[2 * li:2 * li + 1],
                             fmask, inv_d)
        ff = _ffn(enc, e_w1_ref[li], e_b1[li:li + 1], e_w2_ref[li], e_b2[li:li + 1])
        enc = _add_layernorm(enc, ff, e_g[2 * li + 1:2 * li + 2],
                             e_bt[2 * li + 1:2 * li + 2], fmask, inv_d)

    # ------------------------------ decoder stack ----------------------------
    dec = tgt_x_ref[0]                                        # (St, Dp) f32
    for li in range(num_layers):
        a1 = _mha(dec, dec, tgt_mmul, tgt_madd, d_aw_ref, d_ab, 8 * li, head_rows)
        dec = _add_layernorm(dec, a1, d_g[3 * li:3 * li + 1], d_bt[3 * li:3 * li + 1],
                             fmask, inv_d)
        a2 = _mha(dec, enc, src_mmul, src_madd, d_aw_ref, d_ab, 8 * li + 4, head_rows)
        dec = _add_layernorm(dec, a2, d_g[3 * li + 1:3 * li + 2],
                             d_bt[3 * li + 1:3 * li + 2], fmask, inv_d)
        ff = _ffn(dec, d_w1_ref[li], d_b1[li:li + 1], d_w2_ref[li], d_b2[li:li + 1])
        dec = _add_layernorm(dec, ff, d_g[3 * li + 2:3 * li + 3],
                             d_bt[3 * li + 2:3 * li + 3], fmask, inv_d)

    # ---------------------- final vocab projection (fused) -------------------
    out_ref[0] = (jnp.dot(dec.astype(jnp.bfloat16), fcw_ref[...],
                          preferred_element_type=jnp.float32) + fcb_ref[...])


# ----------------------------- pallas_call wrapper ----------------------------

def transformer_stack(src_x, tgt_x, src_mmul, src_madd, tgt_mmul, tgt_madd, p,
                      *, num_heads, d_k, d_model, num_layers):
    B, Ss, Dp = src_x.shape
    St = tgt_x.shape[1]
    Fp = p['enc_ff_w1'].shape[-1]
    Vp = p['fc_w'].shape[-1]
    L = num_layers

    operands = (src_x, tgt_x, src_mmul, src_madd, tgt_mmul, tgt_madd,
                p['enc_attn_w'], p['enc_attn_b'], p['enc_ff_w1'], p['enc_ff_b1'],
                p['enc_ff_w2'], p['enc_ff_b2'], p['enc_ln_g'], p['enc_ln_b'],
                p['dec_attn_w'], p['dec_attn_b'], p['dec_ff_w1'], p['dec_ff_b1'],
                p['dec_ff_w2'], p['dec_ff_b2'], p['dec_ln_g'], p['dec_ln_b'],
                p['fc_w'], p['fc_b'])

    # VMEM budget: all stacked weights + per-batch activation/mask blocks stay
    # resident for the whole call.  v7x has only 64 MiB VMEM per TensorCore
    # (v5e/v6e: 128 MiB); keep 2x (double-buffering worst case) of the resident
    # set well under that, and re-derive if S, d_model, d_ff, vocab or num_layers
    # are scaled up.
    resident_bytes = sum(a.size * a.dtype.itemsize for a in operands) + B * St * Vp * 4
    assert 2 * resident_bytes < 48 * 1024 * 1024, (
        f"resident VMEM estimate {resident_bytes} B too large for v7x's 64 MiB VMEM")

    kernel = functools.partial(_transformer_kernel, num_heads=num_heads, d_k=d_k,
                               d_model=d_model, num_layers=num_layers)

    def wspec2(shape):
        return pl.BlockSpec(shape, lambda b: (0, 0))

    def wspec3(shape):
        return pl.BlockSpec(shape, lambda b: (0, 0, 0))

    return pl.pallas_call(
        kernel,
        out_shape=jax.ShapeDtypeStruct((B, St, Vp), jnp.float32),
        grid=(B,),
        in_specs=[
            pl.BlockSpec((1, Ss, Dp), lambda b: (b, 0, 0)),   # src embeddings+PE
            pl.BlockSpec((1, St, Dp), lambda b: (b, 0, 0)),   # tgt embeddings+PE
            pl.BlockSpec((1, 1, Ss), lambda b: (b, 0, 0)),    # src mask mul
            pl.BlockSpec((1, 1, Ss), lambda b: (b, 0, 0)),    # src mask add
            pl.BlockSpec((1, St, St), lambda b: (b, 0, 0)),   # tgt mask mul
            pl.BlockSpec((1, St, St), lambda b: (b, 0, 0)),   # tgt mask add
            # encoder weights, stacked over layers (constant index maps -> resident)
            wspec3((4 * L, Dp, Dp)), wspec2((4 * L, Dp)),     # attn w / b
            wspec3((L, Dp, Fp)), wspec2((L, Fp)),             # ffn w1 / b1
            wspec3((L, Fp, Dp)), wspec2((L, Dp)),             # ffn w2 / b2
            wspec2((2 * L, Dp)), wspec2((2 * L, Dp)),         # ln gamma / beta
            # decoder weights (self + cross attn interleaved: 8 mats per layer)
            wspec3((8 * L, Dp, Dp)), wspec2((8 * L, Dp)),
            wspec3((L, Dp, Fp)), wspec2((L, Fp)),
            wspec3((L, Fp, Dp)), wspec2((L, Dp)),
            wspec2((3 * L, Dp)), wspec2((3 * L, Dp)),
            # final vocab projection
            wspec2((Dp, Vp)), wspec2((1, Vp)),
        ],
        out_specs=pl.BlockSpec((1, St, Vp), lambda b: (b, 0, 0)),
        compiler_params=pltpu.CompilerParams(
            dimension_semantics=("parallel",),            # B==2 -> one element per v7x TC
            vmem_limit_bytes=32 * 1024 * 1024),
    )(*operands)


# ----------------------------- masks / embeddings (JAX glue) -----------------

def generate_mask_biases(src, tgt, d_k):
    """Compact masks matching the reference generate_mask(), pre-folded so that
    s*mmul + madd == masked_fill(mask == 0, -1e9)(s / sqrt(d_k))  EXACTLY.

    NOTE: mirrors the PyTorch reference exactly — its "nopeak" mask is
    ones(1,St,St-1) padded then inverted, i.e. True ONLY in the last key column
    (not a lower-triangular causal mask).
    """
    B, Ss = src.shape
    St = tgt.shape[1]
    scale = jnp.float32(1.0 / math.sqrt(d_k))
    src_valid = (src != 1).astype(jnp.float32)[:, None, :]              # (B,1,Ss)
    src_mmul = src_valid * scale
    src_madd = (1.0 - src_valid) * NEG_INF
    ones = jnp.ones((St, max(St - 1, 0)), jnp.float32)
    nopeak = ((1.0 - jnp.pad(ones, ((0, 0), (0, 1)))) > 0.5).astype(jnp.float32)  # (St,St)
    tgt_valid = (tgt != 1).astype(jnp.float32)                          # (B,St)
    tgt_mask = tgt_valid[:, :, None] * nopeak[None, :, :]               # (B,St,St)
    tgt_mmul = tgt_mask * scale
    tgt_madd = (1.0 - tgt_mask) * NEG_INF
    return src_mmul, src_madd, tgt_mmul, tgt_madd


def make_positional_encoding(max_seq_length, d_model, d_pad):
    position = jnp.arange(max_seq_length, dtype=jnp.float32)[:, None]
    div_term = jnp.exp(jnp.arange(0, d_model, 2, dtype=jnp.float32)
                       * -(math.log(10000.0) / d_model))
    pe = jnp.zeros((max_seq_length, d_model), jnp.float32)
    pe = pe.at[:, 0::2].set(jnp.sin(position * div_term))
    pe = pe.at[:, 1::2].set(jnp.cos(position * div_term))
    return jnp.pad(pe, ((0, 0), (0, d_pad - d_model)))


# ----------------------------- forward ---------------------------------------

def transformer_forward(params, src, tgt, *, num_heads, num_layers, d_model, tgt_vocab):
    d_k = d_model // num_heads
    src_mmul, src_madd, tgt_mmul, tgt_madd = generate_mask_biases(src, tgt, d_k)
    pe = params['pe']
    # Embedding gather + positional encoding (dropout = identity / eval semantics).
    src_x = params['enc_emb'][src] + pe[None, :src.shape[1], :]        # (B, Ss, Dp)
    tgt_x = params['dec_emb'][tgt] + pe[None, :tgt.shape[1], :]        # (B, St, Dp)
    logits = transformer_stack(src_x, tgt_x, src_mmul, src_madd, tgt_mmul, tgt_madd,
                               params, num_heads=num_heads, d_k=d_k,
                               d_model=d_model, num_layers=num_layers)  # (B, St, Vpad)
    return logits[:, :, :tgt_vocab]


# ----------------------------- parameter init --------------------------------

def _xavier(key, fan_in, fan_out):
    bound = math.sqrt(6.0 / (fan_in + fan_out))
    return jax.random.uniform(key, (fan_in, fan_out), jnp.float32, -bound, bound)


def _pad_to(x, shape):
    return jnp.pad(x, [(0, t - s) for s, t in zip(x.shape, shape)])


def init_params(key, src_vocab, tgt_vocab, d_model, num_layers, d_ff, max_seq_length,
                d_pad, f_pad, v_pad):
    n_keys = 3 + num_layers * 6 + num_layers * 10
    key_iter = iter(jax.random.split(key, n_keys))

    def nk():
        return next(key_iter)

    def attn_mats(n):
        return [_pad_to(_xavier(nk(), d_model, d_model), (d_pad, d_pad)) for _ in range(n)]

    def gamma(n):
        return jnp.concatenate([jnp.ones((n, d_model), jnp.float32),
                                jnp.zeros((n, d_pad - d_model), jnp.float32)], axis=1)

    params = {
        'enc_emb': _pad_to(jax.random.normal(nk(), (src_vocab, d_model), jnp.float32),
                           (src_vocab, d_pad)),
        'dec_emb': _pad_to(jax.random.normal(nk(), (tgt_vocab, d_model), jnp.float32),
                           (tgt_vocab, d_pad)),
        'pe': make_positional_encoding(max_seq_length, d_model, d_pad),
        'fc_w': _pad_to(_xavier(nk(), d_model, tgt_vocab), (d_pad, v_pad)).astype(jnp.bfloat16),
        'fc_b': jnp.zeros((1, v_pad), jnp.float32),
    }

    e_aw, e_w1, e_w2 = [], [], []
    for _ in range(num_layers):
        e_aw += attn_mats(4)                                         # wq, wk, wv, wo
        e_w1.append(_pad_to(_xavier(nk(), d_model, d_ff), (d_pad, f_pad)))
        e_w2.append(_pad_to(_xavier(nk(), d_ff, d_model), (f_pad, d_pad)))
    params.update(
        enc_attn_w=jnp.stack(e_aw).astype(jnp.bfloat16),             # (4L, Dp, Dp)
        enc_attn_b=jnp.zeros((4 * num_layers, d_pad), jnp.float32),
        enc_ff_w1=jnp.stack(e_w1).astype(jnp.bfloat16),              # (L, Dp, Fp)
        enc_ff_b1=jnp.zeros((num_layers, f_pad), jnp.float32),
        enc_ff_w2=jnp.stack(e_w2).astype(jnp.bfloat16),              # (L, Fp, Dp)
        enc_ff_b2=jnp.zeros((num_layers, d_pad), jnp.float32),
        enc_ln_g=gamma(2 * num_layers),
        enc_ln_b=jnp.zeros((2 * num_layers, d_pad), jnp.float32),
    )

    d_aw, d_w1, d_w2 = [], [], []
    for _ in range(num_layers):
        d_aw += attn_mats(8)                                         # self q,k,v,o ; cross q,k,v,o
        d_w1.append(_pad_to(_xavier(nk(), d_model, d_ff), (d_pad, f_pad)))
        d_w2.append(_pad_to(_xavier(nk(), d_ff, d_model), (f_pad, d_pad)))
    params.update(
        dec_attn_w=jnp.stack(d_aw).astype(jnp.bfloat16),             # (8L, Dp, Dp)
        dec_attn_b=jnp.zeros((8 * num_layers, d_pad), jnp.float32),
        dec_ff_w1=jnp.stack(d_w1).astype(jnp.bfloat16),
        dec_ff_b1=jnp.zeros((num_layers, f_pad), jnp.float32),
        dec_ff_w2=jnp.stack(d_w2).astype(jnp.bfloat16),
        dec_ff_b2=jnp.zeros((num_layers, d_pad), jnp.float32),
        dec_ln_g=gamma(3 * num_layers),
        dec_ln_b=jnp.zeros((3 * num_layers, d_pad), jnp.float32),
    )
    return params


# ----------------------------- main -------------------------------------------

if __name__ == "__main__":
    src_vocab_size = 16
    tgt_vocab_size = 16
    d_model = 32
    num_heads = 4
    num_layers = 2
    d_ff = 64
    max_seq_length = 16
    # TODO(synk): dropout is treated as identity (eval-mode semantics); RNG-based
    # dropout from the reference is not implemented.

    B, S_src, S_tgt = 2, 8, 8

    D_PAD = _round_up(d_model, LANE)          # 128
    F_PAD = _round_up(d_ff, LANE)             # 128
    V_PAD = _round_up(tgt_vocab_size, LANE)   # 128

    key = jax.random.PRNGKey(0)
    k_params, k_src, k_tgt = jax.random.split(key, 3)

    params = init_params(k_params, src_vocab_size, tgt_vocab_size, d_model,
                         num_layers, d_ff, max_seq_length, D_PAD, F_PAD, V_PAD)

    src = jax.random.randint(k_src, (B, S_src), 0, src_vocab_size, dtype=jnp.int32)
    tgt = jax.random.randint(k_tgt, (B, S_tgt), 0, tgt_vocab_size, dtype=jnp.int32)

    fwd = jax.jit(functools.partial(transformer_forward,
                                    num_heads=num_heads, num_layers=num_layers,
                                    d_model=d_model, tgt_vocab=tgt_vocab_size))
    out = jax.block_until_ready(fwd(params, src, tgt))

    assert out.shape == (B, S_tgt, tgt_vocab_size), out.shape
    assert bool(jnp.all(jnp.isfinite(out)))
    print("KERNEL_OK")
</pallas_src>

<mosaic_0001>
module attributes {stable_mosaic.version = 11 : i64} {
  func.func @_transformer_kernel(%arg0: i32, %arg1: memref<1x8x128xf32, #tpu.memory_space<vmem>>, %arg2: memref<1x8x128xf32, #tpu.memory_space<vmem>>, %arg3: memref<1x1x8xf32, #tpu.memory_space<vmem>>, %arg4: memref<1x1x8xf32, #tpu.memory_space<vmem>>, %arg5: memref<1x8x8xf32, #tpu.memory_space<vmem>>, %arg6: memref<1x8x8xf32, #tpu.memory_space<vmem>>, %arg7: memref<8x128x128xbf16, #tpu.memory_space<vmem>>, %arg8: memref<8x128xf32, #tpu.memory_space<vmem>>, %arg9: memref<2x128x128xbf16, #tpu.memory_space<vmem>>, %arg10: memref<2x128xf32, #tpu.memory_space<vmem>>, %arg11: memref<2x128x128xbf16, #tpu.memory_space<vmem>>, %arg12: memref<2x128xf32, #tpu.memory_space<vmem>>, %arg13: memref<4x128xf32, #tpu.memory_space<vmem>>, %arg14: memref<4x128xf32, #tpu.memory_space<vmem>>, %arg15: memref<16x128x128xbf16, #tpu.memory_space<vmem>>, %arg16: memref<16x128xf32, #tpu.memory_space<vmem>>, %arg17: memref<2x128x128xbf16, #tpu.memory_space<vmem>>, %arg18: memref<2x128xf32, #tpu.memory_space<vmem>>, %arg19: memref<2x128x128xbf16, #tpu.memory_space<vmem>>, %arg20: memref<2x128xf32, #tpu.memory_space<vmem>>, %arg21: memref<6x128xf32, #tpu.memory_space<vmem>>, %arg22: memref<6x128xf32, #tpu.memory_space<vmem>>, %arg23: memref<128x128xbf16, #tpu.memory_space<vmem>>, %arg24: memref<1x128xf32, #tpu.memory_space<vmem>>, %arg25: memref<1x8x128xf32, #tpu.memory_space<vmem>>) attributes {dimension_semantics = [#tpu.dimension_semantics<parallel>], iteration_bounds = array<i64: 2>, scalar_prefetch = 0 : i64, scratch_operands = 0 : i64, tpu.core_type = #tpu.core_type<tc>, window_params = [{transform_indices = @transform_0, window_bounds = array<i64: 1, 8, 128>}, {transform_indices = @transform_1, window_bounds = array<i64: 1, 8, 128>}, {transform_indices = @transform_2, window_bounds = array<i64: 1, 1, 8>}, {transform_indices = @transform_3, window_bounds = array<i64: 1, 1, 8>}, {transform_indices = @transform_4, window_bounds = array<i64: 1, 8, 8>}, {transform_indices = @transform_5, window_bounds = array<i64: 1, 8, 8>}, {pipeline_mode = #tpu.pipeline_mode<synchronous>, transform_indices = @transform_6, window_bounds = array<i64: 8, 128, 128>}, {pipeline_mode = #tpu.pipeline_mode<synchronous>, transform_indices = @transform_7, window_bounds = array<i64: 8, 128>}, {pipeline_mode = #tpu.pipeline_mode<synchronous>, transform_indices = @transform_8, window_bounds = array<i64: 2, 128, 128>}, {pipeline_mode = #tpu.pipeline_mode<synchronous>, transform_indices = @transform_9, window_bounds = array<i64: 2, 128>}, {pipeline_mode = #tpu.pipeline_mode<synchronous>, transform_indices = @transform_10, window_bounds = array<i64: 2, 128, 128>}, {pipeline_mode = #tpu.pipeline_mode<synchronous>, transform_indices = @transform_11, window_bounds = array<i64: 2, 128>}, {pipeline_mode = #tpu.pipeline_mode<synchronous>, transform_indices = @transform_12, window_bounds = array<i64: 4, 128>}, {pipeline_mode = #tpu.pipeline_mode<synchronous>, transform_indices = @transform_13, window_bounds = array<i64: 4, 128>}, {pipeline_mode = #tpu.pipeline_mode<synchronous>, transform_indices = @transform_14, window_bounds = array<i64: 16, 128, 128>}, {pipeline_mode = #tpu.pipeline_mode<synchronous>, transform_indices = @transform_15, window_bounds = array<i64: 16, 128>}, {pipeline_mode = #tpu.pipeline_mode<synchronous>, transform_indices = @transform_16, window_bounds = array<i64: 2, 128, 128>}, {pipeline_mode = #tpu.pipeline_mode<synchronous>, transform_indices = @transform_17, window_bounds = array<i64: 2, 128>}, {pipeline_mode = #tpu.pipeline_mode<synchronous>, transform_indices = @transform_18, window_bounds = array<i64: 2, 128, 128>}, {pipeline_mode = #tpu.pipeline_mode<synchronous>, transform_indices = @transform_19, window_bounds = array<i64: 2, 128>}, {pipeline_mode = #tpu.pipeline_mode<synchronous>, transform_indices = @transform_20, window_bounds = array<i64: 6, 128>}, {pipeline_mode = #tpu.pipeline_mode<synchronous>, transform_indices = @transform_21, window_bounds = array<i64: 6, 128>}, {pipeline_mode = #tpu.pipeline_mode<synchronous>, transform_indices = @transform_22, window_bounds = array<i64: 128, 128>}, {pipeline_mode = #tpu.pipeline_mode<synchronous>, transform_indices = @transform_23, window_bounds = array<i64: 1, 128>}, {transform_indices = @transform_24, window_bounds = array<i64: 1, 8, 128>}]} {
    %0 = tpu.iota {dimensions = array<i32: 1>} : vector<1x128xi32>
    %c0_i32 = arith.constant 0 : i32
    %1 = vector.broadcast %c0_i32 : i32 to vector<1x128xi32>
    %2 = arith.cmpi sge, %0, %1 : vector<1x128xi32>
    %c8_i32 = arith.constant 8 : i32
    %3 = vector.broadcast %c8_i32 : i32 to vector<1x128xi32>
    %4 = arith.cmpi slt, %0, %3 : vector<1x128xi32>
    %5 = arith.andi %2, %4 : vector<1x128xi1>
    %6 = arith.extui %5 : vector<1x128xi1> to vector<1x128xi32>
    %7 = arith.sitofp %6 : vector<1x128xi32> to vector<1x128xf32>
    %c8_i32_0 = arith.constant 8 : i32
    %8 = vector.broadcast %c8_i32_0 : i32 to vector<1x128xi32>
    %9 = arith.cmpi sge, %0, %8 : vector<1x128xi32>
    %c16_i32 = arith.constant 16 : i32
    %10 = vector.broadcast %c16_i32 : i32 to vector<1x128xi32>
    %11 = arith.cmpi slt, %0, %10 : vector<1x128xi32>
    %12 = arith.andi %9, %11 : vector<1x128xi1>
    %13 = arith.extui %12 : vector<1x128xi1> to vector<1x128xi32>
    %14 = arith.sitofp %13 : vector<1x128xi32> to vector<1x128xf32>
    %c16_i32_1 = arith.constant 16 : i32
    %15 = vector.broadcast %c16_i32_1 : i32 to vector<1x128xi32>
    %16 = arith.cmpi sge, %0, %15 : vector<1x128xi32>
    %c24_i32 = arith.constant 24 : i32
    %17 = vector.broadcast %c24_i32 : i32 to vector<1x128xi32>
    %18 = arith.cmpi slt, %0, %17 : vector<1x128xi32>
    %19 = arith.andi %16, %18 : vector<1x128xi1>
    %20 = arith.extui %19 : vector<1x128xi1> to vector<1x128xi32>
    %21 = arith.sitofp %20 : vector<1x128xi32> to vector<1x128xf32>
    %c24_i32_2 = arith.constant 24 : i32
    %22 = vector.broadcast %c24_i32_2 : i32 to vector<1x128xi32>
    %23 = arith.cmpi sge, %0, %22 : vector<1x128xi32>
    %c32_i32 = arith.constant 32 : i32
    %24 = vector.broadcast %c32_i32 : i32 to vector<1x128xi32>
    %25 = arith.cmpi slt, %0, %24 : vector<1x128xi32>
    %26 = arith.andi %23, %25 : vector<1x128xi1>
    %27 = arith.extui %26 : vector<1x128xi1> to vector<1x128xi32>
    %28 = arith.sitofp %27 : vector<1x128xi32> to vector<1x128xf32>
    %c32_i32_3 = arith.constant 32 : i32
    %29 = vector.broadcast %c32_i32_3 : i32 to vector<1x128xi32>
    %30 = arith.cmpi slt, %0, %29 : vector<1x128xi32>
    %31 = arith.extui %30 : vector<1x128xi1> to vector<1x128xi32>
    %32 = arith.sitofp %31 : vector<1x128xi32> to vector<1x128xf32>
    %c0 = arith.constant 0 : index
    %c0_4 = arith.constant 0 : index
    %33 = vector.load %arg8[%c0, %c0_4] : memref<8x128xf32, #tpu.memory_space<vmem>>, vector<8x128xf32>
    %c0_5 = arith.constant 0 : index
    %c0_6 = arith.constant 0 : index
    %34 = vector.load %arg10[%c0_5, %c0_6] : memref<2x128xf32, #tpu.memory_space<vmem>>, vector<2x128xf32>
    %c0_7 = arith.constant 0 : index
    %c0_8 = arith.constant 0 : index
    %35 = vector.load %arg12[%c0_7, %c0_8] : memref<2x128xf32, #tpu.memory_space<vmem>>, vector<2x128xf32>
    %c0_9 = arith.constant 0 : index
    %c0_10 = arith.constant 0 : index
    %36 = vector.load %arg13[%c0_9, %c0_10] : memref<4x128xf32, #tpu.memory_space<vmem>>, vector<4x128xf32>
    %c0_11 = arith.constant 0 : index
    %c0_12 = arith.constant 0 : index
    %37 = vector.load %arg14[%c0_11, %c0_12] : memref<4x128xf32, #tpu.memory_space<vmem>>, vector<4x128xf32>
    %c0_13 = arith.constant 0 : index
    %c0_14 = arith.constant 0 : index
    %38 = vector.load %arg16[%c0_13, %c0_14] : memref<16x128xf32, #tpu.memory_space<vmem>>, vector<16x128xf32>
    %c0_15 = arith.constant 0 : index
    %c0_16 = arith.constant 0 : index
    %39 = vector.load %arg18[%c0_15, %c0_16] : memref<2x128xf32, #tpu.memory_space<vmem>>, vector<2x128xf32>
    %c0_17 = arith.constant 0 : index
    %c0_18 = arith.constant 0 : index
    %40 = vector.load %arg20[%c0_17, %c0_18] : memref<2x128xf32, #tpu.memory_space<vmem>>, vector<2x128xf32>
    %c0_19 = arith.constant 0 : index
    %c0_20 = arith.constant 0 : index
    %41 = vector.load %arg21[%c0_19, %c0_20] : memref<6x128xf32, #tpu.memory_space<vmem>>, vector<6x128xf32>
    %c0_21 = arith.constant 0 : index
    %c0_22 = arith.constant 0 : index
    %42 = vector.load %arg22[%c0_21, %c0_22] : memref<6x128xf32, #tpu.memory_space<vmem>>, vector<6x128xf32>
    %c0_23 = arith.constant 0 : index
    %c0_24 = arith.constant 0 : index
    %c0_25 = arith.constant 0 : index
    %43 = vector.load %arg3[%c0_23, %c0_24, %c0_25] : memref<1x1x8xf32, #tpu.memory_space<vmem>>, vector<1x1x8xf32>
    %44 = vector.shape_cast %43 : vector<1x1x8xf32> to vector<1x8xf32>
    %c0_26 = arith.constant 0 : index
    %c0_27 = arith.constant 0 : index
    %c0_28 = arith.constant 0 : index
    %45 = vector.load %arg4[%c0_26, %c0_27, %c0_28] : memref<1x1x8xf32, #tpu.memory_space<vmem>>, vector<1x1x8xf32>
    %46 = vector.shape_cast %45 : vector<1x1x8xf32> to vector<1x8xf32>
    %c0_29 = arith.constant 0 : index
    %c0_30 = arith.constant 0 : index
    %c0_31 = arith.constant 0 : index
    %47 = vector.load %arg5[%c0_29, %c0_30, %c0_31] : memref<1x8x8xf32, #tpu.memory_space<vmem>>, vector<1x8x8xf32>
    %48 = vector.shape_cast %47 : vector<1x8x8xf32> to vector<8x8xf32>
    %c0_32 = arith.constant 0 : index
    %c0_33 = arith.constant 0 : index
    %c0_34 = arith.constant 0 : index
    %49 = vector.load %arg6[%c0_32, %c0_33, %c0_34] : memref<1x8x8xf32, #tpu.memory_space<vmem>>, vector<1x8x8xf32>
    %50 = vector.shape_cast %49 : vector<1x8x8xf32> to vector<8x8xf32>
    %c0_35 = arith.constant 0 : index
    %c0_36 = arith.constant 0 : index
    %c0_37 = arith.constant 0 : index
    %51 = vector.load %arg1[%c0_35, %c0_36, %c0_37] : memref<1x8x128xf32, #tpu.memory_space<vmem>>, vector<1x8x128xf32>
    %52 = vector.shape_cast %51 : vector<1x8x128xf32> to vector<8x128xf32>
    %53 = arith.truncf %52 : vector<8x128xf32> to vector<8x128xbf16>
    %54 = arith.truncf %52 : vector<8x128xf32> to vector<8x128xbf16>
    %c0_38 = arith.constant 0 : index
    %c0_39 = arith.constant 0 : index
    %c0_40 = arith.constant 0 : index
    %55 = vector.load %arg7[%c0_38, %c0_39, %c0_40] : memref<8x128x128xbf16, #tpu.memory_space<vmem>>, vector<1x128x128xbf16>
    %56 = vector.shape_cast %55 : vector<1x128x128xbf16> to vector<128x128xbf16>
    %cst = arith.constant dense<0.000000e+00> : vector<8x128xf32>
    %57 = tpu.matmul %53, %56, %cst {dimension_numbers = #tpu.dot_dimension_numbers<[1], [0], [0], [1], [0, 0, 1, 1], [], []>} : vector<8x128xbf16>, vector<128x128xbf16>, vector<8x128xf32> -> vector<8x128xf32>
    %58 = vector.extract_strided_slice %33 {offsets = [0, 0], sizes = [1, 128], strides = [1, 1]} : vector<8x128xf32> to vector<1x128xf32>
    %59 = vector.broadcast %58 : vector<1x128xf32> to vector<8x128xf32>
    %60 = arith.addf %57, %59 : vector<8x128xf32>
    %c1 = arith.constant 1 : index
    %c0_41 = arith.constant 0 : index
    %c0_42 = arith.constant 0 : index
    %61 = vector.load %arg7[%c1, %c0_41, %c0_42] : memref<8x128x128xbf16, #tpu.memory_space<vmem>>, vector<1x128x128xbf16>
    %62 = vector.shape_cast %61 : vector<1x128x128xbf16> to vector<128x128xbf16>
    %cst_43 = arith.constant dense<0.000000e+00> : vector<8x128xf32>
    %63 = tpu.matmul %54, %62, %cst_43 {dimension_numbers = #tpu.dot_dimension_numbers<[1], [0], [0], [1], [0, 0, 1, 1], [], []>} : vector<8x128xbf16>, vector<128x128xbf16>, vector<8x128xf32> -> vector<8x128xf32>
    %64 = vector.extract_strided_slice %33 {offsets = [1, 0], sizes = [1, 128], strides = [1, 1]} : vector<8x128xf32> to vector<1x128xf32>
    %65 = vector.broadcast %64 : vector<1x128xf32> to vector<8x128xf32>
    %66 = arith.addf %63, %65 : vector<8x128xf32>
    %c2 = arith.constant 2 : index
    %c0_44 = arith.constant 0 : index
    %c0_45 = arith.constant 0 : index
    %67 = vector.load %arg7[%c2, %c0_44, %c0_45] : memref<8x128x128xbf16, #tpu.memory_space<vmem>>, vector<1x128x128xbf16>
    %68 = vector.shape_cast %67 : vector<1x128x128xbf16> to vector<128x128xbf16>
    %cst_46 = arith.constant dense<0.000000e+00> : vector<8x128xf32>
    %69 = tpu.matmul %54, %68, %cst_46 {dimension_numbers = #tpu.dot_dimension_numbers<[1], [0], [0], [1], [0, 0, 1, 1], [], []>} : vector<8x128xbf16>, vector<128x128xbf16>, vector<8x128xf32> -> vector<8x128xf32>
    %70 = vector.extract_strided_slice %33 {offsets = [2, 0], sizes = [1, 128], strides = [1, 1]} : vector<8x128xf32> to vector<1x128xf32>
    %71 = vector.broadcast %70 : vector<1x128xf32> to vector<8x128xf32>
    %72 = arith.addf %69, %71 : vector<8x128xf32>
    %73 = tpu.transpose %66, [1, 0] : vector<8x128xf32> -> vector<128x8xf32>
    %74 = arith.truncf %73 : vector<128x8xf32> to vector<128x8xbf16>
    %cst_47 = arith.constant 0.000000e+00 : f32
    %75 = vector.broadcast %cst_47 : f32 to vector<8x128xf32>
    %76 = vector.broadcast %7 : vector<1x128xf32> to vector<8x128xf32>
    %77 = arith.mulf %60, %76 : vector<8x128xf32>
    %78 = arith.truncf %77 : vector<8x128xf32> to vector<8x128xbf16>
    %cst_48 = arith.constant dense<0.000000e+00> : vector<8x8xf32>
    %79 = tpu.matmul %78, %74, %cst_48 {dimension_numbers = #tpu.dot_dimension_numbers<[1], [0], [0], [1], [0, 0, 1, 1], [], []>} : vector<8x128xbf16>, vector<128x8xbf16>, vector<8x8xf32> -> vector<8x8xf32>
    %80 = vector.broadcast %44 : vector<1x8xf32> to vector<8x8xf32>
    %81 = arith.mulf %79, %80 : vector<8x8xf32>
    %82 = vector.broadcast %46 : vector<1x8xf32> to vector<8x8xf32>
    %83 = arith.addf %81, %82 : vector<8x8xf32>
    %cst_49 = arith.constant dense<0xFF800000> : vector<8xf32>
    %84 = vector.multi_reduction <maximumf>, %83, %cst_49 [1] : vector<8x8xf32> to vector<8xf32>
    %85 = vector.shape_cast %84 : vector<8xf32> to vector<8x1xf32>
    %86 = vector.broadcast %85 : vector<8x1xf32> to vector<8x8xf32>
    %87 = arith.subf %83, %86 : vector<8x8xf32>
    %88 = math.exp %87 : vector<8x8xf32>
    %cst_50 = arith.constant dense<0.000000e+00> : vector<8xf32>
    %89 = vector.multi_reduction <add>, %88, %cst_50 [1] : vector<8x8xf32> to vector<8xf32>
    %90 = vector.shape_cast %89 : vector<8xf32> to vector<8x1xf32>
    %91 = tpu.reciprocal %90 {approx = true} : vector<8x1xf32> -> vector<8x1xf32>
    %92 = vector.broadcast %91 : vector<8x1xf32> to vector<8x8xf32>
    %93 = arith.mulf %88, %92 : vector<8x8xf32>
    %94 = vector.broadcast %7 : vector<1x128xf32> to vector<8x128xf32>
    %95 = arith.mulf %72, %94 : vector<8x128xf32>
    %96 = arith.truncf %95 : vector<8x128xf32> to vector<8x128xbf16>
    %97 = arith.truncf %93 : vector<8x8xf32> to vector<8x8xbf16>
    %cst_51 = arith.constant dense<0.000000e+00> : vector<8x128xf32>
    %98 = tpu.matmul %97, %96, %cst_51 {dimension_numbers = #tpu.dot_dimension_numbers<[1], [0], [0], [1], [0, 0, 1, 1], [], []>} : vector<8x8xbf16>, vector<8x128xbf16>, vector<8x128xf32> -> vector<8x128xf32>
    %99 = arith.addf %75, %98 : vector<8x128xf32>
    %100 = vector.broadcast %14 : vector<1x128xf32> to vector<8x128xf32>
    %101 = arith.mulf %60, %100 : vector<8x128xf32>
    %102 = arith.truncf %101 : vector<8x128xf32> to vector<8x128xbf16>
    %cst_52 = arith.constant dense<0.000000e+00> : vector<8x8xf32>
    %103 = tpu.matmul %102, %74, %cst_52 {dimension_numbers = #tpu.dot_dimension_numbers<[1], [0], [0], [1], [0, 0, 1, 1], [], []>} : vector<8x128xbf16>, vector<128x8xbf16>, vector<8x8xf32> -> vector<8x8xf32>
    %104 = vector.broadcast %44 : vector<1x8xf32> to vector<8x8xf32>
    %105 = arith.mulf %103, %104 : vector<8x8xf32>
    %106 = vector.broadcast %46 : vector<1x8xf32> to vector<8x8xf32>
    %107 = arith.addf %105, %106 : vector<8x8xf32>
    %cst_53 = arith.constant dense<0xFF800000> : vector<8xf32>
    %108 = vector.multi_reduction <maximumf>, %107, %cst_53 [1] : vector<8x8xf32> to vector<8xf32>
    %109 = vector.shape_cast %108 : vector<8xf32> to vector<8x1xf32>
    %110 = vector.broadcast %109 : vector<8x1xf32> to vector<8x8xf32>
    %111 = arith.subf %107, %110 : vector<8x8xf32>
    %112 = math.exp %111 : vector<8x8xf32>
    %cst_54 = arith.constant dense<0.000000e+00> : vector<8xf32>
    %113 = vector.multi_reduction <add>, %112, %cst_54 [1] : vector<8x8xf32> to vector<8xf32>
    %114 = vector.shape_cast %113 : vector<8xf32> to vector<8x1xf32>
    %115 = tpu.reciprocal %114 {approx = true} : vector<8x1xf32> -> vector<8x1xf32>
    %116 = vector.broadcast %115 : vector<8x1xf32> to vector<8x8xf32>
    %117 = arith.mulf %112, %116 : vector<8x8xf32>
    %118 = vector.broadcast %14 : vector<1x128xf32> to vector<8x128xf32>
    %119 = arith.mulf %72, %118 : vector<8x128xf32>
    %120 = arith.truncf %119 : vector<8x128xf32> to vector<8x128xbf16>
    %121 = arith.truncf %117 : vector<8x8xf32> to vector<8x8xbf16>
    %cst_55 = arith.constant dense<0.000000e+00> : vector<8x128xf32>
    %122 = tpu.matmul %121, %120, %cst_55 {dimension_numbers = #tpu.dot_dimension_numbers<[1], [0], [0], [1], [0, 0, 1, 1], [], []>} : vector<8x8xbf16>, vector<8x128xbf16>, vector<8x128xf32> -> vector<8x128xf32>
    %123 = arith.addf %99, %122 : vector<8x128xf32>
    %124 = vector.broadcast %21 : vector<1x128xf32> to vector<8x128xf32>
    %125 = arith.mulf %60, %124 : vector<8x128xf32>
    %126 = arith.truncf %125 : vector<8x128xf32> to vector<8x128xbf16>
    %cst_56 = arith.constant dense<0.000000e+00> : vector<8x8xf32>
    %127 = tpu.matmul %126, %74, %cst_56 {dimension_numbers = #tpu.dot_dimension_numbers<[1], [0], [0], [1], [0, 0, 1, 1], [], []>} : vector<8x128xbf16>, vector<128x8xbf16>, vector<8x8xf32> -> vector<8x8xf32>
    %128 = vector.broadcast %44 : vector<1x8xf32> to vector<8x8xf32>
    %129 = arith.mulf %127, %128 : vector<8x8xf32>
    %130 = vector.broadcast %46 : vector<1x8xf32> to vector<8x8xf32>
    %131 = arith.addf %129, %130 : vector<8x8xf32>
    %cst_57 = arith.constant dense<0xFF800000> : vector<8xf32>
    %132 = vector.multi_reduction <maximumf>, %131, %cst_57 [1] : vector<8x8xf32> to vector<8xf32>
    %133 = vector.shape_cast %132 : vector<8xf32> to vector<8x1xf32>
    %134 = vector.broadcast %133 : vector<8x1xf32> to vector<8x8xf32>
    %135 = arith.subf %131, %134 : vector<8x8xf32>
    %136 = math.exp %135 : vector<8x8xf32>
    %cst_58 = arith.constant dense<0.000000e+00> : vector<8xf32>
    %137 = vector.multi_reduction <add>, %136, %cst_58 [1] : vector<8x8xf32> to vector<8xf32>
    %138 = vector.shape_cast %137 : vector<8xf32> to vector<8x1xf32>
    %139 = tpu.reciprocal %138 {approx = true} : vector<8x1xf32> -> vector<8x1xf32>
    %140 = vector.broadcast %139 : vector<8x1xf32> to vector<8x8xf32>
    %141 = arith.mulf %136, %140 : vector<8x8xf32>
    %142 = vector.broadcast %21 : vector<1x128xf32> to vector<8x128xf32>
    %143 = arith.mulf %72, %142 : vector<8x128xf32>
    %144 = arith.truncf %143 : vector<8x128xf32> to vector<8x128xbf16>
    %145 = arith.truncf %141 : vector<8x8xf32> to vector<8x8xbf16>
    %cst_59 = arith.constant dense<0.000000e+00> : vector<8x128xf32>
    %146 = tpu.matmul %145, %144, %cst_59 {dimension_numbers = #tpu.dot_dimension_numbers<[1], [0], [0], [1], [0, 0, 1, 1], [], []>} : vector<8x8xbf16>, vector<8x128xbf16>, vector<8x128xf32> -> vector<8x128xf32>
    %147 = arith.addf %123, %146 : vector<8x128xf32>
    %148 = vector.broadcast %28 : vector<1x128xf32> to vector<8x128xf32>
    %149 = arith.mulf %60, %148 : vector<8x128xf32>
    %150 = arith.truncf %149 : vector<8x128xf32> to vector<8x128xbf16>
    %cst_60 = arith.constant dense<0.000000e+00> : vector<8x8xf32>
    %151 = tpu.matmul %150, %74, %cst_60 {dimension_numbers = #tpu.dot_dimension_numbers<[1], [0], [0], [1], [0, 0, 1, 1], [], []>} : vector<8x128xbf16>, vector<128x8xbf16>, vector<8x8xf32> -> vector<8x8xf32>
    %152 = vector.broadcast %44 : vector<1x8xf32> to vector<8x8xf32>
    %153 = arith.mulf %151, %152 : vector<8x8xf32>
    %154 = vector.broadcast %46 : vector<1x8xf32> to vector<8x8xf32>
    %155 = arith.addf %153, %154 : vector<8x8xf32>
    %cst_61 = arith.constant dense<0xFF800000> : vector<8xf32>
    %156 = vector.multi_reduction <maximumf>, %155, %cst_61 [1] : vector<8x8xf32> to vector<8xf32>
    %157 = vector.shape_cast %156 : vector<8xf32> to vector<8x1xf32>
    %158 = vector.broadcast %157 : vector<8x1xf32> to vector<8x8xf32>
    %159 = arith.subf %155, %158 : vector<8x8xf32>
    %160 = math.exp %159 : vector<8x8xf32>
    %cst_62 = arith.constant dense<0.000000e+00> : vector<8xf32>
    %161 = vector.multi_reduction <add>, %160, %cst_62 [1] : vector<8x8xf32> to vector<8xf32>
    %162 = vector.shape_cast %161 : vector<8xf32> to vector<8x1xf32>
    %163 = tpu.reciprocal %162 {approx = true} : vector<8x1xf32> -> vector<8x1xf32>
    %164 = vector.broadcast %163 : vector<8x1xf32> to vector<8x8xf32>
    %165 = arith.mulf %160, %164 : vector<8x8xf32>
    %166 = vector.broadcast %28 : vector<1x128xf32> to vector<8x128xf32>
    %167 = arith.mulf %72, %166 : vector<8x128xf32>
    %168 = arith.truncf %167 : vector<8x128xf32> to vector<8x128xbf16>
    %169 = arith.truncf %165 : vector<8x8xf32> to vector<8x8xbf16>
    %cst_63 = arith.constant dense<0.000000e+00> : vector<8x128xf32>
    %170 = tpu.matmul %169, %168, %cst_63 {dimension_numbers = #tpu.dot_dimension_numbers<[1], [0], [0], [1], [0, 0, 1, 1], [], []>} : vector<8x8xbf16>, vector<8x128xbf16>, vector<8x128xf32> -> vector<8x128xf32>
    %171 = arith.addf %147, %170 : vector<8x128xf32>
    %172 = arith.truncf %171 : vector<8x128xf32> to vector<8x128xbf16>
    %c3 = arith.constant 3 : index
    %c0_64 = arith.constant 0 : index
    %c0_65 = arith.constant 0 : index
    %173 = vector.load %arg7[%c3, %c0_64, %c0_65] : memref<8x128x128xbf16, #tpu.memory_space<vmem>>, vector<1x128x128xbf16>
    %174 = vector.shape_cast %173 : vector<1x128x128xbf16> to vector<128x128xbf16>
    %cst_66 = arith.constant dense<0.000000e+00> : vector<8x128xf32>
    %175 = tpu.matmul %172, %174, %cst_66 {dimension_numbers = #tpu.dot_dimension_numbers<[1], [0], [0], [1], [0, 0, 1, 1], [], []>} : vector<8x128xbf16>, vector<128x128xbf16>, vector<8x128xf32> -> vector<8x128xf32>
    %176 = vector.extract_strided_slice %33 {offsets = [3, 0], sizes = [1, 128], strides = [1, 1]} : vector<8x128xf32> to vector<1x128xf32>
    %177 = vector.broadcast %176 : vector<1x128xf32> to vector<8x128xf32>
    %178 = arith.addf %175, %177 : vector<8x128xf32>
    %179 = vector.extract_strided_slice %36 {offsets = [0, 0], sizes = [1, 128], strides = [1, 1]} : vector<4x128xf32> to vector<1x128xf32>
    %180 = vector.extract_strided_slice %37 {offsets = [0, 0], sizes = [1, 128], strides = [1, 1]} : vector<4x128xf32> to vector<1x128xf32>
    %181 = arith.addf %52, %178 : vector<8x128xf32>
    %182 = vector.broadcast %32 : vector<1x128xf32> to vector<8x128xf32>
    %183 = arith.mulf %181, %182 : vector<8x128xf32>
    %cst_67 = arith.constant dense<0.000000e+00> : vector<8xf32>
    %184 = vector.multi_reduction <add>, %183, %cst_67 [1] : vector<8x128xf32> to vector<8xf32>
    %185 = vector.shape_cast %184 : vector<8xf32> to vector<8x1xf32>
    %cst_68 = arith.constant 3.125000e-02 : f32
    %186 = vector.broadcast %cst_68 : f32 to vector<8x1xf32>
    %187 = arith.mulf %185, %186 : vector<8x1xf32>
    %188 = vector.broadcast %187 : vector<8x1xf32> to vector<8x128xf32>
    %189 = arith.subf %181, %188 : vector<8x128xf32>
    %190 = vector.broadcast %32 : vector<1x128xf32> to vector<8x128xf32>
    %191 = arith.mulf %189, %190 : vector<8x128xf32>
    %192 = arith.mulf %191, %191 : vector<8x128xf32>
    %cst_69 = arith.constant dense<0.000000e+00> : vector<8xf32>
    %193 = vector.multi_reduction <add>, %192, %cst_69 [1] : vector<8x128xf32> to vector<8xf32>
    %194 = vector.shape_cast %193 : vector<8xf32> to vector<8x1xf32>
    %cst_70 = arith.constant 3.125000e-02 : f32
    %195 = vector.broadcast %cst_70 : f32 to vector<8x1xf32>
    %196 = arith.mulf %194, %195 : vector<8x1xf32>
    %cst_71 = arith.constant 9.99999974E-6 : f32
    %197 = vector.broadcast %cst_71 : f32 to vector<8x1xf32>
    %198 = arith.addf %196, %197 : vector<8x1xf32>
    %199 = math.rsqrt %198 : vector<8x1xf32>
    %200 = vector.broadcast %199 : vector<8x1xf32> to vector<8x128xf32>
    %201 = arith.mulf %191, %200 : vector<8x128xf32>
    %202 = vector.broadcast %179 : vector<1x128xf32> to vector<8x128xf32>
    %203 = arith.mulf %201, %202 : vector<8x128xf32>
    %204 = vector.broadcast %180 : vector<1x128xf32> to vector<8x128xf32>
    %205 = arith.addf %203, %204 : vector<8x128xf32>
    %c0_72 = arith.constant 0 : index
    %c0_73 = arith.constant 0 : index
    %c0_74 = arith.constant 0 : index
    %206 = vector.load %arg9[%c0_72, %c0_73, %c0_74] : memref<2x128x128xbf16, #tpu.memory_space<vmem>>, vector<1x128x128xbf16>
    %207 = vector.shape_cast %206 : vector<1x128x128xbf16> to vector<128x128xbf16>
    %208 = vector.extract_strided_slice %34 {offsets = [0, 0], sizes = [1, 128], strides = [1, 1]} : vector<2x128xf32> to vector<1x128xf32>
    %c0_75 = arith.constant 0 : index
    %c0_76 = arith.constant 0 : index
    %c0_77 = arith.constant 0 : index
    %209 = vector.load %arg11[%c0_75, %c0_76, %c0_77] : memref<2x128x128xbf16, #tpu.memory_space<vmem>>, vector<1x128x128xbf16>
    %210 = vector.shape_cast %209 : vector<1x128x128xbf16> to vector<128x128xbf16>
    %211 = vector.extract_strided_slice %35 {offsets = [0, 0], sizes = [1, 128], strides = [1, 1]} : vector<2x128xf32> to vector<1x128xf32>
    %212 = arith.truncf %205 : vector<8x128xf32> to vector<8x128xbf16>
    %cst_78 = arith.constant dense<0.000000e+00> : vector<8x128xf32>
    %213 = tpu.matmul %212, %207, %cst_78 {dimension_numbers = #tpu.dot_dimension_numbers<[1], [0], [0], [1], [0, 0, 1, 1], [], []>} : vector<8x128xbf16>, vector<128x128xbf16>, vector<8x128xf32> -> vector<8x128xf32>
    %214 = vector.broadcast %208 : vector<1x128xf32> to vector<8x128xf32>
    %215 = arith.addf %213, %214 : vector<8x128xf32>
    %cst_79 = arith.constant 0.000000e+00 : f32
    %216 = vector.broadcast %cst_79 : f32 to vector<8x128xf32>
    %217 = arith.maximumf %215, %216 : vector<8x128xf32>
    %218 = arith.truncf %217 : vector<8x128xf32> to vector<8x128xbf16>
    %cst_80 = arith.constant dense<0.000000e+00> : vector<8x128xf32>
    %219 = tpu.matmul %218, %210, %cst_80 {dimension_numbers = #tpu.dot_dimension_numbers<[1], [0], [0], [1], [0, 0, 1, 1], [], []>} : vector<8x128xbf16>, vector<128x128xbf16>, vector<8x128xf32> -> vector<8x128xf32>
    %220 = vector.broadcast %211 : vector<1x128xf32> to vector<8x128xf32>
    %221 = arith.addf %219, %220 : vector<8x128xf32>
    %222 = vector.extract_strided_slice %36 {offsets = [1, 0], sizes = [1, 128], strides = [1, 1]} : vector<4x128xf32> to vector<1x128xf32>
    %223 = vector.extract_strided_slice %37 {offsets = [1, 0], sizes = [1, 128], strides = [1, 1]} : vector<4x128xf32> to vector<1x128xf32>
    %224 = arith.addf %205, %221 : vector<8x128xf32>
    %225 = vector.broadcast %32 : vector<1x128xf32> to vector<8x128xf32>
    %226 = arith.mulf %224, %225 : vector<8x128xf32>
    %cst_81 = arith.constant dense<0.000000e+00> : vector<8xf32>
    %227 = vector.multi_reduction <add>, %226, %cst_81 [1] : vector<8x128xf32> to vector<8xf32>
    %228 = vector.shape_cast %227 : vector<8xf32> to vector<8x1xf32>
    %cst_82 = arith.constant 3.125000e-02 : f32
    %229 = vector.broadcast %cst_82 : f32 to vector<8x1xf32>
    %230 = arith.mulf %228, %229 : vector<8x1xf32>
    %231 = vector.broadcast %230 : vector<8x1xf32> to vector<8x128xf32>
    %232 = arith.subf %224, %231 : vector<8x128xf32>
    %233 = vector.broadcast %32 : vector<1x128xf32> to vector<8x128xf32>
    %234 = arith.mulf %232, %233 : vector<8x128xf32>
    %235 = arith.mulf %234, %234 : vector<8x128xf32>
    %cst_83 = arith.constant dense<0.000000e+00> : vector<8xf32>
    %236 = vector.multi_reduction <add>, %235, %cst_83 [1] : vector<8x128xf32> to vector<8xf32>
    %237 = vector.shape_cast %236 : vector<8xf32> to vector<8x1xf32>
    %cst_84 = arith.constant 3.125000e-02 : f32
    %238 = vector.broadcast %cst_84 : f32 to vector<8x1xf32>
    %239 = arith.mulf %237, %238 : vector<8x1xf32>
    %cst_85 = arith.constant 9.99999974E-6 : f32
    %240 = vector.broadcast %cst_85 : f32 to vector<8x1xf32>
    %241 = arith.addf %239, %240 : vector<8x1xf32>
    %242 = math.rsqrt %241 : vector<8x1xf32>
    %243 = vector.broadcast %242 : vector<8x1xf32> to vector<8x128xf32>
    %244 = arith.mulf %234, %243 : vector<8x128xf32>
    %245 = vector.broadcast %222 : vector<1x128xf32> to vector<8x128xf32>
    %246 = arith.mulf %244, %245 : vector<8x128xf32>
    %247 = vector.broadcast %223 : vector<1x128xf32> to vector<8x128xf32>
    %248 = arith.addf %246, %247 : vector<8x128xf32>
    %249 = arith.truncf %248 : vector<8x128xf32> to vector<8x128xbf16>
    %250 = arith.truncf %248 : vector<8x128xf32> to vector<8x128xbf16>
    %c4 = arith.constant 4 : index
    %c0_86 = arith.constant 0 : index
    %c0_87 = arith.constant 0 : index
    %251 = vector.load %arg7[%c4, %c0_86, %c0_87] : memref<8x128x128xbf16, #tpu.memory_space<vmem>>, vector<1x128x128xbf16>
    %252 = vector.shape_cast %251 : vector<1x128x128xbf16> to vector<128x128xbf16>
    %cst_88 = arith.constant dense<0.000000e+00> : vector<8x128xf32>
    %253 = tpu.matmul %249, %252, %cst_88 {dimension_numbers = #tpu.dot_dimension_numbers<[1], [0], [0], [1], [0, 0, 1, 1], [], []>} : vector<8x128xbf16>, vector<128x128xbf16>, vector<8x128xf32> -> vector<8x128xf32>
    %254 = vector.extract_strided_slice %33 {offsets = [4, 0], sizes = [1, 128], strides = [1, 1]} : vector<8x128xf32> to vector<1x128xf32>
    %255 = vector.broadcast %254 : vector<1x128xf32> to vector<8x128xf32>
    %256 = arith.addf %253, %255 : vector<8x128xf32>
    %c5 = arith.constant 5 : index
    %c0_89 = arith.constant 0 : index
    %c0_90 = arith.constant 0 : index
    %257 = vector.load %arg7[%c5, %c0_89, %c0_90] : memref<8x128x128xbf16, #tpu.memory_space<vmem>>, vector<1x128x128xbf16>
    %258 = vector.shape_cast %257 : vector<1x128x128xbf16> to vector<128x128xbf16>
    %cst_91 = arith.constant dense<0.000000e+00> : vector<8x128xf32>
    %259 = tpu.matmul %250, %258, %cst_91 {dimension_numbers = #tpu.dot_dimension_numbers<[1], [0], [0], [1], [0, 0, 1, 1], [], []>} : vector<8x128xbf16>, vector<128x128xbf16>, vector<8x128xf32> -> vector<8x128xf32>
    %260 = vector.extract_strided_slice %33 {offsets = [5, 0], sizes = [1, 128], strides = [1, 1]} : vector<8x128xf32> to vector<1x128xf32>
    %261 = vector.broadcast %260 : vector<1x128xf32> to vector<8x128xf32>
    %262 = arith.addf %259, %261 : vector<8x128xf32>
    %c6 = arith.constant 6 : index
    %c0_92 = arith.constant 0 : index
    %c0_93 = arith.constant 0 : index
    %263 = vector.load %arg7[%c6, %c0_92, %c0_93] : memref<8x128x128xbf16, #tpu.memory_space<vmem>>, vector<1x128x128xbf16>
    %264 = vector.shape_cast %263 : vector<1x128x128xbf16> to vector<128x128xbf16>
    %cst_94 = arith.constant dense<0.000000e+00> : vector<8x128xf32>
    %265 = tpu.matmul %250, %264, %cst_94 {dimension_numbers = #tpu.dot_dimension_numbers<[1], [0], [0], [1], [0, 0, 1, 1], [], []>} : vector<8x128xbf16>, vector<128x128xbf16>, vector<8x128xf32> -> vector<8x128xf32>
    %266 = vector.extract_strided_slice %33 {offsets = [6, 0], sizes = [1, 128], strides = [1, 1]} : vector<8x128xf32> to vector<1x128xf32>
    %267 = vector.broadcast %266 : vector<1x128xf32> to vector<8x128xf32>
    %268 = arith.addf %265, %267 : vector<8x128xf32>
    %269 = tpu.transpose %262, [1, 0] : vector<8x128xf32> -> vector<128x8xf32>
    %270 = arith.truncf %269 : vector<128x8xf32> to vector<128x8xbf16>
    %cst_95 = arith.constant 0.000000e+00 : f32
    %271 = vector.broadcast %cst_95 : f32 to vector<8x128xf32>
    %272 = vector.broadcast %7 : vector<1x128xf32> to vector<8x128xf32>
    %273 = arith.mulf %256, %272 : vector<8x128xf32>
    %274 = arith.truncf %273 : vector<8x128xf32> to vector<8x128xbf16>
    %cst_96 = arith.constant dense<0.000000e+00> : vector<8x8xf32>
    %275 = tpu.matmul %274, %270, %cst_96 {dimension_numbers = #tpu.dot_dimension_numbers<[1], [0], [0], [1], [0, 0, 1, 1], [], []>} : vector<8x128xbf16>, vector<128x8xbf16>, vector<8x8xf32> -> vector<8x8xf32>
    %276 = vector.broadcast %44 : vector<1x8xf32> to vector<8x8xf32>
    %277 = arith.mulf %275, %276 : vector<8x8xf32>
    %278 = vector.broadcast %46 : vector<1x8xf32> to vector<8x8xf32>
    %279 = arith.addf %277, %278 : vector<8x8xf32>
    %cst_97 = arith.constant dense<0xFF800000> : vector<8xf32>
    %280 = vector.multi_reduction <maximumf>, %279, %cst_97 [1] : vector<8x8xf32> to vector<8xf32>
    %281 = vector.shape_cast %280 : vector<8xf32> to vector<8x1xf32>
    %282 = vector.broadcast %281 : vector<8x1xf32> to vector<8x8xf32>
    %283 = arith.subf %279, %282 : vector<8x8xf32>
    %284 = math.exp %283 : vector<8x8xf32>
    %cst_98 = arith.constant dense<0.000000e+00> : vector<8xf32>
    %285 = vector.multi_reduction <add>, %284, %cst_98 [1] : vector<8x8xf32> to vector<8xf32>
    %286 = vector.shape_cast %285 : vector<8xf32> to vector<8x1xf32>
    %287 = tpu.reciprocal %286 {approx = true} : vector<8x1xf32> -> vector<8x1xf32>
    %288 = vector.broadcast %287 : vector<8x1xf32> to vector<8x8xf32>
    %289 = arith.mulf %284, %288 : vector<8x8xf32>
    %290 = vector.broadcast %7 : vector<1x128xf32> to vector<8x128xf32>
    %291 = arith.mulf %268, %290 : vector<8x128xf32>
    %292 = arith.truncf %291 : vector<8x128xf32> to vector<8x128xbf16>
    %293 = arith.truncf %289 : vector<8x8xf32> to vector<8x8xbf16>
    %cst_99 = arith.constant dense<0.000000e+00> : vector<8x128xf32>
    %294 = tpu.matmul %293, %292, %cst_99 {dimension_numbers = #tpu.dot_dimension_numbers<[1], [0], [0], [1], [0, 0, 1, 1], [], []>} : vector<8x8xbf16>, vector<8x128xbf16>, vector<8x128xf32> -> vector<8x128xf32>
    %295 = arith.addf %271, %294 : vector<8x128xf32>
    %296 = vector.broadcast %14 : vector<1x128xf32> to vector<8x128xf32>
    %297 = arith.mulf %256, %296 : vector<8x128xf32>
    %298 = arith.truncf %297 : vector<8x128xf32> to vector<8x128xbf16>
    %cst_100 = arith.constant dense<0.000000e+00> : vector<8x8xf32>
    %299 = tpu.matmul %298, %270, %cst_100 {dimension_numbers = #tpu.dot_dimension_numbers<[1], [0], [0], [1], [0, 0, 1, 1], [], []>} : vector<8x128xbf16>, vector<128x8xbf16>, vector<8x8xf32> -> vector<8x8xf32>
    %300 = vector.broadcast %44 : vector<1x8xf32> to vector<8x8xf32>
    %301 = arith.mulf %299, %300 : vector<8x8xf32>
    %302 = vector.broadcast %46 : vector<1x8xf32> to vector<8x8xf32>
    %303 = arith.addf %301, %302 : vector<8x8xf32>
    %cst_101 = arith.constant dense<0xFF800000> : vector<8xf32>
    %304 = vector.multi_reduction <maximumf>, %303, %cst_101 [1] : vector<8x8xf32> to vector<8xf32>
    %305 = vector.shape_cast %304 : vector<8xf32> to vector<8x1xf32>
    %306 = vector.broadcast %305 : vector<8x1xf32> to vector<8x8xf32>
    %307 = arith.subf %303, %306 : vector<8x8xf32>
    %308 = math.exp %307 : vector<8x8xf32>
    %cst_102 = arith.constant dense<0.000000e+00> : vector<8xf32>
    %309 = vector.multi_reduction <add>, %308, %cst_102 [1] : vector<8x8xf32> to vector<8xf32>
    %310 = vector.shape_cast %309 : vector<8xf32> to vector<8x1xf32>
    %311 = tpu.reciprocal %310 {approx = true} : vector<8x1xf32> -> vector<8x1xf32>
    %312 = vector.broadcast %311 : vector<8x1xf32> to vector<8x8xf32>
    %313 = arith.mulf %308, %312 : vector<8x8xf32>
    %314 = vector.broadcast %14 : vector<1x128xf32> to vector<8x128xf32>
    %315 = arith.mulf %268, %314 : vector<8x128xf32>
    %316 = arith.truncf %315 : vector<8x128xf32> to vector<8x128xbf16>
    %317 = arith.truncf %313 : vector<8x8xf32> to vector<8x8xbf16>
    %cst_103 = arith.constant dense<0.000000e+00> : vector<8x128xf32>
    %318 = tpu.matmul %317, %316, %cst_103 {dimension_numbers = #tpu.dot_dimension_numbers<[1], [0], [0], [1], [0, 0, 1, 1], [], []>} : vector<8x8xbf16>, vector<8x128xbf16>, vector<8x128xf32> -> vector<8x128xf32>
    %319 = arith.addf %295, %318 : vector<8x128xf32>
    %320 = vector.broadcast %21 : vector<1x128xf32> to vector<8x128xf32>
    %321 = arith.mulf %256, %320 : vector<8x128xf32>
    %322 = arith.truncf %321 : vector<8x128xf32> to vector<8x128xbf16>
    %cst_104 = arith.constant dense<0.000000e+00> : vector<8x8xf32>
    %323 = tpu.matmul %322, %270, %cst_104 {dimension_numbers = #tpu.dot_dimension_numbers<[1], [0], [0], [1], [0, 0, 1, 1], [], []>} : vector<8x128xbf16>, vector<128x8xbf16>, vector<8x8xf32> -> vector<8x8xf32>
    %324 = vector.broadcast %44 : vector<1x8xf32> to vector<8x8xf32>
    %325 = arith.mulf %323, %324 : vector<8x8xf32>
    %326 = vector.broadcast %46 : vector<1x8xf32> to vector<8x8xf32>
    %327 = arith.addf %325, %326 : vector<8x8xf32>
    %cst_105 = arith.constant dense<0xFF800000> : vector<8xf32>
    %328 = vector.multi_reduction <maximumf>, %327, %cst_105 [1] : vector<8x8xf32> to vector<8xf32>
    %329 = vector.shape_cast %328 : vector<8xf32> to vector<8x1xf32>
    %330 = vector.broadcast %329 : vector<8x1xf32> to vector<8x8xf32>
    %331 = arith.subf %327, %330 : vector<8x8xf32>
    %332 = math.exp %331 : vector<8x8xf32>
    %cst_106 = arith.constant dense<0.000000e+00> : vector<8xf32>
    %333 = vector.multi_reduction <add>, %332, %cst_106 [1] : vector<8x8xf32> to vector<8xf32>
    %334 = vector.shape_cast %333 : vector<8xf32> to vector<8x1xf32>
    %335 = tpu.reciprocal %334 {approx = true} : vector<8x1xf32> -> vector<8x1xf32>
    %336 = vector.broadcast %335 : vector<8x1xf32> to vector<8x8xf32>
    %337 = arith.mulf %332, %336 : vector<8x8xf32>
    %338 = vector.broadcast %21 : vector<1x128xf32> to vector<8x128xf32>
    %339 = arith.mulf %268, %338 : vector<8x128xf32>
    %340 = arith.truncf %339 : vector<8x128xf32> to vector<8x128xbf16>
    %341 = arith.truncf %337 : vector<8x8xf32> to vector<8x8xbf16>
    %cst_107 = arith.constant dense<0.000000e+00> : vector<8x128xf32>
    %342 = tpu.matmul %341, %340, %cst_107 {dimension_numbers = #tpu.dot_dimension_numbers<[1], [0], [0], [1], [0, 0, 1, 1], [], []>} : vector<8x8xbf16>, vector<8x128xbf16>, vector<8x128xf32> -> vector<8x128xf32>
    %343 = arith.addf %319, %342 : vector<8x128xf32>
    %344 = vector.broadcast %28 : vector<1x128xf32> to vector<8x128xf32>
    %345 = arith.mulf %256, %344 : vector<8x128xf32>
    %346 = arith.truncf %345 : vector<8x128xf32> to vector<8x128xbf16>
    %cst_108 = arith.constant dense<0.000000e+00> : vector<8x8xf32>
    %347 = tpu.matmul %346, %270, %cst_108 {dimension_numbers = #tpu.dot_dimension_numbers<[1], [0], [0], [1], [0, 0, 1, 1], [], []>} : vector<8x128xbf16>, vector<128x8xbf16>, vector<8x8xf32> -> vector<8x8xf32>
    %348 = vector.broadcast %44 : vector<1x8xf32> to vector<8x8xf32>
    %349 = arith.mulf %347, %348 : vector<8x8xf32>
    %350 = vector.broadcast %46 : vector<1x8xf32> to vector<8x8xf32>
    %351 = arith.addf %349, %350 : vector<8x8xf32>
    %cst_109 = arith.constant dense<0xFF800000> : vector<8xf32>
    %352 = vector.multi_reduction <maximumf>, %351, %cst_109 [1] : vector<8x8xf32> to vector<8xf32>
    %353 = vector.shape_cast %352 : vector<8xf32> to vector<8x1xf32>
    %354 = vector.broadcast %353 : vector<8x1xf32> to vector<8x8xf32>
    %355 = arith.subf %351, %354 : vector<8x8xf32>
    %356 = math.exp %355 : vector<8x8xf32>
    %cst_110 = arith.constant dense<0.000000e+00> : vector<8xf32>
    %357 = vector.multi_reduction <add>, %356, %cst_110 [1] : vector<8x8xf32> to vector<8xf32>
    %358 = vector.shape_cast %357 : vector<8xf32> to vector<8x1xf32>
    %359 = tpu.reciprocal %358 {approx = true} : vector<8x1xf32> -> vector<8x1xf32>
    %360 = vector.broadcast %359 : vector<8x1xf32> to vector<8x8xf32>
    %361 = arith.mulf %356, %360 : vector<8x8xf32>
    %362 = vector.broadcast %28 : vector<1x128xf32> to vector<8x128xf32>
    %363 = arith.mulf %268, %362 : vector<8x128xf32>
    %364 = arith.truncf %363 : vector<8x128xf32> to vector<8x128xbf16>
    %365 = arith.truncf %361 : vector<8x8xf32> to vector<8x8xbf16>
    %cst_111 = arith.constant dense<0.000000e+00> : vector<8x128xf32>
    %366 = tpu.matmul %365, %364, %cst_111 {dimension_numbers = #tpu.dot_dimension_numbers<[1], [0], [0], [1], [0, 0, 1, 1], [], []>} : vector<8x8xbf16>, vector<8x128xbf16>, vector<8x128xf32> -> vector<8x128xf32>
    %367 = arith.addf %343, %366 : vector<8x128xf32>
    %368 = arith.truncf %367 : vector<8x128xf32> to vector<8x128xbf16>
    %c7 = arith.constant 7 : index
    %c0_112 = arith.constant 0 : index
    %c0_113 = arith.constant 0 : index
    %369 = vector.load %arg7[%c7, %c0_112, %c0_113] : memref<8x128x128xbf16, #tpu.memory_space<vmem>>, vector<1x128x128xbf16>
    %370 = vector.shape_cast %369 : vector<1x128x128xbf16> to vector<128x128xbf16>
    %cst_114 = arith.constant dense<0.000000e+00> : vector<8x128xf32>
    %371 = tpu.matmul %368, %370, %cst_114 {dimension_numbers = #tpu.dot_dimension_numbers<[1], [0], [0], [1], [0, 0, 1, 1], [], []>} : vector<8x128xbf16>, vector<128x128xbf16>, vector<8x128xf32> -> vector<8x128xf32>
    %372 = vector.extract_strided_slice %33 {offsets = [7, 0], sizes = [1, 128], strides = [1, 1]} : vector<8x128xf32> to vector<1x128xf32>
    %373 = vector.broadcast %372 : vector<1x128xf32> to vector<8x128xf32>
    %374 = arith.addf %371, %373 : vector<8x128xf32>
    %375 = vector.extract_strided_slice %36 {offsets = [2, 0], sizes = [1, 128], strides = [1, 1]} : vector<4x128xf32> to vector<1x128xf32>
    %376 = vector.extract_strided_slice %37 {offsets = [2, 0], sizes = [1, 128], strides = [1, 1]} : vector<4x128xf32> to vector<1x128xf32>
    %377 = arith.addf %248, %374 : vector<8x128xf32>
    %378 = vector.broadcast %32 : vector<1x128xf32> to vector<8x128xf32>
    %379 = arith.mulf %377, %378 : vector<8x128xf32>
    %cst_115 = arith.constant dense<0.000000e+00> : vector<8xf32>
    %380 = vector.multi_reduction <add>, %379, %cst_115 [1] : vector<8x128xf32> to vector<8xf32>
    %381 = vector.shape_cast %380 : vector<8xf32> to vector<8x1xf32>
    %cst_116 = arith.constant 3.125000e-02 : f32
    %382 = vector.broadcast %cst_116 : f32 to vector<8x1xf32>
    %383 = arith.mulf %381, %382 : vector<8x1xf32>
    %384 = vector.broadcast %383 : vector<8x1xf32> to vector<8x128xf32>
    %385 = arith.subf %377, %384 : vector<8x128xf32>
    %386 = vector.broadcast %32 : vector<1x128xf32> to vector<8x128xf32>
    %387 = arith.mulf %385, %386 : vector<8x128xf32>
    %388 = arith.mulf %387, %387 : vector<8x128xf32>
    %cst_117 = arith.constant dense<0.000000e+00> : vector<8xf32>
    %389 = vector.multi_reduction <add>, %388, %cst_117 [1] : vector<8x128xf32> to vector<8xf32>
    %390 = vector.shape_cast %389 : vector<8xf32> to vector<8x1xf32>
    %cst_118 = arith.constant 3.125000e-02 : f32
    %391 = vector.broadcast %cst_118 : f32 to vector<8x1xf32>
    %392 = arith.mulf %390, %391 : vector<8x1xf32>
    %cst_119 = arith.constant 9.99999974E-6 : f32
    %393 = vector.broadcast %cst_119 : f32 to vector<8x1xf32>
    %394 = arith.addf %392, %393 : vector<8x1xf32>
    %395 = math.rsqrt %394 : vector<8x1xf32>
    %396 = vector.broadcast %395 : vector<8x1xf32> to vector<8x128xf32>
    %397 = arith.mulf %387, %396 : vector<8x128xf32>
    %398 = vector.broadcast %375 : vector<1x128xf32> to vector<8x128xf32>
    %399 = arith.mulf %397, %398 : vector<8x128xf32>
    %400 = vector.broadcast %376 : vector<1x128xf32> to vector<8x128xf32>
    %401 = arith.addf %399, %400 : vector<8x128xf32>
    %c1_120 = arith.constant 1 : index
    %c0_121 = arith.constant 0 : index
    %c0_122 = arith.constant 0 : index
    %402 = vector.load %arg9[%c1_120, %c0_121, %c0_122] : memref<2x128x128xbf16, #tpu.memory_space<vmem>>, vector<1x128x128xbf16>
    %403 = vector.shape_cast %402 : vector<1x128x128xbf16> to vector<128x128xbf16>
    %404 = vector.extract_strided_slice %34 {offsets = [1, 0], sizes = [1, 128], strides = [1, 1]} : vector<2x128xf32> to vector<1x128xf32>
    %c1_123 = arith.constant 1 : index
    %c0_124 = arith.constant 0 : index
    %c0_125 = arith.constant 0 : index
    %405 = vector.load %arg11[%c1_123, %c0_124, %c0_125] : memref<2x128x128xbf16, #tpu.memory_space<vmem>>, vector<1x128x128xbf16>
    %406 = vector.shape_cast %405 : vector<1x128x128xbf16> to vector<128x128xbf16>
    %407 = vector.extract_strided_slice %35 {offsets = [1, 0], sizes = [1, 128], strides = [1, 1]} : vector<2x128xf32> to vector<1x128xf32>
    %408 = arith.truncf %401 : vector<8x128xf32> to vector<8x128xbf16>
    %cst_126 = arith.constant dense<0.000000e+00> : vector<8x128xf32>
    %409 = tpu.matmul %408, %403, %cst_126 {dimension_numbers = #tpu.dot_dimension_numbers<[1], [0], [0], [1], [0, 0, 1, 1], [], []>} : vector<8x128xbf16>, vector<128x128xbf16>, vector<8x128xf32> -> vector<8x128xf32>
    %410 = vector.broadcast %404 : vector<1x128xf32> to vector<8x128xf32>
    %411 = arith.addf %409, %410 : vector<8x128xf32>
    %cst_127 = arith.constant 0.000000e+00 : f32
    %412 = vector.broadcast %cst_127 : f32 to vector<8x128xf32>
    %413 = arith.maximumf %411, %412 : vector<8x128xf32>
    %414 = arith.truncf %413 : vector<8x128xf32> to vector<8x128xbf16>
    %cst_128 = arith.constant dense<0.000000e+00> : vector<8x128xf32>
    %415 = tpu.matmul %414, %406, %cst_128 {dimension_numbers = #tpu.dot_dimension_numbers<[1], [0], [0], [1], [0, 0, 1, 1], [], []>} : vector<8x128xbf16>, vector<128x128xbf16>, vector<8x128xf32> -> vector<8x128xf32>
    %416 = vector.broadcast %407 : vector<1x128xf32> to vector<8x128xf32>
    %417 = arith.addf %415, %416 : vector<8x128xf32>
    %418 = vector.extract_strided_slice %36 {offsets = [3, 0], sizes = [1, 128], strides = [1, 1]} : vector<4x128xf32> to vector<1x128xf32>
    %419 = vector.extract_strided_slice %37 {offsets = [3, 0], sizes = [1, 128], strides = [1, 1]} : vector<4x128xf32> to vector<1x128xf32>
    %420 = arith.addf %401, %417 : vector<8x128xf32>
    %421 = vector.broadcast %32 : vector<1x128xf32> to vector<8x128xf32>
    %422 = arith.mulf %420, %421 : vector<8x128xf32>
    %cst_129 = arith.constant dense<0.000000e+00> : vector<8xf32>
    %423 = vector.multi_reduction <add>, %422, %cst_129 [1] : vector<8x128xf32> to vector<8xf32>
    %424 = vector.shape_cast %423 : vector<8xf32> to vector<8x1xf32>
    %cst_130 = arith.constant 3.125000e-02 : f32
    %425 = vector.broadcast %cst_130 : f32 to vector<8x1xf32>
    %426 = arith.mulf %424, %425 : vector<8x1xf32>
    %427 = vector.broadcast %426 : vector<8x1xf32> to vector<8x128xf32>
    %428 = arith.subf %420, %427 : vector<8x128xf32>
    %429 = vector.broadcast %32 : vector<1x128xf32> to vector<8x128xf32>
    %430 = arith.mulf %428, %429 : vector<8x128xf32>
    %431 = arith.mulf %430, %430 : vector<8x128xf32>
    %cst_131 = arith.constant dense<0.000000e+00> : vector<8xf32>
    %432 = vector.multi_reduction <add>, %431, %cst_131 [1] : vector<8x128xf32> to vector<8xf32>
    %433 = vector.shape_cast %432 : vector<8xf32> to vector<8x1xf32>
    %cst_132 = arith.constant 3.125000e-02 : f32
    %434 = vector.broadcast %cst_132 : f32 to vector<8x1xf32>
    %435 = arith.mulf %433, %434 : vector<8x1xf32>
    %cst_133 = arith.constant 9.99999974E-6 : f32
    %436 = vector.broadcast %cst_133 : f32 to vector<8x1xf32>
    %437 = arith.addf %435, %436 : vector<8x1xf32>
    %438 = math.rsqrt %437 : vector<8x1xf32>
    %439 = vector.broadcast %438 : vector<8x1xf32> to vector<8x128xf32>
    %440 = arith.mulf %430, %439 : vector<8x128xf32>
    %441 = vector.broadcast %418 : vector<1x128xf32> to vector<8x128xf32>
    %442 = arith.mulf %440, %441 : vector<8x128xf32>
    %443 = vector.broadcast %419 : vector<1x128xf32> to vector<8x128xf32>
    %444 = arith.addf %442, %443 : vector<8x128xf32>
    %c0_134 = arith.constant 0 : index
    %c0_135 = arith.constant 0 : index
    %c0_136 = arith.constant 0 : index
    %445 = vector.load %arg2[%c0_134, %c0_135, %c0_136] : memref<1x8x128xf32, #tpu.memory_space<vmem>>, vector<1x8x128xf32>
    %446 = vector.shape_cast %445 : vector<1x8x128xf32> to vector<8x128xf32>
    %447 = arith.truncf %446 : vector<8x128xf32> to vector<8x128xbf16>
    %448 = arith.truncf %446 : vector<8x128xf32> to vector<8x128xbf16>
    %c0_137 = arith.constant 0 : index
    %c0_138 = arith.constant 0 : index
    %c0_139 = arith.constant 0 : index
    %449 = vector.load %arg15[%c0_137, %c0_138, %c0_139] : memref<16x128x128xbf16, #tpu.memory_space<vmem>>, vector<1x128x128xbf16>
    %450 = vector.shape_cast %449 : vector<1x128x128xbf16> to vector<128x128xbf16>
    %cst_140 = arith.constant dense<0.000000e+00> : vector<8x128xf32>
    %451 = tpu.matmul %447, %450, %cst_140 {dimension_numbers = #tpu.dot_dimension_numbers<[1], [0], [0], [1], [0, 0, 1, 1], [], []>} : vector<8x128xbf16>, vector<128x128xbf16>, vector<8x128xf32> -> vector<8x128xf32>
    %452 = vector.extract_strided_slice %38 {offsets = [0, 0], sizes = [1, 128], strides = [1, 1]} : vector<16x128xf32> to vector<1x128xf32>
    %453 = vector.broadcast %452 : vector<1x128xf32> to vector<8x128xf32>
    %454 = arith.addf %451, %453 : vector<8x128xf32>
    %c1_141 = arith.constant 1 : index
    %c0_142 = arith.constant 0 : index
    %c0_143 = arith.constant 0 : index
    %455 = vector.load %arg15[%c1_141, %c0_142, %c0_143] : memref<16x128x128xbf16, #tpu.memory_space<vmem>>, vector<1x128x128xbf16>
    %456 = vector.shape_cast %455 : vector<1x128x128xbf16> to vector<128x128xbf16>
    %cst_144 = arith.constant dense<0.000000e+00> : vector<8x128xf32>
    %457 = tpu.matmul %448, %456, %cst_144 {dimension_numbers = #tpu.dot_dimension_numbers<[1], [0], [0], [1], [0, 0, 1, 1], [], []>} : vector<8x128xbf16>, vector<128x128xbf16>, vector<8x128xf32> -> vector<8x128xf32>
    %458 = vector.extract_strided_slice %38 {offsets = [1, 0], sizes = [1, 128], strides = [1, 1]} : vector<16x128xf32> to vector<1x128xf32>
    %459 = vector.broadcast %458 : vector<1x128xf32> to vector<8x128xf32>
    %460 = arith.addf %457, %459 : vector<8x128xf32>
    %c2_145 = arith.constant 2 : index
    %c0_146 = arith.constant 0 : index
    %c0_147 = arith.constant 0 : index
    %461 = vector.load %arg15[%c2_145, %c0_146, %c0_147] : memref<16x128x128xbf16, #tpu.memory_space<vmem>>, vector<1x128x128xbf16>
    %462 = vector.shape_cast %461 : vector<1x128x128xbf16> to vector<128x128xbf16>
    %cst_148 = arith.constant dense<0.000000e+00> : vector<8x128xf32>
    %463 = tpu.matmul %448, %462, %cst_148 {dimension_numbers = #tpu.dot_dimension_numbers<[1], [0], [0], [1], [0, 0, 1, 1], [], []>} : vector<8x128xbf16>, vector<128x128xbf16>, vector<8x128xf32> -> vector<8x128xf32>
    %464 = vector.extract_strided_slice %38 {offsets = [2, 0], sizes = [1, 128], strides = [1, 1]} : vector<16x128xf32> to vector<1x128xf32>
    %465 = vector.broadcast %464 : vector<1x128xf32> to vector<8x128xf32>
    %466 = arith.addf %463, %465 : vector<8x128xf32>
    %467 = tpu.transpose %460, [1, 0] : vector<8x128xf32> -> vector<128x8xf32>
    %468 = arith.truncf %467 : vector<128x8xf32> to vector<128x8xbf16>
    %cst_149 = arith.constant 0.000000e+00 : f32
    %469 = vector.broadcast %cst_149 : f32 to vector<8x128xf32>
    %470 = vector.broadcast %7 : vector<1x128xf32> to vector<8x128xf32>
    %471 = arith.mulf %454, %470 : vector<8x128xf32>
    %472 = arith.truncf %471 : vector<8x128xf32> to vector<8x128xbf16>
    %cst_150 = arith.constant dense<0.000000e+00> : vector<8x8xf32>
    %473 = tpu.matmul %472, %468, %cst_150 {dimension_numbers = #tpu.dot_dimension_numbers<[1], [0], [0], [1], [0, 0, 1, 1], [], []>} : vector<8x128xbf16>, vector<128x8xbf16>, vector<8x8xf32> -> vector<8x8xf32>
    %474 = arith.mulf %473, %48 : vector<8x8xf32>
    %475 = arith.addf %474, %50 : vector<8x8xf32>
    %cst_151 = arith.constant dense<0xFF800000> : vector<8xf32>
    %476 = vector.multi_reduction <maximumf>, %475, %cst_151 [1] : vector<8x8xf32> to vector<8xf32>
    %477 = vector.shape_cast %476 : vector<8xf32> to vector<8x1xf32>
    %478 = vector.broadcast %477 : vector<8x1xf32> to vector<8x8xf32>
    %479 = arith.subf %475, %478 : vector<8x8xf32>
    %480 = math.exp %479 : vector<8x8xf32>
    %cst_152 = arith.constant dense<0.000000e+00> : vector<8xf32>
    %481 = vector.multi_reduction <add>, %480, %cst_152 [1] : vector<8x8xf32> to vector<8xf32>
    %482 = vector.shape_cast %481 : vector<8xf32> to vector<8x1xf32>
    %483 = tpu.reciprocal %482 {approx = true} : vector<8x1xf32> -> vector<8x1xf32>
    %484 = vector.broadcast %483 : vector<8x1xf32> to vector<8x8xf32>
    %485 = arith.mulf %480, %484 : vector<8x8xf32>
    %486 = vector.broadcast %7 : vector<1x128xf32> to vector<8x128xf32>
    %487 = arith.mulf %466, %486 : vector<8x128xf32>
    %488 = arith.truncf %487 : vector<8x128xf32> to vector<8x128xbf16>
    %489 = arith.truncf %485 : vector<8x8xf32> to vector<8x8xbf16>
    %cst_153 = arith.constant dense<0.000000e+00> : vector<8x128xf32>
    %490 = tpu.matmul %489, %488, %cst_153 {dimension_numbers = #tpu.dot_dimension_numbers<[1], [0], [0], [1], [0, 0, 1, 1], [], []>} : vector<8x8xbf16>, vector<8x128xbf16>, vector<8x128xf32> -> vector<8x128xf32>
    %491 = arith.addf %469, %490 : vector<8x128xf32>
    %492 = vector.broadcast %14 : vector<1x128xf32> to vector<8x128xf32>
    %493 = arith.mulf %454, %492 : vector<8x128xf32>
    %494 = arith.truncf %493 : vector<8x128xf32> to vector<8x128xbf16>
    %cst_154 = arith.constant dense<0.000000e+00> : vector<8x8xf32>
    %495 = tpu.matmul %494, %468, %cst_154 {dimension_numbers = #tpu.dot_dimension_numbers<[1], [0], [0], [1], [0, 0, 1, 1], [], []>} : vector<8x128xbf16>, vector<128x8xbf16>, vector<8x8xf32> -> vector<8x8xf32>
    %496 = arith.mulf %495, %48 : vector<8x8xf32>
    %497 = arith.addf %496, %50 : vector<8x8xf32>
    %cst_155 = arith.constant dense<0xFF800000> : vector<8xf32>
    %498 = vector.multi_reduction <maximumf>, %497, %cst_155 [1] : vector<8x8xf32> to vector<8xf32>
    %499 = vector.shape_cast %498 : vector<8xf32> to vector<8x1xf32>
    %500 = vector.broadcast %499 : vector<8x1xf32> to vector<8x8xf32>
    %501 = arith.subf %497, %500 : vector<8x8xf32>
    %502 = math.exp %501 : vector<8x8xf32>
    %cst_156 = arith.constant dense<0.000000e+00> : vector<8xf32>
    %503 = vector.multi_reduction <add>, %502, %cst_156 [1] : vector<8x8xf32> to vector<8xf32>
    %504 = vector.shape_cast %503 : vector<8xf32> to vector<8x1xf32>
    %505 = tpu.reciprocal %504 {approx = true} : vector<8x1xf32> -> vector<8x1xf32>
    %506 = vector.broadcast %505 : vector<8x1xf32> to vector<8x8xf32>
    %507 = arith.mulf %502, %506 : vector<8x8xf32>
    %508 = vector.broadcast %14 : vector<1x128xf32> to vector<8x128xf32>
    %509 = arith.mulf %466, %508 : vector<8x128xf32>
    %510 = arith.truncf %509 : vector<8x128xf32> to vector<8x128xbf16>
    %511 = arith.truncf %507 : vector<8x8xf32> to vector<8x8xbf16>
    %cst_157 = arith.constant dense<0.000000e+00> : vector<8x128xf32>
    %512 = tpu.matmul %511, %510, %cst_157 {dimension_numbers = #tpu.dot_dimension_numbers<[1], [0], [0], [1], [0, 0, 1, 1], [], []>} : vector<8x8xbf16>, vector<8x128xbf16>, vector<8x128xf32> -> vector<8x128xf32>
    %513 = arith.addf %491, %512 : vector<8x128xf32>
    %514 = vector.broadcast %21 : vector<1x128xf32> to vector<8x128xf32>
    %515 = arith.mulf %454, %514 : vector<8x128xf32>
    %516 = arith.truncf %515 : vector<8x128xf32> to vector<8x128xbf16>
    %cst_158 = arith.constant dense<0.000000e+00> : vector<8x8xf32>
    %517 = tpu.matmul %516, %468, %cst_158 {dimension_numbers = #tpu.dot_dimension_numbers<[1], [0], [0], [1], [0, 0, 1, 1], [], []>} : vector<8x128xbf16>, vector<128x8xbf16>, vector<8x8xf32> -> vector<8x8xf32>
    %518 = arith.mulf %517, %48 : vector<8x8xf32>
    %519 = arith.addf %518, %50 : vector<8x8xf32>
    %cst_159 = arith.constant dense<0xFF800000> : vector<8xf32>
    %520 = vector.multi_reduction <maximumf>, %519, %cst_159 [1] : vector<8x8xf32> to vector<8xf32>
    %521 = vector.shape_cast %520 : vector<8xf32> to vector<8x1xf32>
    %522 = vector.broadcast %521 : vector<8x1xf32> to vector<8x8xf32>
    %523 = arith.subf %519, %522 : vector<8x8xf32>
    %524 = math.exp %523 : vector<8x8xf32>
    %cst_160 = arith.constant dense<0.000000e+00> : vector<8xf32>
    %525 = vector.multi_reduction <add>, %524, %cst_160 [1] : vector<8x8xf32> to vector<8xf32>
    %526 = vector.shape_cast %525 : vector<8xf32> to vector<8x1xf32>
    %527 = tpu.reciprocal %526 {approx = true} : vector<8x1xf32> -> vector<8x1xf32>
    %528 = vector.broadcast %527 : vector<8x1xf32> to vector<8x8xf32>
    %529 = arith.mulf %524, %528 : vector<8x8xf32>
    %530 = vector.broadcast %21 : vector<1x128xf32> to vector<8x128xf32>
    %531 = arith.mulf %466, %530 : vector<8x128xf32>
    %532 = arith.truncf %531 : vector<8x128xf32> to vector<8x128xbf16>
    %533 = arith.truncf %529 : vector<8x8xf32> to vector<8x8xbf16>
    %cst_161 = arith.constant dense<0.000000e+00> : vector<8x128xf32>
    %534 = tpu.matmul %533, %532, %cst_161 {dimension_numbers = #tpu.dot_dimension_numbers<[1], [0], [0], [1], [0, 0, 1, 1], [], []>} : vector<8x8xbf16>, vector<8x128xbf16>, vector<8x128xf32> -> vector<8x128xf32>
    %535 = arith.addf %513, %534 : vector<8x128xf32>
    %536 = vector.broadcast %28 : vector<1x128xf32> to vector<8x128xf32>
    %537 = arith.mulf %454, %536 : vector<8x128xf32>
    %538 = arith.truncf %537 : vector<8x128xf32> to vector<8x128xbf16>
    %cst_162 = arith.constant dense<0.000000e+00> : vector<8x8xf32>
    %539 = tpu.matmul %538, %468, %cst_162 {dimension_numbers = #tpu.dot_dimension_numbers<[1], [0], [0], [1], [0, 0, 1, 1], [], []>} : vector<8x128xbf16>, vector<128x8xbf16>, vector<8x8xf32> -> vector<8x8xf32>
    %540 = arith.mulf %539, %48 : vector<8x8xf32>
    %541 = arith.addf %540, %50 : vector<8x8xf32>
    %cst_163 = arith.constant dense<0xFF800000> : vector<8xf32>
    %542 = vector.multi_reduction <maximumf>, %541, %cst_163 [1] : vector<8x8xf32> to vector<8xf32>
    %543 = vector.shape_cast %542 : vector<8xf32> to vector<8x1xf32>
    %544 = vector.broadcast %543 : vector<8x1xf32> to vector<8x8xf32>
    %545 = arith.subf %541, %544 : vector<8x8xf32>
    %546 = math.exp %545 : vector<8x8xf32>
    %cst_164 = arith.constant dense<0.000000e+00> : vector<8xf32>
    %547 = vector.multi_reduction <add>, %546, %cst_164 [1] : vector<8x8xf32> to vector<8xf32>
    %548 = vector.shape_cast %547 : vector<8xf32> to vector<8x1xf32>
    %549 = tpu.reciprocal %548 {approx = true} : vector<8x1xf32> -> vector<8x1xf32>
    %550 = vector.broadcast %549 : vector<8x1xf32> to vector<8x8xf32>
    %551 = arith.mulf %546, %550 : vector<8x8xf32>
    %552 = vector.broadcast %28 : vector<1x128xf32> to vector<8x128xf32>
    %553 = arith.mulf %466, %552 : vector<8x128xf32>
    %554 = arith.truncf %553 : vector<8x128xf32> to vector<8x128xbf16>
    %555 = arith.truncf %551 : vector<8x8xf32> to vector<8x8xbf16>
    %cst_165 = arith.constant dense<0.000000e+00> : vector<8x128xf32>
    %556 = tpu.matmul %555, %554, %cst_165 {dimension_numbers = #tpu.dot_dimension_numbers<[1], [0], [0], [1], [0, 0, 1, 1], [], []>} : vector<8x8xbf16>, vector<8x128xbf16>, vector<8x128xf32> -> vector<8x128xf32>
    %557 = arith.addf %535, %556 : vector<8x128xf32>
    %558 = arith.truncf %557 : vector<8x128xf32> to vector<8x128xbf16>
    %c3_166 = arith.constant 3 : index
    %c0_167 = arith.constant 0 : index
    %c0_168 = arith.constant 0 : index
    %559 = vector.load %arg15[%c3_166, %c0_167, %c0_168] : memref<16x128x128xbf16, #tpu.memory_space<vmem>>, vector<1x128x128xbf16>
    %560 = vector.shape_cast %559 : vector<1x128x128xbf16> to vector<128x128xbf16>
    %cst_169 = arith.constant dense<0.000000e+00> : vector<8x128xf32>
    %561 = tpu.matmul %558, %560, %cst_169 {dimension_numbers = #tpu.dot_dimension_numbers<[1], [0], [0], [1], [0, 0, 1, 1], [], []>} : vector<8x128xbf16>, vector<128x128xbf16>, vector<8x128xf32> -> vector<8x128xf32>
    %562 = vector.extract_strided_slice %38 {offsets = [3, 0], sizes = [1, 128], strides = [1, 1]} : vector<16x128xf32> to vector<1x128xf32>
    %563 = vector.broadcast %562 : vector<1x128xf32> to vector<8x128xf32>
    %564 = arith.addf %561, %563 : vector<8x128xf32>
    %565 = vector.extract_strided_slice %41 {offsets = [0, 0], sizes = [1, 128], strides = [1, 1]} : vector<6x128xf32> to vector<1x128xf32>
    %566 = vector.extract_strided_slice %42 {offsets = [0, 0], sizes = [1, 128], strides = [1, 1]} : vector<6x128xf32> to vector<1x128xf32>
    %567 = arith.addf %446, %564 : vector<8x128xf32>
    %568 = vector.broadcast %32 : vector<1x128xf32> to vector<8x128xf32>
    %569 = arith.mulf %567, %568 : vector<8x128xf32>
    %cst_170 = arith.constant dense<0.000000e+00> : vector<8xf32>
    %570 = vector.multi_reduction <add>, %569, %cst_170 [1] : vector<8x128xf32> to vector<8xf32>
    %571 = vector.shape_cast %570 : vector<8xf32> to vector<8x1xf32>
    %cst_171 = arith.constant 3.125000e-02 : f32
    %572 = vector.broadcast %cst_171 : f32 to vector<8x1xf32>
    %573 = arith.mulf %571, %572 : vector<8x1xf32>
    %574 = vector.broadcast %573 : vector<8x1xf32> to vector<8x128xf32>
    %575 = arith.subf %567, %574 : vector<8x128xf32>
    %576 = vector.broadcast %32 : vector<1x128xf32> to vector<8x128xf32>
    %577 = arith.mulf %575, %576 : vector<8x128xf32>
    %578 = arith.mulf %577, %577 : vector<8x128xf32>
    %cst_172 = arith.constant dense<0.000000e+00> : vector<8xf32>
    %579 = vector.multi_reduction <add>, %578, %cst_172 [1] : vector<8x128xf32> to vector<8xf32>
    %580 = vector.shape_cast %579 : vector<8xf32> to vector<8x1xf32>
    %cst_173 = arith.constant 3.125000e-02 : f32
    %581 = vector.broadcast %cst_173 : f32 to vector<8x1xf32>
    %582 = arith.mulf %580, %581 : vector<8x1xf32>
    %cst_174 = arith.constant 9.99999974E-6 : f32
    %583 = vector.broadcast %cst_174 : f32 to vector<8x1xf32>
    %584 = arith.addf %582, %583 : vector<8x1xf32>
    %585 = math.rsqrt %584 : vector<8x1xf32>
    %586 = vector.broadcast %585 : vector<8x1xf32> to vector<8x128xf32>
    %587 = arith.mulf %577, %586 : vector<8x128xf32>
    %588 = vector.broadcast %565 : vector<1x128xf32> to vector<8x128xf32>
    %589 = arith.mulf %587, %588 : vector<8x128xf32>
    %590 = vector.broadcast %566 : vector<1x128xf32> to vector<8x128xf32>
    %591 = arith.addf %589, %590 : vector<8x128xf32>
    %592 = arith.truncf %591 : vector<8x128xf32> to vector<8x128xbf16>
    %593 = arith.truncf %444 : vector<8x128xf32> to vector<8x128xbf16>
    %c4_175 = arith.constant 4 : index
    %c0_176 = arith.constant 0 : index
    %c0_177 = arith.constant 0 : index
    %594 = vector.load %arg15[%c4_175, %c0_176, %c0_177] : memref<16x128x128xbf16, #tpu.memory_space<vmem>>, vector<1x128x128xbf16>
    %595 = vector.shape_cast %594 : vector<1x128x128xbf16> to vector<128x128xbf16>
    %cst_178 = arith.constant dense<0.000000e+00> : vector<8x128xf32>
    %596 = tpu.matmul %592, %595, %cst_178 {dimension_numbers = #tpu.dot_dimension_numbers<[1], [0], [0], [1], [0, 0, 1, 1], [], []>} : vector<8x128xbf16>, vector<128x128xbf16>, vector<8x128xf32> -> vector<8x128xf32>
    %597 = vector.extract_strided_slice %38 {offsets = [4, 0], sizes = [1, 128], strides = [1, 1]} : vector<16x128xf32> to vector<1x128xf32>
    %598 = vector.broadcast %597 : vector<1x128xf32> to vector<8x128xf32>
    %599 = arith.addf %596, %598 : vector<8x128xf32>
    %c5_179 = arith.constant 5 : index
    %c0_180 = arith.constant 0 : index
    %c0_181 = arith.constant 0 : index
    %600 = vector.load %arg15[%c5_179, %c0_180, %c0_181] : memref<16x128x128xbf16, #tpu.memory_space<vmem>>, vector<1x128x128xbf16>
    %601 = vector.shape_cast %600 : vector<1x128x128xbf16> to vector<128x128xbf16>
    %cst_182 = arith.constant dense<0.000000e+00> : vector<8x128xf32>
    %602 = tpu.matmul %593, %601, %cst_182 {dimension_numbers = #tpu.dot_dimension_numbers<[1], [0], [0], [1], [0, 0, 1, 1], [], []>} : vector<8x128xbf16>, vector<128x128xbf16>, vector<8x128xf32> -> vector<8x128xf32>
    %603 = vector.extract_strided_slice %38 {offsets = [5, 0], sizes = [1, 128], strides = [1, 1]} : vector<16x128xf32> to vector<1x128xf32>
    %604 = vector.broadcast %603 : vector<1x128xf32> to vector<8x128xf32>
    %605 = arith.addf %602, %604 : vector<8x128xf32>
    %c6_183 = arith.constant 6 : index
    %c0_184 = arith.constant 0 : index
    %c0_185 = arith.constant 0 : index
    %606 = vector.load %arg15[%c6_183, %c0_184, %c0_185] : memref<16x128x128xbf16, #tpu.memory_space<vmem>>, vector<1x128x128xbf16>
    %607 = vector.shape_cast %606 : vector<1x128x128xbf16> to vector<128x128xbf16>
    %cst_186 = arith.constant dense<0.000000e+00> : vector<8x128xf32>
    %608 = tpu.matmul %593, %607, %cst_186 {dimension_numbers = #tpu.dot_dimension_numbers<[1], [0], [0], [1], [0, 0, 1, 1], [], []>} : vector<8x128xbf16>, vector<128x128xbf16>, vector<8x128xf32> -> vector<8x128xf32>
    %609 = vector.extract_strided_slice %38 {offsets = [6, 0], sizes = [1, 128], strides = [1, 1]} : vector<16x128xf32> to vector<1x128xf32>
    %610 = vector.broadcast %609 : vector<1x128xf32> to vector<8x128xf32>
    %611 = arith.addf %608, %610 : vector<8x128xf32>
    %612 = tpu.transpose %605, [1, 0] : vector<8x128xf32> -> vector<128x8xf32>
    %613 = arith.truncf %612 : vector<128x8xf32> to vector<128x8xbf16>
    %cst_187 = arith.constant 0.000000e+00 : f32
    %614 = vector.broadcast %cst_187 : f32 to vector<8x128xf32>
    %615 = vector.broadcast %7 : vector<1x128xf32> to vector<8x128xf32>
    %616 = arith.mulf %599, %615 : vector<8x128xf32>
    %617 = arith.truncf %616 : vector<8x128xf32> to vector<8x128xbf16>
    %cst_188 = arith.constant dense<0.000000e+00> : vector<8x8xf32>
    %618 = tpu.matmul %617, %613, %cst_188 {dimension_numbers = #tpu.dot_dimension_numbers<[1], [0], [0], [1], [0, 0, 1, 1], [], []>} : vector<8x128xbf16>, vector<128x8xbf16>, vector<8x8xf32> -> vector<8x8xf32>
    %619 = vector.broadcast %44 : vector<1x8xf32> to vector<8x8xf32>
    %620 = arith.mulf %618, %619 : vector<8x8xf32>
    %621 = vector.broadcast %46 : vector<1x8xf32> to vector<8x8xf32>
    %622 = arith.addf %620, %621 : vector<8x8xf32>
    %cst_189 = arith.constant dense<0xFF800000> : vector<8xf32>
    %623 = vector.multi_reduction <maximumf>, %622, %cst_189 [1] : vector<8x8xf32> to vector<8xf32>
    %624 = vector.shape_cast %623 : vector<8xf32> to vector<8x1xf32>
    %625 = vector.broadcast %624 : vector<8x1xf32> to vector<8x8xf32>
    %626 = arith.subf %622, %625 : vector<8x8xf32>
    %627 = math.exp %626 : vector<8x8xf32>
    %cst_190 = arith.constant dense<0.000000e+00> : vector<8xf32>
    %628 = vector.multi_reduction <add>, %627, %cst_190 [1] : vector<8x8xf32> to vector<8xf32>
    %629 = vector.shape_cast %628 : vector<8xf32> to vector<8x1xf32>
    %630 = tpu.reciprocal %629 {approx = true} : vector<8x1xf32> -> vector<8x1xf32>
    %631 = vector.broadcast %630 : vector<8x1xf32> to vector<8x8xf32>
    %632 = arith.mulf %627, %631 : vector<8x8xf32>
    %633 = vector.broadcast %7 : vector<1x128xf32> to vector<8x128xf32>
    %634 = arith.mulf %611, %633 : vector<8x128xf32>
    %635 = arith.truncf %634 : vector<8x128xf32> to vector<8x128xbf16>
    %636 = arith.truncf %632 : vector<8x8xf32> to vector<8x8xbf16>
    %cst_191 = arith.constant dense<0.000000e+00> : vector<8x128xf32>
    %637 = tpu.matmul %636, %635, %cst_191 {dimension_numbers = #tpu.dot_dimension_numbers<[1], [0], [0], [1], [0, 0, 1, 1], [], []>} : vector<8x8xbf16>, vector<8x128xbf16>, vector<8x128xf32> -> vector<8x128xf32>
    %638 = arith.addf %614, %637 : vector<8x128xf32>
    %639 = vector.broadcast %14 : vector<1x128xf32> to vector<8x128xf32>
    %640 = arith.mulf %599, %639 : vector<8x128xf32>
    %641 = arith.truncf %640 : vector<8x128xf32> to vector<8x128xbf16>
    %cst_192 = arith.constant dense<0.000000e+00> : vector<8x8xf32>
    %642 = tpu.matmul %641, %613, %cst_192 {dimension_numbers = #tpu.dot_dimension_numbers<[1], [0], [0], [1], [0, 0, 1, 1], [], []>} : vector<8x128xbf16>, vector<128x8xbf16>, vector<8x8xf32> -> vector<8x8xf32>
    %643 = vector.broadcast %44 : vector<1x8xf32> to vector<8x8xf32>
    %644 = arith.mulf %642, %643 : vector<8x8xf32>
    %645 = vector.broadcast %46 : vector<1x8xf32> to vector<8x8xf32>
    %646 = arith.addf %644, %645 : vector<8x8xf32>
    %cst_193 = arith.constant dense<0xFF800000> : vector<8xf32>
    %647 = vector.multi_reduction <maximumf>, %646, %cst_193 [1] : vector<8x8xf32> to vector<8xf32>
    %648 = vector.shape_cast %647 : vector<8xf32> to vector<8x1xf32>
    %649 = vector.broadcast %648 : vector<8x1xf32> to vector<8x8xf32>
    %650 = arith.subf %646, %649 : vector<8x8xf32>
    %651 = math.exp %650 : vector<8x8xf32>
    %cst_194 = arith.constant dense<0.000000e+00> : vector<8xf32>
    %652 = vector.multi_reduction <add>, %651, %cst_194 [1] : vector<8x8xf32> to vector<8xf32>
    %653 = vector.shape_cast %652 : vector<8xf32> to vector<8x1xf32>
    %654 = tpu.reciprocal %653 {approx = true} : vector<8x1xf32> -> vector<8x1xf32>
    %655 = vector.broadcast %654 : vector<8x1xf32> to vector<8x8xf32>
    %656 = arith.mulf %651, %655 : vector<8x8xf32>
    %657 = vector.broadcast %14 : vector<1x128xf32> to vector<8x128xf32>
    %658 = arith.mulf %611, %657 : vector<8x128xf32>
    %659 = arith.truncf %658 : vector<8x128xf32> to vector<8x128xbf16>
    %660 = arith.truncf %656 : vector<8x8xf32> to vector<8x8xbf16>
    %cst_195 = arith.constant dense<0.000000e+00> : vector<8x128xf32>
    %661 = tpu.matmul %660, %659, %cst_195 {dimension_numbers = #tpu.dot_dimension_numbers<[1], [0], [0], [1], [0, 0, 1, 1], [], []>} : vector<8x8xbf16>, vector<8x128xbf16>, vector<8x128xf32> -> vector<8x128xf32>
    %662 = arith.addf %638, %661 : vector<8x128xf32>
    %663 = vector.broadcast %21 : vector<1x128xf32> to vector<8x128xf32>
    %664 = arith.mulf %599, %663 : vector<8x128xf32>
    %665 = arith.truncf %664 : vector<8x128xf32> to vector<8x128xbf16>
    %cst_196 = arith.constant dense<0.000000e+00> : vector<8x8xf32>
    %666 = tpu.matmul %665, %613, %cst_196 {dimension_numbers = #tpu.dot_dimension_numbers<[1], [0], [0], [1], [0, 0, 1, 1], [], []>} : vector<8x128xbf16>, vector<128x8xbf16>, vector<8x8xf32> -> vector<8x8xf32>
    %667 = vector.broadcast %44 : vector<1x8xf32> to vector<8x8xf32>
    %668 = arith.mulf %666, %667 : vector<8x8xf32>
    %669 = vector.broadcast %46 : vector<1x8xf32> to vector<8x8xf32>
    %670 = arith.addf %668, %669 : vector<8x8xf32>
    %cst_197 = arith.constant dense<0xFF800000> : vector<8xf32>
    %671 = vector.multi_reduction <maximumf>, %670, %cst_197 [1] : vector<8x8xf32> to vector<8xf32>
    %672 = vector.shape_cast %671 : vector<8xf32> to vector<8x1xf32>
    %673 = vector.broadcast %672 : vector<8x1xf32> to vector<8x8xf32>
    %674 = arith.subf %670, %673 : vector<8x8xf32>
    %675 = math.exp %674 : vector<8x8xf32>
    %cst_198 = arith.constant dense<0.000000e+00> : vector<8xf32>
    %676 = vector.multi_reduction <add>, %675, %cst_198 [1] : vector<8x8xf32> to vector<8xf32>
    %677 = vector.shape_cast %676 : vector<8xf32> to vector<8x1xf32>
    %678 = tpu.reciprocal %677 {approx = true} : vector<8x1xf32> -> vector<8x1xf32>
    %679 = vector.broadcast %678 : vector<8x1xf32> to vector<8x8xf32>
    %680 = arith.mulf %675, %679 : vector<8x8xf32>
    %681 = vector.broadcast %21 : vector<1x128xf32> to vector<8x128xf32>
    %682 = arith.mulf %611, %681 : vector<8x128xf32>
    %683 = arith.truncf %682 : vector<8x128xf32> to vector<8x128xbf16>
    %684 = arith.truncf %680 : vector<8x8xf32> to vector<8x8xbf16>
    %cst_199 = arith.constant dense<0.000000e+00> : vector<8x128xf32>
    %685 = tpu.matmul %684, %683, %cst_199 {dimension_numbers = #tpu.dot_dimension_numbers<[1], [0], [0], [1], [0, 0, 1, 1], [], []>} : vector<8x8xbf16>, vector<8x128xbf16>, vector<8x128xf32> -> vector<8x128xf32>
    %686 = arith.addf %662, %685 : vector<8x128xf32>
    %687 = vector.broadcast %28 : vector<1x128xf32> to vector<8x128xf32>
    %688 = arith.mulf %599, %687 : vector<8x128xf32>
    %689 = arith.truncf %688 : vector<8x128xf32> to vector<8x128xbf16>
    %cst_200 = arith.constant dense<0.000000e+00> : vector<8x8xf32>
    %690 = tpu.matmul %689, %613, %cst_200 {dimension_numbers = #tpu.dot_dimension_numbers<[1], [0], [0], [1], [0, 0, 1, 1], [], []>} : vector<8x128xbf16>, vector<128x8xbf16>, vector<8x8xf32> -> vector<8x8xf32>
    %691 = vector.broadcast %44 : vector<1x8xf32> to vector<8x8xf32>
    %692 = arith.mulf %690, %691 : vector<8x8xf32>
    %693 = vector.broadcast %46 : vector<1x8xf32> to vector<8x8xf32>
    %694 = arith.addf %692, %693 : vector<8x8xf32>
    %cst_201 = arith.constant dense<0xFF800000> : vector<8xf32>
    %695 = vector.multi_reduction <maximumf>, %694, %cst_201 [1] : vector<8x8xf32> to vector<8xf32>
    %696 = vector.shape_cast %695 : vector<8xf32> to vector<8x1xf32>
    %697 = vector.broadcast %696 : vector<8x1xf32> to vector<8x8xf32>
    %698 = arith.subf %694, %697 : vector<8x8xf32>
    %699 = math.exp %698 : vector<8x8xf32>
    %cst_202 = arith.constant dense<0.000000e+00> : vector<8xf32>
    %700 = vector.multi_reduction <add>, %699, %cst_202 [1] : vector<8x8xf32> to vector<8xf32>
    %701 = vector.shape_cast %700 : vector<8xf32> to vector<8x1xf32>
    %702 = tpu.reciprocal %701 {approx = true} : vector<8x1xf32> -> vector<8x1xf32>
    %703 = vector.broadcast %702 : vector<8x1xf32> to vector<8x8xf32>
    %704 = arith.mulf %699, %703 : vector<8x8xf32>
    %705 = vector.broadcast %28 : vector<1x128xf32> to vector<8x128xf32>
    %706 = arith.mulf %611, %705 : vector<8x128xf32>
    %707 = arith.truncf %706 : vector<8x128xf32> to vector<8x128xbf16>
    %708 = arith.truncf %704 : vector<8x8xf32> to vector<8x8xbf16>
    %cst_203 = arith.constant dense<0.000000e+00> : vector<8x128xf32>
    %709 = tpu.matmul %708, %707, %cst_203 {dimension_numbers = #tpu.dot_dimension_numbers<[1], [0], [0], [1], [0, 0, 1, 1], [], []>} : vector<8x8xbf16>, vector<8x128xbf16>, vector<8x128xf32> -> vector<8x128xf32>
    %710 = arith.addf %686, %709 : vector<8x128xf32>
    %711 = arith.truncf %710 : vector<8x128xf32> to vector<8x128xbf16>
    %c7_204 = arith.constant 7 : index
    %c0_205 = arith.constant 0 : index
    %c0_206 = arith.constant 0 : index
    %712 = vector.load %arg15[%c7_204, %c0_205, %c0_206] : memref<16x128x128xbf16, #tpu.memory_space<vmem>>, vector<1x128x128xbf16>
    %713 = vector.shape_cast %712 : vector<1x128x128xbf16> to vector<128x128xbf16>
    %cst_207 = arith.constant dense<0.000000e+00> : vector<8x128xf32>
    %714 = tpu.matmul %711, %713, %cst_207 {dimension_numbers = #tpu.dot_dimension_numbers<[1], [0], [0], [1], [0, 0, 1, 1], [], []>} : vector<8x128xbf16>, vector<128x128xbf16>, vector<8x128xf32> -> vector<8x128xf32>
    %715 = vector.extract_strided_slice %38 {offsets = [7, 0], sizes = [1, 128], strides = [1, 1]} : vector<16x128xf32> to vector<1x128xf32>
    %716 = vector.broadcast %715 : vector<1x128xf32> to vector<8x128xf32>
    %717 = arith.addf %714, %716 : vector<8x128xf32>
    %718 = vector.extract_strided_slice %41 {offsets = [1, 0], sizes = [1, 128], strides = [1, 1]} : vector<6x128xf32> to vector<1x128xf32>
    %719 = vector.extract_strided_slice %42 {offsets = [1, 0], sizes = [1, 128], strides = [1, 1]} : vector<6x128xf32> to vector<1x128xf32>
    %720 = arith.addf %591, %717 : vector<8x128xf32>
    %721 = vector.broadcast %32 : vector<1x128xf32> to vector<8x128xf32>
    %722 = arith.mulf %720, %721 : vector<8x128xf32>
    %cst_208 = arith.constant dense<0.000000e+00> : vector<8xf32>
    %723 = vector.multi_reduction <add>, %722, %cst_208 [1] : vector<8x128xf32> to vector<8xf32>
    %724 = vector.shape_cast %723 : vector<8xf32> to vector<8x1xf32>
    %cst_209 = arith.constant 3.125000e-02 : f32
    %725 = vector.broadcast %cst_209 : f32 to vector<8x1xf32>
    %726 = arith.mulf %724, %725 : vector<8x1xf32>
    %727 = vector.broadcast %726 : vector<8x1xf32> to vector<8x128xf32>
    %728 = arith.subf %720, %727 : vector<8x128xf32>
    %729 = vector.broadcast %32 : vector<1x128xf32> to vector<8x128xf32>
    %730 = arith.mulf %728, %729 : vector<8x128xf32>
    %731 = arith.mulf %730, %730 : vector<8x128xf32>
    %cst_210 = arith.constant dense<0.000000e+00> : vector<8xf32>
    %732 = vector.multi_reduction <add>, %731, %cst_210 [1] : vector<8x128xf32> to vector<8xf32>
    %733 = vector.shape_cast %732 : vector<8xf32> to vector<8x1xf32>
    %cst_211 = arith.constant 3.125000e-02 : f32
    %734 = vector.broadcast %cst_211 : f32 to vector<8x1xf32>
    %735 = arith.mulf %733, %734 : vector<8x1xf32>
    %cst_212 = arith.constant 9.99999974E-6 : f32
    %736 = vector.broadcast %cst_212 : f32 to vector<8x1xf32>
    %737 = arith.addf %735, %736 : vector<8x1xf32>
    %738 = math.rsqrt %737 : vector<8x1xf32>
    %739 = vector.broadcast %738 : vector<8x1xf32> to vector<8x128xf32>
    %740 = arith.mulf %730, %739 : vector<8x128xf32>
    %741 = vector.broadcast %718 : vector<1x128xf32> to vector<8x128xf32>
    %742 = arith.mulf %740, %741 : vector<8x128xf32>
    %743 = vector.broadcast %719 : vector<1x128xf32> to vector<8x128xf32>
    %744 = arith.addf %742, %743 : vector<8x128xf32>
    %c0_213 = arith.constant 0 : index
    %c0_214 = arith.constant 0 : index
    %c0_215 = arith.constant 0 : index
    %745 = vector.load %arg17[%c0_213, %c0_214, %c0_215] : memref<2x128x128xbf16, #tpu.memory_space<vmem>>, vector<1x128x128xbf16>
    %746 = vector.shape_cast %745 : vector<1x128x128xbf16> to vector<128x128xbf16>
    %747 = vector.extract_strided_slice %39 {offsets = [0, 0], sizes = [1, 128], strides = [1, 1]} : vector<2x128xf32> to vector<1x128xf32>
    %c0_216 = arith.constant 0 : index
    %c0_217 = arith.constant 0 : index
    %c0_218 = arith.constant 0 : index
    %748 = vector.load %arg19[%c0_216, %c0_217, %c0_218] : memref<2x128x128xbf16, #tpu.memory_space<vmem>>, vector<1x128x128xbf16>
    %749 = vector.shape_cast %748 : vector<1x128x128xbf16> to vector<128x128xbf16>
    %750 = vector.extract_strided_slice %40 {offsets = [0, 0], sizes = [1, 128], strides = [1, 1]} : vector<2x128xf32> to vector<1x128xf32>
    %751 = arith.truncf %744 : vector<8x128xf32> to vector<8x128xbf16>
    %cst_219 = arith.constant dense<0.000000e+00> : vector<8x128xf32>
    %752 = tpu.matmul %751, %746, %cst_219 {dimension_numbers = #tpu.dot_dimension_numbers<[1], [0], [0], [1], [0, 0, 1, 1], [], []>} : vector<8x128xbf16>, vector<128x128xbf16>, vector<8x128xf32> -> vector<8x128xf32>
    %753 = vector.broadcast %747 : vector<1x128xf32> to vector<8x128xf32>
    %754 = arith.addf %752, %753 : vector<8x128xf32>
    %cst_220 = arith.constant 0.000000e+00 : f32
    %755 = vector.broadcast %cst_220 : f32 to vector<8x128xf32>
    %756 = arith.maximumf %754, %755 : vector<8x128xf32>
    %757 = arith.truncf %756 : vector<8x128xf32> to vector<8x128xbf16>
    %cst_221 = arith.constant dense<0.000000e+00> : vector<8x128xf32>
    %758 = tpu.matmul %757, %749, %cst_221 {dimension_numbers = #tpu.dot_dimension_numbers<[1], [0], [0], [1], [0, 0, 1, 1], [], []>} : vector<8x128xbf16>, vector<128x128xbf16>, vector<8x128xf32> -> vector<8x128xf32>
    %759 = vector.broadcast %750 : vector<1x128xf32> to vector<8x128xf32>
    %760 = arith.addf %758, %759 : vector<8x128xf32>
    %761 = vector.extract_strided_slice %41 {offsets = [2, 0], sizes = [1, 128], strides = [1, 1]} : vector<6x128xf32> to vector<1x128xf32>
    %762 = vector.extract_strided_slice %42 {offsets = [2, 0], sizes = [1, 128], strides = [1, 1]} : vector<6x128xf32> to vector<1x128xf32>
    %763 = arith.addf %744, %760 : vector<8x128xf32>
    %764 = vector.broadcast %32 : vector<1x128xf32> to vector<8x128xf32>
    %765 = arith.mulf %763, %764 : vector<8x128xf32>
    %cst_222 = arith.constant dense<0.000000e+00> : vector<8xf32>
    %766 = vector.multi_reduction <add>, %765, %cst_222 [1] : vector<8x128xf32> to vector<8xf32>
    %767 = vector.shape_cast %766 : vector<8xf32> to vector<8x1xf32>
    %cst_223 = arith.constant 3.125000e-02 : f32
    %768 = vector.broadcast %cst_223 : f32 to vector<8x1xf32>
    %769 = arith.mulf %767, %768 : vector<8x1xf32>
    %770 = vector.broadcast %769 : vector<8x1xf32> to vector<8x128xf32>
    %771 = arith.subf %763, %770 : vector<8x128xf32>
    %772 = vector.broadcast %32 : vector<1x128xf32> to vector<8x128xf32>
    %773 = arith.mulf %771, %772 : vector<8x128xf32>
    %774 = arith.mulf %773, %773 : vector<8x128xf32>
    %cst_224 = arith.constant dense<0.000000e+00> : vector<8xf32>
    %775 = vector.multi_reduction <add>, %774, %cst_224 [1] : vector<8x128xf32> to vector<8xf32>
    %776 = vector.shape_cast %775 : vector<8xf32> to vector<8x1xf32>
    %cst_225 = arith.constant 3.125000e-02 : f32
    %777 = vector.broadcast %cst_225 : f32 to vector<8x1xf32>
    %778 = arith.mulf %776, %777 : vector<8x1xf32>
    %cst_226 = arith.constant 9.99999974E-6 : f32
    %779 = vector.broadcast %cst_226 : f32 to vector<8x1xf32>
    %780 = arith.addf %778, %779 : vector<8x1xf32>
    %781 = math.rsqrt %780 : vector<8x1xf32>
    %782 = vector.broadcast %781 : vector<8x1xf32> to vector<8x128xf32>
    %783 = arith.mulf %773, %782 : vector<8x128xf32>
    %784 = vector.broadcast %761 : vector<1x128xf32> to vector<8x128xf32>
    %785 = arith.mulf %783, %784 : vector<8x128xf32>
    %786 = vector.broadcast %762 : vector<1x128xf32> to vector<8x128xf32>
    %787 = arith.addf %785, %786 : vector<8x128xf32>
    %788 = arith.truncf %787 : vector<8x128xf32> to vector<8x128xbf16>
    %789 = arith.truncf %787 : vector<8x128xf32> to vector<8x128xbf16>
    %c8 = arith.constant 8 : index
    %c0_227 = arith.constant 0 : index
    %c0_228 = arith.constant 0 : index
    %790 = vector.load %arg15[%c8, %c0_227, %c0_228] : memref<16x128x128xbf16, #tpu.memory_space<vmem>>, vector<1x128x128xbf16>
    %791 = vector.shape_cast %790 : vector<1x128x128xbf16> to vector<128x128xbf16>
    %cst_229 = arith.constant dense<0.000000e+00> : vector<8x128xf32>
    %792 = tpu.matmul %788, %791, %cst_229 {dimension_numbers = #tpu.dot_dimension_numbers<[1], [0], [0], [1], [0, 0, 1, 1], [], []>} : vector<8x128xbf16>, vector<128x128xbf16>, vector<8x128xf32> -> vector<8x128xf32>
    %793 = vector.extract_strided_slice %38 {offsets = [8, 0], sizes = [1, 128], strides = [1, 1]} : vector<16x128xf32> to vector<1x128xf32>
    %794 = vector.broadcast %793 : vector<1x128xf32> to vector<8x128xf32>
    %795 = arith.addf %792, %794 : vector<8x128xf32>
    %c9 = arith.constant 9 : index
    %c0_230 = arith.constant 0 : index
    %c0_231 = arith.constant 0 : index
    %796 = vector.load %arg15[%c9, %c0_230, %c0_231] : memref<16x128x128xbf16, #tpu.memory_space<vmem>>, vector<1x128x128xbf16>
    %797 = vector.shape_cast %796 : vector<1x128x128xbf16> to vector<128x128xbf16>
    %cst_232 = arith.constant dense<0.000000e+00> : vector<8x128xf32>
    %798 = tpu.matmul %789, %797, %cst_232 {dimension_numbers = #tpu.dot_dimension_numbers<[1], [0], [0], [1], [0, 0, 1, 1], [], []>} : vector<8x128xbf16>, vector<128x128xbf16>, vector<8x128xf32> -> vector<8x128xf32>
    %799 = vector.extract_strided_slice %38 {offsets = [9, 0], sizes = [1, 128], strides = [1, 1]} : vector<16x128xf32> to vector<1x128xf32>
    %800 = vector.broadcast %799 : vector<1x128xf32> to vector<8x128xf32>
    %801 = arith.addf %798, %800 : vector<8x128xf32>
    %c10 = arith.constant 10 : index
    %c0_233 = arith.constant 0 : index
    %c0_234 = arith.constant 0 : index
    %802 = vector.load %arg15[%c10, %c0_233, %c0_234] : memref<16x128x128xbf16, #tpu.memory_space<vmem>>, vector<1x128x128xbf16>
    %803 = vector.shape_cast %802 : vector<1x128x128xbf16> to vector<128x128xbf16>
    %cst_235 = arith.constant dense<0.000000e+00> : vector<8x128xf32>
    %804 = tpu.matmul %789, %803, %cst_235 {dimension_numbers = #tpu.dot_dimension_numbers<[1], [0], [0], [1], [0, 0, 1, 1], [], []>} : vector<8x128xbf16>, vector<128x128xbf16>, vector<8x128xf32> -> vector<8x128xf32>
    %805 = vector.extract_strided_slice %38 {offsets = [10, 0], sizes = [1, 128], strides = [1, 1]} : vector<16x128xf32> to vector<1x128xf32>
    %806 = vector.broadcast %805 : vector<1x128xf32> to vector<8x128xf32>
    %807 = arith.addf %804, %806 : vector<8x128xf32>
    %808 = tpu.transpose %801, [1, 0] : vector<8x128xf32> -> vector<128x8xf32>
    %809 = arith.truncf %808 : vector<128x8xf32> to vector<128x8xbf16>
    %cst_236 = arith.constant 0.000000e+00 : f32
    %810 = vector.broadcast %cst_236 : f32 to vector<8x128xf32>
    %811 = vector.broadcast %7 : vector<1x128xf32> to vector<8x128xf32>
    %812 = arith.mulf %795, %811 : vector<8x128xf32>
    %813 = arith.truncf %812 : vector<8x128xf32> to vector<8x128xbf16>
    %cst_237 = arith.constant dense<0.000000e+00> : vector<8x8xf32>
    %814 = tpu.matmul %813, %809, %cst_237 {dimension_numbers = #tpu.dot_dimension_numbers<[1], [0], [0], [1], [0, 0, 1, 1], [], []>} : vector<8x128xbf16>, vector<128x8xbf16>, vector<8x8xf32> -> vector<8x8xf32>
    %815 = arith.mulf %814, %48 : vector<8x8xf32>
    %816 = arith.addf %815, %50 : vector<8x8xf32>
    %cst_238 = arith.constant dense<0xFF800000> : vector<8xf32>
    %817 = vector.multi_reduction <maximumf>, %816, %cst_238 [1] : vector<8x8xf32> to vector<8xf32>
    %818 = vector.shape_cast %817 : vector<8xf32> to vector<8x1xf32>
    %819 = vector.broadcast %818 : vector<8x1xf32> to vector<8x8xf32>
    %820 = arith.subf %816, %819 : vector<8x8xf32>
    %821 = math.exp %820 : vector<8x8xf32>
    %cst_239 = arith.constant dense<0.000000e+00> : vector<8xf32>
    %822 = vector.multi_reduction <add>, %821, %cst_239 [1] : vector<8x8xf32> to vector<8xf32>
    %823 = vector.shape_cast %822 : vector<8xf32> to vector<8x1xf32>
    %824 = tpu.reciprocal %823 {approx = true} : vector<8x1xf32> -> vector<8x1xf32>
    %825 = vector.broadcast %824 : vector<8x1xf32> to vector<8x8xf32>
    %826 = arith.mulf %821, %825 : vector<8x8xf32>
    %827 = vector.broadcast %7 : vector<1x128xf32> to vector<8x128xf32>
    %828 = arith.mulf %807, %827 : vector<8x128xf32>
    %829 = arith.truncf %828 : vector<8x128xf32> to vector<8x128xbf16>
    %830 = arith.truncf %826 : vector<8x8xf32> to vector<8x8xbf16>
    %cst_240 = arith.constant dense<0.000000e+00> : vector<8x128xf32>
    %831 = tpu.matmul %830, %829, %cst_240 {dimension_numbers = #tpu.dot_dimension_numbers<[1], [0], [0], [1], [0, 0, 1, 1], [], []>} : vector<8x8xbf16>, vector<8x128xbf16>, vector<8x128xf32> -> vector<8x128xf32>
    %832 = arith.addf %810, %831 : vector<8x128xf32>
    %833 = vector.broadcast %14 : vector<1x128xf32> to vector<8x128xf32>
    %834 = arith.mulf %795, %833 : vector<8x128xf32>
    %835 = arith.truncf %834 : vector<8x128xf32> to vector<8x128xbf16>
    %cst_241 = arith.constant dense<0.000000e+00> : vector<8x8xf32>
    %836 = tpu.matmul %835, %809, %cst_241 {dimension_numbers = #tpu.dot_dimension_numbers<[1], [0], [0], [1], [0, 0, 1, 1], [], []>} : vector<8x128xbf16>, vector<128x8xbf16>, vector<8x8xf32> -> vector<8x8xf32>
    %837 = arith.mulf %836, %48 : vector<8x8xf32>
    %838 = arith.addf %837, %50 : vector<8x8xf32>
    %cst_242 = arith.constant dense<0xFF800000> : vector<8xf32>
    %839 = vector.multi_reduction <maximumf>, %838, %cst_242 [1] : vector<8x8xf32> to vector<8xf32>
    %840 = vector.shape_cast %839 : vector<8xf32> to vector<8x1xf32>
    %841 = vector.broadcast %840 : vector<8x1xf32> to vector<8x8xf32>
    %842 = arith.subf %838, %841 : vector<8x8xf32>
    %843 = math.exp %842 : vector<8x8xf32>
    %cst_243 = arith.constant dense<0.000000e+00> : vector<8xf32>
    %844 = vector.multi_reduction <add>, %843, %cst_243 [1] : vector<8x8xf32> to vector<8xf32>
    %845 = vector.shape_cast %844 : vector<8xf32> to vector<8x1xf32>
    %846 = tpu.reciprocal %845 {approx = true} : vector<8x1xf32> -> vector<8x1xf32>
    %847 = vector.broadcast %846 : vector<8x1xf32> to vector<8x8xf32>
    %848 = arith.mulf %843, %847 : vector<8x8xf32>
    %849 = vector.broadcast %14 : vector<1x128xf32> to vector<8x128xf32>
    %850 = arith.mulf %807, %849 : vector<8x128xf32>
    %851 = arith.truncf %850 : vector<8x128xf32> to vector<8x128xbf16>
    %852 = arith.truncf %848 : vector<8x8xf32> to vector<8x8xbf16>
    %cst_244 = arith.constant dense<0.000000e+00> : vector<8x128xf32>
    %853 = tpu.matmul %852, %851, %cst_244 {dimension_numbers = #tpu.dot_dimension_numbers<[1], [0], [0], [1], [0, 0, 1, 1], [], []>} : vector<8x8xbf16>, vector<8x128xbf16>, vector<8x128xf32> -> vector<8x128xf32>
    %854 = arith.addf %832, %853 : vector<8x128xf32>
    %855 = vector.broadcast %21 : vector<1x128xf32> to vector<8x128xf32>
    %856 = arith.mulf %795, %855 : vector<8x128xf32>
    %857 = arith.truncf %856 : vector<8x128xf32> to vector<8x128xbf16>
    %cst_245 = arith.constant dense<0.000000e+00> : vector<8x8xf32>
    %858 = tpu.matmul %857, %809, %cst_245 {dimension_numbers = #tpu.dot_dimension_numbers<[1], [0], [0], [1], [0, 0, 1, 1], [], []>} : vector<8x128xbf16>, vector<128x8xbf16>, vector<8x8xf32> -> vector<8x8xf32>
    %859 = arith.mulf %858, %48 : vector<8x8xf32>
    %860 = arith.addf %859, %50 : vector<8x8xf32>
    %cst_246 = arith.constant dense<0xFF800000> : vector<8xf32>
    %861 = vector.multi_reduction <maximumf>, %860, %cst_246 [1] : vector<8x8xf32> to vector<8xf32>
    %862 = vector.shape_cast %861 : vector<8xf32> to vector<8x1xf32>
    %863 = vector.broadcast %862 : vector<8x1xf32> to vector<8x8xf32>
    %864 = arith.subf %860, %863 : vector<8x8xf32>
    %865 = math.exp %864 : vector<8x8xf32>
    %cst_247 = arith.constant dense<0.000000e+00> : vector<8xf32>
    %866 = vector.multi_reduction <add>, %865, %cst_247 [1] : vector<8x8xf32> to vector<8xf32>
    %867 = vector.shape_cast %866 : vector<8xf32> to vector<8x1xf32>
    %868 = tpu.reciprocal %867 {approx = true} : vector<8x1xf32> -> vector<8x1xf32>
    %869 = vector.broadcast %868 : vector<8x1xf32> to vector<8x8xf32>
    %870 = arith.mulf %865, %869 : vector<8x8xf32>
    %871 = vector.broadcast %21 : vector<1x128xf32> to vector<8x128xf32>
    %872 = arith.mulf %807, %871 : vector<8x128xf32>
    %873 = arith.truncf %872 : vector<8x128xf32> to vector<8x128xbf16>
    %874 = arith.truncf %870 : vector<8x8xf32> to vector<8x8xbf16>
    %cst_248 = arith.constant dense<0.000000e+00> : vector<8x128xf32>
    %875 = tpu.matmul %874, %873, %cst_248 {dimension_numbers = #tpu.dot_dimension_numbers<[1], [0], [0], [1], [0, 0, 1, 1], [], []>} : vector<8x8xbf16>, vector<8x128xbf16>, vector<8x128xf32> -> vector<8x128xf32>
    %876 = arith.addf %854, %875 : vector<8x128xf32>
    %877 = vector.broadcast %28 : vector<1x128xf32> to vector<8x128xf32>
    %878 = arith.mulf %795, %877 : vector<8x128xf32>
    %879 = arith.truncf %878 : vector<8x128xf32> to vector<8x128xbf16>
    %cst_249 = arith.constant dense<0.000000e+00> : vector<8x8xf32>
    %880 = tpu.matmul %879, %809, %cst_249 {dimension_numbers = #tpu.dot_dimension_numbers<[1], [0], [0], [1], [0, 0, 1, 1], [], []>} : vector<8x128xbf16>, vector<128x8xbf16>, vector<8x8xf32> -> vector<8x8xf32>
    %881 = arith.mulf %880, %48 : vector<8x8xf32>
    %882 = arith.addf %881, %50 : vector<8x8xf32>
    %cst_250 = arith.constant dense<0xFF800000> : vector<8xf32>
    %883 = vector.multi_reduction <maximumf>, %882, %cst_250 [1] : vector<8x8xf32> to vector<8xf32>
    %884 = vector.shape_cast %883 : vector<8xf32> to vector<8x1xf32>
    %885 = vector.broadcast %884 : vector<8x1xf32> to vector<8x8xf32>
    %886 = arith.subf %882, %885 : vector<8x8xf32>
    %887 = math.exp %886 : vector<8x8xf32>
    %cst_251 = arith.constant dense<0.000000e+00> : vector<8xf32>
    %888 = vector.multi_reduction <add>, %887, %cst_251 [1] : vector<8x8xf32> to vector<8xf32>
    %889 = vector.shape_cast %888 : vector<8xf32> to vector<8x1xf32>
    %890 = tpu.reciprocal %889 {approx = true} : vector<8x1xf32> -> vector<8x1xf32>
    %891 = vector.broadcast %890 : vector<8x1xf32> to vector<8x8xf32>
    %892 = arith.mulf %887, %891 : vector<8x8xf32>
    %893 = vector.broadcast %28 : vector<1x128xf32> to vector<8x128xf32>
    %894 = arith.mulf %807, %893 : vector<8x128xf32>
    %895 = arith.truncf %894 : vector<8x128xf32> to vector<8x128xbf16>
    %896 = arith.truncf %892 : vector<8x8xf32> to vector<8x8xbf16>
    %cst_252 = arith.constant dense<0.000000e+00> : vector<8x128xf32>
    %897 = tpu.matmul %896, %895, %cst_252 {dimension_numbers = #tpu.dot_dimension_numbers<[1], [0], [0], [1], [0, 0, 1, 1], [], []>} : vector<8x8xbf16>, vector<8x128xbf16>, vector<8x128xf32> -> vector<8x128xf32>
    %898 = arith.addf %876, %897 : vector<8x128xf32>
    %899 = arith.truncf %898 : vector<8x128xf32> to vector<8x128xbf16>
    %c11 = arith.constant 11 : index
    %c0_253 = arith.constant 0 : index
    %c0_254 = arith.constant 0 : index
    %900 = vector.load %arg15[%c11, %c0_253, %c0_254] : memref<16x128x128xbf16, #tpu.memory_space<vmem>>, vector<1x128x128xbf16>
    %901 = vector.shape_cast %900 : vector<1x128x128xbf16> to vector<128x128xbf16>
    %cst_255 = arith.constant dense<0.000000e+00> : vector<8x128xf32>
    %902 = tpu.matmul %899, %901, %cst_255 {dimension_numbers = #tpu.dot_dimension_numbers<[1], [0], [0], [1], [0, 0, 1, 1], [], []>} : vector<8x128xbf16>, vector<128x128xbf16>, vector<8x128xf32> -> vector<8x128xf32>
    %903 = vector.extract_strided_slice %38 {offsets = [11, 0], sizes = [1, 128], strides = [1, 1]} : vector<16x128xf32> to vector<1x128xf32>
    %904 = vector.broadcast %903 : vector<1x128xf32> to vector<8x128xf32>
    %905 = arith.addf %902, %904 : vector<8x128xf32>
    %906 = vector.extract_strided_slice %41 {offsets = [3, 0], sizes = [1, 128], strides = [1, 1]} : vector<6x128xf32> to vector<1x128xf32>
    %907 = vector.extract_strided_slice %42 {offsets = [3, 0], sizes = [1, 128], strides = [1, 1]} : vector<6x128xf32> to vector<1x128xf32>
    %908 = arith.addf %787, %905 : vector<8x128xf32>
    %909 = vector.broadcast %32 : vector<1x128xf32> to vector<8x128xf32>
    %910 = arith.mulf %908, %909 : vector<8x128xf32>
    %cst_256 = arith.constant dense<0.000000e+00> : vector<8xf32>
    %911 = vector.multi_reduction <add>, %910, %cst_256 [1] : vector<8x128xf32> to vector<8xf32>
    %912 = vector.shape_cast %911 : vector<8xf32> to vector<8x1xf32>
    %cst_257 = arith.constant 3.125000e-02 : f32
    %913 = vector.broadcast %cst_257 : f32 to vector<8x1xf32>
    %914 = arith.mulf %912, %913 : vector<8x1xf32>
    %915 = vector.broadcast %914 : vector<8x1xf32> to vector<8x128xf32>
    %916 = arith.subf %908, %915 : vector<8x128xf32>
    %917 = vector.broadcast %32 : vector<1x128xf32> to vector<8x128xf32>
    %918 = arith.mulf %916, %917 : vector<8x128xf32>
    %919 = arith.mulf %918, %918 : vector<8x128xf32>
    %cst_258 = arith.constant dense<0.000000e+00> : vector<8xf32>
    %920 = vector.multi_reduction <add>, %919, %cst_258 [1] : vector<8x128xf32> to vector<8xf32>
    %921 = vector.shape_cast %920 : vector<8xf32> to vector<8x1xf32>
    %cst_259 = arith.constant 3.125000e-02 : f32
    %922 = vector.broadcast %cst_259 : f32 to vector<8x1xf32>
    %923 = arith.mulf %921, %922 : vector<8x1xf32>
    %cst_260 = arith.constant 9.99999974E-6 : f32
    %924 = vector.broadcast %cst_260 : f32 to vector<8x1xf32>
    %925 = arith.addf %923, %924 : vector<8x1xf32>
    %926 = math.rsqrt %925 : vector<8x1xf32>
    %927 = vector.broadcast %926 : vector<8x1xf32> to vector<8x128xf32>
    %928 = arith.mulf %918, %927 : vector<8x128xf32>
    %929 = vector.broadcast %906 : vector<1x128xf32> to vector<8x128xf32>
    %930 = arith.mulf %928, %929 : vector<8x128xf32>
    %931 = vector.broadcast %907 : vector<1x128xf32> to vector<8x128xf32>
    %932 = arith.addf %930, %931 : vector<8x128xf32>
    %933 = arith.truncf %932 : vector<8x128xf32> to vector<8x128xbf16>
    %934 = arith.truncf %444 : vector<8x128xf32> to vector<8x128xbf16>
    %c12 = arith.constant 12 : index
    %c0_261 = arith.constant 0 : index
    %c0_262 = arith.constant 0 : index
    %935 = vector.load %arg15[%c12, %c0_261, %c0_262] : memref<16x128x128xbf16, #tpu.memory_space<vmem>>, vector<1x128x128xbf16>
    %936 = vector.shape_cast %935 : vector<1x128x128xbf16> to vector<128x128xbf16>
    %cst_263 = arith.constant dense<0.000000e+00> : vector<8x128xf32>
    %937 = tpu.matmul %933, %936, %cst_263 {dimension_numbers = #tpu.dot_dimension_numbers<[1], [0], [0], [1], [0, 0, 1, 1], [], []>} : vector<8x128xbf16>, vector<128x128xbf16>, vector<8x128xf32> -> vector<8x128xf32>
    %938 = vector.extract_strided_slice %38 {offsets = [12, 0], sizes = [1, 128], strides = [1, 1]} : vector<16x128xf32> to vector<1x128xf32>
    %939 = vector.broadcast %938 : vector<1x128xf32> to vector<8x128xf32>
    %940 = arith.addf %937, %939 : vector<8x128xf32>
    %c13 = arith.constant 13 : index
    %c0_264 = arith.constant 0 : index
    %c0_265 = arith.constant 0 : index
    %941 = vector.load %arg15[%c13, %c0_264, %c0_265] : memref<16x128x128xbf16, #tpu.memory_space<vmem>>, vector<1x128x128xbf16>
    %942 = vector.shape_cast %941 : vector<1x128x128xbf16> to vector<128x128xbf16>
    %cst_266 = arith.constant dense<0.000000e+00> : vector<8x128xf32>
    %943 = tpu.matmul %934, %942, %cst_266 {dimension_numbers = #tpu.dot_dimension_numbers<[1], [0], [0], [1], [0, 0, 1, 1], [], []>} : vector<8x128xbf16>, vector<128x128xbf16>, vector<8x128xf32> -> vector<8x128xf32>
    %944 = vector.extract_strided_slice %38 {offsets = [13, 0], sizes = [1, 128], strides = [1, 1]} : vector<16x128xf32> to vector<1x128xf32>
    %945 = vector.broadcast %944 : vector<1x128xf32> to vector<8x128xf32>
    %946 = arith.addf %943, %945 : vector<8x128xf32>
    %c14 = arith.constant 14 : index
    %c0_267 = arith.constant 0 : index
    %c0_268 = arith.constant 0 : index
    %947 = vector.load %arg15[%c14, %c0_267, %c0_268] : memref<16x128x128xbf16, #tpu.memory_space<vmem>>, vector<1x128x128xbf16>
    %948 = vector.shape_cast %947 : vector<1x128x128xbf16> to vector<128x128xbf16>
    %cst_269 = arith.constant dense<0.000000e+00> : vector<8x128xf32>
    %949 = tpu.matmul %934, %948, %cst_269 {dimension_numbers = #tpu.dot_dimension_numbers<[1], [0], [0], [1], [0, 0, 1, 1], [], []>} : vector<8x128xbf16>, vector<128x128xbf16>, vector<8x128xf32> -> vector<8x128xf32>
    %950 = vector.extract_strided_slice %38 {offsets = [14, 0], sizes = [1, 128], strides = [1, 1]} : vector<16x128xf32> to vector<1x128xf32>
    %951 = vector.broadcast %950 : vector<1x128xf32> to vector<8x128xf32>
    %952 = arith.addf %949, %951 : vector<8x128xf32>
    %953 = tpu.transpose %946, [1, 0] : vector<8x128xf32> -> vector<128x8xf32>
    %954 = arith.truncf %953 : vector<128x8xf32> to vector<128x8xbf16>
    %cst_270 = arith.constant 0.000000e+00 : f32
    %955 = vector.broadcast %cst_270 : f32 to vector<8x128xf32>
    %956 = vector.broadcast %7 : vector<1x128xf32> to vector<8x128xf32>
    %957 = arith.mulf %940, %956 : vector<8x128xf32>
    %958 = arith.truncf %957 : vector<8x128xf32> to vector<8x128xbf16>
    %cst_271 = arith.constant dense<0.000000e+00> : vector<8x8xf32>
    %959 = tpu.matmul %958, %954, %cst_271 {dimension_numbers = #tpu.dot_dimension_numbers<[1], [0], [0], [1], [0, 0, 1, 1], [], []>} : vector<8x128xbf16>, vector<128x8xbf16>, vector<8x8xf32> -> vector<8x8xf32>
    %960 = vector.broadcast %44 : vector<1x8xf32> to vector<8x8xf32>
    %961 = arith.mulf %959, %960 : vector<8x8xf32>
    %962 = vector.broadcast %46 : vector<1x8xf32> to vector<8x8xf32>
    %963 = arith.addf %961, %962 : vector<8x8xf32>
    %cst_272 = arith.constant dense<0xFF800000> : vector<8xf32>
    %964 = vector.multi_reduction <maximumf>, %963, %cst_272 [1] : vector<8x8xf32> to vector<8xf32>
    %965 = vector.shape_cast %964 : vector<8xf32> to vector<8x1xf32>
    %966 = vector.broadcast %965 : vector<8x1xf32> to vector<8x8xf32>
    %967 = arith.subf %963, %966 : vector<8x8xf32>
    %968 = math.exp %967 : vector<8x8xf32>
    %cst_273 = arith.constant dense<0.000000e+00> : vector<8xf32>
    %969 = vector.multi_reduction <add>, %968, %cst_273 [1] : vector<8x8xf32> to vector<8xf32>
    %970 = vector.shape_cast %969 : vector<8xf32> to vector<8x1xf32>
    %971 = tpu.reciprocal %970 {approx = true} : vector<8x1xf32> -> vector<8x1xf32>
    %972 = vector.broadcast %971 : vector<8x1xf32> to vector<8x8xf32>
    %973 = arith.mulf %968, %972 : vector<8x8xf32>
    %974 = vector.broadcast %7 : vector<1x128xf32> to vector<8x128xf32>
    %975 = arith.mulf %952, %974 : vector<8x128xf32>
    %976 = arith.truncf %975 : vector<8x128xf32> to vector<8x128xbf16>
    %977 = arith.truncf %973 : vector<8x8xf32> to vector<8x8xbf16>
    %cst_274 = arith.constant dense<0.000000e+00> : vector<8x128xf32>
    %978 = tpu.matmul %977, %976, %cst_274 {dimension_numbers = #tpu.dot_dimension_numbers<[1], [0], [0], [1], [0, 0, 1, 1], [], []>} : vector<8x8xbf16>, vector<8x128xbf16>, vector<8x128xf32> -> vector<8x128xf32>
    %979 = arith.addf %955, %978 : vector<8x128xf32>
    %980 = vector.broadcast %14 : vector<1x128xf32> to vector<8x128xf32>
    %981 = arith.mulf %940, %980 : vector<8x128xf32>
    %982 = arith.truncf %981 : vector<8x128xf32> to vector<8x128xbf16>
    %cst_275 = arith.constant dense<0.000000e+00> : vector<8x8xf32>
    %983 = tpu.matmul %982, %954, %cst_275 {dimension_numbers = #tpu.dot_dimension_numbers<[1], [0], [0], [1], [0, 0, 1, 1], [], []>} : vector<8x128xbf16>, vector<128x8xbf16>, vector<8x8xf32> -> vector<8x8xf32>
    %984 = vector.broadcast %44 : vector<1x8xf32> to vector<8x8xf32>
    %985 = arith.mulf %983, %984 : vector<8x8xf32>
    %986 = vector.broadcast %46 : vector<1x8xf32> to vector<8x8xf32>
    %987 = arith.addf %985, %986 : vector<8x8xf32>
    %cst_276 = arith.constant dense<0xFF800000> : vector<8xf32>
    %988 = vector.multi_reduction <maximumf>, %987, %cst_276 [1] : vector<8x8xf32> to vector<8xf32>
    %989 = vector.shape_cast %988 : vector<8xf32> to vector<8x1xf32>
    %990 = vector.broadcast %989 : vector<8x1xf32> to vector<8x8xf32>
    %991 = arith.subf %987, %990 : vector<8x8xf32>
    %992 = math.exp %991 : vector<8x8xf32>
    %cst_277 = arith.constant dense<0.000000e+00> : vector<8xf32>
    %993 = vector.multi_reduction <add>, %992, %cst_277 [1] : vector<8x8xf32> to vector<8xf32>
    %994 = vector.shape_cast %993 : vector<8xf32> to vector<8x1xf32>
    %995 = tpu.reciprocal %994 {approx = true} : vector<8x1xf32> -> vector<8x1xf32>
    %996 = vector.broadcast %995 : vector<8x1xf32> to vector<8x8xf32>
    %997 = arith.mulf %992, %996 : vector<8x8xf32>
    %998 = vector.broadcast %14 : vector<1x128xf32> to vector<8x128xf32>
    %999 = arith.mulf %952, %998 : vector<8x128xf32>
    %1000 = arith.truncf %999 : vector<8x128xf32> to vector<8x128xbf16>
    %1001 = arith.truncf %997 : vector<8x8xf32> to vector<8x8xbf16>
    %cst_278 = arith.constant dense<0.000000e+00> : vector<8x128xf32>
    %1002 = tpu.matmul %1001, %1000, %cst_278 {dimension_numbers = #tpu.dot_dimension_numbers<[1], [0], [0], [1], [0, 0, 1, 1], [], []>} : vector<8x8xbf16>, vector<8x128xbf16>, vector<8x128xf32> -> vector<8x128xf32>
    %1003 = arith.addf %979, %1002 : vector<8x128xf32>
    %1004 = vector.broadcast %21 : vector<1x128xf32> to vector<8x128xf32>
    %1005 = arith.mulf %940, %1004 : vector<8x128xf32>
    %1006 = arith.truncf %1005 : vector<8x128xf32> to vector<8x128xbf16>
    %cst_279 = arith.constant dense<0.000000e+00> : vector<8x8xf32>
    %1007 = tpu.matmul %1006, %954, %cst_279 {dimension_numbers = #tpu.dot_dimension_numbers<[1], [0], [0], [1], [0, 0, 1, 1], [], []>} : vector<8x128xbf16>, vector<128x8xbf16>, vector<8x8xf32> -> vector<8x8xf32>
    %1008 = vector.broadcast %44 : vector<1x8xf32> to vector<8x8xf32>
    %1009 = arith.mulf %1007, %1008 : vector<8x8xf32>
    %1010 = vector.broadcast %46 : vector<1x8xf32> to vector<8x8xf32>
    %1011 = arith.addf %1009, %1010 : vector<8x8xf32>
    %cst_280 = arith.constant dense<0xFF800000> : vector<8xf32>
    %1012 = vector.multi_reduction <maximumf>, %1011, %cst_280 [1] : vector<8x8xf32> to vector<8xf32>
    %1013 = vector.shape_cast %1012 : vector<8xf32> to vector<8x1xf32>
    %1014 = vector.broadcast %1013 : vector<8x1xf32> to vector<8x8xf32>
    %1015 = arith.subf %1011, %1014 : vector<8x8xf32>
    %1016 = math.exp %1015 : vector<8x8xf32>
    %cst_281 = arith.constant dense<0.000000e+00> : vector<8xf32>
    %1017 = vector.multi_reduction <add>, %1016, %cst_281 [1] : vector<8x8xf32> to vector<8xf32>
    %1018 = vector.shape_cast %1017 : vector<8xf32> to vector<8x1xf32>
    %1019 = tpu.reciprocal %1018 {approx = true} : vector<8x1xf32> -> vector<8x1xf32>
    %1020 = vector.broadcast %1019 : vector<8x1xf32> to vector<8x8xf32>
    %1021 = arith.mulf %1016, %1020 : vector<8x8xf32>
    %1022 = vector.broadcast %21 : vector<1x128xf32> to vector<8x128xf32>
    %1023 = arith.mulf %952, %1022 : vector<8x128xf32>
    %1024 = arith.truncf %1023 : vector<8x128xf32> to vector<8x128xbf16>
    %1025 = arith.truncf %1021 : vector<8x8xf32> to vector<8x8xbf16>
    %cst_282 = arith.constant dense<0.000000e+00> : vector<8x128xf32>
    %1026 = tpu.matmul %1025, %1024, %cst_282 {dimension_numbers = #tpu.dot_dimension_numbers<[1], [0], [0], [1], [0, 0, 1, 1], [], []>} : vector<8x8xbf16>, vector<8x128xbf16>, vector<8x128xf32> -> vector<8x128xf32>
    %1027 = arith.addf %1003, %1026 : vector<8x128xf32>
    %1028 = vector.broadcast %28 : vector<1x128xf32> to vector<8x128xf32>
    %1029 = arith.mulf %940, %1028 : vector<8x128xf32>
    %1030 = arith.truncf %1029 : vector<8x128xf32> to vector<8x128xbf16>
    %cst_283 = arith.constant dense<0.000000e+00> : vector<8x8xf32>
    %1031 = tpu.matmul %1030, %954, %cst_283 {dimension_numbers = #tpu.dot_dimension_numbers<[1], [0], [0], [1], [0, 0, 1, 1], [], []>} : vector<8x128xbf16>, vector<128x8xbf16>, vector<8x8xf32> -> vector<8x8xf32>
    %1032 = vector.broadcast %44 : vector<1x8xf32> to vector<8x8xf32>
    %1033 = arith.mulf %1031, %1032 : vector<8x8xf32>
    %1034 = vector.broadcast %46 : vector<1x8xf32> to vector<8x8xf32>
    %1035 = arith.addf %1033, %1034 : vector<8x8xf32>
    %cst_284 = arith.constant dense<0xFF800000> : vector<8xf32>
    %1036 = vector.multi_reduction <maximumf>, %1035, %cst_284 [1] : vector<8x8xf32> to vector<8xf32>
    %1037 = vector.shape_cast %1036 : vector<8xf32> to vector<8x1xf32>
    %1038 = vector.broadcast %1037 : vector<8x1xf32> to vector<8x8xf32>
    %1039 = arith.subf %1035, %1038 : vector<8x8xf32>
    %1040 = math.exp %1039 : vector<8x8xf32>
    %cst_285 = arith.constant dense<0.000000e+00> : vector<8xf32>
    %1041 = vector.multi_reduction <add>, %1040, %cst_285 [1] : vector<8x8xf32> to vector<8xf32>
    %1042 = vector.shape_cast %1041 : vector<8xf32> to vector<8x1xf32>
    %1043 = tpu.reciprocal %1042 {approx = true} : vector<8x1xf32> -> vector<8x1xf32>
    %1044 = vector.broadcast %1043 : vector<8x1xf32> to vector<8x8xf32>
    %1045 = arith.mulf %1040, %1044 : vector<8x8xf32>
    %1046 = vector.broadcast %28 : vector<1x128xf32> to vector<8x128xf32>
    %1047 = arith.mulf %952, %1046 : vector<8x128xf32>
    %1048 = arith.truncf %1047 : vector<8x128xf32> to vector<8x128xbf16>
    %1049 = arith.truncf %1045 : vector<8x8xf32> to vector<8x8xbf16>
    %cst_286 = arith.constant dense<0.000000e+00> : vector<8x128xf32>
    %1050 = tpu.matmul %1049, %1048, %cst_286 {dimension_numbers = #tpu.dot_dimension_numbers<[1], [0], [0], [1], [0, 0, 1, 1], [], []>} : vector<8x8xbf16>, vector<8x128xbf16>, vector<8x128xf32> -> vector<8x128xf32>
    %1051 = arith.addf %1027, %1050 : vector<8x128xf32>
    %1052 = arith.truncf %1051 : vector<8x128xf32> to vector<8x128xbf16>
    %c15 = arith.constant 15 : index
    %c0_287 = arith.constant 0 : index
    %c0_288 = arith.constant 0 : index
    %1053 = vector.load %arg15[%c15, %c0_287, %c0_288] : memref<16x128x128xbf16, #tpu.memory_space<vmem>>, vector<1x128x128xbf16>
    %1054 = vector.shape_cast %1053 : vector<1x128x128xbf16> to vector<128x128xbf16>
    %cst_289 = arith.constant dense<0.000000e+00> : vector<8x128xf32>
    %1055 = tpu.matmul %1052, %1054, %cst_289 {dimension_numbers = #tpu.dot_dimension_numbers<[1], [0], [0], [1], [0, 0, 1, 1], [], []>} : vector<8x128xbf16>, vector<128x128xbf16>, vector<8x128xf32> -> vector<8x128xf32>
    %1056 = vector.extract_strided_slice %38 {offsets = [15, 0], sizes = [1, 128], strides = [1, 1]} : vector<16x128xf32> to vector<1x128xf32>
    %1057 = vector.broadcast %1056 : vector<1x128xf32> to vector<8x128xf32>
    %1058 = arith.addf %1055, %1057 : vector<8x128xf32>
    %1059 = vector.extract_strided_slice %41 {offsets = [4, 0], sizes = [1, 128], strides = [1, 1]} : vector<6x128xf32> to vector<1x128xf32>
    %1060 = vector.extract_strided_slice %42 {offsets = [4, 0], sizes = [1, 128], strides = [1, 1]} : vector<6x128xf32> to vector<1x128xf32>
    %1061 = arith.addf %932, %1058 : vector<8x128xf32>
    %1062 = vector.broadcast %32 : vector<1x128xf32> to vector<8x128xf32>
    %1063 = arith.mulf %1061, %1062 : vector<8x128xf32>
    %cst_290 = arith.constant dense<0.000000e+00> : vector<8xf32>
    %1064 = vector.multi_reduction <add>, %1063, %cst_290 [1] : vector<8x128xf32> to vector<8xf32>
    %1065 = vector.shape_cast %1064 : vector<8xf32> to vector<8x1xf32>
    %cst_291 = arith.constant 3.125000e-02 : f32
    %1066 = vector.broadcast %cst_291 : f32 to vector<8x1xf32>
    %1067 = arith.mulf %1065, %1066 : vector<8x1xf32>
    %1068 = vector.broadcast %1067 : vector<8x1xf32> to vector<8x128xf32>
    %1069 = arith.subf %1061, %1068 : vector<8x128xf32>
    %1070 = vector.broadcast %32 : vector<1x128xf32> to vector<8x128xf32>
    %1071 = arith.mulf %1069, %1070 : vector<8x128xf32>
    %1072 = arith.mulf %1071, %1071 : vector<8x128xf32>
    %cst_292 = arith.constant dense<0.000000e+00> : vector<8xf32>
    %1073 = vector.multi_reduction <add>, %1072, %cst_292 [1] : vector<8x128xf32> to vector<8xf32>
    %1074 = vector.shape_cast %1073 : vector<8xf32> to vector<8x1xf32>
    %cst_293 = arith.constant 3.125000e-02 : f32
    %1075 = vector.broadcast %cst_293 : f32 to vector<8x1xf32>
    %1076 = arith.mulf %1074, %1075 : vector<8x1xf32>
    %cst_294 = arith.constant 9.99999974E-6 : f32
    %1077 = vector.broadcast %cst_294 : f32 to vector<8x1xf32>
    %1078 = arith.addf %1076, %1077 : vector<8x1xf32>
    %1079 = math.rsqrt %1078 : vector<8x1xf32>
    %1080 = vector.broadcast %1079 : vector<8x1xf32> to vector<8x128xf32>
    %1081 = arith.mulf %1071, %1080 : vector<8x128xf32>
    %1082 = vector.broadcast %1059 : vector<1x128xf32> to vector<8x128xf32>
    %1083 = arith.mulf %1081, %1082 : vector<8x128xf32>
    %1084 = vector.broadcast %1060 : vector<1x128xf32> to vector<8x128xf32>
    %1085 = arith.addf %1083, %1084 : vector<8x128xf32>
    %c1_295 = arith.constant 1 : index
    %c0_296 = arith.constant 0 : index
    %c0_297 = arith.constant 0 : index
    %1086 = vector.load %arg17[%c1_295, %c0_296, %c0_297] : memref<2x128x128xbf16, #tpu.memory_space<vmem>>, vector<1x128x128xbf16>
    %1087 = vector.shape_cast %1086 : vector<1x128x128xbf16> to vector<128x128xbf16>
    %1088 = vector.extract_strided_slice %39 {offsets = [1, 0], sizes = [1, 128], strides = [1, 1]} : vector<2x128xf32> to vector<1x128xf32>
    %c1_298 = arith.constant 1 : index
    %c0_299 = arith.constant 0 : index
    %c0_300 = arith.constant 0 : index
    %1089 = vector.load %arg19[%c1_298, %c0_299, %c0_300] : memref<2x128x128xbf16, #tpu.memory_space<vmem>>, vector<1x128x128xbf16>
    %1090 = vector.shape_cast %1089 : vector<1x128x128xbf16> to vector<128x128xbf16>
    %1091 = vector.extract_strided_slice %40 {offsets = [1, 0], sizes = [1, 128], strides = [1, 1]} : vector<2x128xf32> to vector<1x128xf32>
    %1092 = arith.truncf %1085 : vector<8x128xf32> to vector<8x128xbf16>
    %cst_301 = arith.constant dense<0.000000e+00> : vector<8x128xf32>
    %1093 = tpu.matmul %1092, %1087, %cst_301 {dimension_numbers = #tpu.dot_dimension_numbers<[1], [0], [0], [1], [0, 0, 1, 1], [], []>} : vector<8x128xbf16>, vector<128x128xbf16>, vector<8x128xf32> -> vector<8x128xf32>
    %1094 = vector.broadcast %1088 : vector<1x128xf32> to vector<8x128xf32>
    %1095 = arith.addf %1093, %1094 : vector<8x128xf32>
    %cst_302 = arith.constant 0.000000e+00 : f32
    %1096 = vector.broadcast %cst_302 : f32 to vector<8x128xf32>
    %1097 = arith.maximumf %1095, %1096 : vector<8x128xf32>
    %1098 = arith.truncf %1097 : vector<8x128xf32> to vector<8x128xbf16>
    %cst_303 = arith.constant dense<0.000000e+00> : vector<8x128xf32>
    %1099 = tpu.matmul %1098, %1090, %cst_303 {dimension_numbers = #tpu.dot_dimension_numbers<[1], [0], [0], [1], [0, 0, 1, 1], [], []>} : vector<8x128xbf16>, vector<128x128xbf16>, vector<8x128xf32> -> vector<8x128xf32>
    %1100 = vector.broadcast %1091 : vector<1x128xf32> to vector<8x128xf32>
    %1101 = arith.addf %1099, %1100 : vector<8x128xf32>
    %1102 = vector.extract_strided_slice %41 {offsets = [5, 0], sizes = [1, 128], strides = [1, 1]} : vector<6x128xf32> to vector<1x128xf32>
    %1103 = vector.extract_strided_slice %42 {offsets = [5, 0], sizes = [1, 128], strides = [1, 1]} : vector<6x128xf32> to vector<1x128xf32>
    %1104 = arith.addf %1085, %1101 : vector<8x128xf32>
    %1105 = vector.broadcast %32 : vector<1x128xf32> to vector<8x128xf32>
    %1106 = arith.mulf %1104, %1105 : vector<8x128xf32>
    %cst_304 = arith.constant dense<0.000000e+00> : vector<8xf32>
    %1107 = vector.multi_reduction <add>, %1106, %cst_304 [1] : vector<8x128xf32> to vector<8xf32>
    %1108 = vector.shape_cast %1107 : vector<8xf32> to vector<8x1xf32>
    %cst_305 = arith.constant 3.125000e-02 : f32
    %1109 = vector.broadcast %cst_305 : f32 to vector<8x1xf32>
    %1110 = arith.mulf %1108, %1109 : vector<8x1xf32>
    %1111 = vector.broadcast %1110 : vector<8x1xf32> to vector<8x128xf32>
    %1112 = arith.subf %1104, %1111 : vector<8x128xf32>
    %1113 = vector.broadcast %32 : vector<1x128xf32> to vector<8x128xf32>
    %1114 = arith.mulf %1112, %1113 : vector<8x128xf32>
    %1115 = arith.mulf %1114, %1114 : vector<8x128xf32>
    %cst_306 = arith.constant dense<0.000000e+00> : vector<8xf32>
    %1116 = vector.multi_reduction <add>, %1115, %cst_306 [1] : vector<8x128xf32> to vector<8xf32>
    %1117 = vector.shape_cast %1116 : vector<8xf32> to vector<8x1xf32>
    %cst_307 = arith.constant 3.125000e-02 : f32
    %1118 = vector.broadcast %cst_307 : f32 to vector<8x1xf32>
    %1119 = arith.mulf %1117, %1118 : vector<8x1xf32>
    %cst_308 = arith.constant 9.99999974E-6 : f32
    %1120 = vector.broadcast %cst_308 : f32 to vector<8x1xf32>
    %1121 = arith.addf %1119, %1120 : vector<8x1xf32>
    %1122 = math.rsqrt %1121 : vector<8x1xf32>
    %1123 = vector.broadcast %1122 : vector<8x1xf32> to vector<8x128xf32>
    %1124 = arith.mulf %1114, %1123 : vector<8x128xf32>
    %1125 = vector.broadcast %1102 : vector<1x128xf32> to vector<8x128xf32>
    %1126 = arith.mulf %1124, %1125 : vector<8x128xf32>
    %1127 = vector.broadcast %1103 : vector<1x128xf32> to vector<8x128xf32>
    %1128 = arith.addf %1126, %1127 : vector<8x128xf32>
    %1129 = arith.truncf %1128 : vector<8x128xf32> to vector<8x128xbf16>
    %c0_309 = arith.constant 0 : index
    %c0_310 = arith.constant 0 : index
    %1130 = vector.load %arg23[%c0_309, %c0_310] : memref<128x128xbf16, #tpu.memory_space<vmem>>, vector<128x128xbf16>
    %cst_311 = arith.constant dense<0.000000e+00> : vector<8x128xf32>
    %1131 = tpu.matmul %1129, %1130, %cst_311 {dimension_numbers = #tpu.dot_dimension_numbers<[1], [0], [0], [1], [0, 0, 1, 1], [], []>} : vector<8x128xbf16>, vector<128x128xbf16>, vector<8x128xf32> -> vector<8x128xf32>
    %c0_312 = arith.constant 0 : index
    %c0_313 = arith.constant 0 : index
    %1132 = vector.load %arg24[%c0_312, %c0_313] : memref<1x128xf32, #tpu.memory_space<vmem>>, vector<1x128xf32>
    %1133 = vector.broadcast %1132 : vector<1x128xf32> to vector<8x128xf32>
    %1134 = arith.addf %1131, %1133 : vector<8x128xf32>
    %c0_314 = arith.constant 0 : index
    %c0_315 = arith.constant 0 : index
    %c0_316 = arith.constant 0 : index
    %1135 = vector.load %arg25[%c0_314, %c0_315, %c0_316] : memref<1x8x128xf32, #tpu.memory_space<vmem>>, vector<1x8x128xf32>
    %1136 = vector.shape_cast %1135 : vector<1x8x128xf32> to vector<8x128xf32>
    %1137 = vector.shape_cast %1134 : vector<8x128xf32> to vector<1x8x128xf32>
    tpu.vector_store %arg25[%c0_314, %c0_315, %c0_316], %1137 {strides = array<i32>} : memref<1x8x128xf32, #tpu.memory_space<vmem>>, vector<1x8x128xf32>,
    return
  }
  func.func @transform_0(%arg0: i32) -> (i32, i32, i32) {
    %c0_i32 = arith.constant 0 : i32
    %c0_i32_0 = arith.constant 0 : i32
    %c0_i32_1 = arith.constant 0 : i32
    return %arg0, %c0_i32, %c0_i32_0 : i32, i32, i32
  }
  func.func @transform_1(%arg0: i32) -> (i32, i32, i32) {
    %c0_i32 = arith.constant 0 : i32
    %c0_i32_0 = arith.constant 0 : i32
    %c0_i32_1 = arith.constant 0 : i32
    return %arg0, %c0_i32, %c0_i32_0 : i32, i32, i32
  }
  func.func @transform_2(%arg0: i32) -> (i32, i32, i32) {
    %c0_i32 = arith.constant 0 : i32
    %c0_i32_0 = arith.constant 0 : i32
    %c0_i32_1 = arith.constant 0 : i32
    return %arg0, %c0_i32, %c0_i32_0 : i32, i32, i32
  }
  func.func @transform_3(%arg0: i32) -> (i32, i32, i32) {
    %c0_i32 = arith.constant 0 : i32
    %c0_i32_0 = arith.constant 0 : i32
    %c0_i32_1 = arith.constant 0 : i32
    return %arg0, %c0_i32, %c0_i32_0 : i32, i32, i32
  }
  func.func @transform_4(%arg0: i32) -> (i32, i32, i32) {
    %c0_i32 = arith.constant 0 : i32
    %c0_i32_0 = arith.constant 0 : i32
    %c0_i32_1 = arith.constant 0 : i32
    return %arg0, %c0_i32, %c0_i32_0 : i32, i32, i32
  }
  func.func @transform_5(%arg0: i32) -> (i32, i32, i32) {
    %c0_i32 = arith.constant 0 : i32
    %c0_i32_0 = arith.constant 0 : i32
    %c0_i32_1 = arith.constant 0 : i32
    return %arg0, %c0_i32, %c0_i32_0 : i32, i32, i32
  }
  func.func @transform_6(%arg0: i32) -> (i32, i32, i32) {
    %c0_i32 = arith.constant 0 : i32
    %c0_i32_0 = arith.constant 0 : i32
    %c0_i32_1 = arith.constant 0 : i32
    %c0_i32_2 = arith.constant 0 : i32
    return %c0_i32, %c0_i32_0, %c0_i32_1 : i32, i32, i32
  }
  func.func @transform_7(%arg0: i32) -> (i32, i32) {
    %c0_i32 = arith.constant 0 : i32
    %c0_i32_0 = arith.constant 0 : i32
    %c0_i32_1 = arith.constant 0 : i32
    return %c0_i32, %c0_i32_0 : i32, i32
  }
  func.func @transform_8(%arg0: i32) -> (i32, i32, i32) {
    %c0_i32 = arith.constant 0 : i32
    %c0_i32_0 = arith.constant 0 : i32
    %c0_i32_1 = arith.constant 0 : i32
    %c0_i32_2 = arith.constant 0 : i32
    return %c0_i32, %c0_i32_0, %c0_i32_1 : i32, i32, i32
  }
  func.func @transform_9(%arg0: i32) -> (i32, i32) {
    %c0_i32 = arith.constant 0 : i32
    %c0_i32_0 = arith.constant 0 : i32
    %c0_i32_1 = arith.constant 0 : i32
    return %c0_i32, %c0_i32_0 : i32, i32
  }
  func.func @transform_10(%arg0: i32) -> (i32, i32, i32) {
    %c0_i32 = arith.constant 0 : i32
    %c0_i32_0 = arith.constant 0 : i32
    %c0_i32_1 = arith.constant 0 : i32
    %c0_i32_2 = arith.constant 0 : i32
    return %c0_i32, %c0_i32_0, %c0_i32_1 : i32, i32, i32
  }
  func.func @transform_11(%arg0: i32) -> (i32, i32) {
    %c0_i32 = arith.constant 0 : i32
    %c0_i32_0 = arith.constant 0 : i32
    %c0_i32_1 = arith.constant 0 : i32
    return %c0_i32, %c0_i32_0 : i32, i32
  }
  func.func @transform_12(%arg0: i32) -> (i32, i32) {
    %c0_i32 = arith.constant 0 : i32
    %c0_i32_0 = arith.constant 0 : i32
    %c0_i32_1 = arith.constant 0 : i32
    return %c0_i32, %c0_i32_0 : i32, i32
  }
  func.func @transform_13(%arg0: i32) -> (i32, i32) {
    %c0_i32 = arith.constant 0 : i32
    %c0_i32_0 = arith.constant 0 : i32
    %c0_i32_1 = arith.constant 0 : i32
    return %c0_i32, %c0_i32_0 : i32, i32
  }
  func.func @transform_14(%arg0: i32) -> (i32, i32, i32) {
    %c0_i32 = arith.constant 0 : i32
    %c0_i32_0 = arith.constant 0 : i32
    %c0_i32_1 = arith.constant 0 : i32
    %c0_i32_2 = arith.constant 0 : i32
    return %c0_i32, %c0_i32_0, %c0_i32_1 : i32, i32, i32
  }
  func.func @transform_15(%arg0: i32) -> (i32, i32) {
    %c0_i32 = arith.constant 0 : i32
    %c0_i32_0 = arith.constant 0 : i32
    %c0_i32_1 = arith.constant 0 : i32
    return %c0_i32, %c0_i32_0 : i32, i32
  }
  func.func @transform_16(%arg0: i32) -> (i32, i32, i32) {
    %c0_i32 = arith.constant 0 : i32
    %c0_i32_0 = arith.constant 0 : i32
    %c0_i32_1 = arith.constant 0 : i32
    %c0_i32_2 = arith.constant 0 : i32
    return %c0_i32, %c0_i32_0, %c0_i32_1 : i32, i32, i32
  }
  func.func @transform_17(%arg0: i32) -> (i32, i32) {
    %c0_i32 = arith.constant 0 : i32
    %c0_i32_0 = arith.constant 0 : i32
    %c0_i32_1 = arith.constant 0 : i32
    return %c0_i32, %c0_i32_0 : i32, i32
  }
  func.func @transform_18(%arg0: i32) -> (i32, i32, i32) {
    %c0_i32 = arith.constant 0 : i32
    %c0_i32_0 = arith.constant 0 : i32
    %c0_i32_1 = arith.constant 0 : i32
    %c0_i32_2 = arith.constant 0 : i32
    return %c0_i32, %c0_i32_0, %c0_i32_1 : i32, i32, i32
  }
  func.func @transform_19(%arg0: i32) -> (i32, i32) {
    %c0_i32 = arith.constant 0 : i32
    %c0_i32_0 = arith.constant 0 : i32
    %c0_i32_1 = arith.constant 0 : i32
    return %c0_i32, %c0_i32_0 : i32, i32
  }
  func.func @transform_20(%arg0: i32) -> (i32, i32) {
    %c0_i32 = arith.constant 0 : i32
    %c0_i32_0 = arith.constant 0 : i32
    %c0_i32_1 = arith.constant 0 : i32
    return %c0_i32, %c0_i32_0 : i32, i32
  }
  func.func @transform_21(%arg0: i32) -> (i32, i32) {
    %c0_i32 = arith.constant 0 : i32
    %c0_i32_0 = arith.constant 0 : i32
    %c0_i32_1 = arith.constant 0 : i32
    return %c0_i32, %c0_i32_0 : i32, i32
  }
  func.func @transform_22(%arg0: i32) -> (i32, i32) {
    %c0_i32 = arith.constant 0 : i32
    %c0_i32_0 = arith.constant 0 : i32
    %c0_i32_1 = arith.constant 0 : i32
    return %c0_i32, %c0_i32_0 : i32, i32
  }
  func.func @transform_23(%arg0: i32) -> (i32, i32) {
    %c0_i32 = arith.constant 0 : i32
    %c0_i32_0 = arith.constant 0 : i32
    %c0_i32_1 = arith.constant 0 : i32
    return %c0_i32, %c0_i32_0 : i32, i32
  }
  func.func @transform_24(%arg0: i32) -> (i32, i32, i32) {
    %c0_i32 = arith.constant 0 : i32
    %c0_i32_0 = arith.constant 0 : i32
    %c0_i32_1 = arith.constant 0 : i32
    return %arg0, %c0_i32, %c0_i32_0 : i32, i32, i32
  }
}

</mosaic_0001>

<bundles_post_ra>
// kernel: transformer_forward.1
= control target key start
LH: loop header
LB: loop body
LE: loop exit
PB: predicated region body
PF: predicated region fallthrough
CT: control target
= control target key end

     0   :  { %s12959_s0 = inlined_call_operand.vmem [shape: f32[2,8,128], index: 0, kind: input, shape index: {}]   ;;  %s12960_s1 = inlined_call_operand.vmem [shape: f32[2,8,128], index: 1, kind: input, shape index: {}]   ;;  %s12961_s2 = inlined_call_operand.vmem [shape: f32[2,1,8], index: 2, kind: input, shape index: {}]   ;;  %s12962_s3 = inlined_call_operand.vmem [shape: f32[2,1,8], index: 3, kind: input, shape index: {}]   ;;  %s12963_s4 = inlined_call_operand.vmem [shape: f32[2,8,8], index: 4, kind: input, shape index: {}]   ;;  %s12964_s5 = inlined_call_operand.vmem [shape: f32[2,8,8], index: 5, kind: input, shape index: {}]   ;;  %s12965_s6 = inlined_call_operand.hbm [shape: bf16[8,128,128], index: 6, kind: input, shape index: {}]   ;;  %s12966_s7 = inlined_call_operand.vmem [shape: f32[8,128], index: 7, kind: input, shape index: {}]   ;;  %s12967_s8 = inlined_call_operand.vmem [shape: bf16[2,128,128], index: 8, kind: input, shape index: {}]   ;;  %s12968_s9 = inlined_call_operand.vmem [shape: f32[2,128], index: 9, kind: input, shape index: {}]   ;;  %s12969_s10 = inlined_call_operand.vmem [shape: bf16[2,128,128], index: 10, kind: input, shape index: {}]   ;;  %s12970_s11 = inlined_call_operand.hbm [shape: f32[2,128], index: 11, kind: input, shape index: {}]   ;;  %s12971_s12 = inlined_call_operand.vmem [shape: f32[4,128], index: 12, kind: input, shape index: {}]   ;;  %s12972_s13 = inlined_call_operand.vmem [shape: f32[4,128], index: 13, kind: input, shape index: {}]   ;;  %s12973_s14 = inlined_call_operand.hbm [shape: bf16[16,128,128], index: 14, kind: input, shape index: {}]   ;;  %s12974_s15 = inlined_call_operand.hbm [shape: f32[16,128], index: 15, kind: input, shape index: {}]   ;;  %s12975_s16 = inlined_call_operand.vmem [shape: bf16[2,128,128], index: 16, kind: input, shape index: {}]   ;;  %s12976_s17 = inlined_call_operand.hbm [shape: f32[2,128], index: 17, kind: input, shape index: {}]   ;;  %s12977_s18 = inlined_call_operand.hbm [shape: bf16[2,128,128], index: 18, kind: input, shape index: {}]   ;;  %s12978_s19 = inlined_call_operand.hbm [shape: f32[2,128], index: 19, kind: input, shape index: {}]   ;;  %s12979_s20 = inlined_call_operand.hbm [shape: f32[6,128], index: 20, kind: input, shape index: {}]   ;;  %s12980_s21 = inlined_call_operand.hbm [shape: f32[6,128], index: 21, kind: input, shape index: {}]   ;;  %s12981_s22 = inlined_call_operand.vmem [shape: bf16[128,128], index: 22, kind: input, shape index: {}]   ;;  %s12982_s23 = inlined_call_operand.vmem [shape: f32[1,128], index: 23, kind: input, shape index: {}]   ;;  %s12983_s24 = inlined_call_operand.hbm [shape: f32[2,8,128], index: 24, kind: output, shape index: {}]  }
   0x1   :  { %12996 = sst [smem:[#allocation30_spill]] %s12959_s0 }
   0x2   :  { %12997 = sst [smem:[#allocation31_spill]] %s12960_s1 }
   0x3   :  { %12998 = sst [smem:[#allocation32_spill]] %s12961_s2 }
   0x4   :  { %12999 = sst [smem:[#allocation33_spill]] %s12962_s3 }
   0x5   :  { %13000 = sst [smem:[#allocation34_spill]] %s12963_s4 }
   0x6   :  { %13001 = sst [smem:[#allocation35_spill]] %s12964_s5 }
   0x7   :  { %13002 = sst [smem:[#allocation36_spill]] %s12965_s6 }
   0x8   :  { %13003 = sst [smem:[#allocation37_spill]] %s12966_s7 }
   0x9   :  { %13004 = sst [smem:[#allocation38_spill]] %s12967_s8 }
   0xa   :  { %13005 = sst [smem:[#allocation39_spill]] %s12970_s11 }
   0xb   :  { %13006 = sst [smem:[#allocation40_spill]] %s12983_s24 }
   0xc   :  { %29 = vsyncpa [#allocation3], 0 }
   0xd   :  { %30 = vsyncpa [#allocation6], 0 }
   0xe   :  { %31 = vsyncpa [#allocation9], 0 }
   0xf   :  { %32 = vsyncpa [#allocation12], 0 }
  0x10   :  { %33 = vsyncpa [#allocation15], 0 }
  0x11   :  { %34 = vsyncpa [#allocation4], 0 }
  0x12   :  { %36 = vsyncpa [#allocation4 + $0x1], 0  ;;  %s11024_s5 = smov 0   ;;  %s11026_s26 = smov 0  }
  0x13   :  { %s11028_s27 = smov 0   ;;  %s11030_s28 = smov 0  }
  0x14 LB: > { %13007 = sst [smem:[#allocation24_spill]] %s10869_s5  ;;  %s11045_s6 = sadd.s32 4294967295, %s10881_s28   ;;  %s10881_s28 = sphi %s11030_s28, %s13046_s28   ;;  %s10877_s27 = sphi %s11028_s27, %s13048_s27   ;;  %s10873_s26 = sphi %s11026_s26, %s13050_s26   ;;  %s10869_s5 = sphi %s11024_s5, %s13049_s5  }
  0x15   : > { %13008 = sst [smem:[#allocation25_spill]] %s10877_s27  ;;  %s7812_s2 = sadd.s32 4294967294, %s10881_s28  }
  0x16   : > { %13009 = sst [smem:[#allocation26_spill]] %s10881_s28  ;;  %s11049_s29 = sadd.s32 1, %s10881_s28  }
  0x17   : > { %13010 = sst [smem:[#allocation27_spill]] %s11049_s29  ;;  %s583_s0 = sadd.s32 1, %s10877_s27 }
  0x18   : > { %s580_s7 = ssub.s32 %s10881_s28, %s11049_s29  ;;  %p593_p0 = scmp.ne.s32.totalorder %s10877_s27, %s10873_s26 }
  0x19   : > { %p581_p1 = scmp.eq.s32.totalorder %s580_s7, 0  ;;  %p594_p2 = scmp.eq.s32.totalorder %s11045_s6, 1 }
  0x1a   : > { %p599_p3 = scmp.ne.s32.totalorder %s10873_s26, %s10869_s5  ;;  %p600_p4 = scmp.eq.s32.totalorder %s7812_s2, 1 }
  0x1b   : > { %s11060_s30 = scalar_select %p581_p1, %s10877_s27, %s583_s0  }
  0x1c   : > { %p11062_p5 = por %p594_p2, %p593_p0  ;;  %p11066_p6 = por %p600_p4, %p599_p3 }
  0x1d   : > { %13011 = sst [smem:[#allocation28_spill]] %s11060_s30  ;;  %p7813_p7 = scmp.ge.s32.totalorder %s10881_s28, 1 }
  0x1e   : > { %s13012_s3 = scalar_select %p11062_p5, 1, 0 }
  0x1f   : > { %s13013_s25 = scalar_select %p11066_p6, 1, 0 }
  0x20   : > { %p607_p8 = scmp.lt.s32.totalorder %s10881_s28, 3  ;;  %p12989_p9 = scmp.eq.s32.totalorder %s11045_s6, 0 }
  0x21   : > { %13014 = sst [smem:[#allocation29_spill]] %s13013_s25  ;;  %s10883_s4 = smov [#allocation5]  }
  0x22   : > { %p11073_p10 = pnand %p7813_p7, %p607_p8  ;;  %s645_s1 = sshll.u32 %s10883_s4, 4  ;;  %s646_s1 = int_to_ptr.vmem [resolvable:$true] %s645_s1 }
  0x23   : > { %s10884_s2 = smov [#allocation8]   ;;  %s10578_s27 = scalar_lea.vmem %s646_s1, 32 }
  0x24   : > { %s13015_s8 = scalar_select %p11073_p10, 1, 0 }
  0x25   : > { %p10070_p11 = pneg %p11073_p10  ;;  %s674_s0 = sshll.u32 %s10884_s2, 4  ;;  %s675_s0 = int_to_ptr.vmem [resolvable:$true] %s674_s0 }
  0x26   : > { %p10579_p0 = scmp.ne.s32.totalorder %s646_s1, %s10578_s27  ;;  %p10586_p3 = scmp.lt.s32.totalorder %s646_s1, %s646_s1 }
  0x27   : > { %p11081_p12 = pnand %p12989_p9, %p10070_p11  ;;  %p10587_p4 = scmp.lt.s32.totalorder %s10578_s27, %s10578_s27 }
  0x29   : > { %p11087_p13 = pneg %p11081_p12  ;;  %p10588_p7 = por %p10587_p4, %p10586_p3 }
  0x2b   : > { %p10581_p1 = pnand %p10579_p0, %p11087_p13 }
  0x2d   : > { %p10582_p2 = pneg %p10581_p1 }
  0x2f   : > { %p10589_p8 = pnand %p10588_p7, %p10582_p2 }
  0x31   : > { %10592 = shalt.err (!%p10589_p8)
}
  0x32   : > { %s13018_s11 = sld [smem:[#allocation39_spill]]  ;;  %s10604_s29 = scalar_lea.vmem %s675_s0, 256 }
  0x33   : > { %p10605_p11 = scmp.ne.s32.totalorder %s675_s0, %s10604_s29  ;;  %p10612_p5 = scmp.lt.s32.totalorder %s675_s0, %s675_s0 }
  0x34   : > { %p10613_p0 = scmp.lt.s32.totalorder %s10604_s29, %s10604_s29 }
  0x35   : > { %p10607_p9 = pnand %p10605_p11, %p11087_p13 }
  0x36   : > { %p10614_p1 = por %p10613_p0, %p10612_p5 }
  0x37   : > { %p10608_p6 = pneg %p10607_p9 }
  0x38   : > { %10076 = dma.hbm_to_vmem [thread:$0]  (!%p11081_p12), %s13018_s11, 32, %s646_s1, [#allocation6]  }
  0x39   : > { %p10615_p10 = pnand %p10614_p1, %p10608_p6 }
  0x3b   : > { %10618 = shalt.err (!%p10615_p10)
}
  0x3c   : > { %s10885_s27 = smov 128   ;;  %s10886_s25 = smov 8  }
  0x3d   : > { %10082 = dma.hbm_to_vmem [thread:$0]  (!%p11081_p12), %s12974_s15, 256, %s675_s0, [#allocation9], %s10885_s27, %s10885_s27, %s10886_s25  }
  0x3e   : > { %s10887_s1 = smov [#allocation11]   ;;  %s10888_s2 = smov [#allocation14]  }
  0x3f   : > { %s701_s4 = sshll.u32 %s10887_s1, 4  ;;  %s726_s11 = sshll.u32 %s10888_s2, 4  ;;  %s702_s4 = int_to_ptr.vmem [resolvable:$true] %s701_s4  ;;  %s727_s11 = int_to_ptr.vmem [resolvable:$true] %s726_s11 }
  0x40   : > { %s10630_s24 = scalar_lea.vmem %s702_s4, 2048  ;;  %p10638_p10 = scmp.lt.s32.totalorder %s702_s4, %s702_s4 }
  0x41   : > { %p10631_p9 = scmp.ne.s32.totalorder %s702_s4, %s10630_s24  ;;  %p10639_p2 = scmp.lt.s32.totalorder %s10630_s24, %s10630_s24 }
  0x43   : > { %p10633_p5 = pnand %p10631_p9, %p11087_p13  ;;  %p10640_p3 = por %p10639_p2, %p10638_p10 }
  0x45   : > { %p10634_p6 = pneg %p10633_p5 }
  0x47   : > { %p10641_p4 = pnand %p10640_p3, %p10634_p6 }
  0x49   : > { %10644 = shalt.err (!%p10641_p4)
}
  0x4a   : > { %s10889_s29 = smov 64   ;;  %s10890_s5 = smov 4  }
  0x4b   : > { %10088 = dma.hbm_to_vmem [thread:$0]  (!%p11081_p12), %s12977_s18, 2048, %s702_s4, [#allocation12], %s10889_s29, %s10889_s29, %s10890_s5  }
  0x4c   : > { %s10656_s0 = scalar_lea.vmem %s727_s11, 128  ;;  %p10664_p0 = scmp.lt.s32.totalorder %s727_s11, %s727_s11 }
  0x4d   : > { %p10657_p7 = scmp.ne.s32.totalorder %s727_s11, %s10656_s0  ;;  %p10665_p1 = scmp.lt.s32.totalorder %s10656_s0, %s10656_s0 }
  0x4f   : > { %p10659_p8 = pnand %p10657_p7, %p11087_p13  ;;  %p10666_p9 = por %p10665_p1, %p10664_p0 }
  0x51   : > { %p10660_p11 = pneg %p10659_p8 }
  0x53   : > { %p10667_p5 = pnand %p10666_p9, %p10660_p11 }
  0x55   : > { %10670 = shalt.err (!%p10667_p5)
}
  0x56   : > { %10094 = dma.hbm_to_vmem [thread:$0]  (!%p11081_p12), %s12979_s20, 128, %s727_s11, [#allocation15]  }
  0x57   : > { %s10891_s1 = smov [#allocation2]   ;;  %s10892_s4 = smov [#allocation7]  }
  0x58   : > { %s619_s2 = sshll.u32 %s10891_s1, 4  ;;  %s661_s28 = sshll.u32 %s10892_s4, 4  ;;  %s620_s2 = int_to_ptr.vmem [resolvable:$true] %s619_s2  ;;  %s662_s28 = int_to_ptr.vmem [resolvable:$true] %s661_s28 }
  0x59   : > { %s10682_s25 = scalar_lea.vmem %s620_s2, 8192  ;;  %p10690_p3 = scmp.lt.s32.totalorder %s620_s2, %s620_s2 }
  0x5a   : > { %p10683_p6 = scmp.ne.s32.totalorder %s620_s2, %s10682_s25  ;;  %p10691_p4 = scmp.lt.s32.totalorder %s10682_s25, %s10682_s25 }
  0x5c   : > { %p10685_p10 = pnand %p10683_p6, %p11087_p13  ;;  %p10692_p7 = por %p10691_p4, %p10690_p3 }
  0x5e   : > { %p10686_p2 = pneg %p10685_p10 }
  0x60   : > { %p10693_p8 = pnand %p10692_p7, %p10686_p2 }
  0x62   : > { %10696 = shalt.err (!%p10693_p8)
}
  0x63   : > { %s13019_s24 = sld [smem:[#allocation36_spill]]  ;;  %s10708_s27 = scalar_lea.vmem %s662_s28, 16384 }
  0x64   : > { %p10709_p11 = scmp.ne.s32.totalorder %s662_s28, %s10708_s27  ;;  %p10716_p9 = scmp.lt.s32.totalorder %s662_s28, %s662_s28 }
  0x65   : > { %p10717_p5 = scmp.lt.s32.totalorder %s10708_s27, %s10708_s27 }
  0x66   : > { %p10711_p0 = pnand %p10709_p11, %p11087_p13 }
  0x67   : > { %p10718_p6 = por %p10717_p5, %p10716_p9 }
  0x68   : > { %p10712_p1 = pneg %p10711_p0 }
  0x69   : > { %10073 = dma.hbm_to_vmem [thread:$0]  (!%p11081_p12), %s13019_s24, 8192, %s620_s2, [#allocation3], %s10889_s29, %s10889_s29, %s10890_s5  }
  0x6a   : > { %p10719_p10 = pnand %p10718_p6, %p10712_p1 }
  0x6c   : > { %10722 = shalt.err (!%p10719_p10)
}
  0x6d   : > { %10079 = dma.hbm_to_vmem [thread:$0]  (!%p11081_p12), %s12973_s14, 16384, %s662_s28, [#allocation6], %s10889_s29, %s10889_s29, %s10890_s5  }
  0x6e   : > { %s10893_s2 = smov [#allocation10]   ;;  %s10894_s11 = smov [#allocation13]  }
  0x6f   : > { %s691_s25 = sshll.u32 %s10893_s2, 4  ;;  %s715_s0 = sshll.u32 %s10894_s11, 4  ;;  %s692_s25 = int_to_ptr.vmem [resolvable:$true] %s691_s25  ;;  %s716_s0 = int_to_ptr.vmem [resolvable:$true] %s715_s0 }
  0x70   : > { %s10734_s24 = scalar_lea.vmem %s692_s25, 32  ;;  %p10742_p7 = scmp.lt.s32.totalorder %s692_s25, %s692_s25 }
  0x71   : > { %p10735_p2 = scmp.ne.s32.totalorder %s692_s25, %s10734_s24  ;;  %p10743_p8 = scmp.lt.s32.totalorder %s10734_s24, %s10734_s24 }
  0x73   : > { %p10737_p3 = pnand %p10735_p2, %p11087_p13  ;;  %p10744_p11 = por %p10743_p8, %p10742_p7 }
  0x75   : > { %p10738_p4 = pneg %p10737_p3 }
  0x77   : > { %p10745_p0 = pnand %p10744_p11, %p10738_p4 }
  0x79   : > { %10748 = shalt.err (!%p10745_p0)
}
  0x7a   : > { %10085 = dma.hbm_to_vmem [thread:$0]  (!%p11081_p12), %s12976_s17, 32, %s692_s25, [#allocation9]  }
  0x7b   : > { %s10760_s5 = scalar_lea.vmem %s716_s0, 32  ;;  %p10768_p6 = scmp.lt.s32.totalorder %s716_s0, %s716_s0 }
  0x7c   : > { %p10761_p1 = scmp.ne.s32.totalorder %s716_s0, %s10760_s5  ;;  %p10769_p10 = scmp.lt.s32.totalorder %s10760_s5, %s10760_s5 }
  0x7e   : > { %p10763_p9 = pnand %p10761_p1, %p11087_p13  ;;  %p10770_p2 = por %p10769_p10, %p10768_p6 }
  0x80   : > { %p10764_p5 = pneg %p10763_p9 }
  0x82   : > { %p10771_p3 = pnand %p10770_p2, %p10764_p5 }
  0x84   : > { %10774 = shalt.err (!%p10771_p3)
}
  0x85   : > { %10091 = dma.hbm_to_vmem [thread:$0]  (!%p11081_p12), %s12978_s19, 32, %s716_s0, [#allocation12]  }
  0x86   : > { %s10895_s4 = smov [#allocation16]  }
  0x87   : > { %s737_s2 = sshll.u32 %s10895_s4, 4  ;;  %s738_s2 = int_to_ptr.vmem [resolvable:$true] %s737_s2 }
  0x88   : > { %s10786_s25 = scalar_lea.vmem %s738_s2, 128  ;;  %p10794_p11 = scmp.lt.s32.totalorder %s738_s2, %s738_s2 }
  0x89   : > { %p10787_p4 = scmp.ne.s32.totalorder %s738_s2, %s10786_s25  ;;  %p10795_p0 = scmp.lt.s32.totalorder %s10786_s25, %s10786_s25 }
  0x8b   : > { %p10789_p7 = pnand %p10787_p4, %p11087_p13  ;;  %p10796_p1 = por %p10795_p0, %p10794_p11 }
  0x8d   : > { %p10790_p8 = pneg %p10789_p7 }
  0x8f   : > { %p10797_p9 = pnand %p10796_p1, %p10790_p8 }
  0x91   : > { %10800 = shalt.err (!%p10797_p9)
}
  0x92   : > { %10097 = dma.hbm_to_vmem [thread:$0]  (!%p11081_p12), %s12980_s21, 128, %s738_s2, [#allocation15]  }
  0x93   : > { %p13020_p5 = scmp.ne.s32.totalorder %s13015_s8, 0 }
  0x94   : > { %p13021_p6 = scmp.eq.s32.totalorder (!%p13020_p5), %s11045_s6, 0 }
  0x95   : > { %796 = sbr.rel (%p13020_p5) target bundleno = 18131 (0x46d3), region = 116 }
  0x9a   : > { %10844 = dma.done.wait (%p13021_p6), [#allocation3], 8192   ;;  %p13022_p13 = pmov %p13021_p6 }
  0x9b   : > { %p13023_p10 = pmov %p13021_p6 }
  0x9c   : > { %10846 = vsyncadd (%p13022_p13), [#allocation3], 4294959104 }
  0x9d   : > { %10848 = dma.done.wait (%p13023_p10), [#allocation6], 16416   ;;  %p13024_p2 = pmov %p13021_p6 }
  0x9f   : > { %10850 = vsyncadd (%p13024_p2), [#allocation6], 4294950880  ;;  %p13025_p3 = pmov %p13024_p2 }
  0xa0   : > { %p13026_p12 = pmov %p13024_p2 }
  0xa1   : > { %10852 = dma.done.wait (%p13025_p3), [#allocation9], 288  }
  0xa2   : > { %10854 = vsyncadd (%p13026_p12), [#allocation9], 4294967008  ;;  %p13027_p4 = pmov %p13024_p2 }
  0xa3   : > { %p13028_p7 = pmov %p13024_p2 }
  0xa4   : > { %10856 = dma.done.wait (%p13027_p4), [#allocation12], 2080  }
  0xa5   : > { %10858 = vsyncadd (%p13028_p7), [#allocation12], 4294965216  ;;  %p13029_p8 = pmov %p13024_p2 }
  0xa6   : > { %p13030_p11 = pmov %p13024_p2 }
  0xa7   : > { %10860 = dma.done.wait (%p13029_p8), [#allocation15], 256  }
  0xa8   : > { %10862 = vsyncadd (%p13030_p11), [#allocation15], 4294967040  ;;  %v10896_v0 = vmov 0.0   ;;  %vm10897_vm0 = vmmov 0   ;;  %v10168_v1 = vld [vmem:[#allocation2 + $0x78] sm:$0xff]   ;;  %v10169_v2 = vld [vmem:[#allocation2 + $0x70] sm:$0xff]   ;;  %v934_v19 = vlaneseq }
  0xa9   : > { %8768 = vmatprep.subr.bf16.mxu1 %v10896_v0  ;;  %8784 = vmatprep.mubr.msk.bf16.mxu1 %vm10897_vm0, %v10896_v0  ;;  %p911_p0 = scmp.lt.s32.totalorder %s11045_s6, 1  ;;  %v10170_v3 = vld [vmem:[#allocation2 + $0x68] sm:$0xff]   ;;  %v10171_v4 = vld [vmem:[#allocation2 + $0x60] sm:$0xff]   ;;  %v10176_v5 = vld [vmem:[#allocation2 + $0x38] sm:$0xff]   ;;  %s13031_s27 = sld [smem:[#allocation30_spill]]  ;;  %vm1473_vm8 = vcmask 1043456  }
  0xaa   : > { %8748 = vmatprep.subr.bf16.mxu0 %v10896_v0  ;;  %8764 = vmatprep.mubr.msk.bf16.mxu0 %vm10897_vm0, %v10896_v0  ;;  %v10177_v6 = vld [vmem:[#allocation2 + $0x30] sm:$0xff]   ;;  %v10172_v7 = vld [vmem:[#allocation2 + $0x58] sm:$0xff]   ;;  %v10178_v8 = vld [vmem:[#allocation2 + $0x28] sm:$0xff]   ;;  %v11226_v20 = vshrl.u32 %v934_v19, 7  ;;  %s13032_s1 = sld [smem:[#allocation37_spill]]  ;;  %v11271_v61 = vand.u32 127, %v934_v19 }
  0xab   : > { %8769 = vmatpush3.bf16.msra.mxu1 %v10168_v1  ;;  %s11195_s30 = scalar_select %p911_p0, %s11045_s6, 1  ;;  %8749 = vmatpush3.bf16.msra.mxu0 %v10176_v5  ;;  %v10173_v9 = vld [vmem:[#allocation2 + $0x50] sm:$0xff]   ;;  %v10179_v10 = vld [vmem:[#allocation2 + $0x20] sm:$0xff]   ;;  %v10174_v11 = vld [vmem:[#allocation2 + $0x48] sm:$0xff]   ;;  %vm1397_vm9 = vcmask 64512  }
  0xac   : > { %8770 = vmatprep.subr.bf16.mxu1 %v10896_v0  ;;  %8750 = vmatprep.subr.bf16.mxu0 %v10896_v0  ;;  %v10175_v12 = vld [vmem:[#allocation2 + $0x40] sm:$0xff]   ;;  %v10180_v15 = vld [vmem:[#allocation2 + $0x18] sm:$0xff]   ;;  %v10181_v16 = vld [vmem:[#allocation2 + $0x10] sm:$0xff]   ;;  %v11229_v21 = vsub.s32 1, %v11226_v20  ;;  %v11274_v62 = vsub.s32 0, %v11226_v20  ;;  %vm941_vm1 = vcmp.ge.s32.totalorder %v11271_v61, 8 }
  0xad   : > { %s11199_s8 = sshll.u32 %s11195_s30, 3  ;;  %v10182_v17 = vld [vmem:[#allocation2 + $0x8] sm:$0xff]   ;;  %v10183_v18 = vld [vmem:[#allocation2] sm:$0xff]   ;;  %v10184_v29 = vld [vmem:[#allocation2 + $0xb8] sm:$0xff]   ;;  %vm942_vm2 = vcmp.lt.s32.totalorder %v11271_v61, 16  ;;  %vm937_vm3 = vcmp.lt.s32.totalorder %v11271_v61, 8 }
  0xae   : > { %v10185_v30 = vld [vmem:[#allocation2 + $0xb0] sm:$0xff]   ;;  %v10186_v31 = vld [vmem:[#allocation2 + $0xa8] sm:$0xff]   ;;  %v10187_v32 = vld [vmem:[#allocation2 + $0xa0] sm:$0xff]   ;;  %vm946_vm5 = vcmp.ge.s32.totalorder %v11271_v61, 16  ;;  %vm947_vm6 = vcmp.lt.s32.totalorder %v11271_v61, 24  ;;  %s13033_s25 = sld [smem:[#allocation32_spill]] }
  0xaf   : > { %8771 = vmatpush3.bf16.msra.mxu1 %v10169_v2  ;;  %8751 = vmatpush3.bf16.msra.mxu0 %v10177_v6  ;;  %s11209_s29 = scalar_lea.vmem %s13031_s27, %s11199_s8  ;;  %v10188_v33 = vld [vmem:[#allocation2 + $0x98] sm:$0xff]   ;;  %v10189_v34 = vld [vmem:[#allocation2 + $0x90] sm:$0xff]   ;;  %v10190_v35 = vld [vmem:[#allocation2 + $0x88] sm:$0xff]   ;;  %s13034_s0 = sld [smem:[#allocation33_spill]]  ;;  %vm951_vm10 = vcmp.ge.s32.totalorder %v11271_v61, 24  ;;  %vm952_vm11 = vcmp.lt.s32.totalorder %v11271_v61, 32 }
  0xb0   : > { %8772 = vmatprep.subr.bf16.mxu1 %v10896_v0  ;;  %8752 = vmatprep.subr.bf16.mxu0 %v10896_v0  ;;  %v973_v13 = vld [vmem:[%s11209_s29] sm:$0xff]  ;;  %vm943_vm4 = vmand %vm941_vm1, %vm942_vm2  ;;  %s13035_s28 = sld [smem:[#allocation38_spill]]  ;;  %p13041_p9 = scmp.ne.s32.totalorder %s13012_s3, 0 }
  0xb1   : > { %v974_v14 = vpack.c.bf16 %v973_v13, %v973_v13  ;;  %v11234_v22 = vld [vmem:[%s13032_s1] sm:$0xff]  ;;  %v11301_v5 = vsel %vm943_vm4, 1.0, %v10896_v0  ;;  %vm948_vm7 = vmand %vm946_vm5, %vm947_vm6  ;;  %s13037_s2 = sld [smem:[#allocation31_spill]] }
  0xb2   : > { %v1103_v23 = vrot.slane %v11234_v22, %v11229_v21  ;;  %v10191_v36 = vld [vmem:[#allocation2 + $0x80] sm:$0xff]   ;;  %v994_v1 = vrot.slane %v11234_v22, %v11274_v62  ;;  %vm953_vm12 = vmand %vm951_vm10, %vm952_vm11  ;;  %s13038_s7 = sld [smem:[#allocation34_spill]] }
  0xb3   : > { %8773 = vmatpush3.bf16.msra.mxu1 %v10170_v3  ;;  %8753 = vmatpush3.bf16.msra.mxu0 %v10178_v8 }
  0xb4   : > { %8774 = vmatprep.subr.bf16.mxu1 %v10896_v0  ;;  %8754 = vmatprep.subr.bf16.mxu0 %v10896_v0  ;;  %s11350_s11 = scalar_lea.vmem %s13033_s25, %s11195_s30 }
  0xb5   : > { %s11356_s27 = scalar_lea.vmem %s13034_s0, %s11195_s30  ;;  %s13040_s30 = sld [smem:[#allocation40_spill]] }
  0xb6   : > { %s13036_s4 = smov %s13035_s28 }
  0xb7   : > { %8775 = vmatpush3.bf16.msra.mxu1 %v10171_v4  ;;  %8755 = vmatpush3.bf16.msra.mxu0 %v10179_v10  ;;  %v11298_v4 = vsel %vm937_vm3, 1.0, %v10896_v0  ;;  %s918_s25 = scalar_lea.vmem %s13037_s2, %s11199_s8 }
  0xb8   : > { %8776 = vmatprep.subr.bf16.mxu1 %v10896_v0  ;;  %8756 = vmatprep.subr.bf16.mxu0 %v10896_v0  ;;  %s11994_s0 = scalar_lea.vmem %s13038_s7, %s11199_s8 }
  0xbb   : > { %8777 = vmatpush3.bf16.msra.mxu1 %v10172_v7  ;;  %8757 = vmatpush3.bf16.msra.mxu0 %v10180_v15 }
  0xbc   : > { %8778 = vmatprep.subr.bf16.mxu1 %v10896_v0  ;;  %8758 = vmatprep.subr.bf16.mxu0 %v10896_v0 }
  0xbf   : > { %8779 = vmatpush3.bf16.msra.mxu1 %v10173_v9  ;;  %8759 = vmatpush3.bf16.msra.mxu0 %v10181_v16 }
  0xc0   : > { %8780 = vmatprep.subr.bf16.mxu1 %v10896_v0  ;;  %8760 = vmatprep.subr.bf16.mxu0 %v10896_v0 }
  0xc3   : > { %8781 = vmatpush3.bf16.msra.mxu1 %v10174_v11  ;;  %8761 = vmatpush3.bf16.msra.mxu0 %v10182_v17  ;;  %v11336_v17 = vsel %vm948_vm7, 1.0, %v10896_v0 }
  0xc4   : > { %8782 = vmatprep.subr.bf16.mxu1 %v10896_v0  ;;  %8762 = vmatprep.subr.bf16.mxu0 %v10896_v0 }
  0xc7   : > { %8783 = vmatpush3.bf16.msra.mxu1 %v10175_v12  ;;  %8763 = vmatpush3.bf16.msra.mxu0 %v10183_v18  ;;  %v11327_v12 = vsub.s32 2, %v11226_v20 }
  0xc8   : > { %8808 = vmatprep.subr.bf16.mxu1 %v10896_v0  ;;  %8788 = vmatprep.subr.bf16.mxu0 %v10896_v0 }
  0xc9   : > { %v1212_v13 = vrot.slane %v11234_v22, %v11327_v12 }
  0xca   : > { %8785 = vmatmul.mubr.bf16.vlgmr.msra.gmra.mxu1 %v974_v14  ;;  %8765 = vmatmul.mubr.bf16.vlgmr.msra.gmra.mxu0 %v974_v14 }
  0xcb   : > { %8824 = vmatprep.mubr.msk.bf16.mxu1 %vm10897_vm0, %v10896_v0  ;;  %8804 = vmatprep.mubr.msk.bf16.mxu0 %vm10897_vm0, %v10896_v0 }
  0xcc   : > { %8789 = vmatpush3.bf16.msra.mxu0 %v10184_v29  ;;  %v11359_v29 = vld [vmem:[%s11350_s11] ss:$0 sm:$0xff] }
  0xcd   : > { %8790 = vmatprep.subr.bf16.mxu0 %v10896_v0 }
  0xd0   : > { %8791 = vmatpush3.bf16.msra.mxu0 %v10185_v30  ;;  %v11362_v30 = vld [vmem:[%s11356_s27] ss:$0 sm:$0xff] }
  0xd1   : > { %8792 = vmatprep.subr.bf16.mxu0 %v10896_v0 }
  0xd4   : > { %8793 = vmatpush3.bf16.msra.mxu0 %v10186_v31 }
  0xd5   : > { %8794 = vmatprep.subr.bf16.mxu0 %v10896_v0 }
  0xd8   : > { %8795 = vmatpush3.bf16.msra.mxu0 %v10187_v32 }
  0xd9   : > { %8796 = vmatprep.subr.bf16.mxu0 %v10896_v0 }
  0xdc   : > { %8797 = vmatpush3.bf16.msra.mxu0 %v10188_v33 }
  0xdd   : > { %8798 = vmatprep.subr.bf16.mxu0 %v10896_v0 }
  0xe0   : > { %8799 = vmatpush3.bf16.msra.mxu0 %v10189_v34 }
  0xe1   : > { %8800 = vmatprep.subr.bf16.mxu0 %v10896_v0 }
  0xe4   : > { %8801 = vmatpush3.bf16.msra.mxu0 %v10190_v35 }
  0xe5   : > { %8802 = vmatprep.subr.bf16.mxu0 %v10896_v0 }
  0xe8   : > { %8803 = vmatpush3.bf16.msra.mxu0 %v10191_v36 }
  0xe9   : > { %8828 = vmatprep.subr.bf16.mxu0 %v10896_v0 }
  0xeb   : > { %8805 = vmatmul.mubr.bf16.vlgmr.msra.gmra.mxu0 %v974_v14 }
  0xec   : > { %8844 = vmatprep.mubr.msk.bf16.mxu0 %vm10897_vm0, %v10896_v0 }
 0x18a   : > { %v1186_v24 = vpop.f32.mrf.mxu1  ;;  %v1077_v37 = vpop.f32.mrf.mxu0 }
 0x18b   : > { %v1187_v25 = vadd.f32 %v1186_v24, %v1103_v23  ;;  %v11293_v3 = vadd.f32 %v1077_v37, %v994_v1 }
 0x18c   : > { %v8786_v26 = vpop.f32.mrf.mxu1  ;;  %v8766_v38 = vpop.f32.mrf.mxu0 }
 0x18d   : > { %1301 = vxpose.xlu0.b32.start.end [1/1] (short) %v1187_v25, 128  ;;  %v1341_v7 = vmul.f32 %v11298_v4, %v11293_v3  ;;  %v1412_v8 = vmul.f32 %v11301_v5, %v11293_v3 }
 0x18e   : > { %v1189_v27 = vpop.f32.mrf.mxu1  ;;  %v1080_v39 = vpop.f32.mrf.mxu0 }
 0x18f   : > { %v1342_v10 = vpack.c.bf16 %v1341_v7, %v1341_v7  ;;  %v1413_v11 = vpack.c.bf16 %v1412_v8, %v1412_v8 }
 0x190   : > { %v8787_v28 = vpop.f32.mrf.mxu1  ;;  %v8767_v40 = vpop.f32.mrf.mxu0 }
 0x1ab   : > { %v1295_v14 = vpop.f32.mrf.mxu0 }
 0x1ac   : > { %v11333_v15 = vadd.f32 %v1295_v14, %v1212_v13 }
 0x1ad   : > { %v8806_v16 = vpop.f32.mrf.mxu0 }
 0x1ae   : > { %v1467_v18 = vmul.f32 %v11301_v5, %v11333_v15  ;;  %v1618_v19 = vmul.f32 %v11336_v17, %v11333_v15  ;;  %v1409_v1 = vmul.f32 %v11298_v4, %v11333_v15 }
 0x1af   : > { %v1298_v23 = vpop.f32.mrf.mxu0 }
 0x1b0   : > { %v1468_v24 = vpack.c.bf16 %v1467_v18, %v1467_v18  ;;  %v1619_v25 = vpack.c.bf16 %v1618_v19, %v1618_v19  ;;  %v11399_v19 = vsel %vm953_vm12, 1.0, %v10896_v0 }
 0x1b1   : > { %v8807_v26 = vpop.f32.mrf.mxu0  ;;  %v1723_v23 = vmul.f32 %v11399_v19, %v11333_v15 }
 0x1b2   : > { %v1475_v27 = vsel %vm1473_vm8, %v1468_v24, 0  ;;  %v1625_v28 = vsel %vm1473_vm8, %v1619_v25, 0  ;;  %v1563_v24 = vmul.f32 %v11336_v17, %v11293_v3 }
 0x1b3   : > { %v1724_v25 = vpack.c.bf16 %v1723_v23, %v1723_v23 }
 0x1b4   : > { %v1564_v26 = vpack.c.bf16 %v1563_v24, %v1563_v24  ;;  %v10192_v24 = vld [vmem:[#allocation2 + $0xf8] sm:$0xff]  }
 0x209   : > { %v11248_v41 = vpop.trf.xlu0 }
 0x20d   : > { %v1318_v42 = vpop.trf.xlu0 }
 0x20e   : > { %v11316_v9 = vpack.c.bf16 %v1318_v42, %v11248_v41 }
 0x211   : > { %v1319_v43 = vpop.trf.xlu0 }
 0x215   : > { %v1320_v44 = vpop.trf.xlu0 }
 0x216   : > { %v11305_v6 = vpack.c.bf16 %v1320_v44, %v1319_v43 }
 0x219   : > { %v1321_v45 = vpop.trf.xlu0 }
 0x21d   : > { %v1322_v46 = vpop.trf.xlu0 }
 0x21e   : > { %v11291_v2 = vpack.c.bf16 %v1322_v46, %v1321_v45 }
 0x221   : > { %v1323_v47 = vpop.trf.xlu0 }
 0x225   : > { %v1324_v48 = vpop.trf.xlu0 }
 0x226   : > { %v11280_v63 = vpack.c.bf16 %v1324_v48, %v1323_v47 }
 0x229   : > { %v1325_v49 = vpop.trf.xlu0 }
 0x22d   : > { %v1326_v50 = vpop.trf.xlu0 }
 0x22e   : > { %v11268_v60 = vpack.c.bf16 %v1326_v50, %v1325_v49 }
 0x231   : > { %v1327_v51 = vpop.trf.xlu0 }
 0x235   : > { %v1328_v52 = vpop.trf.xlu0 }
 0x236   : > { %v11262_v59 = vpack.c.bf16 %v1328_v52, %v1327_v51 }
 0x239   : > { %v1329_v53 = vpop.trf.xlu0 }
 0x23d   : > { %v1330_v54 = vpop.trf.xlu0 }
 0x23e   : > { %v11256_v58 = vpack.c.bf16 %v1330_v54, %v1329_v53 }
 0x241   : > { %v1331_v55 = vpop.trf.xlu0 }
 0x245   : > { %v1332_v56 = vpop.trf.xlu0 }
 0x246   : > { %v11250_v57 = vpack.c.bf16 %v1332_v56, %v1331_v55 }
 0x248   : > { %8809 = vmatpush3.bf16.msra.mxu1 %v11250_v57  ;;  %8829 = vmatpush3.bf16.msra.mxu0 %v11250_v57 }
 0x249   : > { %8810 = vmatprep.subr.bf16.mxu1 %v10896_v0  ;;  %8830 = vmatprep.subr.bf16.mxu0 %v10896_v0 }
 0x24c   : > { %8811 = vmatpush3.bf16.msra.mxu1 %v11256_v58  ;;  %8831 = vmatpush3.bf16.msra.mxu0 %v11256_v58 }
 0x24d   : > { %8812 = vmatprep.subr.bf16.mxu1 %v10896_v0  ;;  %8832 = vmatprep.subr.bf16.mxu0 %v10896_v0 }
 0x250   : > { %8813 = vmatpush3.bf16.msra.mxu1 %v11262_v59  ;;  %8833 = vmatpush3.bf16.msra.mxu0 %v11262_v59 }
 0x251   : > { %8814 = vmatprep.subr.bf16.mxu1 %v10896_v0  ;;  %8834 = vmatprep.subr.bf16.mxu0 %v10896_v0 }
 0x254   : > { %8815 = vmatpush3.bf16.msra.mxu1 %v11268_v60  ;;  %8835 = vmatpush3.bf16.msra.mxu0 %v11268_v60 }
 0x255   : > { %8816 = vmatprep.subr.bf16.mxu1 %v10896_v0  ;;  %8836 = vmatprep.subr.bf16.mxu0 %v10896_v0 }
 0x258   : > { %8817 = vmatpush3.bf16.msra.mxu1 %v11280_v63  ;;  %8837 = vmatpush3.bf16.msra.mxu0 %v11280_v63 }
 0x259   : > { %8818 = vmatprep.subr.bf16.mxu1 %v10896_v0  ;;  %8838 = vmatprep.subr.bf16.mxu0 %v10896_v0 }
 0x25c   : > { %8819 = vmatpush3.bf16.msra.mxu1 %v11291_v2  ;;  %8839 = vmatpush3.bf16.msra.mxu0 %v11291_v2 }
 0x25d   : > { %8820 = vmatprep.subr.bf16.mxu1 %v10896_v0  ;;  %8840 = vmatprep.subr.bf16.mxu0 %v10896_v0 }
 0x260   : > { %8821 = vmatpush3.bf16.msra.mxu1 %v11305_v6  ;;  %8841 = vmatpush3.bf16.msra.mxu0 %v11305_v6 }
 0x261   : > { %8822 = vmatprep.subr.bf16.mxu1 %v10896_v0  ;;  %8842 = vmatprep.subr.bf16.mxu0 %v10896_v0 }
 0x264   : > { %8823 = vmatpush3.bf16.msra.mxu1 %v11316_v9  ;;  %8843 = vmatpush3.bf16.msra.mxu0 %v11316_v9 }
 0x265   : > { %8848 = vmatprep.subr.bf16.mxu1 %v10896_v0  ;;  %8880 = vmatprep.subr.bf16.mxu0 %v10896_v0 }
 0x267   : > { %8825 = vmatmul.mubr.bf16.vlgmr.msra.gmra.mxu1 %v1342_v10  ;;  %8845 = vmatmul.mubr.bf16.vlgmr.msra.gmra.mxu0 %v1413_v11  ;;  %v1410_v10 = vpack.c.bf16 %v1409_v1, %v1409_v1 }
 0x268   : > { %8850 = vmatprep.mubr.msk.bf16.mxu1 %vm10897_vm0, %v10896_v0  ;;  %8882 = vmatprep.mubr.msk.bf16.mxu0 %vm10897_vm0, %v10896_v0 }
 0x269   : > { %8849 = vmatpush3.bf16.msra.mxu1 %v1475_v27  ;;  %8881 = vmatpush3.bf16.msra.mxu0 %v1625_v28  ;;  %v1521_v14 = vsel %vm1473_vm8, %v1410_v10, 0  ;;  %v1730_v27 = vsel %vm1473_vm8, %v1724_v25, 0 }
 0x26a   : > { %8854 = vmatprep.subr.bf16.mxu1 %v10896_v0  ;;  %8886 = vmatprep.subr.bf16.mxu0 %v10896_v0 }
 0x327   : > { %v1377_v31 = vpop.f32.mrf.mxu1  ;;  %v1448_v32 = vpop.f32.mrf.mxu0 }
 0x328   : > { %v1389_v33 = vmul.f32 %v11359_v29, %v1377_v31  ;;  %v1454_v34 = vmul.f32 %v11359_v29, %v1448_v32 }
 0x329   : > { %v8826_v35 = vpop.f32.mrf.mxu1  ;;  %v8846_v36 = vpop.f32.mrf.mxu0 }
 0x32a   : > { %v1455_v37 = vadd.f32 %v11362_v30, %v1454_v34  ;;  %v1396_v38 = vadd.f32 %v11362_v30, %v1389_v33 }
 0x32b   : > { %v1380_v39 = vpop.f32.mrf.mxu1  ;;  %v1451_v40 = vpop.f32.mrf.mxu0 }
 0x32c   : > { %v1456_v41 = vsel %vm1397_vm9, %v1455_v37, -inf  ;;  %v1398_v42 = vsel %vm1397_vm9, %v1396_v38, -inf }
 0x32d   : > { %1457 = vmax.xlane.f32.xlu0 %v1456_v41  ;;  %v8847_v43 = vpop.f32.mrf.mxu0  ;;  %1399 = vmax.xlane.f32.xlu1 %v1398_v42  ;;  %v8827_v44 = vpop.f32.mrf.mxu1 }
 0x3b6   : > { %v1458_v45 = vpop.xlane.xlu0 %1457  ;;  %v1400_v46 = vpop.xlane.xlu1 %1399 }
 0x3b7   : > { %v1459_v47 = vsub.f32 %v1455_v37, %v1458_v45  ;;  %v1401_v48 = vsub.f32 %v1396_v38, %v1400_v46 }
 0x3b9   : > { %v1460_v49 = vmul.f32 1.442695, %v1459_v47  ;;  %v1402_v50 = vmul.f32 1.442695, %v1401_v48 }
 0x3bb   : > { %10432 = vpow2.f32 %v1460_v49 }
 0x3bc   : > { %10434 = vpow2.f32 %v1402_v50 }
 0x3c8   : > { %v10433_v51 = vpop.eup %10432 }
 0x3c9   : > { %v1462_v52 = vsel %vm1397_vm9, %v10433_v51, 0.0  ;;  %v10435_v53 = vpop.eup %10434 }
 0x3ca   : > { %1463 = vadd.xlane.f32.xlu1 %v1462_v52  ;;  %v1404_v54 = vsel %vm1397_vm9, %v10435_v53, 0.0 }
 0x3ce   : > { %1405 = vadd.xlane.f32.xlu1 %v1404_v54 }
 0x453   : > { %v1464_v55 = vpop.xlane.xlu1 %1463 }
 0x454   : > { %10436 = vrcp.f32 %v1464_v55 }
 0x457   : > { %v1406_v56 = vpop.xlane.xlu1 %1405 }
 0x458   : > { %10438 = vrcp.f32 %v1406_v56 }
 0x461   : > { %v10437_v7 = vpop.eup %10436 }
 0x462   : > { %v1466_v8 = vmul.f32 %v10437_v7, %v10433_v51 }
 0x464   : > { %v1469_v11 = vpack.c.bf16 %v1466_v8, %v1466_v8 }
 0x465   : > { %v10439_v13 = vpop.eup %10438 }
 0x466   : > { %8851 = vmatmul.mubr.msk.bf16.vlgmr.msra.gmra.mxu1 %vm1397_vm9, %v1469_v11  ;;  %v1408_v16 = vmul.f32 %v10439_v13, %v10435_v53 }
 0x467   : > { %8855 = vmatpush3.bf16.msra.mxu1 %v1521_v14  ;;  %8856 = vmatprep.mubr.msk.bf16.mxu1 %vm10897_vm0, %v10896_v0 }
 0x468   : > { %8860 = vmatprep.subr.bf16.mxu1 %v10896_v0  ;;  %v1411_v18 = vpack.c.bf16 %v1408_v16, %v1408_v16 }
 0x46e   : > { %8857 = vmatmul.mubr.msk.bf16.vlgmr.msra.gmra.mxu1 %vm1397_vm9, %v1411_v18 }
 0x46f   : > { %8861 = vmatpush3.bf16.msra.mxu1 %v11250_v57  ;;  %8876 = vmatprep.mubr.msk.bf16.mxu1 %vm10897_vm0, %v10896_v0 }
 0x470   : > { %8862 = vmatprep.subr.bf16.mxu1 %v10896_v0 }
 0x473   : > { %8863 = vmatpush3.bf16.msra.mxu1 %v11256_v58 }
 0x474   : > { %8864 = vmatprep.subr.bf16.mxu1 %v10896_v0 }
 0x477   : > { %8865 = vmatpush3.bf16.msra.mxu1 %v11262_v59 }
 0x478   : > { %8866 = vmatprep.subr.bf16.mxu1 %v10896_v0 }
 0x47b   : > { %8867 = vmatpush3.bf16.msra.mxu1 %v11268_v60 }
 0x47c   : > { %8868 = vmatprep.subr.bf16.mxu1 %v10896_v0 }
 0x47f   : > { %8869 = vmatpush3.bf16.msra.mxu1 %v11280_v63 }
 0x480   : > { %8870 = vmatprep.subr.bf16.mxu1 %v10896_v0 }
 0x483   : > { %8871 = vmatpush3.bf16.msra.mxu1 %v11291_v2 }
 0x484   : > { %8872 = vmatprep.subr.bf16.mxu1 %v10896_v0 }
 0x487   : > { %8873 = vmatpush3.bf16.msra.mxu1 %v11305_v6 }
 0x488   : > { %8874 = vmatprep.subr.bf16.mxu1 %v10896_v0 }
 0x48b   : > { %8875 = vmatpush3.bf16.msra.mxu1 %v11316_v9 }
 0x48c   : > { %8906 = vmatprep.subr.bf16.mxu1 %v10896_v0 }
 0x48e   : > { %8877 = vmatmul.mubr.bf16.vlgmr.msra.gmra.mxu1 %v1564_v26  ;;  %v10193_v26 = vld [vmem:[#allocation2 + $0xf0] sm:$0xff]  }
 0x48f   : > { %8907 = vmatpush3.bf16.msra.mxu1 %v1730_v27  ;;  %8908 = vmatprep.mubr.msk.bf16.mxu1 %vm10897_vm0, %v10896_v0  ;;  %v10194_v27 = vld [vmem:[#allocation2 + $0xe8] sm:$0xff]  }
 0x490   : > { %8912 = vmatprep.subr.bf16.mxu1 %v10896_v0 }
 0x526   : > { %v1511_v15 = vpop.f32.mrf.mxu1 }
 0x528   : > { %v8852_v28 = vpop.f32.mrf.mxu1 }
 0x529   : > { %v10196_v28 = vld [vmem:[#allocation2 + $0xd8] sm:$0xff]  }
 0x52a   : > { %v1514_v31 = vpop.f32.mrf.mxu1 }
 0x52b   : > { %v10197_v31 = vld [vmem:[#allocation2 + $0xd0] sm:$0xff]  }
 0x52c   : > { %v8853_v32 = vpop.f32.mrf.mxu1 }
 0x52d   : > { %v10198_v32 = vld [vmem:[#allocation2 + $0xc8] sm:$0xff]  }
 0x52e   : > { %v1557_v33 = vpop.f32.mrf.mxu1 }
 0x52f   : > { %v1558_v34 = vadd.f32 %v1557_v33, %v1511_v15  ;;  %v10195_v15 = vld [vmem:[#allocation2 + $0xe0] sm:$0xff]  }
 0x530   : > { %v8858_v35 = vpop.f32.mrf.mxu1  ;;  %v10199_v33 = vld [vmem:[#allocation2 + $0xc0] sm:$0xff]  }
 0x532   : > { %v1560_v36 = vpop.f32.mrf.mxu1 }
 0x534   : > { %v8859_v37 = vpop.f32.mrf.mxu1 }
 0x54e   : > { %v1599_v38 = vpop.f32.mrf.mxu1 }
 0x54f   : > { %v1605_v39 = vmul.f32 %v11359_v29, %v1599_v38 }
 0x550   : > { %v8878_v40 = vpop.f32.mrf.mxu1 }
 0x551   : > { %v1606_v41 = vadd.f32 %v11362_v30, %v1605_v39  ;;  %v11458_v40 = vsub.s32 3, %v11226_v20 }
 0x552   : > { %v1602_v42 = vpop.f32.mrf.mxu1 }
 0x553   : > { %v1607_v43 = vsel %vm1397_vm9, %v1606_v41, -inf }
 0x554   : > { %1608 = vmax.xlane.f32.xlu1 %v1607_v43  ;;  %v8879_v44 = vpop.f32.mrf.mxu1 }
 0x555   : > { %v11465_v44 = vsel %vm952_vm11, 1.0, %v10896_v0 }
 0x5dd   : > { %v1609_v45 = vpop.xlane.xlu1 %1608 }
 0x5de   : > { %v1610_v46 = vsub.f32 %v1606_v41, %v1609_v45  ;;  %v1794_v41 = vrot.slane %v11234_v22, %v11458_v40  ;;  %v10201_v22 = vld [vmem:[%s13036_s4 + $0x30] sm:$0xff]  }
 0x5e0   : > { %v1611_v47 = vmul.f32 1.442695, %v1610_v46  ;;  %v10548_v46 = vld [vmem:[%s11209_s29] sm:$0xff] }
 0x5e2   : > { %10440 = vpow2.f32 %v1611_v47 }
 0x5ef   : > { %v10441_v48 = vpop.eup %10440 }
 0x5f0   : > { %v1613_v49 = vsel %vm1397_vm9, %v10441_v48, 0.0 }
 0x5f1   : > { %1614 = vadd.xlane.f32.xlu1 %v1613_v49 }
 0x67a   : > { %v1615_v50 = vpop.xlane.xlu1 %1614 }
 0x67b   : > { %10442 = vrcp.f32 %v1615_v50 }
 0x688   : > { %v10443_v51 = vpop.eup %10442 }
 0x689   : > { %v1617_v52 = vmul.f32 %v10443_v51, %v10441_v48  ;;  %v10200_v51 = vld [vmem:[%s13035_s28 + $0x38] sm:$0xff]   ;;  %s13039_s28 = sld [smem:[#allocation35_spill]] }
 0x68b   : > { %v1620_v53 = vpack.c.bf16 %v1617_v52, %v1617_v52 }
 0x68d   : > { %8883 = vmatmul.mubr.msk.bf16.vlgmr.msra.gmra.mxu0 %vm1397_vm9, %v1620_v53 }
 0x68e   : > { %8887 = vmatpush3.bf16.msra.mxu0 %v11250_v57  ;;  %8902 = vmatprep.mubr.msk.bf16.mxu0 %vm10897_vm0, %v10896_v0  ;;  %v1668_v57 = vmul.f32 %v11399_v19, %v11293_v3 }
 0x68f   : > { %8888 = vmatprep.subr.bf16.mxu0 %v10896_v0  ;;  %s12000_s2 = scalar_lea.vmem %s13039_s28, %s11199_s8  ;;  %s908_s8 = sand.u32 1, %s10873_s26  }
 0x690   : > { %s7598_s28 = scalar_lea.sflag [#allocation4], %s908_s8 }
 0x692   : > { %8889 = vmatpush3.bf16.msra.mxu0 %v11256_v58  ;;  %v1669_v58 = vpack.c.bf16 %v1668_v57, %v1668_v57 }
 0x693   : > { %8890 = vmatprep.subr.bf16.mxu0 %v10896_v0 }
 0x696   : > { %8891 = vmatpush3.bf16.msra.mxu0 %v11262_v59 }
 0x697   : > { %8892 = vmatprep.subr.bf16.mxu0 %v10896_v0 }
 0x69a   : > { %8893 = vmatpush3.bf16.msra.mxu0 %v11268_v60 }
 0x69b   : > { %8894 = vmatprep.subr.bf16.mxu0 %v10896_v0 }
 0x69e   : > { %8895 = vmatpush3.bf16.msra.mxu0 %v11280_v63 }
 0x69f   : > { %8896 = vmatprep.subr.bf16.mxu0 %v10896_v0 }
 0x6a2   : > { %8897 = vmatpush3.bf16.msra.mxu0 %v11291_v2 }
 0x6a3   : > { %8898 = vmatprep.subr.bf16.mxu0 %v10896_v0 }
 0x6a6   : > { %8899 = vmatpush3.bf16.msra.mxu0 %v11305_v6 }
 0x6a7   : > { %8900 = vmatprep.subr.bf16.mxu0 %v10896_v0 }
 0x6aa   : > { %8901 = vmatpush3.bf16.msra.mxu0 %v11316_v9 }
 0x6ab   : > { %8932 = vmatprep.subr.bf16.mxu0 %v10896_v0 }
 0x6ad   : > { %8903 = vmatmul.mubr.bf16.vlgmr.msra.gmra.mxu0 %v1669_v58 }
 0x6ae   : > { %8948 = vmatprep.mubr.msk.bf16.mxu0 %vm10897_vm0, %v10896_v0  ;;  %8933 = vmatpush3.bf16.msra.mxu0 %v10200_v51  ;;  %v10216_v51 = vld [vmem:[#allocation2 + $0x138] sm:$0xff]  }
 0x6af   : > { %8934 = vmatprep.subr.bf16.mxu0 %v10896_v0 }
 0x6b2   : > { %8935 = vmatpush3.bf16.msra.mxu0 %v10201_v22  ;;  %v10217_v22 = vld [vmem:[#allocation2 + $0x178] sm:$0xff]  }
 0x6b3   : > { %8936 = vmatprep.subr.bf16.mxu0 %v10896_v0 }
 0x74d   : > { %v1661_v59 = vpop.f32.mrf.mxu0 }
 0x74e   : > { %v1667_v60 = vadd.f32 %v1661_v59, %v1558_v34  ;;  %v10202_v59 = vld [vmem:[%s13036_s4 + $0x28] sm:$0xff]  }
 0x74f   : > { %v8884_v63 = vpop.f32.mrf.mxu0  ;;  %8937 = vmatpush3.bf16.msra.mxu0 %v10202_v59 }
 0x750   : > { %8938 = vmatprep.subr.bf16.mxu0 %v10896_v0  ;;  %v10204_v63 = vld [vmem:[%s13036_s4 + $0x18] sm:$0xff]  }
 0x751   : > { %v1664_v2 = vpop.f32.mrf.mxu0 }
 0x752   : > { %v10205_v2 = vld [vmem:[%s13036_s4 + $0x10] sm:$0xff]  }
 0x753   : > { %v8885_v54 = vpop.f32.mrf.mxu0 }
 0x754   : > { %v10206_v54 = vld [vmem:[%s13036_s4 + $0x8] sm:$0xff]  }
 0x76d   : > { %v1704_v6 = vpop.f32.mrf.mxu0 }
 0x76e   : > { %v1710_v55 = vmul.f32 %v11359_v29, %v1704_v6  ;;  %v10207_v6 = vld [vmem:[%s13036_s4] sm:$0xff]  }
 0x76f   : > { %v8904_v56 = vpop.f32.mrf.mxu0 }
 0x770   : > { %v1711_v3 = vadd.f32 %v11362_v30, %v1710_v55  ;;  %v10208_v55 = vld [vmem:[%s12969_s10 + $0x38] sm:$0xff]   ;;  %v10209_v56 = vld [vmem:[%s12969_s10 + $0x30] sm:$0xff]  }
 0x771   : > { %v1707_v1 = vpop.f32.mrf.mxu0 }
 0x772   : > { %v1712_v9 = vsel %vm1397_vm9, %v1711_v3, -inf  ;;  %v10211_v1 = vld [vmem:[%s12969_s10 + $0x20] sm:$0xff]  }
 0x773   : > { %1713 = vmax.xlane.f32.xlu1 %v1712_v9  ;;  %v8905_v7 = vpop.f32.mrf.mxu0  ;;  %v10212_v9 = vld [vmem:[%s12969_s10 + $0x18] sm:$0xff]  }
 0x774   : > { %v10213_v7 = vld [vmem:[%s12969_s10 + $0x10] sm:$0xff]  }
 0x7fc   : > { %v1714_v8 = vpop.xlane.xlu1 %1713 }
 0x7fd   : > { %v1715_v10 = vsub.f32 %v1711_v3, %v1714_v8  ;;  %v10210_v3 = vld [vmem:[%s12969_s10 + $0x28] sm:$0xff]  }
 0x7ff   : > { %v1716_v11 = vmul.f32 1.442695, %v1715_v10 }
 0x801   : > { %10444 = vpow2.f32 %v1716_v11 }
 0x80e   : > { %v10445_v13 = vpop.eup %10444 }
 0x80f   : > { %v1718_v14 = vsel %vm1397_vm9, %v10445_v13, 0.0 }
 0x810   : > { %1719 = vadd.xlane.f32.xlu1 %v1718_v14  ;;  %v11534_v14 = vld [vmem:[%s12972_s13] sm:$0xf] }
 0x899   : > { %v1720_v16 = vpop.xlane.xlu1 %1719 }
 0x89a   : > { %10446 = vrcp.f32 %v1720_v16 }
 0x8a7   : > { %v10447_v18 = vpop.eup %10446 }
 0x8a8   : > { %v1722_v23 = vmul.f32 %v10447_v18, %v10445_v13  ;;  %v11529_v13 = vld [vmem:[%s12971_s12] sm:$0xf] }
 0x8a9   : > { %v1900_v16 = vrot.slane %v11529_v13, %v11274_v62 }
 0x8aa   : > { %v1725_v25 = vpack.c.bf16 %v1722_v23, %v1722_v23 }
 0x8ac   : > { %8909 = vmatmul.mubr.msk.bf16.vlgmr.msra.gmra.mxu1 %vm1397_vm9, %v1725_v25 }
 0x8ad   : > { %8913 = vmatpush3.bf16.msra.mxu1 %v10192_v24  ;;  %8928 = vmatprep.mubr.msk.bf16.mxu1 %vm10897_vm0, %v10896_v0  ;;  %v1905_v24 = vrot.slane %v11534_v14, %v11274_v62 }
 0x8ae   : > { %8914 = vmatprep.subr.bf16.mxu1 %v10896_v0 }
 0x8b1   : > { %8915 = vmatpush3.bf16.msra.mxu1 %v10193_v26 }
 0x8b2   : > { %8916 = vmatprep.subr.bf16.mxu1 %v10896_v0 }
 0x8b5   : > { %8917 = vmatpush3.bf16.msra.mxu1 %v10194_v27 }
 0x8b6   : > { %8918 = vmatprep.subr.bf16.mxu1 %v10896_v0 }
 0x8b9   : > { %8919 = vmatpush3.bf16.msra.mxu1 %v10195_v15  ;;  %v10214_v15 = vld [vmem:[%s12969_s10 + $0x8] sm:$0xff]  }
 0x8ba   : > { %8920 = vmatprep.subr.bf16.mxu1 %v10896_v0 }
 0x8bd   : > { %8921 = vmatpush3.bf16.msra.mxu1 %v10196_v28  ;;  %v10215_v28 = vld [vmem:[%s12969_s10] sm:$0xff]  }
 0x8be   : > { %8922 = vmatprep.subr.bf16.mxu1 %v10896_v0 }
 0x8c1   : > { %8923 = vmatpush3.bf16.msra.mxu1 %v10197_v31  ;;  %v11553_v31 = vld [vmem:[%s12968_s9] sm:$0x3] }
 0x8c2   : > { %8924 = vmatprep.subr.bf16.mxu1 %v10896_v0 }
 0x8c5   : > { %8925 = vmatpush3.bf16.msra.mxu1 %v10198_v32  ;;  %v1943_v32 = vrot.slane %v11553_v31, %v11274_v62 }
 0x8c6   : > { %8926 = vmatprep.subr.bf16.mxu1 %v10896_v0 }
 0x8c9   : > { %8927 = vmatpush3.bf16.msra.mxu1 %v10199_v33 }
 0x8ca   : > { %8952 = vmatprep.subr.bf16.mxu1 %v10896_v0 }
 0x96c   : > { %v1766_v34 = vpop.f32.mrf.mxu1 }
 0x96d   : > { %v1772_v35 = vadd.f32 %v1766_v34, %v1667_v60  ;;  %v10203_v60 = vld [vmem:[%s13036_s4 + $0x20] sm:$0xff]  }
 0x96e   : > { %v8910_v36 = vpop.f32.mrf.mxu1  ;;  %8939 = vmatpush3.bf16.msra.mxu0 %v10203_v60 }
 0x96f   : > { %v1773_v37 = vpack.c.bf16 %v1772_v35, %v1772_v35  ;;  %8940 = vmatprep.subr.bf16.mxu0 %v10896_v0 }
 0x970   : > { %v1769_v38 = vpop.f32.mrf.mxu1 }
 0x971   : > { %8929 = vmatmul.mubr.bf16.vlgmr.msra.gmra.mxu1 %v1773_v37 }
 0x972   : > { %v8911_v39 = vpop.f32.mrf.mxu1  ;;  %8968 = vmatprep.mubr.msk.bf16.mxu1 %vm10897_vm0, %v10896_v0  ;;  %8941 = vmatpush3.bf16.msra.mxu0 %v10204_v63  ;;  %v10220_v63 = vld [vmem:[#allocation2 + $0x128] sm:$0xff]  }
 0x973   : > { %8942 = vmatprep.subr.bf16.mxu0 %v10896_v0  ;;  %8953 = vmatpush3.bf16.msra.mxu1 %v10208_v55  ;;  %v10224_v55 = vld [vmem:[#allocation2 + $0x118] sm:$0xff]  }
 0x974   : > { %8954 = vmatprep.subr.bf16.mxu1 %v10896_v0 }
 0x976   : > { %8943 = vmatpush3.bf16.msra.mxu0 %v10205_v2  ;;  %v10221_v2 = vld [vmem:[#allocation2 + $0x168] sm:$0xff]  }
 0x977   : > { %8944 = vmatprep.subr.bf16.mxu0 %v10896_v0  ;;  %8955 = vmatpush3.bf16.msra.mxu1 %v10209_v56  ;;  %v10225_v56 = vld [vmem:[#allocation2 + $0x158] sm:$0xff]  }
 0x978   : > { %8956 = vmatprep.subr.bf16.mxu1 %v10896_v0 }
 0x97a   : > { %8945 = vmatpush3.bf16.msra.mxu0 %v10206_v54  ;;  %v10222_v54 = vld [vmem:[#allocation2 + $0x120] sm:$0xff]  }
 0x97b   : > { %8946 = vmatprep.subr.bf16.mxu0 %v10896_v0  ;;  %8957 = vmatpush3.bf16.msra.mxu1 %v10210_v3  ;;  %v10226_v3 = vld [vmem:[#allocation2 + $0x110] sm:$0xff]  }
 0x97c   : > { %8958 = vmatprep.subr.bf16.mxu1 %v10896_v0 }
 0x97e   : > { %8947 = vmatpush3.bf16.msra.mxu0 %v10207_v6  ;;  %v10223_v6 = vld [vmem:[#allocation2 + $0x160] sm:$0xff]  }
 0x97f   : > { %8972 = vmatprep.subr.bf16.mxu0 %v10896_v0  ;;  %8959 = vmatpush3.bf16.msra.mxu1 %v10211_v1  ;;  %v10227_v1 = vld [vmem:[#allocation2 + $0x150] sm:$0xff]  }
 0x980   : > { %8960 = vmatprep.subr.bf16.mxu1 %v10896_v0 }
 0x983   : > { %8961 = vmatpush3.bf16.msra.mxu1 %v10212_v9  ;;  %v10228_v9 = vld [vmem:[#allocation2 + $0x108] sm:$0xff]  }
 0x984   : > { %8962 = vmatprep.subr.bf16.mxu1 %v10896_v0 }
 0x987   : > { %8963 = vmatpush3.bf16.msra.mxu1 %v10213_v7  ;;  %v10229_v7 = vld [vmem:[#allocation2 + $0x148] sm:$0xff]  }
 0x988   : > { %8964 = vmatprep.subr.bf16.mxu1 %v10896_v0 }
 0x98b   : > { %8965 = vmatpush3.bf16.msra.mxu1 %v10214_v15 }
 0x98c   : > { %8966 = vmatprep.subr.bf16.mxu1 %v10896_v0 }
 0x98f   : > { %8967 = vmatpush3.bf16.msra.mxu1 %v10215_v28  ;;  %v10232_v28 = vld [vmem:[#allocation2 + $0x1b8] sm:$0xff]  }
 0x990   : > { %8992 = vmatprep.subr.bf16.mxu1 %v10896_v0 }
 0xa31   : > { %v1877_v42 = vpop.f32.mrf.mxu1 }
 0xa32   : > { %v1878_v43 = vadd.f32 %v1877_v42, %v1794_v41  ;;  %v960_v41 = vld [vmem:[#allocation5] sm:$0x3] }
 0xa33   : > { %v8930_v45 = vpop.f32.mrf.mxu1  ;;  %v2037_v42 = vrot.slane %v960_v41, %v11274_v62  ;;  %v11601_v41 = vsub.s32 5, %v11226_v20 }
 0xa34   : > { %v1883_v47 = vadd.f32 %v10548_v46, %v1878_v43 }
 0xa35   : > { %v1880_v48 = vpop.f32.mrf.mxu1 }
 0xa36   : > { %v1884_v49 = vmul.f32 %v11465_v44, %v1883_v47 }
 0xa37   : > { %v8931_v50 = vpop.f32.mrf.mxu1 }
 0xa38   : > { %1885 = vadd.xlane.f32.xlu1 %v1884_v49 }
 0xac1   : > { %v1886_v61 = vpop.xlane.xlu1 %1885 }
 0xac2   : > { %v1887_v52 = vmul.f32 0.03125, %v1886_v61  ;;  %v10218_v61 = vld [vmem:[#allocation2 + $0x130] sm:$0xff]  }
 0xac4   : > { %v1888_v53 = vsub.f32 %v1883_v47, %v1887_v52  ;;  %v10219_v52 = vld [vmem:[#allocation2 + $0x170] sm:$0xff]  }
 0xac6   : > { %v1889_v57 = vmul.f32 %v11465_v44, %v1888_v53 }
 0xac8   : > { %v1890_v58 = vmul.f32 %v1889_v57, %v1889_v57 }
 0xaca   : > { %1891 = vadd.xlane.f32.xlu1 %v1890_v58 }
 0xb53   : > { %v1892_v8 = vpop.xlane.xlu1 %1891 }
 0xb54   : > { %v1893_v10 = vmul.f32 0.03125, %v1892_v8  ;;  %v10230_v8 = vld [vmem:[#allocation2 + $0x100] sm:$0xff]  }
 0xb56   : > { %v1894_v11 = vadd.f32 1e-05, %v1893_v10  ;;  %v10231_v10 = vld [vmem:[#allocation2 + $0x140] sm:$0xff]  }
 0xb58   : > { %10448 = vrsqrt.f32 %v1894_v11 }
 0xb65   : > { %v10449_v18 = vpop.eup %10448 }
 0xb66   : > { %v1896_v23 = vmul.f32 %v10449_v18, %v1889_v57 }
 0xb68   : > { %v1901_v25 = vmul.f32 %v1900_v16, %v1896_v23  ;;  %v2143_v23 = vrot.slane %v11529_v13, %v11229_v21 }
 0xb6a   : > { %v1906_v26 = vadd.f32 %v1905_v24, %v1901_v25 }
 0xb6c   : > { %v1939_v27 = vpack.c.bf16 %v1906_v26, %v1906_v26 }
 0xb6e   : > { %8949 = vmatmul.mubr.bf16.vlgmr.msra.gmra.mxu0 %v1939_v27 }
 0xb6f   : > { %8988 = vmatprep.mubr.msk.bf16.mxu0 %vm10897_vm0, %v10896_v0  ;;  %8973 = vmatpush3.bf16.msra.mxu0 %v10216_v51 }
 0xb70   : > { %8974 = vmatprep.subr.bf16.mxu0 %v10896_v0 }
 0xb73   : > { %8975 = vmatpush3.bf16.msra.mxu0 %v10218_v61 }
 0xb74   : > { %8976 = vmatprep.subr.bf16.mxu0 %v10896_v0 }
 0xb77   : > { %8977 = vmatpush3.bf16.msra.mxu0 %v10220_v63 }
 0xb78   : > { %8978 = vmatprep.subr.bf16.mxu0 %v10896_v0 }
 0xb7b   : > { %8979 = vmatpush3.bf16.msra.mxu0 %v10222_v54 }
 0xb7c   : > { %8980 = vmatprep.subr.bf16.mxu0 %v10896_v0 }
 0xb7f   : > { %8981 = vmatpush3.bf16.msra.mxu0 %v10224_v55 }
 0xb80   : > { %8982 = vmatprep.subr.bf16.mxu0 %v10896_v0 }
 0xb83   : > { %8983 = vmatpush3.bf16.msra.mxu0 %v10226_v3 }
 0xb84   : > { %8984 = vmatprep.subr.bf16.mxu0 %v10896_v0 }
 0xb87   : > { %8985 = vmatpush3.bf16.msra.mxu0 %v10228_v9 }
 0xb88   : > { %8986 = vmatprep.subr.bf16.mxu0 %v10896_v0 }
 0xb8b   : > { %8987 = vmatpush3.bf16.msra.mxu0 %v10230_v8 }
 0xb8c   : > { %9012 = vmatprep.subr.bf16.mxu0 %v10896_v0 }
 0xc2e   : > { %v2026_v33 = vpop.f32.mrf.mxu0 }
 0xc2f   : > { %v2027_v34 = vadd.f32 %v2026_v33, %v1943_v32  ;;  %v10233_v33 = vld [vmem:[#allocation2 + $0x1b0] sm:$0xff]  }
 0xc30   : > { %v8950_v35 = vpop.f32.mrf.mxu0 }
 0xc31   : > { %v2032_v36 = vmax.f32 %v2027_v34, 0.0  ;;  %v10234_v34 = vld [vmem:[#allocation2 + $0x1a8] sm:$0xff]   ;;  %v10235_v35 = vld [vmem:[#allocation2 + $0x1a0] sm:$0xff]  }
 0xc32   : > { %v2029_v37 = vpop.f32.mrf.mxu0 }
 0xc33   : > { %v2033_v38 = vpack.c.bf16 %v2032_v36, %v2032_v36  ;;  %v10236_v36 = vld [vmem:[#allocation2 + $0x198] sm:$0xff]   ;;  %v10237_v37 = vld [vmem:[#allocation2 + $0x190] sm:$0xff]  }
 0xc34   : > { %v8951_v39 = vpop.f32.mrf.mxu0 }
 0xc35   : > { %8969 = vmatmul.mubr.bf16.vlgmr.msra.gmra.mxu1 %v2033_v38  ;;  %v10238_v38 = vld [vmem:[#allocation2 + $0x188] sm:$0xff]   ;;  %v10239_v39 = vld [vmem:[#allocation2 + $0x180] sm:$0xff]  }
 0xc36   : > { %9008 = vmatprep.mubr.msk.bf16.mxu1 %vm10897_vm0, %v10896_v0  ;;  %8993 = vmatpush3.bf16.msra.mxu1 %v10217_v22 }
 0xc37   : > { %8994 = vmatprep.subr.bf16.mxu1 %v10896_v0 }
 0xc3a   : > { %8995 = vmatpush3.bf16.msra.mxu1 %v10219_v52 }
 0xc3b   : > { %8996 = vmatprep.subr.bf16.mxu1 %v10896_v0 }
 0xc3e   : > { %8997 = vmatpush3.bf16.msra.mxu1 %v10221_v2 }
 0xc3f   : > { %8998 = vmatprep.subr.bf16.mxu1 %v10896_v0 }
 0xc42   : > { %8999 = vmatpush3.bf16.msra.mxu1 %v10223_v6 }
 0xc43   : > { %9000 = vmatprep.subr.bf16.mxu1 %v10896_v0 }
 0xc46   : > { %9001 = vmatpush3.bf16.msra.mxu1 %v10225_v56 }
 0xc47   : > { %9002 = vmatprep.subr.bf16.mxu1 %v10896_v0 }
 0xc4a   : > { %9003 = vmatpush3.bf16.msra.mxu1 %v10227_v1 }
 0xc4b   : > { %9004 = vmatprep.subr.bf16.mxu1 %v10896_v0 }
 0xc4e   : > { %9005 = vmatpush3.bf16.msra.mxu1 %v10229_v7 }
 0xc4f   : > { %9006 = vmatprep.subr.bf16.mxu1 %v10896_v0 }
 0xc52   : > { %9007 = vmatpush3.bf16.msra.mxu1 %v10231_v10 }
 0xc53   : > { %9032 = vmatprep.subr.bf16.mxu1 %v10896_v0 }
 0xcf5   : > { %v2120_v43 = vpop.f32.mrf.mxu1 }
 0xcf6   : > { %v2121_v45 = vadd.f32 %v2120_v43, %v2037_v42  ;;  %v11606_v42 = vld [vmem:[%s13032_s1] sm:$0xff] }
 0xcf7   : > { %v8970_v46 = vpop.f32.mrf.mxu1  ;;  %v2280_v43 = vrot.slane %v11606_v42, %v11601_v41 }
 0xcf8   : > { %v2126_v47 = vadd.f32 %v2121_v45, %v1906_v26  ;;  %v2148_v26 = vrot.slane %v11534_v14, %v11229_v21 }
 0xcf9   : > { %v2123_v48 = vpop.f32.mrf.mxu1 }
 0xcfa   : > { %v2127_v49 = vmul.f32 %v11465_v44, %v2126_v47 }
 0xcfb   : > { %v8971_v50 = vpop.f32.mrf.mxu1 }
 0xcfc   : > { %2128 = vadd.xlane.f32.xlu1 %v2127_v49 }
 0xd85   : > { %v2129_v53 = vpop.xlane.xlu1 %2128 }
 0xd86   : > { %v2130_v57 = vmul.f32 0.03125, %v2129_v53 }
 0xd88   : > { %v2131_v58 = vsub.f32 %v2126_v47, %v2130_v57 }
 0xd8a   : > { %v2132_v59 = vmul.f32 %v11465_v44, %v2131_v58 }
 0xd8c   : > { %v2133_v60 = vmul.f32 %v2132_v59, %v2132_v59 }
 0xd8e   : > { %2134 = vadd.xlane.f32.xlu1 %v2133_v60 }
 0xe17   : > { %v2135_v11 = vpop.xlane.xlu1 %2134 }
 0xe18   : > { %v2136_v16 = vmul.f32 0.03125, %v2135_v11 }
 0xe1a   : > { %v2137_v18 = vadd.f32 1e-05, %v2136_v16 }
 0xe1c   : > { %10450 = vrsqrt.f32 %v2137_v18 }
 0xe29   : > { %v10451_v24 = vpop.eup %10450 }
 0xe2a   : > { %v2139_v25 = vmul.f32 %v10451_v24, %v2132_v59 }
 0xe2c   : > { %v2144_v27 = vmul.f32 %v2143_v23, %v2139_v25 }
 0xe2e   : > { %v11582_v15 = vadd.f32 %v2148_v26, %v2144_v27  ;;  %v11633_v26 = vsub.s32 6, %v11226_v20  ;;  %v11638_v27 = vsub.s32 4, %v11226_v20 }
 0xe30   : > { %v2150_v32 = vpack.c.bf16 %v11582_v15, %v11582_v15 }
 0xe32   : > { %8989 = vmatmul.mubr.bf16.vlgmr.msra.gmra.mxu0 %v2150_v32  ;;  %9009 = vmatmul.mubr.bf16.vlgmr.msra.gmra.mxu1 %v2150_v32 }
 0xe33   : > { %9013 = vmatpush3.bf16.msra.mxu0 %v10232_v28  ;;  %9028 = vmatprep.mubr.msk.bf16.mxu0 %vm10897_vm0, %v10896_v0 }
 0xe34   : > { %9014 = vmatprep.subr.bf16.mxu0 %v10896_v0  ;;  %9048 = vmatprep.mubr.msk.bf16.mxu1 %vm10897_vm0, %v10896_v0 }
 0xe37   : > { %9015 = vmatpush3.bf16.msra.mxu0 %v10233_v33  ;;  %v2171_v33 = vrot.slane %v11606_v42, %v11638_v27 }
 0xe38   : > { %9016 = vmatprep.subr.bf16.mxu0 %v10896_v0 }
 0xe3b   : > { %9017 = vmatpush3.bf16.msra.mxu0 %v10234_v34 }
 0xe3c   : > { %9018 = vmatprep.subr.bf16.mxu0 %v10896_v0 }
 0xe3f   : > { %9019 = vmatpush3.bf16.msra.mxu0 %v10235_v35 }
 0xe40   : > { %9020 = vmatprep.subr.bf16.mxu0 %v10896_v0 }
 0xe43   : > { %9021 = vmatpush3.bf16.msra.mxu0 %v10236_v36 }
 0xe44   : > { %9022 = vmatprep.subr.bf16.mxu0 %v10896_v0 }
 0xe47   : > { %9023 = vmatpush3.bf16.msra.mxu0 %v10237_v37 }
 0xe48   : > { %9024 = vmatprep.subr.bf16.mxu0 %v10896_v0 }
 0xe4b   : > { %9025 = vmatpush3.bf16.msra.mxu0 %v10238_v38 }
 0xe4c   : > { %9026 = vmatprep.subr.bf16.mxu0 %v10896_v0 }
 0xe4f   : > { %9027 = vmatpush3.bf16.msra.mxu0 %v10239_v39 }
 0xe50   : > { %9052 = vmatprep.subr.bf16.mxu0 %v10896_v0 }
 0xe52   : > { %9029 = vmatmul.mubr.bf16.vlgmr.msra.gmra.mxu0 %v2150_v32  ;;  %v2389_v32 = vrot.slane %v11606_v42, %v11633_v26 }
 0xe53   : > { %9068 = vmatprep.mubr.msk.bf16.mxu0 %vm10897_vm0, %v10896_v0 }
 0xef2   : > { %v11610_v45 = vpop.f32.mrf.mxu0  ;;  %v2363_v46 = vpop.f32.mrf.mxu1 }
 0xef3   : > { %v2364_v47 = vadd.f32 %v2363_v46, %v2280_v43  ;;  %v11659_v36 = vadd.f32 %v11610_v45, %v2171_v33 }
 0xef4   : > { %v8990_v48 = vpop.f32.mrf.mxu0  ;;  %v9010_v49 = vpop.f32.mrf.mxu1 }
 0xef5   : > { %2478 = vxpose.xlu1.b32.start.end [1/1] (short) %v2364_v47, 128  ;;  %v2518_v39 = vmul.f32 %v11298_v4, %v11659_v36  ;;  %v2576_v43 = vmul.f32 %v11301_v5, %v11659_v36 }
 0xef6   : > { %v2257_v50 = vpop.f32.mrf.mxu0  ;;  %v2366_v51 = vpop.f32.mrf.mxu1 }
 0xef7   : > { %v2519_v47 = vpack.c.bf16 %v2518_v39, %v2518_v39  ;;  %v2577_v48 = vpack.c.bf16 %v2576_v43, %v2576_v43  ;;  %v2726_v51 = vmul.f32 %v11336_v17, %v11659_v36 }
 0xef8   : > { %v8991_v22 = vpop.f32.mrf.mxu0  ;;  %v9011_v61 = vpop.f32.mrf.mxu1 }
 0xef9   : > { %v2727_v61 = vpack.c.bf16 %v2726_v51, %v2726_v51 }
 0xf12   : > { %v2472_v52 = vpop.f32.mrf.mxu0 }
 0xf13   : > { %v11654_v35 = vadd.f32 %v2472_v52, %v2389_v32 }
 0xf14   : > { %v9030_v53 = vpop.f32.mrf.mxu0 }
 0xf15   : > { %v2631_v38 = vmul.f32 %v11301_v5, %v11654_v35  ;;  %v2886_v50 = vmul.f32 %v11399_v19, %v11654_v35 }
 0xf16   : > { %v2475_v57 = vpop.f32.mrf.mxu0 }
 0xf17   : > { %v2632_v46 = vpack.c.bf16 %v2631_v38, %v2631_v38  ;;  %v2887_v22 = vpack.c.bf16 %v2886_v50, %v2886_v50 }
 0xf18   : > { %v9031_v58 = vpop.f32.mrf.mxu0 }
 0xf19   : > { %v2638_v49 = vsel %vm1473_vm8, %v2632_v46, 0  ;;  %v2893_v52 = vsel %vm1473_vm8, %v2887_v22, 0 }
 0xf71   : > { %v2494_v59 = vpop.trf.xlu1 }
 0xf75   : > { %v2495_v60 = vpop.trf.xlu1 }
 0xf76   : > { %v11675_v45 = vpack.c.bf16 %v2495_v60, %v2494_v59 }
 0xf79   : > { %v2496_v63 = vpop.trf.xlu1 }
 0xf7d   : > { %v2497_v2 = vpop.trf.xlu1 }
 0xf7e   : > { %v11663_v37 = vpack.c.bf16 %v2497_v2, %v2496_v63 }
 0xf81   : > { %v2498_v54 = vpop.trf.xlu1 }
 0xf85   : > { %v2499_v6 = vpop.trf.xlu1 }
 0xf86   : > { %v11652_v34 = vpack.c.bf16 %v2499_v6, %v2498_v54 }
 0xf89   : > { %v2500_v55 = vpop.trf.xlu1 }
 0xf8d   : > { %v2501_v56 = vpop.trf.xlu1 }
 0xf8e   : > { %v11642_v28 = vpack.c.bf16 %v2501_v56, %v2500_v55 }
 0xf91   : > { %v2502_v3 = vpop.trf.xlu1 }
 0xf95   : > { %v2503_v1 = vpop.trf.xlu1 }
 0xf96   : > { %v11630_v25 = vpack.c.bf16 %v2503_v1, %v2502_v3 }
 0xf99   : > { %v2504_v9 = vpop.trf.xlu1 }
 0xf9d   : > { %v2505_v7 = vpop.trf.xlu1 }
 0xf9e   : > { %v11624_v24 = vpack.c.bf16 %v2505_v7, %v2504_v9 }
 0xfa1   : > { %v2506_v8 = vpop.trf.xlu1 }
 0xfa5   : > { %v2507_v10 = vpop.trf.xlu1 }
 0xfa6   : > { %v11618_v23 = vpack.c.bf16 %v2507_v10, %v2506_v8  ;;  %v11718_v8 = vld [vmem:[%s11350_s11] ss:$0 sm:$0xff] }
 0xfa9   : > { %v2508_v11 = vpop.trf.xlu1 }
 0xfad   : > { %v2509_v16 = vpop.trf.xlu1 }
 0xfae   : > { %v11612_v18 = vpack.c.bf16 %v2509_v16, %v2508_v11  ;;  %v11722_v11 = vld [vmem:[%s11356_s27] ss:$0 sm:$0xff] }
 0xfb0   : > { %9033 = vmatpush3.bf16.msra.mxu1 %v11612_v18  ;;  %9053 = vmatpush3.bf16.msra.mxu0 %v11612_v18 }
 0xfb1   : > { %9034 = vmatprep.subr.bf16.mxu1 %v10896_v0  ;;  %9054 = vmatprep.subr.bf16.mxu0 %v10896_v0 }
 0xfb4   : > { %9035 = vmatpush3.bf16.msra.mxu1 %v11618_v23  ;;  %9055 = vmatpush3.bf16.msra.mxu0 %v11618_v23 }
 0xfb5   : > { %9036 = vmatprep.subr.bf16.mxu1 %v10896_v0  ;;  %9056 = vmatprep.subr.bf16.mxu0 %v10896_v0 }
 0xfb8   : > { %9037 = vmatpush3.bf16.msra.mxu1 %v11624_v24  ;;  %9057 = vmatpush3.bf16.msra.mxu0 %v11624_v24 }
 0xfb9   : > { %9038 = vmatprep.subr.bf16.mxu1 %v10896_v0  ;;  %9058 = vmatprep.subr.bf16.mxu0 %v10896_v0 }
 0xfbc   : > { %9039 = vmatpush3.bf16.msra.mxu1 %v11630_v25  ;;  %9059 = vmatpush3.bf16.msra.mxu0 %v11630_v25 }
 0xfbd   : > { %9040 = vmatprep.subr.bf16.mxu1 %v10896_v0  ;;  %9060 = vmatprep.subr.bf16.mxu0 %v10896_v0 }
 0xfc0   : > { %9041 = vmatpush3.bf16.msra.mxu1 %v11642_v28  ;;  %9061 = vmatpush3.bf16.msra.mxu0 %v11642_v28 }
 0xfc1   : > { %9042 = vmatprep.subr.bf16.mxu1 %v10896_v0  ;;  %9062 = vmatprep.subr.bf16.mxu0 %v10896_v0 }
 0xfc4   : > { %9043 = vmatpush3.bf16.msra.mxu1 %v11652_v34  ;;  %9063 = vmatpush3.bf16.msra.mxu0 %v11652_v34 }
 0xfc5   : > { %9044 = vmatprep.subr.bf16.mxu1 %v10896_v0  ;;  %9064 = vmatprep.subr.bf16.mxu0 %v10896_v0 }
 0xfc8   : > { %9045 = vmatpush3.bf16.msra.mxu1 %v11663_v37  ;;  %9065 = vmatpush3.bf16.msra.mxu0 %v11663_v37 }
 0xfc9   : > { %9046 = vmatprep.subr.bf16.mxu1 %v10896_v0  ;;  %9066 = vmatprep.subr.bf16.mxu0 %v10896_v0 }
 0xfcc   : > { %9047 = vmatpush3.bf16.msra.mxu1 %v11675_v45  ;;  %9067 = vmatpush3.bf16.msra.mxu0 %v11675_v45 }
 0xfcd   : > { %9072 = vmatprep.subr.bf16.mxu1 %v10896_v0  ;;  %9084 = vmatprep.subr.bf16.mxu0 %v10896_v0 }
 0xfcf   : > { %9049 = vmatmul.mubr.bf16.vlgmr.msra.gmra.mxu1 %v2519_v47  ;;  %9069 = vmatmul.mubr.bf16.vlgmr.msra.gmra.mxu0 %v2577_v48 }
 0xfd0   : > { %9073 = vmatpush3.bf16.msra.mxu1 %v2638_v49  ;;  %9085 = vmatpush3.bf16.msra.mxu0 %v11612_v18 }
 0xfd1   : > { %9086 = vmatprep.subr.bf16.mxu0 %v10896_v0  ;;  %9100 = vmatprep.mubr.msk.bf16.mxu0 %vm10897_vm0, %v10896_v0 }
 0xfd2   : > { %9074 = vmatprep.mubr.msk.bf16.mxu1 %vm10897_vm0, %v10896_v0  ;;  %9078 = vmatprep.subr.bf16.mxu1 %v10896_v0 }
 0xfd4   : > { %9087 = vmatpush3.bf16.msra.mxu0 %v11618_v23 }
 0xfd5   : > { %9088 = vmatprep.subr.bf16.mxu0 %v10896_v0 }
 0xfd8   : > { %9089 = vmatpush3.bf16.msra.mxu0 %v11624_v24 }
 0xfd9   : > { %9090 = vmatprep.subr.bf16.mxu0 %v10896_v0 }
 0xfdc   : > { %9091 = vmatpush3.bf16.msra.mxu0 %v11630_v25 }
 0xfdd   : > { %9092 = vmatprep.subr.bf16.mxu0 %v10896_v0 }
 0xfe0   : > { %9093 = vmatpush3.bf16.msra.mxu0 %v11642_v28 }
 0xfe1   : > { %9094 = vmatprep.subr.bf16.mxu0 %v10896_v0 }
 0xfe4   : > { %9095 = vmatpush3.bf16.msra.mxu0 %v11652_v34 }
 0xfe5   : > { %9096 = vmatprep.subr.bf16.mxu0 %v10896_v0 }
 0xfe8   : > { %9097 = vmatpush3.bf16.msra.mxu0 %v11663_v37 }
 0xfe9   : > { %9098 = vmatprep.subr.bf16.mxu0 %v10896_v0 }
 0xfec   : > { %9099 = vmatpush3.bf16.msra.mxu0 %v11675_v45 }
 0xfed   : > { %9130 = vmatprep.subr.bf16.mxu0 %v10896_v0 }
 0xfef   : > { %9101 = vmatmul.mubr.bf16.vlgmr.msra.gmra.mxu0 %v2727_v61 }
 0xff0   : > { %9131 = vmatpush3.bf16.msra.mxu0 %v2893_v52  ;;  %9132 = vmatprep.mubr.msk.bf16.mxu0 %vm10897_vm0, %v10896_v0 }
 0xff1   : > { %9136 = vmatprep.subr.bf16.mxu0 %v10896_v0 }
0x108f   : > { %v2554_v53 = vpop.f32.mrf.mxu1  ;;  %v2612_v57 = vpop.f32.mrf.mxu0 }
0x1090   : > { %v2560_v58 = vmul.f32 %v11359_v29, %v2554_v53  ;;  %v2618_v59 = vmul.f32 %v11359_v29, %v2612_v57 }
0x1091   : > { %v9050_v60 = vpop.f32.mrf.mxu1  ;;  %v9070_v63 = vpop.f32.mrf.mxu0 }
0x1092   : > { %v2619_v2 = vadd.f32 %v11362_v30, %v2618_v59  ;;  %v2561_v54 = vadd.f32 %v11362_v30, %v2560_v58  ;;  %v2573_v63 = vmul.f32 %v11298_v4, %v11654_v35 }
0x1093   : > { %v2557_v6 = vpop.f32.mrf.mxu1  ;;  %v2615_v55 = vpop.f32.mrf.mxu0 }
0x1094   : > { %v2620_v56 = vsel %vm1397_vm9, %v2619_v2, -inf  ;;  %v2562_v3 = vsel %vm1397_vm9, %v2561_v54, -inf  ;;  %v2574_v6 = vpack.c.bf16 %v2573_v63, %v2573_v63 }
0x1095   : > { %2621 = vmax.xlane.f32.xlu1 %v2620_v56  ;;  %v9071_v1 = vpop.f32.mrf.mxu0  ;;  %2563 = vmax.xlane.f32.xlu0 %v2562_v3  ;;  %v9051_v9 = vpop.f32.mrf.mxu1 }
0x1096   : > { %v2684_v3 = vsel %vm1473_vm8, %v2574_v6, 0  ;;  %v2781_v1 = vmul.f32 %v11336_v17, %v11654_v35  ;;  %v10240_v6 = vld [vmem:[#allocation2 + $0x1f8] sm:$0xff]  }
0x10af   : > { %v2762_v7 = vpop.f32.mrf.mxu0 }
0x10b0   : > { %v2768_v29 = vmul.f32 %v11718_v8, %v2762_v7  ;;  %v2782_v7 = vpack.c.bf16 %v2781_v1, %v2781_v1  ;;  %v10244_v1 = vld [vmem:[#allocation2 + $0x1d8] sm:$0xff]  }
0x10b1   : > { %v9102_v10 = vpop.f32.mrf.mxu0 }
0x10b2   : > { %v2769_v30 = vadd.f32 %v11722_v11, %v2768_v29  ;;  %v2788_v10 = vsel %vm1473_vm8, %v2782_v7, 0  ;;  %v10246_v7 = vld [vmem:[#allocation2 + $0x1c8] sm:$0xff]  }
0x10b3   : > { %v2765_v16 = vpop.f32.mrf.mxu0 }
0x10b4   : > { %v2770_v32 = vsel %vm1397_vm9, %v2769_v30, -inf }
0x10b5   : > { %v9103_v33 = vpop.f32.mrf.mxu0  ;;  %2771 = vmax.xlane.f32.xlu0 %v2770_v32 }
0x111e   : > { %v2622_v38 = vpop.xlane.xlu1 %2621  ;;  %v2564_v39 = vpop.xlane.xlu0 %2563 }
0x111f   : > { %v2623_v43 = vsub.f32 %v2619_v2, %v2622_v38  ;;  %v2565_v46 = vsub.f32 %v2561_v54, %v2564_v39 }
0x1121   : > { %v2624_v47 = vmul.f32 1.442695, %v2623_v43  ;;  %v2566_v48 = vmul.f32 1.442695, %v2565_v46 }
0x1123   : > { %10452 = vpow2.f32 %v2624_v47 }
0x1124   : > { %10454 = vpow2.f32 %v2566_v48 }
0x1130   : > { %v10453_v49 = vpop.eup %10452 }
0x1131   : > { %v2626_v50 = vsel %vm1397_vm9, %v10453_v49, 0.0  ;;  %v10455_v51 = vpop.eup %10454 }
0x1132   : > { %2627 = vadd.xlane.f32.xlu0 %v2626_v50  ;;  %v2568_v22 = vsel %vm1397_vm9, %v10455_v51, 0.0 }
0x1136   : > { %2569 = vadd.xlane.f32.xlu0 %v2568_v22 }
0x113e   : > { %v2772_v61 = vpop.xlane.xlu0 %2771 }
0x113f   : > { %v2773_v52 = vsub.f32 %v2769_v30, %v2772_v61 }
0x1141   : > { %v2774_v53 = vmul.f32 1.442695, %v2773_v52 }
0x1143   : > { %10456 = vpow2.f32 %v2774_v53 }
0x1150   : > { %v10457_v57 = vpop.eup %10456 }
0x1151   : > { %v2776_v58 = vsel %vm1397_vm9, %v10457_v57, 0.0 }
0x1152   : > { %2777 = vadd.xlane.f32.xlu0 %v2776_v58 }
0x11bb   : > { %v2628_v59 = vpop.xlane.xlu0 %2627 }
0x11bc   : > { %10458 = vrcp.f32 %v2628_v59 }
0x11bf   : > { %v2570_v60 = vpop.xlane.xlu0 %2569 }
0x11c0   : > { %10460 = vrcp.f32 %v2570_v60 }
0x11c9   : > { %v10459_v2 = vpop.eup %10458 }
0x11ca   : > { %v2630_v54 = vmul.f32 %v10459_v2, %v10453_v49 }
0x11cc   : > { %v2633_v55 = vpack.c.bf16 %v2630_v54, %v2630_v54 }
0x11cd   : > { %v10461_v56 = vpop.eup %10460 }
0x11ce   : > { %9075 = vmatmul.mubr.msk.bf16.vlgmr.msra.gmra.mxu1 %vm1397_vm9, %v2633_v55  ;;  %v2572_v9 = vmul.f32 %v10461_v56, %v10455_v51  ;;  %v10242_v56 = vld [vmem:[#allocation2 + $0x1e8] sm:$0xff]  }
0x11cf   : > { %9079 = vmatpush3.bf16.msra.mxu1 %v2684_v3  ;;  %9080 = vmatprep.mubr.msk.bf16.mxu1 %vm10897_vm0, %v10896_v0  ;;  %v10243_v3 = vld [vmem:[#allocation2 + $0x1e0] sm:$0xff]  }
0x11d0   : > { %9104 = vmatprep.subr.bf16.mxu1 %v10896_v0  ;;  %v2575_v29 = vpack.c.bf16 %v2572_v9, %v2572_v9  ;;  %v10245_v9 = vld [vmem:[#allocation2 + $0x1d0] sm:$0xff]  }
0x11d6   : > { %9081 = vmatmul.mubr.msk.bf16.vlgmr.msra.gmra.mxu1 %vm1397_vm9, %v2575_v29  ;;  %v10247_v29 = vld [vmem:[#allocation2 + $0x1c0] sm:$0xff]  }
0x11d7   : > { %9105 = vmatpush3.bf16.msra.mxu1 %v2788_v10  ;;  %9106 = vmatprep.mubr.msk.bf16.mxu1 %vm10897_vm0, %v10896_v0 }
0x11d8   : > { %9110 = vmatprep.subr.bf16.mxu1 %v10896_v0 }
0x11db   : > { %v2778_v35 = vpop.xlane.xlu0 %2777 }
0x11dc   : > { %10462 = vrcp.f32 %v2778_v35 }
0x11e9   : > { %v10463_v30 = vpop.eup %10462 }
0x11ea   : > { %v2780_v16 = vmul.f32 %v10463_v30, %v10457_v57 }
0x11ec   : > { %v2783_v32 = vpack.c.bf16 %v2780_v16, %v2780_v16 }
0x11ee   : > { %9107 = vmatmul.mubr.msk.bf16.vlgmr.msra.gmra.mxu1 %vm1397_vm9, %v2783_v32 }
0x11ef   : > { %9111 = vmatpush3.bf16.msra.mxu1 %v11612_v18  ;;  %9126 = vmatprep.mubr.msk.bf16.mxu1 %vm10897_vm0, %v10896_v0  ;;  %v2831_v18 = vmul.f32 %v11399_v19, %v11659_v36 }
0x11f0   : > { %9112 = vmatprep.subr.bf16.mxu1 %v10896_v0 }
0x11f3   : > { %9113 = vmatpush3.bf16.msra.mxu1 %v11618_v23  ;;  %v2832_v23 = vpack.c.bf16 %v2831_v18, %v2831_v18 }
0x11f4   : > { %9114 = vmatprep.subr.bf16.mxu1 %v10896_v0 }
0x11f7   : > { %9115 = vmatpush3.bf16.msra.mxu1 %v11624_v24 }
0x11f8   : > { %9116 = vmatprep.subr.bf16.mxu1 %v10896_v0 }
0x11fb   : > { %9117 = vmatpush3.bf16.msra.mxu1 %v11630_v25 }
0x11fc   : > { %9118 = vmatprep.subr.bf16.mxu1 %v10896_v0 }
0x11ff   : > { %9119 = vmatpush3.bf16.msra.mxu1 %v11642_v28 }
0x1200   : > { %9120 = vmatprep.subr.bf16.mxu1 %v10896_v0 }
0x1203   : > { %9121 = vmatpush3.bf16.msra.mxu1 %v11652_v34 }
0x1204   : > { %9122 = vmatprep.subr.bf16.mxu1 %v10896_v0 }
0x1207   : > { %9123 = vmatpush3.bf16.msra.mxu1 %v11663_v37 }
0x1208   : > { %9124 = vmatprep.subr.bf16.mxu1 %v10896_v0 }
0x120b   : > { %9125 = vmatpush3.bf16.msra.mxu1 %v11675_v45 }
0x120c   : > { %9156 = vmatprep.subr.bf16.mxu1 %v10896_v0 }
0x120e   : > { %9127 = vmatmul.mubr.bf16.vlgmr.msra.gmra.mxu1 %v2832_v23  ;;  %v11784_v23 = vsub.s32 7, %v11226_v20  ;;  %v10249_v20 = vld [vmem:[%s13036_s4 + $0x70] sm:$0xff]  }
0x120f   : > { %9172 = vmatprep.mubr.msk.bf16.mxu1 %vm10897_vm0, %v10896_v0 }
0x128e   : > { %v2674_v24 = vpop.f32.mrf.mxu1 }
0x1290   : > { %v9076_v25 = vpop.f32.mrf.mxu1 }
0x1292   : > { %v2677_v28 = vpop.f32.mrf.mxu1 }
0x1294   : > { %v9077_v34 = vpop.f32.mrf.mxu1 }
0x1296   : > { %v2720_v33 = vpop.f32.mrf.mxu1 }
0x1297   : > { %v2721_v37 = vadd.f32 %v2720_v33, %v2674_v24  ;;  %v2957_v24 = vrot.slane %v11606_v42, %v11784_v23 }
0x1298   : > { %v9082_v38 = vpop.f32.mrf.mxu1 }
0x129a   : > { %v2723_v39 = vpop.f32.mrf.mxu1 }
0x129c   : > { %v9083_v43 = vpop.f32.mrf.mxu1 }
0x129d   : > { %v10248_v43 = vld [vmem:[%s13036_s4 + $0x78] sm:$0xff]  }
0x129e   : > { %9157 = vmatpush3.bf16.msra.mxu1 %v10248_v43  ;;  %v10273_v43 = vld [vmem:[#allocation7 + $0x30] sm:$0xff]  }
0x129f   : > { %9158 = vmatprep.subr.bf16.mxu1 %v10896_v0 }
0x12a2   : > { %9159 = vmatpush3.bf16.msra.mxu1 %v10249_v20  ;;  %v10274_v20 = vld [vmem:[#allocation7 + $0x28] sm:$0xff]  }
0x12a3   : > { %9160 = vmatprep.subr.bf16.mxu1 %v10896_v0 }
0x12ae   : > { %v2824_v46 = vpop.f32.mrf.mxu1 }
0x12af   : > { %v2830_v36 = vadd.f32 %v2824_v46, %v2721_v37 }
0x12b0   : > { %v9108_v47 = vpop.f32.mrf.mxu1 }
0x12b2   : > { %v2827_v45 = vpop.f32.mrf.mxu1 }
0x12b3   : > { %v10250_v45 = vld [vmem:[%s13036_s4 + $0x68] sm:$0xff]  }
0x12b4   : > { %v9109_v48 = vpop.f32.mrf.mxu1  ;;  %9161 = vmatpush3.bf16.msra.mxu1 %v10250_v45 }
0x12b5   : > { %9162 = vmatprep.subr.bf16.mxu1 %v10896_v0  ;;  %v10251_v48 = vld [vmem:[%s13036_s4 + $0x60] sm:$0xff]  }
0x12b8   : > { %9163 = vmatpush3.bf16.msra.mxu1 %v10251_v48 }
0x12b9   : > { %9164 = vmatprep.subr.bf16.mxu1 %v10896_v0 }
0x12ce   : > { %v2867_v49 = vpop.f32.mrf.mxu1 }
0x12cf   : > { %v2873_v50 = vmul.f32 %v11718_v8, %v2867_v49  ;;  %v10252_v49 = vld [vmem:[%s13036_s4 + $0x58] sm:$0xff]  }
0x12d0   : > { %v9128_v51 = vpop.f32.mrf.mxu1  ;;  %9165 = vmatpush3.bf16.msra.mxu1 %v10252_v49 }
0x12d1   : > { %v2874_v22 = vadd.f32 %v11722_v11, %v2873_v50  ;;  %v10241_v11 = vld [vmem:[#allocation2 + $0x1f0] sm:$0xff]   ;;  %9166 = vmatprep.subr.bf16.mxu1 %v10896_v0  ;;  %v10254_v51 = vld [vmem:[%s13036_s4 + $0x48] sm:$0xff]  }
0x12d2   : > { %v2870_v61 = vpop.f32.mrf.mxu1  ;;  %v10253_v50 = vld [vmem:[%s13036_s4 + $0x50] sm:$0xff]  }
0x12d3   : > { %v2875_v52 = vsel %vm1397_vm9, %v2874_v22, -inf  ;;  %v10256_v61 = vld [vmem:[%s12969_s10 + $0x78] sm:$0xff]  }
0x12d4   : > { %2876 = vmax.xlane.f32.xlu0 %v2875_v52  ;;  %v9129_v53 = vpop.f32.mrf.mxu1  ;;  %9167 = vmatpush3.bf16.msra.mxu1 %v10253_v50  ;;  %v10257_v52 = vld [vmem:[%s12969_s10 + $0x70] sm:$0xff]  }
0x12d5   : > { %9168 = vmatprep.subr.bf16.mxu1 %v10896_v0  ;;  %v10258_v53 = vld [vmem:[%s12969_s10 + $0x68] sm:$0xff]  }
0x12d8   : > { %9169 = vmatpush3.bf16.msra.mxu1 %v10254_v51  ;;  %v11903_v51 = vld [vmem:[#allocation8] sm:$0xff] }
0x12d9   : > { %9170 = vmatprep.subr.bf16.mxu1 %v10896_v0 }
0x135d   : > { %v2877_v57 = vpop.xlane.xlu0 %2876 }
0x135e   : > { %v2878_v58 = vsub.f32 %v2874_v22, %v2877_v57  ;;  %v10255_v22 = vld [vmem:[%s13036_s4 + $0x40] sm:$0xff]  }
0x135f   : > { %9171 = vmatpush3.bf16.msra.mxu1 %v10255_v22  ;;  %v10259_v57 = vld [vmem:[%s12969_s10 + $0x60] sm:$0xff]   ;;  %v3445_v22 = vrot.slane %v11903_v51, %v11229_v21 }
0x1360   : > { %v2879_v59 = vmul.f32 1.442695, %v2878_v58  ;;  %9196 = vmatprep.subr.bf16.mxu1 %v10896_v0  ;;  %v10260_v58 = vld [vmem:[%s12969_s10 + $0x58] sm:$0xff]  }
0x1362   : > { %10464 = vpow2.f32 %v2879_v59  ;;  %v10261_v59 = vld [vmem:[%s12969_s10 + $0x50] sm:$0xff]  }
0x136f   : > { %v10465_v60 = vpop.eup %10464 }
0x1370   : > { %v2881_v63 = vsel %vm1397_vm9, %v10465_v60, 0.0 }
0x1371   : > { %2882 = vadd.xlane.f32.xlu0 %v2881_v63 }
0x13fa   : > { %v2883_v2 = vpop.xlane.xlu0 %2882 }
0x13fb   : > { %10466 = vrcp.f32 %v2883_v2 }
0x1408   : > { %v10467_v54 = vpop.eup %10466 }
0x1409   : > { %v2885_v8 = vmul.f32 %v10467_v54, %v10465_v60  ;;  %v10262_v60 = vld [vmem:[%s12969_s10 + $0x48] sm:$0xff]  }
0x140b   : > { %v2888_v55 = vpack.c.bf16 %v2885_v8, %v2885_v8  ;;  %v3063_v8 = vrot.slane %v11529_v13, %v11327_v12  ;;  %v3108_v13 = vrot.slane %v11553_v31, %v11229_v21  ;;  %v10267_v31 = vld [vmem:[#allocation7 + $0x60] sm:$0xff]  }
0x140d   : > { %9133 = vmatmul.mubr.msk.bf16.vlgmr.msra.gmra.mxu0 %vm1397_vm9, %v2888_v55 }
0x140e   : > { %9137 = vmatpush3.bf16.msra.mxu0 %v10240_v6  ;;  %9152 = vmatprep.mubr.msk.bf16.mxu0 %vm10897_vm0, %v10896_v0 }
0x140f   : > { %9138 = vmatprep.subr.bf16.mxu0 %v10896_v0 }
0x1412   : > { %9139 = vmatpush3.bf16.msra.mxu0 %v10241_v11  ;;  %v3068_v11 = vrot.slane %v11534_v14, %v11327_v12 }
0x1413   : > { %9140 = vmatprep.subr.bf16.mxu0 %v10896_v0 }
0x1416   : > { %9141 = vmatpush3.bf16.msra.mxu0 %v10242_v56 }
0x1417   : > { %9142 = vmatprep.subr.bf16.mxu0 %v10896_v0 }
0x141a   : > { %9143 = vmatpush3.bf16.msra.mxu0 %v10243_v3 }
0x141b   : > { %9144 = vmatprep.subr.bf16.mxu0 %v10896_v0 }
0x141e   : > { %9145 = vmatpush3.bf16.msra.mxu0 %v10244_v1 }
0x141f   : > { %9146 = vmatprep.subr.bf16.mxu0 %v10896_v0 }
0x1422   : > { %9147 = vmatpush3.bf16.msra.mxu0 %v10245_v9  ;;  %v10263_v9 = vld [vmem:[%s12969_s10 + $0x40] sm:$0xff]  }
0x1423   : > { %9148 = vmatprep.subr.bf16.mxu0 %v10896_v0 }
0x1426   : > { %9149 = vmatpush3.bf16.msra.mxu0 %v10246_v7 }
0x1427   : > { %9150 = vmatprep.subr.bf16.mxu0 %v10896_v0 }
0x142a   : > { %9151 = vmatpush3.bf16.msra.mxu0 %v10247_v29 }
0x142b   : > { %9176 = vmatprep.subr.bf16.mxu0 %v10896_v0 }
0x14cd   : > { %v2929_v10 = vpop.f32.mrf.mxu0 }
0x14ce   : > { %v2935_v35 = vadd.f32 %v2929_v10, %v2830_v36 }
0x14cf   : > { %v9134_v30 = vpop.f32.mrf.mxu0 }
0x14d0   : > { %v2936_v16 = vpack.c.bf16 %v2935_v35, %v2935_v35  ;;  %v10264_v30 = vld [vmem:[#allocation7 + $0x78] sm:$0xff]  }
0x14d1   : > { %v2932_v32 = vpop.f32.mrf.mxu0 }
0x14d2   : > { %9153 = vmatmul.mubr.bf16.vlgmr.msra.gmra.mxu0 %v2936_v16 }
0x14d3   : > { %v9135_v18 = vpop.f32.mrf.mxu0  ;;  %9192 = vmatprep.mubr.msk.bf16.mxu0 %vm10897_vm0, %v10896_v0  ;;  %9177 = vmatpush3.bf16.msra.mxu0 %v10256_v61 }
0x14d4   : > { %9178 = vmatprep.subr.bf16.mxu0 %v10896_v0  ;;  %v10265_v18 = vld [vmem:[#allocation7 + $0x70] sm:$0xff]  }
0x14d7   : > { %9179 = vmatpush3.bf16.msra.mxu0 %v10257_v52 }
0x14d8   : > { %9180 = vmatprep.subr.bf16.mxu0 %v10896_v0 }
0x14db   : > { %9181 = vmatpush3.bf16.msra.mxu0 %v10258_v53 }
0x14dc   : > { %9182 = vmatprep.subr.bf16.mxu0 %v10896_v0 }
0x14df   : > { %9183 = vmatpush3.bf16.msra.mxu0 %v10259_v57 }
0x14e0   : > { %9184 = vmatprep.subr.bf16.mxu0 %v10896_v0 }
0x14e3   : > { %9185 = vmatpush3.bf16.msra.mxu0 %v10260_v58 }
0x14e4   : > { %9186 = vmatprep.subr.bf16.mxu0 %v10896_v0 }
0x14e7   : > { %9187 = vmatpush3.bf16.msra.mxu0 %v10261_v59  ;;  %v10280_v59 = vld [vmem:[#allocation7 + $0xb8] sm:$0xff]  }
0x14e8   : > { %9188 = vmatprep.subr.bf16.mxu0 %v10896_v0 }
0x14eb   : > { %9189 = vmatpush3.bf16.msra.mxu0 %v10262_v60  ;;  %v10281_v60 = vld [vmem:[#allocation7 + $0xb0] sm:$0xff]  }
0x14ec   : > { %9190 = vmatprep.subr.bf16.mxu0 %v10896_v0 }
0x14ef   : > { %9191 = vmatpush3.bf16.msra.mxu0 %v10263_v9 }
0x14f0   : > { %9216 = vmatprep.subr.bf16.mxu0 %v10896_v0 }
0x1592   : > { %v3040_v25 = vpop.f32.mrf.mxu0 }
0x1593   : > { %v3041_v28 = vadd.f32 %v3040_v25, %v2957_v24  ;;  %v10266_v24 = vld [vmem:[#allocation7 + $0x68] sm:$0xff]   ;;  %v10268_v25 = vld [vmem:[#allocation7 + $0x58] sm:$0xff]  }
0x1594   : > { %v9154_v34 = vpop.f32.mrf.mxu0 }
0x1595   : > { %v3046_v33 = vadd.f32 %v3041_v28, %v11582_v15  ;;  %v10269_v28 = vld [vmem:[#allocation7 + $0x50] sm:$0xff]   ;;  %v10270_v34 = vld [vmem:[#allocation7 + $0x48] sm:$0xff]  }
0x1596   : > { %v3043_v37 = vpop.f32.mrf.mxu0 }
0x1597   : > { %v3047_v38 = vmul.f32 %v11465_v44, %v3046_v33  ;;  %v11879_v37 = vld [vmem:[%s918_s25] sm:$0xff]  ;;  %s7834_s25 = sshll.u32 %s908_s8, 3 }
0x1598   : > { %v9155_v39 = vpop.f32.mrf.mxu0 }
0x1599   : > { %3048 = vadd.xlane.f32.xlu0 %v3047_v38  ;;  %v11884_v38 = vpack.c.bf16 %v11879_v37, %v11879_v37  ;;  %v10272_v39 = vld [vmem:[#allocation7 + $0x38] sm:$0xff]  }
0x1622   : > { %v3049_v15 = vpop.xlane.xlu0 %3048 }
0x1623   : > { %v3050_v42 = vmul.f32 0.03125, %v3049_v15  ;;  %v10275_v15 = vld [vmem:[#allocation7 + $0x20] sm:$0xff]  }
0x1625   : > { %v3051_v46 = vsub.f32 %v3046_v33, %v3050_v42  ;;  %v10271_v33 = vld [vmem:[#allocation7 + $0x40] sm:$0xff]   ;;  %v10276_v42 = vld [vmem:[#allocation7 + $0x18] sm:$0xff]  }
0x1627   : > { %v3052_v36 = vmul.f32 %v11465_v44, %v3051_v46  ;;  %v10277_v46 = vld [vmem:[#allocation7 + $0x10] sm:$0xff]  }
0x1629   : > { %v3053_v47 = vmul.f32 %v3052_v36, %v3052_v36 }
0x162b   : > { %3054 = vadd.xlane.f32.xlu0 %v3053_v47  ;;  %v10279_v47 = vld [vmem:[#allocation7] sm:$0xff]  }
0x16b4   : > { %v3055_v63 = vpop.xlane.xlu0 %3054 }
0x16b5   : > { %v3056_v2 = vmul.f32 0.03125, %v3055_v63  ;;  %v10282_v63 = vld [vmem:[#allocation7 + $0xa8] sm:$0xff]  }
0x16b7   : > { %v3057_v54 = vadd.f32 1e-05, %v3056_v2  ;;  %v10283_v2 = vld [vmem:[#allocation7 + $0xa0] sm:$0xff]  }
0x16b9   : > { %10468 = vrsqrt.f32 %v3057_v54  ;;  %v10284_v54 = vld [vmem:[#allocation7 + $0x98] sm:$0xff]  }
0x16c6   : > { %v10469_v6 = vpop.eup %10468 }
0x16c7   : > { %v3059_v55 = vmul.f32 %v10469_v6, %v3052_v36  ;;  %v10278_v36 = vld [vmem:[#allocation7 + $0x8] sm:$0xff]  }
0x16c8   : > { %v10286_v6 = vld [vmem:[#allocation7 + $0x88] sm:$0xff]  }
0x16c9   : > { %v3064_v56 = vmul.f32 %v3063_v8, %v3059_v55  ;;  %v10285_v8 = vld [vmem:[#allocation7 + $0x90] sm:$0xff]   ;;  %v10287_v55 = vld [vmem:[#allocation7 + $0x80] sm:$0xff]  }
0x16cb   : > { %v11855_v3 = vadd.f32 %v3068_v11, %v3064_v56 }
0x16cd   : > { %v3104_v1 = vpack.c.bf16 %v11855_v3, %v11855_v3 }
0x16cf   : > { %9173 = vmatmul.mubr.bf16.vlgmr.msra.gmra.mxu1 %v3104_v1 }
0x16d0   : > { %9212 = vmatprep.mubr.msk.bf16.mxu1 %vm10897_vm0, %v10896_v0  ;;  %9197 = vmatpush3.bf16.msra.mxu1 %v10272_v39 }
0x16d1   : > { %9198 = vmatprep.subr.bf16.mxu1 %v10896_v0 }
0x16d4   : > { %9199 = vmatpush3.bf16.msra.mxu1 %v10273_v43 }
0x16d5   : > { %9200 = vmatprep.subr.bf16.mxu1 %v10896_v0 }
0x16d8   : > { %9201 = vmatpush3.bf16.msra.mxu1 %v10274_v20 }
0x16d9   : > { %9202 = vmatprep.subr.bf16.mxu1 %v10896_v0 }
0x16dc   : > { %9203 = vmatpush3.bf16.msra.mxu1 %v10275_v15 }
0x16dd   : > { %9204 = vmatprep.subr.bf16.mxu1 %v10896_v0 }
0x16e0   : > { %9205 = vmatpush3.bf16.msra.mxu1 %v10276_v42  ;;  %v3336_v42 = vrot.slane %v11903_v51, %v11274_v62 }
0x16e1   : > { %9206 = vmatprep.subr.bf16.mxu1 %v10896_v0 }
0x16e4   : > { %9207 = vmatpush3.bf16.msra.mxu1 %v10277_v46 }
0x16e5   : > { %9208 = vmatprep.subr.bf16.mxu1 %v10896_v0 }
0x16e8   : > { %9209 = vmatpush3.bf16.msra.mxu1 %v10278_v36 }
0x16e9   : > { %9210 = vmatprep.subr.bf16.mxu1 %v10896_v0 }
0x16ec   : > { %9211 = vmatpush3.bf16.msra.mxu1 %v10279_v47 }
0x16ed   : > { %9236 = vmatprep.subr.bf16.mxu1 %v10896_v0 }
0x16ef   : > { %9213 = vmatmul.mubr.bf16.vlgmr.msra.gmra.mxu1 %v11884_v38 }
0x16f0   : > { %9252 = vmatprep.mubr.msk.bf16.mxu1 %vm10897_vm0, %v10896_v0  ;;  %9237 = vmatpush3.bf16.msra.mxu1 %v10280_v59 }
0x16f1   : > { %9238 = vmatprep.subr.bf16.mxu1 %v10896_v0 }
0x16f4   : > { %9239 = vmatpush3.bf16.msra.mxu1 %v10281_v60 }
0x16f5   : > { %9240 = vmatprep.subr.bf16.mxu1 %v10896_v0 }
0x16f8   : > { %9241 = vmatpush3.bf16.msra.mxu1 %v10282_v63 }
0x16f9   : > { %9242 = vmatprep.subr.bf16.mxu1 %v10896_v0 }
0x16fc   : > { %9243 = vmatpush3.bf16.msra.mxu1 %v10283_v2 }
0x16fd   : > { %9244 = vmatprep.subr.bf16.mxu1 %v10896_v0 }
0x1700   : > { %9245 = vmatpush3.bf16.msra.mxu1 %v10284_v54 }
0x1701   : > { %9246 = vmatprep.subr.bf16.mxu1 %v10896_v0 }
0x1704   : > { %9247 = vmatpush3.bf16.msra.mxu1 %v10285_v8 }
0x1705   : > { %9248 = vmatprep.subr.bf16.mxu1 %v10896_v0 }
0x1708   : > { %9249 = vmatpush3.bf16.msra.mxu1 %v10286_v6 }
0x1709   : > { %9250 = vmatprep.subr.bf16.mxu1 %v10896_v0 }
0x170c   : > { %9251 = vmatpush3.bf16.msra.mxu1 %v10287_v55 }
0x170d   : > { %9276 = vmatprep.subr.bf16.mxu1 %v10896_v0 }
0x170f   : > { %9253 = vmatmul.mubr.bf16.vlgmr.msra.gmra.mxu1 %v11884_v38 }
0x1710   : > { %9292 = vmatprep.mubr.msk.bf16.mxu1 %vm10897_vm0, %v10896_v0 }
0x178f   : > { %v3191_v14 = vpop.f32.mrf.mxu1 }
0x1790   : > { %v3192_v7 = vadd.f32 %v3191_v14, %v3108_v13 }
0x1791   : > { %v9174_v29 = vpop.f32.mrf.mxu1 }
0x1792   : > { %v3197_v10 = vmax.f32 %v3192_v7, 0.0 }
0x1793   : > { %v3194_v35 = vpop.f32.mrf.mxu1 }
0x1794   : > { %v3198_v16 = vpack.c.bf16 %v3197_v10, %v3197_v10 }
0x1795   : > { %v9175_v32 = vpop.f32.mrf.mxu1 }
0x1796   : > { %9193 = vmatmul.mubr.bf16.vlgmr.msra.gmra.mxu0 %v3198_v16 }
0x1797   : > { %9217 = vmatpush3.bf16.msra.mxu0 %v10264_v30  ;;  %9232 = vmatprep.mubr.msk.bf16.mxu0 %vm10897_vm0, %v10896_v0 }
0x1798   : > { %9218 = vmatprep.subr.bf16.mxu0 %v10896_v0 }
0x179b   : > { %9219 = vmatpush3.bf16.msra.mxu0 %v10265_v18 }
0x179c   : > { %9220 = vmatprep.subr.bf16.mxu0 %v10896_v0 }
0x179f   : > { %9221 = vmatpush3.bf16.msra.mxu0 %v10266_v24 }
0x17a0   : > { %9222 = vmatprep.subr.bf16.mxu0 %v10896_v0 }
0x17a3   : > { %9223 = vmatpush3.bf16.msra.mxu0 %v10267_v31 }
0x17a4   : > { %9224 = vmatprep.subr.bf16.mxu0 %v10896_v0 }
0x17a7   : > { %9225 = vmatpush3.bf16.msra.mxu0 %v10268_v25 }
0x17a8   : > { %9226 = vmatprep.subr.bf16.mxu0 %v10896_v0 }
0x17ab   : > { %9227 = vmatpush3.bf16.msra.mxu0 %v10269_v28 }
0x17ac   : > { %9228 = vmatprep.subr.bf16.mxu0 %v10896_v0 }
0x17af   : > { %9229 = vmatpush3.bf16.msra.mxu0 %v10270_v34  ;;  %v3419_v11 = vpop.f32.mrf.mxu1 }
0x17b0   : > { %9230 = vmatprep.subr.bf16.mxu0 %v10896_v0  ;;  %v11952_v36 = vadd.f32 %v3419_v11, %v3336_v42  ;;  %v12003_v11 = vld [vmem:[%s11994_s0] sm:$0xff] }
0x17b1   : > { %v9214_v56 = vpop.f32.mrf.mxu1 }
0x17b2   : > { %v12006_v56 = vld [vmem:[%s12000_s2] sm:$0xff] }
0x17b3   : > { %9231 = vmatpush3.bf16.msra.mxu0 %v10271_v33  ;;  %v3422_v1 = vpop.f32.mrf.mxu1 }
0x17b4   : > { %9256 = vmatprep.subr.bf16.mxu0 %v10896_v0 }
0x17b5   : > { %v9215_v9 = vpop.f32.mrf.mxu1 }
0x17b6   : > { %9233 = vmatmul.mubr.bf16.vlgmr.msra.gmra.mxu0 %v11884_v38 }
0x17b7   : > { %9272 = vmatprep.mubr.msk.bf16.mxu0 %vm10897_vm0, %v10896_v0 }
0x1856   : > { %v11901_v45 = vpop.f32.mrf.mxu0 }
0x1858   : > { %v9194_v48 = vpop.f32.mrf.mxu0 }
0x1859   : > { %v3683_v48 = vmul.f32 %v11298_v4, %v11952_v36 }
0x185a   : > { %v3288_v49 = vpop.f32.mrf.mxu0 }
0x185b   : > { %v3741_v49 = vmul.f32 %v11301_v5, %v11952_v36 }
0x185c   : > { %v9195_v50 = vpop.f32.mrf.mxu0 }
0x1876   : > { %v3528_v61 = vpop.f32.mrf.mxu0 }
0x1877   : > { %v3529_v52 = vadd.f32 %v3528_v61, %v3445_v22  ;;  %v3684_v22 = vpack.c.bf16 %v3683_v48, %v3683_v48  ;;  %v3742_v61 = vpack.c.bf16 %v3741_v49, %v3741_v49 }
0x1878   : > { %v9234_v53 = vpop.f32.mrf.mxu0 }
0x1879   : > { %3643 = vxpose.xlu0.b32.start.end [1/1] (short) %v3529_v52, 128  ;;  %v3554_v52 = vrot.slane %v11903_v51, %v11327_v12  ;;  %v3637_v53 = vpop.f32.mrf.mxu1 }
0x187a   : > { %v3531_v57 = vpop.f32.mrf.mxu0 }
0x187b   : > { %v11980_v57 = vadd.f32 %v3637_v53, %v3554_v52  ;;  %v3891_v53 = vmul.f32 %v11336_v17, %v11952_v36 }
0x187c   : > { %v9235_v58 = vpop.f32.mrf.mxu0 }
0x187d   : > { %v9254_v58 = vpop.f32.mrf.mxu1  ;;  %v3796_v59 = vmul.f32 %v11301_v5, %v11980_v57  ;;  %v3738_v60 = vmul.f32 %v11298_v4, %v11980_v57  ;;  %v4051_v52 = vmul.f32 %v11399_v19, %v11980_v57 }
0x187f   : > { %v3640_v63 = vpop.f32.mrf.mxu1  ;;  %v3797_v2 = vpack.c.bf16 %v3796_v59, %v3796_v59  ;;  %v3739_v54 = vpack.c.bf16 %v3738_v60, %v3738_v60  ;;  %v4052_v58 = vpack.c.bf16 %v4051_v52, %v4051_v52  ;;  %v3892_v59 = vpack.c.bf16 %v3891_v53, %v3891_v53 }
0x1881   : > { %v9255_v8 = vpop.f32.mrf.mxu1  ;;  %v3803_v6 = vsel %vm1473_vm8, %v3797_v2, 0  ;;  %v3849_v55 = vsel %vm1473_vm8, %v3739_v54, 0  ;;  %v4058_v60 = vsel %vm1473_vm8, %v4052_v58, 0 }
0x18f5   : > { %v3659_v13 = vpop.trf.xlu0 }
0x18f9   : > { %v3660_v14 = vpop.trf.xlu0 }
0x18fa   : > { %v11968_v50 = vpack.c.bf16 %v3660_v14, %v3659_v13 }
0x18fd   : > { %v3661_v7 = vpop.trf.xlu0 }
0x1901   : > { %v3662_v29 = vpop.trf.xlu0 }
0x1902   : > { %v11958_v47 = vpack.c.bf16 %v3662_v29, %v3661_v7 }
0x1905   : > { %v3663_v10 = vpop.trf.xlu0 }
0x1909   : > { %v3664_v35 = vpop.trf.xlu0 }
0x190a   : > { %v11950_v46 = vpack.c.bf16 %v3664_v35, %v3663_v10 }
0x190d   : > { %v3665_v30 = vpop.trf.xlu0 }
0x1911   : > { %v3666_v16 = vpop.trf.xlu0 }
0x1912   : > { %v11942_v15 = vpack.c.bf16 %v3666_v16, %v3665_v30 }
0x1915   : > { %v3667_v32 = vpop.trf.xlu0 }
0x1919   : > { %v3668_v18 = vpop.trf.xlu0 }
0x191a   : > { %v11936_v20 = vpack.c.bf16 %v3668_v18, %v3667_v32 }
0x191d   : > { %v3669_v24 = vpop.trf.xlu0 }
0x1921   : > { %v3670_v31 = vpop.trf.xlu0 }
0x1922   : > { %v11930_v43 = vpack.c.bf16 %v3670_v31, %v3669_v24 }
0x1925   : > { %v3671_v25 = vpop.trf.xlu0 }
0x1929   : > { %v3672_v28 = vpop.trf.xlu0 }
0x192a   : > { %v11924_v39 = vpack.c.bf16 %v3672_v28, %v3671_v25 }
0x192d   : > { %v3673_v34 = vpop.trf.xlu0 }
0x1931   : > { %v3674_v33 = vpop.trf.xlu0 }
0x1932   : > { %v11918_v38 = vpack.c.bf16 %v3674_v33, %v3673_v34 }
0x1934   : > { %9257 = vmatpush3.bf16.msra.mxu0 %v11918_v38  ;;  %9277 = vmatpush3.bf16.msra.mxu1 %v11918_v38 }
0x1935   : > { %9258 = vmatprep.subr.bf16.mxu0 %v10896_v0  ;;  %9278 = vmatprep.subr.bf16.mxu1 %v10896_v0 }
0x1938   : > { %9259 = vmatpush3.bf16.msra.mxu0 %v11924_v39  ;;  %9279 = vmatpush3.bf16.msra.mxu1 %v11924_v39 }
0x1939   : > { %9260 = vmatprep.subr.bf16.mxu0 %v10896_v0  ;;  %9280 = vmatprep.subr.bf16.mxu1 %v10896_v0 }
0x193c   : > { %9261 = vmatpush3.bf16.msra.mxu0 %v11930_v43  ;;  %9281 = vmatpush3.bf16.msra.mxu1 %v11930_v43 }
0x193d   : > { %9262 = vmatprep.subr.bf16.mxu0 %v10896_v0  ;;  %9282 = vmatprep.subr.bf16.mxu1 %v10896_v0 }
0x1940   : > { %9263 = vmatpush3.bf16.msra.mxu0 %v11936_v20  ;;  %9283 = vmatpush3.bf16.msra.mxu1 %v11936_v20 }
0x1941   : > { %9264 = vmatprep.subr.bf16.mxu0 %v10896_v0  ;;  %9284 = vmatprep.subr.bf16.mxu1 %v10896_v0 }
0x1944   : > { %9265 = vmatpush3.bf16.msra.mxu0 %v11942_v15  ;;  %9285 = vmatpush3.bf16.msra.mxu1 %v11942_v15 }
0x1945   : > { %9266 = vmatprep.subr.bf16.mxu0 %v10896_v0  ;;  %9286 = vmatprep.subr.bf16.mxu1 %v10896_v0 }
0x1948   : > { %9267 = vmatpush3.bf16.msra.mxu0 %v11950_v46  ;;  %9287 = vmatpush3.bf16.msra.mxu1 %v11950_v46 }
0x1949   : > { %9268 = vmatprep.subr.bf16.mxu0 %v10896_v0  ;;  %9288 = vmatprep.subr.bf16.mxu1 %v10896_v0 }
0x194c   : > { %9269 = vmatpush3.bf16.msra.mxu0 %v11958_v47  ;;  %9289 = vmatpush3.bf16.msra.mxu1 %v11958_v47 }
0x194d   : > { %9270 = vmatprep.subr.bf16.mxu0 %v10896_v0  ;;  %9290 = vmatprep.subr.bf16.mxu1 %v10896_v0 }
0x1950   : > { %9271 = vmatpush3.bf16.msra.mxu0 %v11968_v50  ;;  %9291 = vmatpush3.bf16.msra.mxu1 %v11968_v50 }
0x1951   : > { %9296 = vmatprep.subr.bf16.mxu0 %v10896_v0  ;;  %9302 = vmatprep.subr.bf16.mxu1 %v10896_v0 }
0x1953   : > { %9273 = vmatmul.mubr.bf16.vlgmr.msra.gmra.mxu0 %v3684_v22  ;;  %9293 = vmatmul.mubr.bf16.vlgmr.msra.gmra.mxu1 %v3742_v61 }
0x1954   : > { %9298 = vmatprep.mubr.msk.bf16.mxu0 %vm10897_vm0, %v10896_v0  ;;  %9304 = vmatprep.mubr.msk.bf16.mxu1 %vm10897_vm0, %v10896_v0 }
0x1955   : > { %9297 = vmatpush3.bf16.msra.mxu0 %v3803_v6  ;;  %9303 = vmatpush3.bf16.msra.mxu1 %v3849_v55 }
0x1956   : > { %9308 = vmatprep.subr.bf16.mxu0 %v10896_v0  ;;  %9328 = vmatprep.subr.bf16.mxu1 %v10896_v0 }
0x1a13   : > { %v3719_v1 = vpop.f32.mrf.mxu0  ;;  %v3777_v9 = vpop.f32.mrf.mxu1 }
0x1a14   : > { %v3783_v13 = vmul.f32 %v3777_v9, %v12003_v11  ;;  %v3725_v25 = vmul.f32 %v3719_v1, %v12003_v11 }
0x1a15   : > { %v9274_v14 = vpop.f32.mrf.mxu0  ;;  %v9294_v7 = vpop.f32.mrf.mxu1 }
0x1a16   : > { %v3784_v29 = vadd.f32 %v3783_v13, %v12006_v56  ;;  %v3726_v33 = vadd.f32 %v3725_v25, %v12006_v56  ;;  %v3946_v25 = vmul.f32 %v11336_v17, %v11980_v57 }
0x1a17   : > { %v3722_v10 = vpop.f32.mrf.mxu0  ;;  %v3780_v35 = vpop.f32.mrf.mxu1 }
0x1a18   : > { %v3785_v30 = vsel %vm1397_vm9, %v3784_v29, -inf  ;;  %v3727_v42 = vsel %vm1397_vm9, %v3726_v33, -inf }
0x1a19   : > { %v9275_v16 = vpop.f32.mrf.mxu0  ;;  %3786 = vmax.xlane.f32.xlu0 %v3785_v30  ;;  %v9295_v32 = vpop.f32.mrf.mxu1 }
0x1aa2   : > { %v3787_v18 = vpop.xlane.xlu0 %3786 }
0x1aa3   : > { %v3788_v24 = vsub.f32 %v3784_v29, %v3787_v18 }
0x1aa5   : > { %v3789_v31 = vmul.f32 1.442695, %v3788_v24 }
0x1aa7   : > { %10470 = vpow2.f32 %v3789_v31 }
0x1ab4   : > { %v10471_v28 = vpop.eup %10470 }
0x1ab5   : > { %v3791_v34 = vsel %vm1397_vm9, %v10471_v28, 0.0 }
0x1ab6   : > { %3792 = vadd.xlane.f32.xlu1 %v3791_v34 }
0x1aba   : > { %3728 = vmax.xlane.f32.xlu1 %v3727_v42 }
0x1b3f   : > { %v3793_v48 = vpop.xlane.xlu1 %3792 }
0x1b40   : > { %10472 = vrcp.f32 %v3793_v48  ;;  %v3947_v48 = vpack.c.bf16 %v3946_v25, %v3946_v25 }
0x1b43   : > { %v3729_v6 = vpop.xlane.xlu1 %3728 }
0x1b44   : > { %v3730_v55 = vsub.f32 %v3726_v33, %v3729_v6 }
0x1b46   : > { %v3731_v1 = vmul.f32 1.442695, %v3730_v55 }
0x1b48   : > { %10474 = vpow2.f32 %v3731_v1 }
0x1b4d   : > { %v10473_v49 = vpop.eup %10472 }
0x1b4e   : > { %v3795_v22 = vmul.f32 %v10473_v49, %v10471_v28 }
0x1b50   : > { %v3798_v61 = vpack.c.bf16 %v3795_v22, %v3795_v22  ;;  %v3953_v22 = vsel %vm1473_vm8, %v3947_v48, 0  ;;  %v10291_v48 = vld [vmem:[#allocation7 + $0xe0] sm:$0xff]  }
0x1b52   : > { %9299 = vmatmul.mubr.msk.bf16.vlgmr.msra.gmra.mxu0 %vm1397_vm9, %v3798_v61 }
0x1b53   : > { %9309 = vmatpush3.bf16.msra.mxu0 %v11918_v38  ;;  %9324 = vmatprep.mubr.msk.bf16.mxu0 %vm10897_vm0, %v10896_v0 }
0x1b54   : > { %9310 = vmatprep.subr.bf16.mxu0 %v10896_v0 }
0x1b55   : > { %v10475_v35 = vpop.eup %10474 }
0x1b56   : > { %v3733_v16 = vsel %vm1397_vm9, %v10475_v35, 0.0 }
0x1b57   : > { %9311 = vmatpush3.bf16.msra.mxu0 %v11924_v39 }
0x1b58   : > { %9312 = vmatprep.subr.bf16.mxu0 %v10896_v0 }
0x1b5b   : > { %9313 = vmatpush3.bf16.msra.mxu0 %v11930_v43 }
0x1b5c   : > { %9314 = vmatprep.subr.bf16.mxu0 %v10896_v0 }
0x1b5f   : > { %9315 = vmatpush3.bf16.msra.mxu0 %v11936_v20 }
0x1b60   : > { %9316 = vmatprep.subr.bf16.mxu0 %v10896_v0 }
0x1b63   : > { %9317 = vmatpush3.bf16.msra.mxu0 %v11942_v15 }
0x1b64   : > { %9318 = vmatprep.subr.bf16.mxu0 %v10896_v0 }
0x1b67   : > { %9319 = vmatpush3.bf16.msra.mxu0 %v11950_v46 }
0x1b68   : > { %9320 = vmatprep.subr.bf16.mxu0 %v10896_v0 }
0x1b6b   : > { %9321 = vmatpush3.bf16.msra.mxu0 %v11958_v47 }
0x1b6c   : > { %9322 = vmatprep.subr.bf16.mxu0 %v10896_v0 }
0x1b6f   : > { %9323 = vmatpush3.bf16.msra.mxu0 %v11968_v50 }
0x1b70   : > { %9354 = vmatprep.subr.bf16.mxu0 %v10896_v0 }
0x1b72   : > { %9325 = vmatmul.mubr.bf16.vlgmr.msra.gmra.mxu0 %v3892_v59 }
0x1b73   : > { %9355 = vmatpush3.bf16.msra.mxu0 %v4058_v60  ;;  %9356 = vmatprep.mubr.msk.bf16.mxu0 %vm10897_vm0, %v10896_v0 }
0x1b74   : > { %9360 = vmatprep.subr.bf16.mxu0 %v10896_v0 }
0x1c12   : > { %v12042_v63 = vpop.f32.mrf.mxu0 }
0x1c14   : > { %v9300_v2 = vpop.f32.mrf.mxu0 }
0x1c16   : > { %v3842_v54 = vpop.f32.mrf.mxu0 }
0x1c18   : > { %v9301_v8 = vpop.f32.mrf.mxu0 }
0x1c32   : > { %v3927_v9 = vpop.f32.mrf.mxu0 }
0x1c33   : > { %v3933_v13 = vmul.f32 %v3927_v9, %v12003_v11 }
0x1c34   : > { %v9326_v14 = vpop.f32.mrf.mxu0 }
0x1c35   : > { %v3934_v7 = vadd.f32 %v3933_v13, %v12006_v56 }
0x1c36   : > { %v3930_v29 = vpop.f32.mrf.mxu0 }
0x1c37   : > { %v3935_v10 = vsel %vm1397_vm9, %v3934_v7, -inf }
0x1c38   : > { %3936 = vmax.xlane.f32.xlu1 %v3935_v10  ;;  %v9327_v30 = vpop.f32.mrf.mxu0 }
0x1c3c   : > { %3734 = vadd.xlane.f32.xlu1 %v3733_v16 }
0x1cc1   : > { %v3937_v32 = vpop.xlane.xlu1 %3936 }
0x1cc2   : > { %v3938_v18 = vsub.f32 %v3934_v7, %v3937_v32  ;;  %v10552_v7 = vld [vmem:[#allocation5] sm:$0x3] }
0x1cc3   : > { %v3202_v29 = vrot.slane %v10552_v7, %v11229_v21 }
0x1cc4   : > { %v3939_v24 = vmul.f32 1.442695, %v3938_v18 }
0x1cc5   : > { %v3735_v31 = vpop.xlane.xlu1 %3734  ;;  %v3286_v10 = vadd.f32 %v11901_v45, %v3202_v29 }
0x1cc6   : > { %10476 = vpow2.f32 %v3939_v24 }
0x1cc7   : > { %10478 = vrcp.f32 %v3735_v31 }
0x1cd3   : > { %v10477_v28 = vpop.eup %10476 }
0x1cd4   : > { %v10479_v34 = vpop.eup %10478  ;;  %v3941_v33 = vsel %vm1397_vm9, %v10477_v28, 0.0 }
0x1cd5   : > { %3942 = vadd.xlane.f32.xlu1 %v3941_v33  ;;  %v3737_v42 = vmul.f32 %v10479_v34, %v10475_v35  ;;  %v10289_v33 = vld [vmem:[#allocation7 + $0xf0] sm:$0xff]  }
0x1cd7   : > { %v3740_v49 = vpack.c.bf16 %v3737_v42, %v3737_v42  ;;  %v10290_v42 = vld [vmem:[#allocation7 + $0xe8] sm:$0xff]  }
0x1cd9   : > { %9305 = vmatmul.mubr.msk.bf16.vlgmr.msra.gmra.mxu1 %vm1397_vm9, %v3740_v49  ;;  %v10292_v49 = vld [vmem:[#allocation7 + $0xd8] sm:$0xff]  }
0x1cda   : > { %9329 = vmatpush3.bf16.msra.mxu1 %v3953_v22  ;;  %9330 = vmatprep.mubr.msk.bf16.mxu1 %vm10897_vm0, %v10896_v0  ;;  %v10293_v22 = vld [vmem:[#allocation7 + $0xd0] sm:$0xff]  }
0x1cdb   : > { %9334 = vmatprep.subr.bf16.mxu1 %v10896_v0 }
0x1d5e   : > { %v3943_v61 = vpop.xlane.xlu1 %3942 }
0x1d5f   : > { %10480 = vrcp.f32 %v3943_v61  ;;  %v10294_v61 = vld [vmem:[#allocation7 + $0xc8] sm:$0xff]  }
0x1d6c   : > { %v10481_v57 = vpop.eup %10480 }
0x1d6d   : > { %v3945_v52 = vmul.f32 %v10481_v57, %v10477_v28  ;;  %v10295_v57 = vld [vmem:[#allocation7 + $0xc0] sm:$0xff]  }
0x1d6f   : > { %v3948_v53 = vpack.c.bf16 %v3945_v52, %v3945_v52 }
0x1d71   : > { %9331 = vmatmul.mubr.msk.bf16.vlgmr.msra.gmra.mxu1 %vm1397_vm9, %v3948_v53 }
0x1d72   : > { %9335 = vmatpush3.bf16.msra.mxu1 %v11918_v38  ;;  %9350 = vmatprep.mubr.msk.bf16.mxu1 %vm10897_vm0, %v10896_v0  ;;  %v3996_v38 = vmul.f32 %v11399_v19, %v11952_v36 }
0x1d73   : > { %9336 = vmatprep.subr.bf16.mxu1 %v10896_v0 }
0x1d76   : > { %9337 = vmatpush3.bf16.msra.mxu1 %v11924_v39  ;;  %v3997_v39 = vpack.c.bf16 %v3996_v38, %v3996_v38 }
0x1d77   : > { %9338 = vmatprep.subr.bf16.mxu1 %v10896_v0 }
0x1d7a   : > { %9339 = vmatpush3.bf16.msra.mxu1 %v11930_v43 }
0x1d7b   : > { %9340 = vmatprep.subr.bf16.mxu1 %v10896_v0 }
0x1d7e   : > { %9341 = vmatpush3.bf16.msra.mxu1 %v11936_v20 }
0x1d7f   : > { %9342 = vmatprep.subr.bf16.mxu1 %v10896_v0 }
0x1d82   : > { %9343 = vmatpush3.bf16.msra.mxu1 %v11942_v15 }
0x1d83   : > { %9344 = vmatprep.subr.bf16.mxu1 %v10896_v0 }
0x1d86   : > { %9345 = vmatpush3.bf16.msra.mxu1 %v11950_v46 }
0x1d87   : > { %9346 = vmatprep.subr.bf16.mxu1 %v10896_v0 }
0x1d8a   : > { %9347 = vmatpush3.bf16.msra.mxu1 %v11958_v47 }
0x1d8b   : > { %9348 = vmatprep.subr.bf16.mxu1 %v10896_v0 }
0x1d8e   : > { %9349 = vmatpush3.bf16.msra.mxu1 %v11968_v50 }
0x1d8f   : > { %9380 = vmatprep.subr.bf16.mxu1 %v10896_v0 }
0x1d91   : > { %9351 = vmatmul.mubr.bf16.vlgmr.msra.gmra.mxu1 %v3997_v39 }
0x1d92   : > { %9396 = vmatprep.mubr.msk.bf16.mxu1 %vm10897_vm0, %v10896_v0 }
0x1d99   : > { %v3885_v43 = vpop.f32.mrf.mxu1 }
0x1d9a   : > { %v3886_v47 = vadd.f32 %v3885_v43, %v12042_v63 }
0x1d9b   : > { %v9306_v20 = vpop.f32.mrf.mxu1 }
0x1d9c   : > { %v10296_v20 = vld [vmem:[#allocation7 + $0x178] sm:$0xff]  }
0x1d9d   : > { %v3888_v15 = vpop.f32.mrf.mxu1 }
0x1d9f   : > { %v9307_v46 = vpop.f32.mrf.mxu1 }
0x1e31   : > { %v3989_v58 = vpop.f32.mrf.mxu1 }
0x1e32   : > { %v12080_v59 = vadd.f32 %v3989_v58, %v3886_v47 }
0x1e33   : > { %v9332_v60 = vpop.f32.mrf.mxu1 }
0x1e34   : > { %v10297_v60 = vld [vmem:[#allocation7 + $0x170] sm:$0xff]  }
0x1e35   : > { %v3992_v36 = vpop.f32.mrf.mxu1 }
0x1e36   : > { %v10298_v36 = vld [vmem:[#allocation7 + $0x168] sm:$0xff]  }
0x1e37   : > { %v9333_v2 = vpop.f32.mrf.mxu1 }
0x1e38   : > { %v10300_v2 = vld [vmem:[#allocation7 + $0x158] sm:$0xff]  }
0x1e51   : > { %v4032_v50 = vpop.f32.mrf.mxu1 }
0x1e52   : > { %v4038_v54 = vmul.f32 %v4032_v50, %v12003_v11  ;;  %v3291_v11 = vadd.f32 %v3286_v10, %v11855_v3  ;;  %v10288_v3 = vld [vmem:[#allocation7 + $0xf8] sm:$0xff]   ;;  %v4122_v10 = vrot.slane %v11903_v51, %v11458_v40 }
0x1e53   : > { %v9352_v8 = vpop.f32.mrf.mxu1 }
0x1e54   : > { %v4039_v6 = vadd.f32 %v4038_v54, %v12006_v56  ;;  %v3292_v56 = vmul.f32 %v11465_v44, %v3291_v11  ;;  %v10301_v54 = vld [vmem:[#allocation7 + $0x150] sm:$0xff]  }
0x1e55   : > { %v4035_v55 = vpop.f32.mrf.mxu1 }
0x1e56   : > { %v4040_v1 = vsel %vm1397_vm9, %v4039_v6, -inf }
0x1e57   : > { %4041 = vmax.xlane.f32.xlu1 %v4040_v1  ;;  %v9353_v9 = vpop.f32.mrf.mxu1  ;;  %v10302_v1 = vld [vmem:[#allocation7 + $0x148] sm:$0xff]  }
0x1ee0   : > { %v4042_v13 = vpop.xlane.xlu1 %4041 }
0x1ee1   : > { %v4043_v14 = vsub.f32 %v4039_v6, %v4042_v13  ;;  %v10553_v6 = vld [vmem:[%s12971_s12] sm:$0xf] }
0x1ee2   : > { %v3308_v55 = vrot.slane %v10553_v6, %v11458_v40  ;;  %v10554_v13 = vld [vmem:[%s12972_s13] sm:$0xf]  ;;  %v10313_v6 = vld [vmem:[#allocation7 + $0x1b0] sm:$0xff]  }
0x1ee3   : > { %v4044_v63 = vmul.f32 1.442695, %v4043_v14  ;;  %v3313_v14 = vrot.slane %v10554_v13, %v11458_v40  ;;  %v10316_v13 = vld [vmem:[#allocation7 + $0x198] sm:$0xff]  }
0x1ee5   : > { %10482 = vpow2.f32 %v4044_v63  ;;  %v10303_v63 = vld [vmem:[#allocation7 + $0x140] sm:$0xff]  }
0x1ef2   : > { %v10483_v35 = vpop.eup %10482 }
0x1ef3   : > { %v4046_v30 = vsel %vm1397_vm9, %v10483_v35, 0.0 }
0x1ef4   : > { %4047 = vadd.xlane.f32.xlu1 %v4046_v30 }
0x1ef8   : > { %3293 = vadd.xlane.f32.xlu1 %v3292_v56 }
0x1f7d   : > { %v4048_v16 = vpop.xlane.xlu1 %4047 }
0x1f7e   : > { %10484 = vrcp.f32 %v4048_v16 }
0x1f81   : > { %v3294_v32 = vpop.xlane.xlu1 %3293 }
0x1f82   : > { %v3295_v18 = vmul.f32 0.03125, %v3294_v32 }
0x1f84   : > { %v3296_v24 = vsub.f32 %v3291_v11, %v3295_v18 }
0x1f86   : > { %v3297_v31 = vmul.f32 %v11465_v44, %v3296_v24 }
0x1f88   : > { %v3298_v25 = vmul.f32 %v3297_v31, %v3297_v31 }
0x1f8a   : > { %3299 = vadd.xlane.f32.xlu1 %v3298_v25 }
0x1f8b   : > { %v10485_v28 = vpop.eup %10484 }
0x1f8c   : > { %v4050_v45 = vmul.f32 %v10485_v28, %v10483_v35 }
0x1f8e   : > { %v4053_v34 = vpack.c.bf16 %v4050_v45, %v4050_v45  ;;  %v10304_v45 = vld [vmem:[#allocation7 + $0x138] sm:$0xff]  }
0x1f8f   : > { %9381 = vmatpush3.bf16.msra.mxu1 %v10304_v45 }
0x1f90   : > { %9357 = vmatmul.mubr.msk.bf16.vlgmr.msra.gmra.mxu0 %vm1397_vm9, %v4053_v34  ;;  %v10305_v34 = vld [vmem:[#allocation7 + $0x130] sm:$0xff]   ;;  %9382 = vmatprep.subr.bf16.mxu1 %v10896_v0 }
0x1f91   : > { %9376 = vmatprep.mubr.msk.bf16.mxu0 %vm10897_vm0, %v10896_v0  ;;  %9361 = vmatpush3.bf16.msra.mxu0 %v10288_v3 }
0x1f92   : > { %9362 = vmatprep.subr.bf16.mxu0 %v10896_v0 }
0x1f93   : > { %9383 = vmatpush3.bf16.msra.mxu1 %v10305_v34 }
0x1f94   : > { %9384 = vmatprep.subr.bf16.mxu1 %v10896_v0 }
0x1f95   : > { %9363 = vmatpush3.bf16.msra.mxu0 %v10289_v33 }
0x1f96   : > { %9364 = vmatprep.subr.bf16.mxu0 %v10896_v0 }
0x1f99   : > { %9365 = vmatpush3.bf16.msra.mxu0 %v10290_v42 }
0x1f9a   : > { %9366 = vmatprep.subr.bf16.mxu0 %v10896_v0 }
0x1f9d   : > { %9367 = vmatpush3.bf16.msra.mxu0 %v10291_v48 }
0x1f9e   : > { %9368 = vmatprep.subr.bf16.mxu0 %v10896_v0 }
0x1fa1   : > { %9369 = vmatpush3.bf16.msra.mxu0 %v10292_v49  ;;  %v10306_v49 = vld [vmem:[#allocation7 + $0x128] sm:$0xff]  }
0x1fa2   : > { %9370 = vmatprep.subr.bf16.mxu0 %v10896_v0  ;;  %9385 = vmatpush3.bf16.msra.mxu1 %v10306_v49 }
0x1fa3   : > { %9386 = vmatprep.subr.bf16.mxu1 %v10896_v0 }
0x1fa5   : > { %9371 = vmatpush3.bf16.msra.mxu0 %v10293_v22  ;;  %v10307_v22 = vld [vmem:[#allocation7 + $0x120] sm:$0xff]  }
0x1fa6   : > { %9372 = vmatprep.subr.bf16.mxu0 %v10896_v0  ;;  %9387 = vmatpush3.bf16.msra.mxu1 %v10307_v22 }
0x1fa7   : > { %9388 = vmatprep.subr.bf16.mxu1 %v10896_v0 }
0x1fa9   : > { %9373 = vmatpush3.bf16.msra.mxu0 %v10294_v61  ;;  %v10308_v61 = vld [vmem:[#allocation7 + $0x118] sm:$0xff]  }
0x1faa   : > { %9374 = vmatprep.subr.bf16.mxu0 %v10896_v0  ;;  %9389 = vmatpush3.bf16.msra.mxu1 %v10308_v61 }
0x1fab   : > { %9390 = vmatprep.subr.bf16.mxu1 %v10896_v0 }
0x1fad   : > { %9375 = vmatpush3.bf16.msra.mxu0 %v10295_v57  ;;  %v10309_v57 = vld [vmem:[#allocation7 + $0x110] sm:$0xff]  }
0x1fae   : > { %9400 = vmatprep.subr.bf16.mxu0 %v10896_v0  ;;  %9391 = vmatpush3.bf16.msra.mxu1 %v10309_v57 }
0x1faf   : > { %9392 = vmatprep.subr.bf16.mxu1 %v10896_v0 }
0x2013   : > { %v3300_v52 = vpop.xlane.xlu1 %3299 }
0x2014   : > { %v3301_v53 = vmul.f32 0.03125, %v3300_v52  ;;  %v10310_v52 = vld [vmem:[#allocation7 + $0x108] sm:$0xff]  }
0x2015   : > { %9393 = vmatpush3.bf16.msra.mxu1 %v10310_v52  ;;  %v4257_v52 = vrot.slane %v11903_v51, %v11638_v27 }
0x2016   : > { %v3302_v15 = vadd.f32 1e-05, %v3301_v53  ;;  %v10311_v53 = vld [vmem:[#allocation7 + $0x100] sm:$0xff]   ;;  %9394 = vmatprep.subr.bf16.mxu1 %v10896_v0 }
0x2018   : > { %10486 = vrsqrt.f32 %v3302_v15 }
0x2019   : > { %9395 = vmatpush3.bf16.msra.mxu1 %v10311_v53 }
0x201a   : > { %9420 = vmatprep.subr.bf16.mxu1 %v10896_v0 }
0x2025   : > { %v10487_v50 = vpop.eup %10486 }
0x2026   : > { %v3304_v8 = vmul.f32 %v10487_v50, %v3297_v31 }
0x2028   : > { %v3309_v9 = vmul.f32 %v3308_v55, %v3304_v8  ;;  %v10314_v55 = vld [vmem:[#allocation7 + $0x1a8] sm:$0xff]  }
0x202a   : > { %v3314_v7 = vadd.f32 %v3313_v14, %v3309_v9 }
0x202c   : > { %v12120_v29 = vpack.c.bf16 %v3314_v7, %v3314_v7  ;;  %v10317_v7 = vld [vmem:[#allocation7 + $0x190] sm:$0xff]  }
0x2050   : > { %v4094_v38 = vpop.f32.mrf.mxu0 }
0x2051   : > { %v4100_v39 = vadd.f32 %v4094_v38, %v12080_v59  ;;  %v10299_v59 = vld [vmem:[#allocation7 + $0x160] sm:$0xff]   ;;  %v4366_v38 = vrot.slane %v11903_v51, %v11601_v41 }
0x2052   : > { %v9358_v43 = vpop.f32.mrf.mxu0  ;;  %v12226_v51 = vld [vmem:[#allocation8] sm:$0xff] }
0x2053   : > { %v4101_v46 = vpack.c.bf16 %v4100_v39, %v4100_v39 }
0x2054   : > { %v4097_v47 = vpop.f32.mrf.mxu0 }
0x2055   : > { %9377 = vmatmul.mubr.bf16.vlgmr.msra.gmra.mxu0 %v4101_v46  ;;  %v12141_v46 = vld [vmem:[#allocation14] sm:$0x3f]  ;;  %v12143_v47 = vld [vmem:[#allocation16] sm:$0x3f] }
0x2056   : > { %9401 = vmatpush3.bf16.msra.mxu0 %v10296_v20  ;;  %v9359_v58 = vpop.f32.mrf.mxu0  ;;  %9416 = vmatprep.mubr.msk.bf16.mxu0 %vm10897_vm0, %v10896_v0 }
0x2057   : > { %9402 = vmatprep.subr.bf16.mxu0 %v10896_v0  ;;  %v4228_v58 = vrot.slane %v12141_v46, %v11274_v62 }
0x205a   : > { %9403 = vmatpush3.bf16.msra.mxu0 %v10297_v60 }
0x205b   : > { %9404 = vmatprep.subr.bf16.mxu0 %v10896_v0 }
0x205e   : > { %9405 = vmatpush3.bf16.msra.mxu0 %v10298_v36 }
0x205f   : > { %9406 = vmatprep.subr.bf16.mxu0 %v10896_v0 }
0x2062   : > { %9407 = vmatpush3.bf16.msra.mxu0 %v10299_v59  ;;  %v4233_v59 = vrot.slane %v12143_v47, %v11274_v62 }
0x2063   : > { %9408 = vmatprep.subr.bf16.mxu0 %v10896_v0 }
0x2066   : > { %9409 = vmatpush3.bf16.msra.mxu0 %v10300_v2 }
0x2067   : > { %9410 = vmatprep.subr.bf16.mxu0 %v10896_v0 }
0x206a   : > { %9411 = vmatpush3.bf16.msra.mxu0 %v10301_v54  ;;  %v10312_v54 = vld [vmem:[#allocation7 + $0x1b8] sm:$0xff]  }
0x206b   : > { %9412 = vmatprep.subr.bf16.mxu0 %v10896_v0 }
0x206e   : > { %9413 = vmatpush3.bf16.msra.mxu0 %v10302_v1  ;;  %v10315_v1 = vld [vmem:[#allocation7 + $0x1a0] sm:$0xff]  }
0x206f   : > { %9414 = vmatprep.subr.bf16.mxu0 %v10896_v0 }
0x2072   : > { %9415 = vmatpush3.bf16.msra.mxu0 %v10303_v63 }
0x2073   : > { %9440 = vmatprep.subr.bf16.mxu0 %v10896_v0 }
0x2075   : > { %9417 = vmatmul.mubr.bf16.vlgmr.msra.gmra.mxu0 %v12120_v29 }
0x2076   : > { %9456 = vmatprep.mubr.msk.bf16.mxu0 %vm10897_vm0, %v10896_v0 }
0x2115   : > { %v4205_v35 = vpop.f32.mrf.mxu0 }
0x2116   : > { %v4206_v11 = vadd.f32 %v4205_v35, %v4122_v10  ;;  %v10318_v35 = vld [vmem:[#allocation7 + $0x188] sm:$0xff]  }
0x2117   : > { %v9378_v30 = vpop.f32.mrf.mxu0 }
0x2118   : > { %v4211_v56 = vadd.f32 %v4206_v11, %v11879_v37 }
0x2119   : > { %v4208_v16 = vpop.f32.mrf.mxu0 }
0x211a   : > { %v4212_v32 = vmul.f32 %v11465_v44, %v4211_v56 }
0x211b   : > { %v9379_v18 = vpop.f32.mrf.mxu0 }
0x211c   : > { %4213 = vadd.xlane.f32.xlu1 %v4212_v32 }
0x2135   : > { %v4449_v24 = vpop.f32.mrf.mxu0 }
0x2136   : > { %v4450_v39 = vadd.f32 %v4449_v24, %v4366_v38 }
0x2137   : > { %v9418_v31 = vpop.f32.mrf.mxu0 }
0x2139   : > { %v4452_v25 = vpop.f32.mrf.mxu0 }
0x213b   : > { %v9419_v28 = vpop.f32.mrf.mxu0 }
0x21a5   : > { %v4214_v3 = vpop.xlane.xlu1 %4213 }
0x21a6   : > { %v4215_v33 = vmul.f32 0.03125, %v4214_v3 }
0x21a8   : > { %v4216_v37 = vsub.f32 %v4211_v56, %v4215_v33  ;;  %v10319_v56 = vld [vmem:[#allocation7 + $0x180] sm:$0xff]  }
0x21aa   : > { %v4217_v42 = vmul.f32 %v11465_v44, %v4216_v37 }
0x21ac   : > { %v4218_v48 = vmul.f32 %v4217_v42, %v4217_v42 }
0x21ae   : > { %4219 = vadd.xlane.f32.xlu1 %v4218_v48 }
0x21e1   : > { %4564 = vxpose.xlu1.b32.start.end [1/1] (short) %v4450_v39, 128 }
0x2237   : > { %v4220_v43 = vpop.xlane.xlu1 %4219 }
0x2238   : > { %v4221_v20 = vmul.f32 0.03125, %v4220_v43 }
0x223a   : > { %v4222_v15 = vadd.f32 1e-05, %v4221_v20 }
0x223c   : > { %10488 = vrsqrt.f32 %v4222_v15 }
0x2249   : > { %v10489_v60 = vpop.eup %10488 }
0x224a   : > { %v4224_v36 = vmul.f32 %v10489_v60, %v4217_v42 }
0x224c   : > { %v4229_v2 = vmul.f32 %v4228_v58, %v4224_v36 }
0x224e   : > { %v12149_v50 = vadd.f32 %v4233_v59, %v4229_v2  ;;  %v4475_v59 = vrot.slane %v12226_v51, %v11633_v26 }
0x2250   : > { %v4235_v8 = vpack.c.bf16 %v12149_v50, %v12149_v50 }
0x2252   : > { %9397 = vmatmul.mubr.bf16.vlgmr.msra.gmra.mxu1 %v4235_v8 }
0x2253   : > { %9421 = vmatpush3.bf16.msra.mxu1 %v10312_v54  ;;  %9436 = vmatprep.mubr.msk.bf16.mxu1 %vm10897_vm0, %v10896_v0 }
0x2254   : > { %9422 = vmatprep.subr.bf16.mxu1 %v10896_v0 }
0x2257   : > { %9423 = vmatpush3.bf16.msra.mxu1 %v10313_v6 }
0x2258   : > { %9424 = vmatprep.subr.bf16.mxu1 %v10896_v0 }
0x225b   : > { %9425 = vmatpush3.bf16.msra.mxu1 %v10314_v55 }
0x225c   : > { %9426 = vmatprep.subr.bf16.mxu1 %v10896_v0 }
0x225d   : > { %v4580_v9 = vpop.trf.xlu1 }
0x225f   : > { %9427 = vmatpush3.bf16.msra.mxu1 %v10315_v1 }
0x2260   : > { %9428 = vmatprep.subr.bf16.mxu1 %v10896_v0 }
0x2261   : > { %v4581_v14 = vpop.trf.xlu1 }
0x2262   : > { %v12159_v63 = vpack.c.bf16 %v4581_v14, %v4580_v9 }
0x2263   : > { %9429 = vmatpush3.bf16.msra.mxu1 %v10316_v13 }
0x2264   : > { %9430 = vmatprep.subr.bf16.mxu1 %v10896_v0 }
0x2265   : > { %v4582_v10 = vpop.trf.xlu1 }
0x2267   : > { %9431 = vmatpush3.bf16.msra.mxu1 %v10317_v7 }
0x2268   : > { %9432 = vmatprep.subr.bf16.mxu1 %v10896_v0 }
0x2269   : > { %v4583_v11 = vpop.trf.xlu1 }
0x226a   : > { %v12163_v30 = vpack.c.bf16 %v4583_v11, %v4582_v10 }
0x226b   : > { %9433 = vmatpush3.bf16.msra.mxu1 %v10318_v35 }
0x226c   : > { %9434 = vmatprep.subr.bf16.mxu1 %v10896_v0 }
0x226d   : > { %v4584_v16 = vpop.trf.xlu1 }
0x226f   : > { %9435 = vmatpush3.bf16.msra.mxu1 %v10319_v56  ;;  %v12241_v56 = vld [vmem:[%s11350_s11] ss:$0 sm:$0xff] }
0x2270   : > { %9460 = vmatprep.subr.bf16.mxu1 %v10896_v0 }
0x2271   : > { %v4585_v32 = vpop.trf.xlu1 }
0x2272   : > { %9437 = vmatmul.mubr.bf16.vlgmr.msra.gmra.mxu1 %v12120_v29  ;;  %v12196_v57 = vpack.c.bf16 %v4585_v32, %v4584_v16 }
0x2273   : > { %9476 = vmatprep.mubr.msk.bf16.mxu1 %vm10897_vm0, %v10896_v0 }
0x2275   : > { %v4586_v18 = vpop.trf.xlu1 }
0x2279   : > { %v4587_v24 = vpop.trf.xlu1 }
0x227a   : > { %v12190_v61 = vpack.c.bf16 %v4587_v24, %v4586_v18  ;;  %v12245_v24 = vld [vmem:[%s11356_s27] ss:$0 sm:$0xff] }
0x227d   : > { %v4588_v31 = vpop.trf.xlu1 }
0x2281   : > { %v4589_v25 = vpop.trf.xlu1 }
0x2282   : > { %v12184_v22 = vpack.c.bf16 %v4589_v25, %v4588_v31 }
0x2285   : > { %v4590_v28 = vpop.trf.xlu1 }
0x2289   : > { %v4591_v45 = vpop.trf.xlu1 }
0x228a   : > { %v12178_v49 = vpack.c.bf16 %v4591_v45, %v4590_v28 }
0x228d   : > { %v4592_v34 = vpop.trf.xlu1 }
0x2291   : > { %v4593_v3 = vpop.trf.xlu1 }
0x2292   : > { %v12172_v48 = vpack.c.bf16 %v4593_v3, %v4592_v34 }
0x2295   : > { %v4594_v33 = vpop.trf.xlu1 }
0x2299   : > { %v4595_v37 = vpop.trf.xlu1 }
0x229a   : > { %v12170_v42 = vpack.c.bf16 %v4595_v37, %v4594_v33 }
0x229c   : > { %9441 = vmatpush3.bf16.msra.mxu0 %v12170_v42  ;;  %9461 = vmatpush3.bf16.msra.mxu1 %v12170_v42 }
0x229d   : > { %9442 = vmatprep.subr.bf16.mxu0 %v10896_v0  ;;  %9462 = vmatprep.subr.bf16.mxu1 %v10896_v0 }
0x22a0   : > { %9443 = vmatpush3.bf16.msra.mxu0 %v12172_v48  ;;  %9463 = vmatpush3.bf16.msra.mxu1 %v12172_v48 }
0x22a1   : > { %9444 = vmatprep.subr.bf16.mxu0 %v10896_v0  ;;  %9464 = vmatprep.subr.bf16.mxu1 %v10896_v0 }
0x22a4   : > { %9445 = vmatpush3.bf16.msra.mxu0 %v12178_v49  ;;  %9465 = vmatpush3.bf16.msra.mxu1 %v12178_v49 }
0x22a5   : > { %9446 = vmatprep.subr.bf16.mxu0 %v10896_v0  ;;  %9466 = vmatprep.subr.bf16.mxu1 %v10896_v0 }
0x22a8   : > { %9447 = vmatpush3.bf16.msra.mxu0 %v12184_v22  ;;  %9467 = vmatpush3.bf16.msra.mxu1 %v12184_v22 }
0x22a9   : > { %9448 = vmatprep.subr.bf16.mxu0 %v10896_v0  ;;  %9468 = vmatprep.subr.bf16.mxu1 %v10896_v0 }
0x22ac   : > { %9449 = vmatpush3.bf16.msra.mxu0 %v12190_v61  ;;  %9469 = vmatpush3.bf16.msra.mxu1 %v12190_v61 }
0x22ad   : > { %9450 = vmatprep.subr.bf16.mxu0 %v10896_v0  ;;  %9470 = vmatprep.subr.bf16.mxu1 %v10896_v0 }
0x22b0   : > { %9451 = vmatpush3.bf16.msra.mxu0 %v12196_v57  ;;  %9471 = vmatpush3.bf16.msra.mxu1 %v12196_v57 }
0x22b1   : > { %9452 = vmatprep.subr.bf16.mxu0 %v10896_v0  ;;  %9472 = vmatprep.subr.bf16.mxu1 %v10896_v0 }
0x22b4   : > { %9453 = vmatpush3.bf16.msra.mxu0 %v12163_v30  ;;  %9473 = vmatpush3.bf16.msra.mxu1 %v12163_v30 }
0x22b5   : > { %9454 = vmatprep.subr.bf16.mxu0 %v10896_v0  ;;  %9474 = vmatprep.subr.bf16.mxu1 %v10896_v0 }
0x22b8   : > { %9455 = vmatpush3.bf16.msra.mxu0 %v12159_v63  ;;  %9475 = vmatpush3.bf16.msra.mxu1 %v12159_v63 }
0x22b9   : > { %9480 = vmatprep.subr.bf16.mxu0 %v10896_v0  ;;  %9486 = vmatprep.subr.bf16.mxu1 %v10896_v0 }
0x2312   : > { %v4340_v53 = vpop.f32.mrf.mxu1 }
0x2313   : > { %v12216_v38 = vadd.f32 %v4340_v53, %v4257_v52 }
0x2314   : > { %v9398_v39 = vpop.f32.mrf.mxu1 }
0x2315   : > { %v4604_v43 = vmul.f32 %v11298_v4, %v12216_v38  ;;  %v4662_v20 = vmul.f32 %v11301_v5, %v12216_v38 }
0x2316   : > { %v4343_v15 = vpop.f32.mrf.mxu1 }
0x2317   : > { %v4605_v58 = vpack.c.bf16 %v4604_v43, %v4604_v43  ;;  %v4663_v60 = vpack.c.bf16 %v4662_v20, %v4662_v20 }
0x2318   : > { %v9399_v36 = vpop.f32.mrf.mxu1 }
0x2319   : > { %9457 = vmatmul.mubr.bf16.vlgmr.msra.gmra.mxu0 %v4605_v58  ;;  %9477 = vmatmul.mubr.bf16.vlgmr.msra.gmra.mxu1 %v4663_v60 }
0x231a   : > { %9482 = vmatprep.mubr.msk.bf16.mxu0 %vm10897_vm0, %v10896_v0  ;;  %9488 = vmatprep.mubr.msk.bf16.mxu1 %vm10897_vm0, %v10896_v0 }
0x2332   : > { %v4558_v2 = vpop.f32.mrf.mxu1 }
0x2333   : > { %v12230_v54 = vadd.f32 %v4558_v2, %v4475_v59 }
0x2334   : > { %v9438_v8 = vpop.f32.mrf.mxu1 }
0x2335   : > { %v4717_v6 = vmul.f32 %v11301_v5, %v12230_v54  ;;  %v4659_v55 = vmul.f32 %v11298_v4, %v12230_v54  ;;  %v4972_v2 = vmul.f32 %v11399_v19, %v12230_v54  ;;  %v4812_v8 = vmul.f32 %v11336_v17, %v12216_v38 }
0x2336   : > { %v4561_v1 = vpop.f32.mrf.mxu1 }
0x2337   : > { %v4718_v9 = vpack.c.bf16 %v4717_v6, %v4717_v6  ;;  %v4660_v13 = vpack.c.bf16 %v4659_v55, %v4659_v55  ;;  %v4973_v6 = vpack.c.bf16 %v4972_v2, %v4972_v2  ;;  %v4813_v55 = vpack.c.bf16 %v4812_v8, %v4812_v8 }
0x2338   : > { %v9439_v14 = vpop.f32.mrf.mxu1 }
0x2339   : > { %v4724_v7 = vsel %vm1473_vm8, %v4718_v9, 0  ;;  %v4770_v10 = vsel %vm1473_vm8, %v4660_v13, 0  ;;  %v4979_v1 = vsel %vm1473_vm8, %v4973_v6, 0 }
0x233a   : > { %9481 = vmatpush3.bf16.msra.mxu0 %v4724_v7  ;;  %9487 = vmatpush3.bf16.msra.mxu1 %v4770_v10 }
0x233b   : > { %9492 = vmatprep.subr.bf16.mxu0 %v10896_v0  ;;  %9512 = vmatprep.subr.bf16.mxu1 %v10896_v0 }
0x23d9   : > { %v4640_v35 = vpop.f32.mrf.mxu0  ;;  %v4698_v11 = vpop.f32.mrf.mxu1 }
0x23da   : > { %v4704_v16 = vmul.f32 %v12241_v56, %v4698_v11  ;;  %v4646_v53 = vmul.f32 %v12241_v56, %v4640_v35 }
0x23db   : > { %v9458_v32 = vpop.f32.mrf.mxu0  ;;  %v9478_v18 = vpop.f32.mrf.mxu1 }
0x23dc   : > { %v4705_v31 = vadd.f32 %v12245_v24, %v4704_v16  ;;  %v4647_v20 = vadd.f32 %v12245_v24, %v4646_v53 }
0x23dd   : > { %v4643_v25 = vpop.f32.mrf.mxu0  ;;  %v4701_v28 = vpop.f32.mrf.mxu1 }
0x23de   : > { %v4706_v45 = vsel %vm1397_vm9, %v4705_v31, -inf  ;;  %v4648_v15 = vsel %vm1397_vm9, %v4647_v20, -inf }
0x23df   : > { %v9459_v34 = vpop.f32.mrf.mxu0  ;;  %4707 = vmax.xlane.f32.xlu1 %v4706_v45  ;;  %v9479_v3 = vpop.f32.mrf.mxu1 }
0x2468   : > { %v4708_v33 = vpop.xlane.xlu1 %4707 }
0x2469   : > { %v4709_v37 = vsub.f32 %v4705_v31, %v4708_v33 }
0x246b   : > { %v4710_v52 = vmul.f32 1.442695, %v4709_v37 }
0x246d   : > { %10490 = vpow2.f32 %v4710_v52 }
0x247a   : > { %v10491_v39 = vpop.eup %10490 }
0x247b   : > { %v4712_v43 = vsel %vm1397_vm9, %v10491_v39, 0.0 }
0x247c   : > { %4713 = vadd.xlane.f32.xlu0 %v4712_v43 }
0x2480   : > { %4649 = vmax.xlane.f32.xlu0 %v4648_v15 }
0x2505   : > { %v4714_v58 = vpop.xlane.xlu0 %4713 }
0x2506   : > { %10492 = vrcp.f32 %v4714_v58 }
0x2509   : > { %v4650_v10 = vpop.xlane.xlu0 %4649 }
0x250a   : > { %v4651_v35 = vsub.f32 %v4647_v20, %v4650_v10 }
0x250c   : > { %v4652_v11 = vmul.f32 1.442695, %v4651_v35 }
0x250e   : > { %10494 = vpow2.f32 %v4652_v11 }
0x2513   : > { %v10493_v60 = vpop.eup %10492 }
0x2514   : > { %v4716_v36 = vmul.f32 %v10493_v60, %v10491_v39  ;;  %v4867_v39 = vmul.f32 %v11336_v17, %v12230_v54 }
0x2516   : > { %v4719_v59 = vpack.c.bf16 %v4716_v36, %v4716_v36  ;;  %v4868_v60 = vpack.c.bf16 %v4867_v39, %v4867_v39  ;;  %v10325_v39 = vld [vmem:[#allocation7 + $0x1d0] sm:$0xff]  }
0x2518   : > { %9483 = vmatmul.mubr.msk.bf16.vlgmr.msra.gmra.mxu0 %vm1397_vm9, %v4719_v59  ;;  %v4874_v59 = vsel %vm1473_vm8, %v4868_v60, 0 }
0x2519   : > { %9493 = vmatpush3.bf16.msra.mxu0 %v12170_v42  ;;  %9508 = vmatprep.mubr.msk.bf16.mxu0 %vm10897_vm0, %v10896_v0 }
0x251a   : > { %9494 = vmatprep.subr.bf16.mxu0 %v10896_v0 }
0x251b   : > { %v10495_v45 = vpop.eup %10494 }
0x251c   : > { %v4654_v3 = vsel %vm1397_vm9, %v10495_v45, 0.0 }
0x251d   : > { %9495 = vmatpush3.bf16.msra.mxu0 %v12172_v48 }
0x251e   : > { %9496 = vmatprep.subr.bf16.mxu0 %v10896_v0 }
0x2521   : > { %9497 = vmatpush3.bf16.msra.mxu0 %v12178_v49 }
0x2522   : > { %9498 = vmatprep.subr.bf16.mxu0 %v10896_v0 }
0x2525   : > { %9499 = vmatpush3.bf16.msra.mxu0 %v12184_v22 }
0x2526   : > { %9500 = vmatprep.subr.bf16.mxu0 %v10896_v0 }
0x2529   : > { %9501 = vmatpush3.bf16.msra.mxu0 %v12190_v61 }
0x252a   : > { %9502 = vmatprep.subr.bf16.mxu0 %v10896_v0 }
0x252d   : > { %9503 = vmatpush3.bf16.msra.mxu0 %v12196_v57 }
0x252e   : > { %9504 = vmatprep.subr.bf16.mxu0 %v10896_v0 }
0x2531   : > { %9505 = vmatpush3.bf16.msra.mxu0 %v12163_v30 }
0x2532   : > { %9506 = vmatprep.subr.bf16.mxu0 %v10896_v0 }
0x2535   : > { %9507 = vmatpush3.bf16.msra.mxu0 %v12159_v63 }
0x2536   : > { %9538 = vmatprep.subr.bf16.mxu0 %v10896_v0 }
0x2538   : > { %9509 = vmatmul.mubr.bf16.vlgmr.msra.gmra.mxu0 %v4813_v55 }
0x2539   : > { %9539 = vmatpush3.bf16.msra.mxu0 %v4979_v1  ;;  %9540 = vmatprep.mubr.msk.bf16.mxu0 %vm10897_vm0, %v10896_v0 }
0x253a   : > { %9544 = vmatprep.subr.bf16.mxu0 %v10896_v0 }
0x25d8   : > { %v12280_v9 = vpop.f32.mrf.mxu0 }
0x25da   : > { %v9484_v13 = vpop.f32.mrf.mxu0 }
0x25dc   : > { %v4763_v14 = vpop.f32.mrf.mxu0 }
0x25de   : > { %v9485_v7 = vpop.f32.mrf.mxu0 }
0x25f8   : > { %v4848_v16 = vpop.f32.mrf.mxu0 }
0x25f9   : > { %v4854_v32 = vmul.f32 %v12241_v56, %v4848_v16 }
0x25fa   : > { %v9510_v18 = vpop.f32.mrf.mxu0 }
0x25fb   : > { %v4855_v31 = vadd.f32 %v12245_v24, %v4854_v32 }
0x25fc   : > { %v4851_v25 = vpop.f32.mrf.mxu0 }
0x25fd   : > { %v4856_v28 = vsel %vm1397_vm9, %v4855_v31, -inf }
0x25fe   : > { %4857 = vmax.xlane.f32.xlu0 %v4856_v28  ;;  %v9511_v34 = vpop.f32.mrf.mxu0 }
0x2602   : > { %4655 = vadd.xlane.f32.xlu0 %v4654_v3  ;;  %v10320_v3 = vld [vmem:[#allocation7 + $0x1f8] sm:$0xff]  }
0x2687   : > { %v4858_v33 = vpop.xlane.xlu0 %4857 }
0x2688   : > { %v4859_v37 = vsub.f32 %v4855_v31, %v4858_v33 }
0x268a   : > { %v4860_v52 = vmul.f32 1.442695, %v4859_v37  ;;  %v10322_v37 = vld [vmem:[#allocation7 + $0x1e8] sm:$0xff]  }
0x268b   : > { %v4656_v53 = vpop.xlane.xlu0 %4655 }
0x268c   : > { %10496 = vpow2.f32 %v4860_v52  ;;  %v10323_v52 = vld [vmem:[#allocation7 + $0x1e0] sm:$0xff]  }
0x268d   : > { %10498 = vrcp.f32 %v4656_v53  ;;  %v10324_v53 = vld [vmem:[#allocation7 + $0x1d8] sm:$0xff]  }
0x2699   : > { %v10497_v43 = vpop.eup %10496 }
0x269a   : > { %v10499_v20 = vpop.eup %10498  ;;  %v4862_v15 = vsel %vm1397_vm9, %v10497_v43, 0.0 }
0x269b   : > { %4863 = vadd.xlane.f32.xlu0 %v4862_v15  ;;  %v4658_v58 = vmul.f32 %v10499_v20, %v10495_v45  ;;  %v10327_v20 = vld [vmem:[#allocation7 + $0x1c0] sm:$0xff]  }
0x269d   : > { %v4661_v36 = vpack.c.bf16 %v4658_v58, %v4658_v58 }
0x269f   : > { %9489 = vmatmul.mubr.msk.bf16.vlgmr.msra.gmra.mxu1 %vm1397_vm9, %v4661_v36 }
0x26a0   : > { %9513 = vmatpush3.bf16.msra.mxu1 %v4874_v59  ;;  %9514 = vmatprep.mubr.msk.bf16.mxu1 %vm10897_vm0, %v10896_v0 }
0x26a1   : > { %9518 = vmatprep.subr.bf16.mxu1 %v10896_v0 }
0x2724   : > { %v4864_v2 = vpop.xlane.xlu0 %4863 }
0x2725   : > { %10500 = vrcp.f32 %v4864_v2 }
0x2732   : > { %v10501_v54 = vpop.eup %10500 }
0x2733   : > { %v4866_v8 = vmul.f32 %v10501_v54, %v10497_v43  ;;  %v10326_v43 = vld [vmem:[#allocation7 + $0x1c8] sm:$0xff]   ;;  %v5043_v54 = vrot.slane %v12226_v51, %v11784_v23 }
0x2735   : > { %v4869_v6 = vpack.c.bf16 %v4866_v8, %v4866_v8 }
0x2737   : > { %9515 = vmatmul.mubr.msk.bf16.vlgmr.msra.gmra.mxu1 %vm1397_vm9, %v4869_v6 }
0x2738   : > { %9519 = vmatpush3.bf16.msra.mxu1 %v12170_v42  ;;  %9534 = vmatprep.mubr.msk.bf16.mxu1 %vm10897_vm0, %v10896_v0  ;;  %v4917_v42 = vmul.f32 %v11399_v19, %v12216_v38 }
0x2739   : > { %9520 = vmatprep.subr.bf16.mxu1 %v10896_v0 }
0x273c   : > { %9521 = vmatpush3.bf16.msra.mxu1 %v12172_v48  ;;  %v4918_v48 = vpack.c.bf16 %v4917_v42, %v4917_v42 }
0x273d   : > { %9522 = vmatprep.subr.bf16.mxu1 %v10896_v0 }
0x2740   : > { %9523 = vmatpush3.bf16.msra.mxu1 %v12178_v49 }
0x2741   : > { %9524 = vmatprep.subr.bf16.mxu1 %v10896_v0 }
0x2744   : > { %9525 = vmatpush3.bf16.msra.mxu1 %v12184_v22 }
0x2745   : > { %9526 = vmatprep.subr.bf16.mxu1 %v10896_v0 }
0x2748   : > { %9527 = vmatpush3.bf16.msra.mxu1 %v12190_v61 }
0x2749   : > { %9528 = vmatprep.subr.bf16.mxu1 %v10896_v0 }
0x274c   : > { %9529 = vmatpush3.bf16.msra.mxu1 %v12196_v57 }
0x274d   : > { %9530 = vmatprep.subr.bf16.mxu1 %v10896_v0 }
0x2750   : > { %9531 = vmatpush3.bf16.msra.mxu1 %v12163_v30 }
0x2751   : > { %9532 = vmatprep.subr.bf16.mxu1 %v10896_v0 }
0x2754   : > { %9533 = vmatpush3.bf16.msra.mxu1 %v12159_v63 }
0x2755   : > { %9564 = vmatprep.subr.bf16.mxu1 %v10896_v0 }
0x2757   : > { %9535 = vmatmul.mubr.bf16.vlgmr.msra.gmra.mxu1 %v4918_v48 }
0x2758   : > { %9580 = vmatprep.mubr.msk.bf16.mxu1 %vm10897_vm0, %v10896_v0 }
0x275f   : > { %v4806_v49 = vpop.f32.mrf.mxu1 }
0x2760   : > { %v4807_v30 = vadd.f32 %v4806_v49, %v12280_v9 }
0x2761   : > { %v9490_v22 = vpop.f32.mrf.mxu1 }
0x2763   : > { %v4809_v61 = vpop.f32.mrf.mxu1 }
0x2765   : > { %v9491_v57 = vpop.f32.mrf.mxu1 }
0x2766   : > { %v10328_v57 = vld [vmem:[%s12975_s16 + $0x38] sm:$0xff]  }
0x2767   : > { %9565 = vmatpush3.bf16.msra.mxu1 %v10328_v57 }
0x2768   : > { %9566 = vmatprep.subr.bf16.mxu1 %v10896_v0 }
0x27f7   : > { %v4910_v55 = vpop.f32.mrf.mxu1 }
0x27f8   : > { %v4916_v1 = vadd.f32 %v4910_v55, %v4807_v30  ;;  %v10329_v30 = vld [vmem:[%s12975_s16 + $0x30] sm:$0xff]  }
0x27f9   : > { %v9516_v13 = vpop.f32.mrf.mxu1  ;;  %9567 = vmatpush3.bf16.msra.mxu1 %v10329_v30 }
0x27fa   : > { %9568 = vmatprep.subr.bf16.mxu1 %v10896_v0 }
0x27fb   : > { %v4913_v14 = vpop.f32.mrf.mxu1 }
0x27fc   : > { %v10330_v14 = vld [vmem:[%s12975_s16 + $0x28] sm:$0xff]  }
0x27fd   : > { %v9517_v38 = vpop.f32.mrf.mxu1  ;;  %9569 = vmatpush3.bf16.msra.mxu1 %v10330_v14 }
0x27fe   : > { %v10331_v38 = vld [vmem:[%s12975_s16 + $0x20] sm:$0xff]   ;;  %9570 = vmatprep.subr.bf16.mxu1 %v10896_v0 }
0x2801   : > { %9571 = vmatpush3.bf16.msra.mxu1 %v10331_v38 }
0x2802   : > { %9572 = vmatprep.subr.bf16.mxu1 %v10896_v0 }
0x2817   : > { %v4953_v7 = vpop.f32.mrf.mxu1 }
0x2818   : > { %v4959_v63 = vmul.f32 %v12241_v56, %v4953_v7  ;;  %v10332_v7 = vld [vmem:[%s12975_s16 + $0x18] sm:$0xff]  }
0x2819   : > { %v9536_v10 = vpop.f32.mrf.mxu1  ;;  %9573 = vmatpush3.bf16.msra.mxu1 %v10332_v7 }
0x281a   : > { %v4960_v35 = vadd.f32 %v12245_v24, %v4959_v63  ;;  %v10321_v24 = vld [vmem:[#allocation7 + $0x1f0] sm:$0xff]   ;;  %9574 = vmatprep.subr.bf16.mxu1 %v10896_v0  ;;  %v10334_v10 = vld [vmem:[%s12975_s16 + $0x8] sm:$0xff]  }
0x281b   : > { %v4956_v11 = vpop.f32.mrf.mxu1  ;;  %v10333_v63 = vld [vmem:[%s12975_s16 + $0x10] sm:$0xff]  }
0x281c   : > { %v4961_v16 = vsel %vm1397_vm9, %v4960_v35, -inf  ;;  %v10336_v11 = vld [vmem:[#allocation11 + $0x38] sm:$0xff]  }
0x281d   : > { %4962 = vmax.xlane.f32.xlu0 %v4961_v16  ;;  %v9537_v32 = vpop.f32.mrf.mxu1  ;;  %9575 = vmatpush3.bf16.msra.mxu1 %v10333_v63  ;;  %v10337_v16 = vld [vmem:[#allocation11 + $0x30] sm:$0xff]  }
0x281e   : > { %9576 = vmatprep.subr.bf16.mxu1 %v10896_v0  ;;  %v10338_v32 = vld [vmem:[#allocation11 + $0x28] sm:$0xff]  }
0x2821   : > { %9577 = vmatpush3.bf16.msra.mxu1 %v10334_v10  ;;  %v10348_v10 = vld [vmem:[#allocation7 + $0x228] sm:$0xff]  }
0x2822   : > { %9578 = vmatprep.subr.bf16.mxu1 %v10896_v0 }
0x28a6   : > { %v4963_v18 = vpop.xlane.xlu0 %4962 }
0x28a7   : > { %v4964_v31 = vsub.f32 %v4960_v35, %v4963_v18  ;;  %v10335_v35 = vld [vmem:[%s12975_s16] sm:$0xff]   ;;  %v10339_v18 = vld [vmem:[#allocation11 + $0x20] sm:$0xff]  }
0x28a8   : > { %9579 = vmatpush3.bf16.msra.mxu1 %v10335_v35  ;;  %v10349_v35 = vld [vmem:[#allocation7 + $0x268] sm:$0xff]  }
0x28a9   : > { %v4965_v25 = vmul.f32 1.442695, %v4964_v31  ;;  %9604 = vmatprep.subr.bf16.mxu1 %v10896_v0  ;;  %v10340_v31 = vld [vmem:[#allocation11 + $0x18] sm:$0xff]  }
0x28ab   : > { %10502 = vpow2.f32 %v4965_v25  ;;  %v10341_v25 = vld [vmem:[#allocation11 + $0x10] sm:$0xff]  }
0x28b8   : > { %v10503_v9 = vpop.eup %10502 }
0x28b9   : > { %v4967_v28 = vsel %vm1397_vm9, %v10503_v9, 0.0 }
0x28ba   : > { %4968 = vadd.xlane.f32.xlu0 %v4967_v28 }
0x2943   : > { %v4969_v45 = vpop.xlane.xlu0 %4968 }
0x2944   : > { %10504 = vrcp.f32 %v4969_v45 }
0x2951   : > { %v10505_v34 = vpop.eup %10504 }
0x2952   : > { %v4971_v56 = vmul.f32 %v10505_v34, %v10503_v9  ;;  %v5149_v34 = vrot.slane %v12141_v46, %v11229_v21 }
0x2954   : > { %v4974_v33 = vpack.c.bf16 %v4971_v56, %v4971_v56 }
0x2956   : > { %9541 = vmatmul.mubr.msk.bf16.vlgmr.msra.gmra.mxu0 %vm1397_vm9, %v4974_v33  ;;  %v5154_v33 = vrot.slane %v12143_v47, %v11229_v21 }
0x2957   : > { %9545 = vmatpush3.bf16.msra.mxu0 %v10320_v3  ;;  %9560 = vmatprep.mubr.msk.bf16.mxu0 %vm10897_vm0, %v10896_v0 }
0x2958   : > { %9546 = vmatprep.subr.bf16.mxu0 %v10896_v0 }
0x295b   : > { %9547 = vmatpush3.bf16.msra.mxu0 %v10321_v24 }
0x295c   : > { %9548 = vmatprep.subr.bf16.mxu0 %v10896_v0 }
0x295f   : > { %9549 = vmatpush3.bf16.msra.mxu0 %v10322_v37 }
0x2960   : > { %9550 = vmatprep.subr.bf16.mxu0 %v10896_v0 }
0x2963   : > { %9551 = vmatpush3.bf16.msra.mxu0 %v10323_v52 }
0x2964   : > { %9552 = vmatprep.subr.bf16.mxu0 %v10896_v0 }
0x2967   : > { %9553 = vmatpush3.bf16.msra.mxu0 %v10324_v53  ;;  %v10342_v53 = vld [vmem:[#allocation11 + $0x8] sm:$0xff]  }
0x2968   : > { %9554 = vmatprep.subr.bf16.mxu0 %v10896_v0 }
0x296b   : > { %9555 = vmatpush3.bf16.msra.mxu0 %v10325_v39  ;;  %v10343_v39 = vld [vmem:[#allocation11] sm:$0xff]  }
0x296c   : > { %9556 = vmatprep.subr.bf16.mxu0 %v10896_v0 }
0x296f   : > { %9557 = vmatpush3.bf16.msra.mxu0 %v10326_v43  ;;  %v965_v43 = vld [vmem:[#allocation10] sm:$0x3] }
0x2970   : > { %9558 = vmatprep.subr.bf16.mxu0 %v10896_v0 }
0x2973   : > { %9559 = vmatpush3.bf16.msra.mxu0 %v10327_v20  ;;  %v5192_v20 = vrot.slane %v965_v43, %v11274_v62 }
0x2974   : > { %9584 = vmatprep.subr.bf16.mxu0 %v10896_v0 }
0x2a16   : > { %v5015_v15 = vpop.f32.mrf.mxu0 }
0x2a17   : > { %v5021_v58 = vadd.f32 %v5015_v15, %v4916_v1 }
0x2a18   : > { %v9542_v60 = vpop.f32.mrf.mxu0 }
0x2a19   : > { %v5022_v36 = vpack.c.bf16 %v5021_v58, %v5021_v58 }
0x2a1a   : > { %v5018_v59 = vpop.f32.mrf.mxu0 }
0x2a1b   : > { %9561 = vmatmul.mubr.bf16.vlgmr.msra.gmra.mxu0 %v5022_v36 }
0x2a1c   : > { %v9543_v2 = vpop.f32.mrf.mxu0  ;;  %9600 = vmatprep.mubr.msk.bf16.mxu0 %vm10897_vm0, %v10896_v0  ;;  %9585 = vmatpush3.bf16.msra.mxu0 %v10336_v11  ;;  %v10350_v11 = vld [vmem:[#allocation7 + $0x220] sm:$0xff]  }
0x2a1d   : > { %9586 = vmatprep.subr.bf16.mxu0 %v10896_v0 }
0x2a20   : > { %9587 = vmatpush3.bf16.msra.mxu0 %v10337_v16  ;;  %v10351_v16 = vld [vmem:[#allocation7 + $0x260] sm:$0xff]  }
0x2a21   : > { %9588 = vmatprep.subr.bf16.mxu0 %v10896_v0 }
0x2a24   : > { %9589 = vmatpush3.bf16.msra.mxu0 %v10338_v32  ;;  %v10352_v32 = vld [vmem:[#allocation7 + $0x218] sm:$0xff]  }
0x2a25   : > { %9590 = vmatprep.subr.bf16.mxu0 %v10896_v0 }
0x2a28   : > { %9591 = vmatpush3.bf16.msra.mxu0 %v10339_v18  ;;  %v10353_v18 = vld [vmem:[#allocation7 + $0x258] sm:$0xff]  }
0x2a29   : > { %9592 = vmatprep.subr.bf16.mxu0 %v10896_v0 }
0x2a2c   : > { %9593 = vmatpush3.bf16.msra.mxu0 %v10340_v31  ;;  %v10354_v31 = vld [vmem:[#allocation7 + $0x210] sm:$0xff]  }
0x2a2d   : > { %9594 = vmatprep.subr.bf16.mxu0 %v10896_v0 }
0x2a30   : > { %9595 = vmatpush3.bf16.msra.mxu0 %v10341_v25  ;;  %v10355_v25 = vld [vmem:[#allocation7 + $0x250] sm:$0xff]  }
0x2a31   : > { %9596 = vmatprep.subr.bf16.mxu0 %v10896_v0 }
0x2a34   : > { %9597 = vmatpush3.bf16.msra.mxu0 %v10342_v53  ;;  %v5397_v53 = vrot.slane %v12143_v47, %v11327_v12  ;;  %v10363_v47 = vld [vmem:[#allocation7 + $0x2a0] sm:$0xff]  }
0x2a35   : > { %9598 = vmatprep.subr.bf16.mxu0 %v10896_v0 }
0x2a38   : > { %9599 = vmatpush3.bf16.msra.mxu0 %v10343_v39 }
0x2a39   : > { %9624 = vmatprep.subr.bf16.mxu0 %v10896_v0 }
0x2adb   : > { %v5126_v8 = vpop.f32.mrf.mxu0 }
0x2adc   : > { %v5127_v6 = vadd.f32 %v5126_v8, %v5043_v54  ;;  %v966_v8 = vld [vmem:[#allocation13] sm:$0x3] }
0x2add   : > { %v9562_v42 = vpop.f32.mrf.mxu0 }
0x2ade   : > { %v5132_v48 = vadd.f32 %v5127_v6, %v12149_v50  ;;  %v5286_v6 = vrot.slane %v966_v8, %v11274_v62 }
0x2adf   : > { %v5129_v49 = vpop.f32.mrf.mxu0 }
0x2ae0   : > { %v5133_v22 = vmul.f32 %v11465_v44, %v5132_v48 }
0x2ae1   : > { %v9563_v61 = vpop.f32.mrf.mxu0 }
0x2ae2   : > { %5134 = vadd.xlane.f32.xlu0 %v5133_v22 }
0x2b6b   : > { %v5135_v50 = vpop.xlane.xlu0 %5134 }
0x2b6c   : > { %v5136_v51 = vmul.f32 0.03125, %v5135_v50  ;;  %v10344_v50 = vld [vmem:[#allocation7 + $0x238] sm:$0xff]  }
0x2b6e   : > { %v5137_v55 = vsub.f32 %v5132_v48, %v5136_v51  ;;  %v10345_v51 = vld [vmem:[#allocation7 + $0x278] sm:$0xff]  }
0x2b70   : > { %v5138_v1 = vmul.f32 %v11465_v44, %v5137_v55  ;;  %v10346_v55 = vld [vmem:[#allocation7 + $0x230] sm:$0xff]  }
0x2b72   : > { %v5139_v13 = vmul.f32 %v5138_v1, %v5138_v1 }
0x2b74   : > { %5140 = vadd.xlane.f32.xlu0 %v5139_v13 }
0x2bfd   : > { %v5141_v9 = vpop.xlane.xlu0 %5140 }
0x2bfe   : > { %v5142_v28 = vmul.f32 0.03125, %v5141_v9  ;;  %v10356_v9 = vld [vmem:[#allocation7 + $0x208] sm:$0xff]  }
0x2c00   : > { %v5143_v45 = vadd.f32 1e-05, %v5142_v28  ;;  %v10357_v28 = vld [vmem:[#allocation7 + $0x248] sm:$0xff]  }
0x2c02   : > { %10506 = vrsqrt.f32 %v5143_v45  ;;  %v10358_v45 = vld [vmem:[#allocation7 + $0x200] sm:$0xff]  }
0x2c0f   : > { %v10507_v56 = vpop.eup %10506 }
0x2c10   : > { %v5145_v3 = vmul.f32 %v10507_v56, %v5138_v1  ;;  %v10347_v1 = vld [vmem:[#allocation7 + $0x270] sm:$0xff]  }
0x2c12   : > { %v5150_v24 = vmul.f32 %v5149_v34, %v5145_v3  ;;  %v10359_v34 = vld [vmem:[#allocation7 + $0x240] sm:$0xff]  }
0x2c14   : > { %v5155_v37 = vadd.f32 %v5154_v33, %v5150_v24  ;;  %v5392_v24 = vrot.slane %v12141_v46, %v11327_v12  ;;  %v10362_v46 = vld [vmem:[#allocation7 + $0x2a8] sm:$0xff]  }
0x2c16   : > { %v5188_v52 = vpack.c.bf16 %v5155_v37, %v5155_v37 }
0x2c18   : > { %9581 = vmatmul.mubr.bf16.vlgmr.msra.gmra.mxu1 %v5188_v52 }
0x2c19   : > { %9620 = vmatprep.mubr.msk.bf16.mxu1 %vm10897_vm0, %v10896_v0  ;;  %9605 = vmatpush3.bf16.msra.mxu1 %v10344_v50 }
0x2c1a   : > { %9606 = vmatprep.subr.bf16.mxu1 %v10896_v0 }
0x2c1d   : > { %9607 = vmatpush3.bf16.msra.mxu1 %v10346_v55 }
0x2c1e   : > { %9608 = vmatprep.subr.bf16.mxu1 %v10896_v0 }
0x2c21   : > { %9609 = vmatpush3.bf16.msra.mxu1 %v10348_v10 }
0x2c22   : > { %9610 = vmatprep.subr.bf16.mxu1 %v10896_v0 }
0x2c25   : > { %9611 = vmatpush3.bf16.msra.mxu1 %v10350_v11 }
0x2c26   : > { %9612 = vmatprep.subr.bf16.mxu1 %v10896_v0 }
0x2c29   : > { %9613 = vmatpush3.bf16.msra.mxu1 %v10352_v32 }
0x2c2a   : > { %9614 = vmatprep.subr.bf16.mxu1 %v10896_v0 }
0x2c2d   : > { %9615 = vmatpush3.bf16.msra.mxu1 %v10354_v31 }
0x2c2e   : > { %9616 = vmatprep.subr.bf16.mxu1 %v10896_v0 }
0x2c31   : > { %9617 = vmatpush3.bf16.msra.mxu1 %v10356_v9 }
0x2c32   : > { %9618 = vmatprep.subr.bf16.mxu1 %v10896_v0 }
0x2c35   : > { %9619 = vmatpush3.bf16.msra.mxu1 %v10358_v45 }
0x2c36   : > { %9644 = vmatprep.subr.bf16.mxu1 %v10896_v0 }
0x2cd8   : > { %v5275_v15 = vpop.f32.mrf.mxu1 }
0x2cd9   : > { %v5276_v58 = vadd.f32 %v5275_v15, %v5192_v20  ;;  %v10360_v20 = vld [vmem:[#allocation7 + $0x2b8] sm:$0xff]  }
0x2cda   : > { %v9582_v60 = vpop.f32.mrf.mxu1 }
0x2cdb   : > { %v5281_v36 = vmax.f32 %v5276_v58, 0.0  ;;  %v10361_v58 = vld [vmem:[#allocation7 + $0x2b0] sm:$0xff]   ;;  %v10364_v60 = vld [vmem:[#allocation7 + $0x298] sm:$0xff]  }
0x2cdc   : > { %v5278_v59 = vpop.f32.mrf.mxu1 }
0x2cdd   : > { %v5282_v2 = vpack.c.bf16 %v5281_v36, %v5281_v36  ;;  %v10365_v36 = vld [vmem:[#allocation7 + $0x290] sm:$0xff]   ;;  %v10366_v59 = vld [vmem:[#allocation7 + $0x288] sm:$0xff]  }
0x2cde   : > { %v9583_v54 = vpop.f32.mrf.mxu1 }
0x2cdf   : > { %9601 = vmatmul.mubr.bf16.vlgmr.msra.gmra.mxu0 %v5282_v2  ;;  %v10367_v2 = vld [vmem:[#allocation7 + $0x280] sm:$0xff]   ;;  %v12430_v54 = vld [vmem:[#allocation8 + $0x8] sm:$0xff] }
0x2ce0   : > { %9640 = vmatprep.mubr.msk.bf16.mxu0 %vm10897_vm0, %v10896_v0  ;;  %9625 = vmatpush3.bf16.msra.mxu0 %v10345_v51  ;;  %v5529_v8 = vrot.slane %v12430_v54, %v11229_v21 }
0x2ce1   : > { %9626 = vmatprep.subr.bf16.mxu0 %v10896_v0 }
0x2ce4   : > { %9627 = vmatpush3.bf16.msra.mxu0 %v10347_v1 }
0x2ce5   : > { %9628 = vmatprep.subr.bf16.mxu0 %v10896_v0 }
0x2ce8   : > { %9629 = vmatpush3.bf16.msra.mxu0 %v10349_v35 }
0x2ce9   : > { %9630 = vmatprep.subr.bf16.mxu0 %v10896_v0 }
0x2cec   : > { %9631 = vmatpush3.bf16.msra.mxu0 %v10351_v16 }
0x2ced   : > { %9632 = vmatprep.subr.bf16.mxu0 %v10896_v0 }
0x2cf0   : > { %9633 = vmatpush3.bf16.msra.mxu0 %v10353_v18 }
0x2cf1   : > { %9634 = vmatprep.subr.bf16.mxu0 %v10896_v0 }
0x2cf4   : > { %9635 = vmatpush3.bf16.msra.mxu0 %v10355_v25 }
0x2cf5   : > { %9636 = vmatprep.subr.bf16.mxu0 %v10896_v0 }
0x2cf8   : > { %9637 = vmatpush3.bf16.msra.mxu0 %v10357_v28 }
0x2cf9   : > { %9638 = vmatprep.subr.bf16.mxu0 %v10896_v0 }
0x2cfc   : > { %9639 = vmatpush3.bf16.msra.mxu0 %v10359_v34 }
0x2cfd   : > { %9664 = vmatprep.subr.bf16.mxu0 %v10896_v0 }
0x2d9f   : > { %v5369_v42 = vpop.f32.mrf.mxu0 }
0x2da0   : > { %v5370_v48 = vadd.f32 %v5369_v42, %v5286_v6 }
0x2da1   : > { %v9602_v49 = vpop.f32.mrf.mxu0 }
0x2da2   : > { %v5375_v22 = vadd.f32 %v5370_v48, %v5155_v37 }
0x2da3   : > { %v5372_v61 = vpop.f32.mrf.mxu0 }
0x2da4   : > { %v5376_v57 = vmul.f32 %v11465_v44, %v5375_v22 }
0x2da5   : > { %v9603_v30 = vpop.f32.mrf.mxu0 }
0x2da6   : > { %5377 = vadd.xlane.f32.xlu0 %v5376_v57 }
0x2e2f   : > { %v5378_v13 = vpop.xlane.xlu0 %5377 }
0x2e30   : > { %v5379_v14 = vmul.f32 0.03125, %v5378_v13 }
0x2e32   : > { %v5380_v38 = vsub.f32 %v5375_v22, %v5379_v14 }
0x2e34   : > { %v5381_v7 = vmul.f32 %v11465_v44, %v5380_v38 }
0x2e36   : > { %v5382_v63 = vmul.f32 %v5381_v7, %v5381_v7 }
0x2e38   : > { %5383 = vadd.xlane.f32.xlu0 %v5382_v63 }
0x2ec1   : > { %v5384_v56 = vpop.xlane.xlu0 %5383 }
0x2ec2   : > { %v5385_v3 = vmul.f32 0.03125, %v5384_v56 }
0x2ec4   : > { %v5386_v33 = vadd.f32 1e-05, %v5385_v3 }
0x2ec6   : > { %10508 = vrsqrt.f32 %v5386_v33 }
0x2ed3   : > { %v10509_v37 = vpop.eup %10508 }
0x2ed4   : > { %v5388_v52 = vmul.f32 %v10509_v37, %v5381_v7 }
0x2ed6   : > { %v5393_v39 = vmul.f32 %v5392_v24, %v5388_v52 }
0x2ed8   : > { %v12412_v43 = vadd.f32 %v5397_v53, %v5393_v39  ;;  %v5638_v39 = vrot.slane %v12430_v54, %v11327_v12 }
0x2eda   : > { %v5399_v15 = vpack.c.bf16 %v12412_v43, %v12412_v43 }
0x2edc   : > { %9621 = vmatmul.mubr.bf16.vlgmr.msra.gmra.mxu1 %v5399_v15  ;;  %9641 = vmatmul.mubr.bf16.vlgmr.msra.gmra.mxu0 %v5399_v15 }
0x2edd   : > { %9645 = vmatpush3.bf16.msra.mxu1 %v10360_v20  ;;  %9660 = vmatprep.mubr.msk.bf16.mxu1 %vm10897_vm0, %v10896_v0  ;;  %v5420_v20 = vrot.slane %v12430_v54, %v11274_v62 }
0x2ede   : > { %9646 = vmatprep.subr.bf16.mxu1 %v10896_v0  ;;  %9680 = vmatprep.mubr.msk.bf16.mxu0 %vm10897_vm0, %v10896_v0 }
0x2ee1   : > { %9647 = vmatpush3.bf16.msra.mxu1 %v10361_v58 }
0x2ee2   : > { %9648 = vmatprep.subr.bf16.mxu1 %v10896_v0 }
0x2ee5   : > { %9649 = vmatpush3.bf16.msra.mxu1 %v10362_v46 }
0x2ee6   : > { %9650 = vmatprep.subr.bf16.mxu1 %v10896_v0 }
0x2ee9   : > { %9651 = vmatpush3.bf16.msra.mxu1 %v10363_v47 }
0x2eea   : > { %9652 = vmatprep.subr.bf16.mxu1 %v10896_v0 }
0x2eed   : > { %9653 = vmatpush3.bf16.msra.mxu1 %v10364_v60 }
0x2eee   : > { %9654 = vmatprep.subr.bf16.mxu1 %v10896_v0 }
0x2ef1   : > { %9655 = vmatpush3.bf16.msra.mxu1 %v10365_v36 }
0x2ef2   : > { %9656 = vmatprep.subr.bf16.mxu1 %v10896_v0 }
0x2ef5   : > { %9657 = vmatpush3.bf16.msra.mxu1 %v10366_v59 }
0x2ef6   : > { %9658 = vmatprep.subr.bf16.mxu1 %v10896_v0 }
0x2ef9   : > { %9659 = vmatpush3.bf16.msra.mxu1 %v10367_v2 }
0x2efa   : > { %9684 = vmatprep.subr.bf16.mxu1 %v10896_v0 }
0x2efc   : > { %9661 = vmatmul.mubr.bf16.vlgmr.msra.gmra.mxu1 %v5399_v15 }
0x2efd   : > { %9700 = vmatprep.mubr.msk.bf16.mxu1 %vm10897_vm0, %v10896_v0 }
0x2f9c   : > { %v12434_v6 = vpop.f32.mrf.mxu1  ;;  %v5612_v42 = vpop.f32.mrf.mxu0 }
0x2f9d   : > { %v5613_v48 = vadd.f32 %v5612_v42, %v5529_v8  ;;  %v12481_v12 = vadd.f32 %v12434_v6, %v5420_v20 }
0x2f9e   : > { %v9622_v49 = vpop.f32.mrf.mxu1  ;;  %v9642_v22 = vpop.f32.mrf.mxu0 }
0x2f9f   : > { %5727 = vxpose.xlu0.b32.start.end [1/1] (short) %v5613_v48, 128  ;;  %v5825_v47 = vmul.f32 %v11301_v5, %v12481_v12  ;;  %v5767_v60 = vmul.f32 %v11298_v4, %v12481_v12  ;;  %v12510_v22 = vld [vmem:[%s11994_s0] sm:$0xff] }
0x2fa0   : > { %v5506_v61 = vpop.f32.mrf.mxu1  ;;  %v5615_v57 = vpop.f32.mrf.mxu0 }
0x2fa1   : > { %v5826_v2 = vpack.c.bf16 %v5825_v47, %v5825_v47  ;;  %v5768_v8 = vpack.c.bf16 %v5767_v60, %v5767_v60 }
0x2fa2   : > { %v9623_v30 = vpop.f32.mrf.mxu1  ;;  %v9643_v50 = vpop.f32.mrf.mxu0 }
0x2fa3   : > { %v12514_v50 = vld [vmem:[%s12000_s2] sm:$0xff] }
0x2fbc   : > { %v5721_v51 = vpop.f32.mrf.mxu1 }
0x2fbd   : > { %v12476_v58 = vadd.f32 %v5721_v51, %v5638_v39 }
0x2fbe   : > { %v9662_v55 = vpop.f32.mrf.mxu1 }
0x2fbf   : > { %v5880_v62 = vmul.f32 %v11301_v5, %v12476_v58  ;;  %v5822_v46 = vmul.f32 %v11298_v4, %v12476_v58 }
0x2fc0   : > { %v5724_v1 = vpop.f32.mrf.mxu1 }
0x2fc1   : > { %v5881_v36 = vpack.c.bf16 %v5880_v62, %v5880_v62  ;;  %v5823_v59 = vpack.c.bf16 %v5822_v46, %v5822_v46 }
0x2fc2   : > { %v9663_v13 = vpop.f32.mrf.mxu1 }
0x2fc3   : > { %v5887_v6 = vsel %vm1473_vm8, %v5881_v36, 0  ;;  %v5933_v42 = vsel %vm1473_vm8, %v5823_v59, 0 }
0x301b   : > { %v5743_v14 = vpop.trf.xlu0 }
0x301f   : > { %v5744_v38 = vpop.trf.xlu0 }
0x3020   : > { %v12436_v7 = vpack.c.bf16 %v5744_v38, %v5743_v14 }
0x3023   : > { %v5745_v63 = vpop.trf.xlu0 }
0x3027   : > { %v5746_v10 = vpop.trf.xlu0 }
0x3028   : > { %v12438_v35 = vpack.c.bf16 %v5746_v10, %v5745_v63 }
0x302b   : > { %v5747_v11 = vpop.trf.xlu0 }
0x302f   : > { %v5748_v16 = vpop.trf.xlu0 }
0x3030   : > { %v12474_v15 = vpack.c.bf16 %v5748_v16, %v5747_v11 }
0x3033   : > { %v5749_v32 = vpop.trf.xlu0 }
0x3037   : > { %v5750_v18 = vpop.trf.xlu0 }
0x3038   : > { %v12464_v53 = vpack.c.bf16 %v5750_v18, %v5749_v32 }
0x303b   : > { %v5751_v31 = vpop.trf.xlu0 }
0x303f   : > { %v5752_v25 = vpop.trf.xlu0 }
0x3040   : > { %v12458_v52 = vpack.c.bf16 %v5752_v25, %v5751_v31 }
0x3043   : > { %v5753_v9 = vpop.trf.xlu0 }
0x3047   : > { %v5754_v28 = vpop.trf.xlu0 }
0x3048   : > { %v12452_v37 = vpack.c.bf16 %v5754_v28, %v5753_v9 }
0x304b   : > { %v5755_v45 = vpop.trf.xlu0 }
0x304f   : > { %v5756_v34 = vpop.trf.xlu0 }
0x3050   : > { %v12446_v24 = vpack.c.bf16 %v5756_v34, %v5755_v45 }
0x3053   : > { %v5757_v56 = vpop.trf.xlu0 }
0x3057   : > { %v5758_v3 = vpop.trf.xlu0 }
0x3058   : > { %v12440_v33 = vpack.c.bf16 %v5758_v3, %v5757_v56  ;;  %v6135_v56 = vmul.f32 %v11399_v19, %v12476_v58  ;;  %v5975_v3 = vmul.f32 %v11336_v17, %v12481_v12 }
0x305a   : > { %9665 = vmatpush3.bf16.msra.mxu0 %v12440_v33  ;;  %9685 = vmatpush3.bf16.msra.mxu1 %v12440_v33  ;;  %v6136_v39 = vpack.c.bf16 %v6135_v56, %v6135_v56  ;;  %v5976_v20 = vpack.c.bf16 %v5975_v3, %v5975_v3 }
0x305b   : > { %9666 = vmatprep.subr.bf16.mxu0 %v10896_v0  ;;  %9686 = vmatprep.subr.bf16.mxu1 %v10896_v0 }
0x305c   : > { %v6142_v62 = vsel %vm1473_vm8, %v6136_v39, 0 }
0x305e   : > { %9667 = vmatpush3.bf16.msra.mxu0 %v12446_v24  ;;  %9687 = vmatpush3.bf16.msra.mxu1 %v12446_v24 }
0x305f   : > { %9668 = vmatprep.subr.bf16.mxu0 %v10896_v0  ;;  %9688 = vmatprep.subr.bf16.mxu1 %v10896_v0 }
0x3062   : > { %9669 = vmatpush3.bf16.msra.mxu0 %v12452_v37  ;;  %9689 = vmatpush3.bf16.msra.mxu1 %v12452_v37 }
0x3063   : > { %9670 = vmatprep.subr.bf16.mxu0 %v10896_v0  ;;  %9690 = vmatprep.subr.bf16.mxu1 %v10896_v0 }
0x3066   : > { %9671 = vmatpush3.bf16.msra.mxu0 %v12458_v52  ;;  %9691 = vmatpush3.bf16.msra.mxu1 %v12458_v52 }
0x3067   : > { %9672 = vmatprep.subr.bf16.mxu0 %v10896_v0  ;;  %9692 = vmatprep.subr.bf16.mxu1 %v10896_v0 }
0x306a   : > { %9673 = vmatpush3.bf16.msra.mxu0 %v12464_v53  ;;  %9693 = vmatpush3.bf16.msra.mxu1 %v12464_v53 }
0x306b   : > { %9674 = vmatprep.subr.bf16.mxu0 %v10896_v0  ;;  %9694 = vmatprep.subr.bf16.mxu1 %v10896_v0 }
0x306e   : > { %9675 = vmatpush3.bf16.msra.mxu0 %v12474_v15  ;;  %9695 = vmatpush3.bf16.msra.mxu1 %v12474_v15 }
0x306f   : > { %9676 = vmatprep.subr.bf16.mxu0 %v10896_v0  ;;  %9696 = vmatprep.subr.bf16.mxu1 %v10896_v0 }
0x3072   : > { %9677 = vmatpush3.bf16.msra.mxu0 %v12438_v35  ;;  %9697 = vmatpush3.bf16.msra.mxu1 %v12438_v35 }
0x3073   : > { %9678 = vmatprep.subr.bf16.mxu0 %v10896_v0  ;;  %9698 = vmatprep.subr.bf16.mxu1 %v10896_v0 }
0x3076   : > { %9679 = vmatpush3.bf16.msra.mxu0 %v12436_v7  ;;  %9699 = vmatpush3.bf16.msra.mxu1 %v12436_v7 }
0x3077   : > { %9704 = vmatprep.subr.bf16.mxu0 %v10896_v0  ;;  %9710 = vmatprep.subr.bf16.mxu1 %v10896_v0 }
0x3079   : > { %9681 = vmatmul.mubr.bf16.vlgmr.msra.gmra.mxu0 %v5768_v8  ;;  %9701 = vmatmul.mubr.bf16.vlgmr.msra.gmra.mxu1 %v5826_v2 }
0x307a   : > { %9705 = vmatpush3.bf16.msra.mxu0 %v5887_v6  ;;  %9711 = vmatpush3.bf16.msra.mxu1 %v5933_v42 }
0x307b   : > { %9706 = vmatprep.mubr.msk.bf16.mxu0 %vm10897_vm0, %v10896_v0  ;;  %9716 = vmatprep.subr.bf16.mxu0 %v10896_v0 }
0x307c   : > { %9712 = vmatprep.mubr.msk.bf16.mxu1 %vm10897_vm0, %v10896_v0  ;;  %9736 = vmatprep.subr.bf16.mxu1 %v10896_v0 }
0x3139   : > { %v5803_v48 = vpop.f32.mrf.mxu0  ;;  %v5861_v49 = vpop.f32.mrf.mxu1 }
0x313a   : > { %v5867_v61 = vmul.f32 %v12510_v22, %v5861_v49  ;;  %v5809_v16 = vmul.f32 %v12510_v22, %v5803_v48 }
0x313b   : > { %v9682_v57 = vpop.f32.mrf.mxu0  ;;  %v9702_v30 = vpop.f32.mrf.mxu1 }
0x313c   : > { %v5868_v51 = vadd.f32 %v12514_v50, %v5867_v61  ;;  %v5810_v18 = vadd.f32 %v12514_v50, %v5809_v16 }
0x313d   : > { %v5806_v55 = vpop.f32.mrf.mxu0  ;;  %v5864_v1 = vpop.f32.mrf.mxu1 }
0x313e   : > { %v5869_v13 = vsel %vm1397_vm9, %v5868_v51, -inf  ;;  %v5811_v25 = vsel %vm1397_vm9, %v5810_v18, -inf }
0x313f   : > { %v9683_v14 = vpop.f32.mrf.mxu0  ;;  %5870 = vmax.xlane.f32.xlu0 %v5869_v13  ;;  %v9703_v38 = vpop.f32.mrf.mxu1 }
0x31c8   : > { %v5871_v63 = vpop.xlane.xlu0 %5870 }
0x31c9   : > { %v5872_v10 = vsub.f32 %v5868_v51, %v5871_v63  ;;  %v6030_v63 = vmul.f32 %v11336_v17, %v12476_v58 }
0x31cb   : > { %v5873_v11 = vmul.f32 1.442695, %v5872_v10 }
0x31cd   : > { %10510 = vpow2.f32 %v5873_v11 }
0x31da   : > { %v10511_v32 = vpop.eup %10510 }
0x31db   : > { %v5875_v31 = vsel %vm1397_vm9, %v10511_v32, 0.0 }
0x31dc   : > { %5876 = vadd.xlane.f32.xlu1 %v5875_v31 }
0x31e0   : > { %5812 = vmax.xlane.f32.xlu1 %v5811_v25 }
0x3265   : > { %v5877_v9 = vpop.xlane.xlu1 %5876 }
0x3266   : > { %10512 = vrcp.f32 %v5877_v9 }
0x3269   : > { %v5813_v59 = vpop.xlane.xlu1 %5812 }
0x326a   : > { %v5814_v2 = vsub.f32 %v5810_v18, %v5813_v59  ;;  %v6031_v18 = vpack.c.bf16 %v6030_v63, %v6030_v63 }
0x326c   : > { %v5815_v8 = vmul.f32 1.442695, %v5814_v2  ;;  %v6037_v25 = vsel %vm1473_vm8, %v6031_v18, 0 }
0x326e   : > { %10514 = vpow2.f32 %v5815_v8 }
0x3273   : > { %v10513_v28 = vpop.eup %10512 }
0x3274   : > { %v5879_v45 = vmul.f32 %v10513_v28, %v10511_v32 }
0x3276   : > { %v5882_v34 = vpack.c.bf16 %v5879_v45, %v5879_v45 }
0x3278   : > { %9707 = vmatmul.mubr.msk.bf16.vlgmr.msra.gmra.mxu0 %vm1397_vm9, %v5882_v34 }
0x3279   : > { %9717 = vmatpush3.bf16.msra.mxu0 %v12440_v33  ;;  %9732 = vmatprep.mubr.msk.bf16.mxu0 %vm10897_vm0, %v10896_v0 }
0x327a   : > { %9718 = vmatprep.subr.bf16.mxu0 %v10896_v0 }
0x327b   : > { %v10515_v30 = vpop.eup %10514 }
0x327c   : > { %v5817_v55 = vsel %vm1397_vm9, %v10515_v30, 0.0 }
0x327d   : > { %9719 = vmatpush3.bf16.msra.mxu0 %v12446_v24 }
0x327e   : > { %9720 = vmatprep.subr.bf16.mxu0 %v10896_v0 }
0x3281   : > { %9721 = vmatpush3.bf16.msra.mxu0 %v12452_v37 }
0x3282   : > { %9722 = vmatprep.subr.bf16.mxu0 %v10896_v0 }
0x3285   : > { %9723 = vmatpush3.bf16.msra.mxu0 %v12458_v52 }
0x3286   : > { %9724 = vmatprep.subr.bf16.mxu0 %v10896_v0 }
0x3289   : > { %9725 = vmatpush3.bf16.msra.mxu0 %v12464_v53 }
0x328a   : > { %9726 = vmatprep.subr.bf16.mxu0 %v10896_v0 }
0x328d   : > { %9727 = vmatpush3.bf16.msra.mxu0 %v12474_v15 }
0x328e   : > { %9728 = vmatprep.subr.bf16.mxu0 %v10896_v0 }
0x3291   : > { %9729 = vmatpush3.bf16.msra.mxu0 %v12438_v35 }
0x3292   : > { %9730 = vmatprep.subr.bf16.mxu0 %v10896_v0 }
0x3295   : > { %9731 = vmatpush3.bf16.msra.mxu0 %v12436_v7 }
0x3296   : > { %9762 = vmatprep.subr.bf16.mxu0 %v10896_v0 }
0x3298   : > { %9733 = vmatmul.mubr.bf16.vlgmr.msra.gmra.mxu0 %v5976_v20 }
0x3299   : > { %9763 = vmatpush3.bf16.msra.mxu0 %v6142_v62  ;;  %9764 = vmatprep.mubr.msk.bf16.mxu0 %vm10897_vm0, %v10896_v0 }
0x329a   : > { %9768 = vmatprep.subr.bf16.mxu0 %v10896_v0 }
0x3338   : > { %v12549_v46 = vpop.f32.mrf.mxu0 }
0x333a   : > { %v9708_v47 = vpop.f32.mrf.mxu0 }
0x333c   : > { %v5926_v60 = vpop.f32.mrf.mxu0 }
0x333e   : > { %v9709_v36 = vpop.f32.mrf.mxu0 }
0x3358   : > { %v6011_v6 = vpop.f32.mrf.mxu0 }
0x3359   : > { %v6017_v42 = vmul.f32 %v12510_v22, %v6011_v6 }
0x335a   : > { %v9734_v48 = vpop.f32.mrf.mxu0 }
0x335b   : > { %v6018_v49 = vadd.f32 %v12514_v50, %v6017_v42 }
0x335c   : > { %v6014_v61 = vpop.f32.mrf.mxu0 }
0x335d   : > { %v6019_v57 = vsel %vm1397_vm9, %v6018_v49, -inf  ;;  %v10368_v61 = vld [vmem:[#allocation7 + $0x2f8] sm:$0xff]  }
0x335e   : > { %6020 = vmax.xlane.f32.xlu1 %v6019_v57  ;;  %v9735_v51 = vpop.f32.mrf.mxu0 }
0x335f   : > { %v10371_v51 = vld [vmem:[#allocation7 + $0x2e0] sm:$0xff]  }
0x3362   : > { %5818 = vadd.xlane.f32.xlu1 %v5817_v55  ;;  %v10372_v55 = vld [vmem:[#allocation7 + $0x2d8] sm:$0xff]  }
0x33e7   : > { %v6021_v1 = vpop.xlane.xlu1 %6020 }
0x33e8   : > { %v6022_v13 = vsub.f32 %v6018_v49, %v6021_v1  ;;  %v10373_v1 = vld [vmem:[#allocation7 + $0x2d0] sm:$0xff]  }
0x33ea   : > { %v6023_v14 = vmul.f32 1.442695, %v6022_v13  ;;  %v10374_v13 = vld [vmem:[#allocation7 + $0x2c8] sm:$0xff]  }
0x33eb   : > { %v5819_v38 = vpop.xlane.xlu1 %5818 }
0x33ec   : > { %10516 = vpow2.f32 %v6023_v14  ;;  %v10375_v14 = vld [vmem:[#allocation7 + $0x2c0] sm:$0xff]  }
0x33ed   : > { %10518 = vrcp.f32 %v5819_v38 }
0x33f9   : > { %v10517_v10 = vpop.eup %10516 }
0x33fa   : > { %v10519_v11 = vpop.eup %10518  ;;  %v6025_v16 = vsel %vm1397_vm9, %v10517_v10, 0.0 }
0x33fb   : > { %v5821_v32 = vmul.f32 %v10519_v11, %v10515_v30  ;;  %6026 = vadd.xlane.f32.xlu1 %v6025_v16  ;;  %v10370_v30 = vld [vmem:[#allocation7 + $0x2e8] sm:$0xff]   ;;  %v10376_v11 = vld [vmem:[#allocation7 + $0x378] sm:$0xff]  }
0x33fd   : > { %v5824_v31 = vpack.c.bf16 %v5821_v32, %v5821_v32 }
0x33ff   : > { %9713 = vmatmul.mubr.msk.bf16.vlgmr.msra.gmra.mxu1 %vm1397_vm9, %v5824_v31  ;;  %v10377_v31 = vld [vmem:[#allocation7 + $0x370] sm:$0xff]  }
0x3400   : > { %9737 = vmatpush3.bf16.msra.mxu1 %v6037_v25  ;;  %9738 = vmatprep.mubr.msk.bf16.mxu1 %vm10897_vm0, %v10896_v0  ;;  %v10378_v25 = vld [vmem:[#allocation7 + $0x368] sm:$0xff]  }
0x3401   : > { %9742 = vmatprep.subr.bf16.mxu1 %v10896_v0 }
0x3484   : > { %v6027_v9 = vpop.xlane.xlu1 %6026 }
0x3485   : > { %10520 = vrcp.f32 %v6027_v9  ;;  %v10379_v9 = vld [vmem:[#allocation7 + $0x360] sm:$0xff]  }
0x3492   : > { %v10521_v58 = vpop.eup %10520 }
0x3493   : > { %v6029_v28 = vmul.f32 %v10521_v58, %v10517_v10  ;;  %v10380_v58 = vld [vmem:[#allocation7 + $0x358] sm:$0xff]  }
0x3495   : > { %v6032_v45 = vpack.c.bf16 %v6029_v28, %v6029_v28  ;;  %v10381_v28 = vld [vmem:[#allocation7 + $0x350] sm:$0xff]  }
0x3497   : > { %9739 = vmatmul.mubr.msk.bf16.vlgmr.msra.gmra.mxu1 %vm1397_vm9, %v6032_v45  ;;  %v10382_v45 = vld [vmem:[#allocation7 + $0x348] sm:$0xff]  }
0x3498   : > { %9743 = vmatpush3.bf16.msra.mxu1 %v12440_v33  ;;  %9758 = vmatprep.mubr.msk.bf16.mxu1 %vm10897_vm0, %v10896_v0  ;;  %v6080_v33 = vmul.f32 %v11399_v19, %v12481_v12 }
0x3499   : > { %9744 = vmatprep.subr.bf16.mxu1 %v10896_v0 }
0x349c   : > { %9745 = vmatpush3.bf16.msra.mxu1 %v12446_v24  ;;  %v6081_v24 = vpack.c.bf16 %v6080_v33, %v6080_v33  ;;  %v10383_v33 = vld [vmem:[#allocation7 + $0x340] sm:$0xff]  }
0x349d   : > { %9746 = vmatprep.subr.bf16.mxu1 %v10896_v0 }
0x34a0   : > { %9747 = vmatpush3.bf16.msra.mxu1 %v12452_v37 }
0x34a1   : > { %9748 = vmatprep.subr.bf16.mxu1 %v10896_v0 }
0x34a4   : > { %9749 = vmatpush3.bf16.msra.mxu1 %v12458_v52 }
0x34a5   : > { %9750 = vmatprep.subr.bf16.mxu1 %v10896_v0 }
0x34a8   : > { %9751 = vmatpush3.bf16.msra.mxu1 %v12464_v53 }
0x34a9   : > { %9752 = vmatprep.subr.bf16.mxu1 %v10896_v0 }
0x34ac   : > { %9753 = vmatpush3.bf16.msra.mxu1 %v12474_v15 }
0x34ad   : > { %9754 = vmatprep.subr.bf16.mxu1 %v10896_v0 }
0x34b0   : > { %9755 = vmatpush3.bf16.msra.mxu1 %v12438_v35 }
0x34b1   : > { %9756 = vmatprep.subr.bf16.mxu1 %v10896_v0 }
0x34b4   : > { %9757 = vmatpush3.bf16.msra.mxu1 %v12436_v7 }
0x34b5   : > { %9788 = vmatprep.subr.bf16.mxu1 %v10896_v0 }
0x34b7   : > { %9759 = vmatmul.mubr.bf16.vlgmr.msra.gmra.mxu1 %v6081_v24  ;;  %v6206_v24 = vrot.slane %v12430_v54, %v11458_v40 }
0x34b8   : > { %9804 = vmatprep.mubr.msk.bf16.mxu1 %vm10897_vm0, %v10896_v0 }
0x34bf   : > { %v5969_v37 = vpop.f32.mrf.mxu1 }
0x34c0   : > { %v5970_v35 = vadd.f32 %v5969_v37, %v12549_v46 }
0x34c1   : > { %v9714_v52 = vpop.f32.mrf.mxu1 }
0x34c3   : > { %v5972_v53 = vpop.f32.mrf.mxu1 }
0x34c5   : > { %v9715_v15 = vpop.f32.mrf.mxu1 }
0x3557   : > { %v6073_v34 = vpop.f32.mrf.mxu1 }
0x3558   : > { %v6079_v56 = vadd.f32 %v6073_v34, %v5970_v35 }
0x3559   : > { %v9740_v12 = vpop.f32.mrf.mxu1 }
0x355b   : > { %v6076_v3 = vpop.f32.mrf.mxu1 }
0x355d   : > { %v9741_v39 = vpop.f32.mrf.mxu1 }
0x3577   : > { %v6116_v20 = vpop.f32.mrf.mxu1 }
0x3578   : > { %v6122_v7 = vmul.f32 %v12510_v22, %v6116_v20 }
0x3579   : > { %v9760_v62 = vpop.f32.mrf.mxu1 }
0x357a   : > { %v6123_v47 = vadd.f32 %v12514_v50, %v6122_v7  ;;  %v10369_v50 = vld [vmem:[#allocation7 + $0x2f0] sm:$0xff]   ;;  %v10384_v7 = vld [vmem:[#allocation7 + $0x338] sm:$0xff]  }
0x357b   : > { %v6119_v60 = vpop.f32.mrf.mxu1  ;;  %9789 = vmatpush3.bf16.msra.mxu1 %v10384_v7  ;;  %v10385_v62 = vld [vmem:[#allocation7 + $0x330] sm:$0xff]  }
0x357c   : > { %v6124_v36 = vsel %vm1397_vm9, %v6123_v47, -inf  ;;  %9790 = vmatprep.subr.bf16.mxu1 %v10896_v0 }
0x357d   : > { %6125 = vmax.xlane.f32.xlu1 %v6124_v36  ;;  %v9761_v59 = vpop.f32.mrf.mxu1 }
0x357f   : > { %9791 = vmatpush3.bf16.msra.mxu1 %v10385_v62 }
0x3580   : > { %9792 = vmatprep.subr.bf16.mxu1 %v10896_v0 }
0x3606   : > { %v6126_v2 = vpop.xlane.xlu1 %6125 }
0x3607   : > { %v6127_v8 = vsub.f32 %v6123_v47, %v6126_v2  ;;  %v10386_v2 = vld [vmem:[#allocation7 + $0x328] sm:$0xff]  }
0x3608   : > { %9793 = vmatpush3.bf16.msra.mxu1 %v10386_v2  ;;  %v6340_v2 = vrot.slane %v12430_v54, %v11638_v27 }
0x3609   : > { %v6128_v6 = vmul.f32 1.442695, %v6127_v8  ;;  %9794 = vmatprep.subr.bf16.mxu1 %v10896_v0  ;;  %v10387_v8 = vld [vmem:[#allocation7 + $0x320] sm:$0xff]  }
0x360b   : > { %10522 = vpow2.f32 %v6128_v6  ;;  %v10388_v6 = vld [vmem:[#allocation7 + $0x318] sm:$0xff]  }
0x360c   : > { %9795 = vmatpush3.bf16.msra.mxu1 %v10387_v8 }
0x360d   : > { %9796 = vmatprep.subr.bf16.mxu1 %v10896_v0 }
0x3610   : > { %9797 = vmatpush3.bf16.msra.mxu1 %v10388_v6 }
0x3611   : > { %9798 = vmatprep.subr.bf16.mxu1 %v10896_v0 }
0x3618   : > { %v10523_v46 = vpop.eup %10522 }
0x3619   : > { %v6130_v42 = vsel %vm1397_vm9, %v10523_v46, 0.0 }
0x361a   : > { %6131 = vadd.xlane.f32.xlu1 %v6130_v42  ;;  %v10390_v42 = vld [vmem:[#allocation7 + $0x308] sm:$0xff]  }
0x36a3   : > { %v6132_v48 = vpop.xlane.xlu1 %6131 }
0x36a4   : > { %10524 = vrcp.f32 %v6132_v48  ;;  %v10391_v48 = vld [vmem:[#allocation7 + $0x300] sm:$0xff]  }
0x36b1   : > { %v10525_v49 = vpop.eup %10524 }
0x36b2   : > { %v6134_v22 = vmul.f32 %v10525_v49, %v10523_v46  ;;  %v10389_v46 = vld [vmem:[#allocation7 + $0x310] sm:$0xff]   ;;  %v6449_v49 = vrot.slane %v12430_v54, %v11601_v41 }
0x36b3   : > { %9799 = vmatpush3.bf16.msra.mxu1 %v10389_v46 }
0x36b4   : > { %v6137_v57 = vpack.c.bf16 %v6134_v22, %v6134_v22  ;;  %9800 = vmatprep.subr.bf16.mxu1 %v10896_v0 }
0x36b6   : > { %9765 = vmatmul.mubr.msk.bf16.vlgmr.msra.gmra.mxu0 %vm1397_vm9, %v6137_v57 }
0x36b7   : > { %9769 = vmatpush3.bf16.msra.mxu0 %v10368_v61  ;;  %9784 = vmatprep.mubr.msk.bf16.mxu0 %vm10897_vm0, %v10896_v0 }
0x36b8   : > { %9770 = vmatprep.subr.bf16.mxu0 %v10896_v0  ;;  %9801 = vmatpush3.bf16.msra.mxu1 %v10390_v42 }
0x36b9   : > { %9802 = vmatprep.subr.bf16.mxu1 %v10896_v0 }
0x36bb   : > { %9771 = vmatpush3.bf16.msra.mxu0 %v10369_v50 }
0x36bc   : > { %9772 = vmatprep.subr.bf16.mxu0 %v10896_v0  ;;  %9803 = vmatpush3.bf16.msra.mxu1 %v10391_v48 }
0x36bd   : > { %9828 = vmatprep.subr.bf16.mxu1 %v10896_v0 }
0x36bf   : > { %9773 = vmatpush3.bf16.msra.mxu0 %v10370_v30  ;;  %v12630_v30 = vld [vmem:[#allocation14] sm:$0x3f] }
0x36c0   : > { %9774 = vmatprep.subr.bf16.mxu0 %v10896_v0 }
0x36c3   : > { %9775 = vmatpush3.bf16.msra.mxu0 %v10371_v51  ;;  %v6312_v51 = vrot.slane %v12630_v30, %v11458_v40 }
0x36c4   : > { %9776 = vmatprep.subr.bf16.mxu0 %v10896_v0 }
0x36c7   : > { %9777 = vmatpush3.bf16.msra.mxu0 %v10372_v55 }
0x36c8   : > { %9778 = vmatprep.subr.bf16.mxu0 %v10896_v0 }
0x36cb   : > { %9779 = vmatpush3.bf16.msra.mxu0 %v10373_v1 }
0x36cc   : > { %9780 = vmatprep.subr.bf16.mxu0 %v10896_v0 }
0x36cf   : > { %9781 = vmatpush3.bf16.msra.mxu0 %v10374_v13  ;;  %v12634_v13 = vld [vmem:[#allocation16] sm:$0x3f] }
0x36d0   : > { %9782 = vmatprep.subr.bf16.mxu0 %v10896_v0 }
0x36d3   : > { %9783 = vmatpush3.bf16.msra.mxu0 %v10375_v14  ;;  %v6317_v14 = vrot.slane %v12634_v13, %v11458_v40  ;;  %v10395_v40 = vld [vmem:[#allocation7 + $0x3a0] sm:$0xff]  }
0x36d4   : > { %9808 = vmatprep.subr.bf16.mxu0 %v10896_v0 }
0x3776   : > { %v6178_v38 = vpop.f32.mrf.mxu0 }
0x3777   : > { %v6184_v63 = vadd.f32 %v6178_v38, %v6079_v56 }
0x3778   : > { %v9766_v10 = vpop.f32.mrf.mxu0 }
0x3779   : > { %v6185_v16 = vpack.c.bf16 %v6184_v63, %v6184_v63  ;;  %v10392_v10 = vld [vmem:[#allocation7 + $0x3b8] sm:$0xff]  }
0x377a   : > { %v6181_v32 = vpop.f32.mrf.mxu0 }
0x377b   : > { %9785 = vmatmul.mubr.bf16.vlgmr.msra.gmra.mxu0 %v6185_v16  ;;  %v10393_v16 = vld [vmem:[#allocation7 + $0x3b0] sm:$0xff]   ;;  %v10394_v32 = vld [vmem:[#allocation7 + $0x3a8] sm:$0xff]  }
0x377c   : > { %9809 = vmatpush3.bf16.msra.mxu0 %v10376_v11  ;;  %v9767_v18 = vpop.f32.mrf.mxu0  ;;  %9824 = vmatprep.mubr.msk.bf16.mxu0 %vm10897_vm0, %v10896_v0 }
0x377d   : > { %9810 = vmatprep.subr.bf16.mxu0 %v10896_v0 }
0x3780   : > { %9811 = vmatpush3.bf16.msra.mxu0 %v10377_v31  ;;  %v10396_v31 = vld [vmem:[#allocation7 + $0x398] sm:$0xff]  }
0x3781   : > { %9812 = vmatprep.subr.bf16.mxu0 %v10896_v0 }
0x3784   : > { %9813 = vmatpush3.bf16.msra.mxu0 %v10378_v25 }
0x3785   : > { %9814 = vmatprep.subr.bf16.mxu0 %v10896_v0 }
0x3788   : > { %9815 = vmatpush3.bf16.msra.mxu0 %v10379_v9 }
0x3789   : > { %9816 = vmatprep.subr.bf16.mxu0 %v10896_v0 }
0x378c   : > { %9817 = vmatpush3.bf16.msra.mxu0 %v10380_v58  ;;  %v10397_v58 = vld [vmem:[#allocation7 + $0x390] sm:$0xff]  }
0x378d   : > { %9818 = vmatprep.subr.bf16.mxu0 %v10896_v0 }
0x3790   : > { %9819 = vmatpush3.bf16.msra.mxu0 %v10381_v28 }
0x3791   : > { %9820 = vmatprep.subr.bf16.mxu0 %v10896_v0 }
0x3794   : > { %9821 = vmatpush3.bf16.msra.mxu0 %v10382_v45  ;;  %v10398_v45 = vld [vmem:[#allocation7 + $0x388] sm:$0xff]  }
0x3795   : > { %9822 = vmatprep.subr.bf16.mxu0 %v10896_v0 }
0x3798   : > { %9823 = vmatpush3.bf16.msra.mxu0 %v10383_v33 }
0x3799   : > { %9848 = vmatprep.subr.bf16.mxu0 %v10896_v0 }
0x379b   : > { %9825 = vmatmul.mubr.bf16.vlgmr.msra.gmra.mxu0 %v12120_v29 }
0x379c   : > { %9864 = vmatprep.mubr.msk.bf16.mxu0 %vm10897_vm0, %v10896_v0 }
0x383b   : > { %v6289_v37 = vpop.f32.mrf.mxu0 }
0x383c   : > { %v6290_v52 = vadd.f32 %v6289_v37, %v6206_v24  ;;  %v10399_v37 = vld [vmem:[#allocation7 + $0x380] sm:$0xff]  }
0x383d   : > { %v9786_v53 = vpop.f32.mrf.mxu0 }
0x383e   : > { %v6295_v15 = vadd.f32 %v6290_v52, %v12412_v43 }
0x383f   : > { %v6292_v35 = vpop.f32.mrf.mxu0 }
0x3840   : > { %v6296_v34 = vmul.f32 %v11465_v44, %v6295_v15 }
0x3841   : > { %v9787_v56 = vpop.f32.mrf.mxu0 }
0x3842   : > { %6297 = vadd.xlane.f32.xlu1 %v6296_v34 }
0x385b   : > { %v6532_v12 = vpop.f32.mrf.mxu0 }
0x385c   : > { %v6533_v22 = vadd.f32 %v6532_v12, %v6449_v49 }
0x385d   : > { %v9826_v3 = vpop.f32.mrf.mxu0 }
0x385f   : > { %v6535_v39 = vpop.f32.mrf.mxu0 }
0x3861   : > { %v9827_v20 = vpop.f32.mrf.mxu0 }
0x38cb   : > { %v6298_v47 = vpop.xlane.xlu1 %6297 }
0x38cc   : > { %v6299_v60 = vmul.f32 0.03125, %v6298_v47 }
0x38ce   : > { %v6300_v43 = vsub.f32 %v6295_v15, %v6299_v60 }
0x38d0   : > { %v6301_v36 = vmul.f32 %v11465_v44, %v6300_v43 }
0x38d2   : > { %v6302_v59 = vmul.f32 %v6301_v36, %v6301_v36 }
0x38d4   : > { %6303 = vadd.xlane.f32.xlu1 %v6302_v59 }
0x3907   : > { %6647 = vxpose.xlu1.b32.start.end [1/1] (short) %v6533_v22, 128 }
0x395d   : > { %v6304_v61 = vpop.xlane.xlu1 %6303 }
0x395e   : > { %v6305_v57 = vmul.f32 0.03125, %v6304_v61 }
0x3960   : > { %v6306_v50 = vadd.f32 1e-05, %v6305_v57 }
0x3962   : > { %10526 = vrsqrt.f32 %v6306_v50  ;;  %v6558_v50 = vrot.slane %v12430_v54, %v11633_v26 }
0x396f   : > { %v10527_v55 = vpop.eup %10526 }
0x3970   : > { %v6308_v1 = vmul.f32 %v10527_v55, %v6301_v36 }
0x3972   : > { %v6313_v38 = vmul.f32 %v6312_v51, %v6308_v1 }
0x3974   : > { %v12638_v63 = vadd.f32 %v6317_v14, %v6313_v38 }
0x3976   : > { %v6319_v11 = vpack.c.bf16 %v12638_v63, %v12638_v63 }
0x3978   : > { %9805 = vmatmul.mubr.bf16.vlgmr.msra.gmra.mxu1 %v6319_v11 }
0x3979   : > { %9829 = vmatpush3.bf16.msra.mxu1 %v10392_v10  ;;  %9844 = vmatprep.mubr.msk.bf16.mxu1 %vm10897_vm0, %v10896_v0 }
0x397a   : > { %9830 = vmatprep.subr.bf16.mxu1 %v10896_v0 }
0x397d   : > { %9831 = vmatpush3.bf16.msra.mxu1 %v10393_v16 }
0x397e   : > { %9832 = vmatprep.subr.bf16.mxu1 %v10896_v0 }
0x3981   : > { %9833 = vmatpush3.bf16.msra.mxu1 %v10394_v32 }
0x3982   : > { %9834 = vmatprep.subr.bf16.mxu1 %v10896_v0 }
0x3983   : > { %v6663_v18 = vpop.trf.xlu1 }
0x3985   : > { %9835 = vmatpush3.bf16.msra.mxu1 %v10395_v40 }
0x3986   : > { %9836 = vmatprep.subr.bf16.mxu1 %v10896_v0 }
0x3987   : > { %v6664_v25 = vpop.trf.xlu1 }
0x3988   : > { %v12648_v9 = vpack.c.bf16 %v6664_v25, %v6663_v18  ;;  %v12728_v18 = vld [vmem:[%s11350_s11] ss:$0 sm:$0xff]  ;;  %s8184_s11 = sshll.u32 %s11045_s6, 7  ;;  %s10898_s6 = smov [#allocation17]  }
0x3989   : > { %9837 = vmatpush3.bf16.msra.mxu1 %v10396_v31  ;;  %s12918_s5 = scalar_lea.hbm %s13040_s30, %s8184_s11 }
0x398a   : > { %9838 = vmatprep.subr.bf16.mxu1 %v10896_v0 }
0x398b   : > { %v6665_v28 = vpop.trf.xlu1 }
0x398d   : > { %9839 = vmatpush3.bf16.msra.mxu1 %v10397_v58  ;;  %v12732_v58 = vld [vmem:[%s11356_s27] ss:$0 sm:$0xff]  ;;  %s910_s27 = scalar_lea.vmem [#allocation17], %s7834_s25  ;;  %s10805_s25 = sshll.u32 %s10898_s6, 4  ;;  %s10806_s25 = int_to_ptr.vmem [resolvable:$false] %s10805_s25 }
0x398e   : > { %9840 = vmatprep.subr.bf16.mxu1 %v10896_v0  ;;  %s7611_s0 = sshll.u32 %s910_s27, 4  ;;  %s10807_s24 = scalar_lea.vmem %s10806_s25, 256  ;;  %s12920_s0 = int_to_ptr.vmem [resolvable:$true] %s7611_s0 }
0x398f   : > { %v6666_v33 = vpop.trf.xlu1  ;;  %s10801_s29 = scalar_lea.vmem %s12920_s0, 128  ;;  %p10808_p13 = scmp.lt.s32.totalorder %s12920_s0, %s10806_s25 }
0x3990   : > { %v12652_v24 = vpack.c.bf16 %v6666_v33, %v6665_v28  ;;  %p10802_p1 = scmp.ne.s32.totalorder %s12920_s0, %s10801_s29  ;;  %p10809_p10 = scmp.lt.s32.totalorder %s10807_s24, %s10801_s29 }
0x3991   : > { %9841 = vmatpush3.bf16.msra.mxu1 %v10398_v45 }
0x3992   : > { %9842 = vmatprep.subr.bf16.mxu1 %v10896_v0  ;;  %p10803_p5 = pnand %p10802_p1, %p13041_p9  ;;  %p10810_p2 = por %p10809_p10, %p10808_p13 }
0x3993   : > { %v6667_v52 = vpop.trf.xlu1 }
0x3994   : > { %p10804_p6 = pneg %p10803_p5 }
0x3995   : > { %9843 = vmatpush3.bf16.msra.mxu1 %v10399_v37 }
0x3996   : > { %9868 = vmatprep.subr.bf16.mxu1 %v10896_v0  ;;  %p10811_p3 = pnand %p10810_p2, %p10804_p6 }
0x3997   : > { %v6668_v53 = vpop.trf.xlu1 }
0x3998   : > { %9845 = vmatmul.mubr.bf16.vlgmr.msra.gmra.mxu1 %v12120_v29  ;;  %v12685_v59 = vpack.c.bf16 %v6668_v53, %v6667_v52 }
0x3999   : > { %9884 = vmatprep.mubr.msk.bf16.mxu1 %vm10897_vm0, %v10896_v0 }
0x399b   : > { %v6669_v15 = vpop.trf.xlu1 }
0x399f   : > { %v6670_v35 = vpop.trf.xlu1 }
0x39a0   : > { %v12679_v36 = vpack.c.bf16 %v6670_v35, %v6669_v15 }
0x39a3   : > { %v6671_v34 = vpop.trf.xlu1 }
0x39a7   : > { %v6672_v56 = vpop.trf.xlu1 }
0x39a8   : > { %v12673_v43 = vpack.c.bf16 %v6672_v56, %v6671_v34 }
0x39ab   : > { %v6673_v12 = vpop.trf.xlu1 }
0x39af   : > { %v6674_v3 = vpop.trf.xlu1 }
0x39b0   : > { %v12667_v29 = vpack.c.bf16 %v6674_v3, %v6673_v12 }
0x39b3   : > { %v6675_v39 = vpop.trf.xlu1 }
0x39b7   : > { %v6676_v20 = vpop.trf.xlu1 }
0x39b8   : > { %v12661_v60 = vpack.c.bf16 %v6676_v20, %v6675_v39 }
0x39bb   : > { %v6677_v7 = vpop.trf.xlu1 }
0x39bf   : > { %v6678_v62 = vpop.trf.xlu1 }
0x39c0   : > { %v12659_v47 = vpack.c.bf16 %v6678_v62, %v6677_v7 }
0x39c2   : > { %9849 = vmatpush3.bf16.msra.mxu0 %v12659_v47  ;;  %9869 = vmatpush3.bf16.msra.mxu1 %v12659_v47 }
0x39c3   : > { %9850 = vmatprep.subr.bf16.mxu0 %v10896_v0  ;;  %9870 = vmatprep.subr.bf16.mxu1 %v10896_v0 }
0x39c6   : > { %9851 = vmatpush3.bf16.msra.mxu0 %v12661_v60  ;;  %9871 = vmatpush3.bf16.msra.mxu1 %v12661_v60 }
0x39c7   : > { %9852 = vmatprep.subr.bf16.mxu0 %v10896_v0  ;;  %9872 = vmatprep.subr.bf16.mxu1 %v10896_v0 }
0x39ca   : > { %9853 = vmatpush3.bf16.msra.mxu0 %v12667_v29  ;;  %9873 = vmatpush3.bf16.msra.mxu1 %v12667_v29 }
0x39cb   : > { %9854 = vmatprep.subr.bf16.mxu0 %v10896_v0  ;;  %9874 = vmatprep.subr.bf16.mxu1 %v10896_v0 }
0x39ce   : > { %9855 = vmatpush3.bf16.msra.mxu0 %v12673_v43  ;;  %9875 = vmatpush3.bf16.msra.mxu1 %v12673_v43 }
0x39cf   : > { %9856 = vmatprep.subr.bf16.mxu0 %v10896_v0  ;;  %9876 = vmatprep.subr.bf16.mxu1 %v10896_v0 }
0x39d2   : > { %9857 = vmatpush3.bf16.msra.mxu0 %v12679_v36  ;;  %9877 = vmatpush3.bf16.msra.mxu1 %v12679_v36 }
0x39d3   : > { %9858 = vmatprep.subr.bf16.mxu0 %v10896_v0  ;;  %9878 = vmatprep.subr.bf16.mxu1 %v10896_v0 }
0x39d6   : > { %9859 = vmatpush3.bf16.msra.mxu0 %v12685_v59  ;;  %9879 = vmatpush3.bf16.msra.mxu1 %v12685_v59 }
0x39d7   : > { %9860 = vmatprep.subr.bf16.mxu0 %v10896_v0  ;;  %9880 = vmatprep.subr.bf16.mxu1 %v10896_v0 }
0x39da   : > { %9861 = vmatpush3.bf16.msra.mxu0 %v12652_v24  ;;  %9881 = vmatpush3.bf16.msra.mxu1 %v12652_v24 }
0x39db   : > { %9862 = vmatprep.subr.bf16.mxu0 %v10896_v0  ;;  %9882 = vmatprep.subr.bf16.mxu1 %v10896_v0 }
0x39de   : > { %9863 = vmatpush3.bf16.msra.mxu0 %v12648_v9  ;;  %9883 = vmatpush3.bf16.msra.mxu1 %v12648_v9 }
0x39df   : > { %9888 = vmatprep.subr.bf16.mxu0 %v10896_v0  ;;  %9894 = vmatprep.subr.bf16.mxu1 %v10896_v0 }
0x3a38   : > { %v6423_v8 = vpop.f32.mrf.mxu1 }
0x3a39   : > { %v12705_v6 = vadd.f32 %v6423_v8, %v6340_v2 }
0x3a3a   : > { %v9806_v46 = vpop.f32.mrf.mxu1 }
0x3a3b   : > { %v6687_v42 = vmul.f32 %v11298_v4, %v12705_v6  ;;  %v6745_v48 = vmul.f32 %v11301_v5, %v12705_v6 }
0x3a3c   : > { %v6426_v49 = vpop.f32.mrf.mxu1 }
0x3a3d   : > { %v6688_v22 = vpack.c.bf16 %v6687_v42, %v6687_v42  ;;  %v6746_v61 = vpack.c.bf16 %v6745_v48, %v6745_v48  ;;  %v6895_v42 = vmul.f32 %v11336_v17, %v12705_v6 }
0x3a3e   : > { %v9807_v57 = vpop.f32.mrf.mxu1 }
0x3a3f   : > { %9865 = vmatmul.mubr.bf16.vlgmr.msra.gmra.mxu0 %v6688_v22  ;;  %9885 = vmatmul.mubr.bf16.vlgmr.msra.gmra.mxu1 %v6746_v61  ;;  %v6896_v49 = vpack.c.bf16 %v6895_v42, %v6895_v42 }
0x3a40   : > { %9890 = vmatprep.mubr.msk.bf16.mxu0 %vm10897_vm0, %v10896_v0  ;;  %9896 = vmatprep.mubr.msk.bf16.mxu1 %vm10897_vm0, %v10896_v0 }
0x3a58   : > { %v6641_v51 = vpop.f32.mrf.mxu1 }
0x3a59   : > { %v12717_v55 = vadd.f32 %v6641_v51, %v6558_v50 }
0x3a5a   : > { %v9846_v1 = vpop.f32.mrf.mxu1 }
0x3a5b   : > { %v6800_v14 = vmul.f32 %v11301_v5, %v12717_v55  ;;  %v6742_v38 = vmul.f32 %v11298_v4, %v12717_v55  ;;  %v7055_v46 = vmul.f32 %v11399_v19, %v12717_v55 }
0x3a5c   : > { %v6644_v10 = vpop.f32.mrf.mxu1 }
0x3a5d   : > { %v6801_v11 = vpack.c.bf16 %v6800_v14, %v6800_v14  ;;  %v6743_v16 = vpack.c.bf16 %v6742_v38, %v6742_v38  ;;  %v7056_v48 = vpack.c.bf16 %v7055_v46, %v7055_v46 }
0x3a5e   : > { %v9847_v32 = vpop.f32.mrf.mxu1 }
0x3a5f   : > { %v6807_v40 = vsel %vm1473_vm8, %v6801_v11, 0  ;;  %v6853_v26 = vsel %vm1473_vm8, %v6743_v16, 0  ;;  %v7062_v22 = vsel %vm1473_vm8, %v7056_v48, 0 }
0x3a60   : > { %9889 = vmatpush3.bf16.msra.mxu0 %v6807_v40  ;;  %9895 = vmatpush3.bf16.msra.mxu1 %v6853_v26 }
0x3a61   : > { %9900 = vmatprep.subr.bf16.mxu0 %v10896_v0  ;;  %9920 = vmatprep.subr.bf16.mxu1 %v10896_v0 }
0x3aff   : > { %v6723_v54 = vpop.f32.mrf.mxu0  ;;  %v6781_v5 = vpop.f32.mrf.mxu1 }
0x3b00   : > { %v6787_v4 = vmul.f32 %v12728_v18, %v6781_v5  ;;  %v6729_v56 = vmul.f32 %v12728_v18, %v6723_v54 }
0x3b01   : > { %v9866_v31 = vpop.f32.mrf.mxu0  ;;  %v9886_v25 = vpop.f32.mrf.mxu1 }
0x3b02   : > { %v6788_v28 = vadd.f32 %v12732_v58, %v6787_v4  ;;  %v6730_v3 = vadd.f32 %v12732_v58, %v6729_v56 }
0x3b03   : > { %v6726_v45 = vpop.f32.mrf.mxu0  ;;  %v6784_v33 = vpop.f32.mrf.mxu1 }
0x3b04   : > { %v6789_v37 = vsel %vm1397_vm9, %v6788_v28, -inf  ;;  %v6731_v20 = vsel %vm1397_vm9, %v6730_v3, -inf  ;;  %v6950_v33 = vmul.f32 %v11336_v17, %v12717_v55 }
0x3b05   : > { %v9867_v52 = vpop.f32.mrf.mxu0  ;;  %6790 = vmax.xlane.f32.xlu1 %v6789_v37  ;;  %v9887_v53 = vpop.f32.mrf.mxu1 }
0x3b8e   : > { %v6791_v15 = vpop.xlane.xlu1 %6790 }
0x3b8f   : > { %v6792_v35 = vsub.f32 %v6788_v28, %v6791_v15 }
0x3b91   : > { %v6793_v34 = vmul.f32 1.442695, %v6792_v35  ;;  %v6951_v35 = vpack.c.bf16 %v6950_v33, %v6950_v33 }
0x3b93   : > { %10528 = vpow2.f32 %v6793_v34  ;;  %v6957_v56 = vsel %vm1473_vm8, %v6951_v35, 0 }
0x3ba0   : > { %v10529_v12 = vpop.eup %10528 }
0x3ba1   : > { %v6795_v39 = vsel %vm1397_vm9, %v10529_v12, 0.0 }
0x3ba2   : > { %6796 = vadd.xlane.f32.xlu0 %v6795_v39 }
0x3ba6   : > { %6732 = vmax.xlane.f32.xlu0 %v6731_v20 }
0x3c2b   : > { %v6797_v7 = vpop.xlane.xlu0 %6796 }
0x3c2c   : > { %10530 = vrcp.f32 %v6797_v7 }
0x3c2f   : > { %v6733_v1 = vpop.xlane.xlu0 %6732 }
0x3c30   : > { %v6734_v14 = vsub.f32 %v6730_v3, %v6733_v1 }
0x3c32   : > { %v6735_v38 = vmul.f32 1.442695, %v6734_v14  ;;  %v10400_v14 = vld [vmem:[#allocation7 + $0x3f8] sm:$0xff]  }
0x3c34   : > { %10532 = vpow2.f32 %v6735_v38 }
0x3c39   : > { %v10531_v62 = vpop.eup %10530 }
0x3c3a   : > { %v6799_v2 = vmul.f32 %v10531_v62, %v10529_v12 }
0x3c3c   : > { %v6802_v8 = vpack.c.bf16 %v6799_v2, %v6799_v2 }
0x3c3e   : > { %9891 = vmatmul.mubr.msk.bf16.vlgmr.msra.gmra.mxu0 %vm1397_vm9, %v6802_v8 }
0x3c3f   : > { %9901 = vmatpush3.bf16.msra.mxu0 %v12659_v47  ;;  %9916 = vmatprep.mubr.msk.bf16.mxu0 %vm10897_vm0, %v10896_v0 }
0x3c40   : > { %9902 = vmatprep.subr.bf16.mxu0 %v10896_v0 }
0x3c41   : > { %v10533_v54 = vpop.eup %10532 }
0x3c42   : > { %v6737_v4 = vsel %vm1397_vm9, %v10533_v54, 0.0 }
0x3c43   : > { %9903 = vmatpush3.bf16.msra.mxu0 %v12661_v60 }
0x3c44   : > { %9904 = vmatprep.subr.bf16.mxu0 %v10896_v0 }
0x3c47   : > { %9905 = vmatpush3.bf16.msra.mxu0 %v12667_v29 }
0x3c48   : > { %9906 = vmatprep.subr.bf16.mxu0 %v10896_v0 }
0x3c4b   : > { %9907 = vmatpush3.bf16.msra.mxu0 %v12673_v43 }
0x3c4c   : > { %9908 = vmatprep.subr.bf16.mxu0 %v10896_v0 }
0x3c4f   : > { %9909 = vmatpush3.bf16.msra.mxu0 %v12679_v36 }
0x3c50   : > { %9910 = vmatprep.subr.bf16.mxu0 %v10896_v0 }
0x3c53   : > { %9911 = vmatpush3.bf16.msra.mxu0 %v12685_v59 }
0x3c54   : > { %9912 = vmatprep.subr.bf16.mxu0 %v10896_v0 }
0x3c57   : > { %9913 = vmatpush3.bf16.msra.mxu0 %v12652_v24 }
0x3c58   : > { %9914 = vmatprep.subr.bf16.mxu0 %v10896_v0 }
0x3c5b   : > { %9915 = vmatpush3.bf16.msra.mxu0 %v12648_v9 }
0x3c5c   : > { %9946 = vmatprep.subr.bf16.mxu0 %v10896_v0 }
0x3c5e   : > { %9917 = vmatmul.mubr.bf16.vlgmr.msra.gmra.mxu0 %v6896_v49 }
0x3c5f   : > { %9947 = vmatpush3.bf16.msra.mxu0 %v7062_v22  ;;  %9948 = vmatprep.mubr.msk.bf16.mxu0 %vm10897_vm0, %v10896_v0 }
0x3c60   : > { %9952 = vmatprep.subr.bf16.mxu0 %v10896_v0 }
0x3cfe   : > { %v12767_v61 = vpop.f32.mrf.mxu0 }
0x3d00   : > { %v9892_v57 = vpop.f32.mrf.mxu0 }
0x3d02   : > { %v6846_v50 = vpop.f32.mrf.mxu0 }
0x3d04   : > { %v9893_v51 = vpop.f32.mrf.mxu0 }
0x3d1e   : > { %v6931_v10 = vpop.f32.mrf.mxu0 }
0x3d1f   : > { %v6937_v11 = vmul.f32 %v12728_v18, %v6931_v10  ;;  %v10402_v10 = vld [vmem:[#allocation7 + $0x3e8] sm:$0xff]  }
0x3d20   : > { %v9918_v16 = vpop.f32.mrf.mxu0 }
0x3d21   : > { %v6938_v32 = vadd.f32 %v12732_v58, %v6937_v11  ;;  %v10403_v11 = vld [vmem:[#allocation7 + $0x3e0] sm:$0xff]   ;;  %v10404_v16 = vld [vmem:[#allocation7 + $0x3d8] sm:$0xff]  }
0x3d22   : > { %v6934_v40 = vpop.f32.mrf.mxu0 }
0x3d23   : > { %v6939_v26 = vsel %vm1397_vm9, %v6938_v32, -inf  ;;  %v10406_v40 = vld [vmem:[#allocation7 + $0x3c8] sm:$0xff]  }
0x3d24   : > { %6940 = vmax.xlane.f32.xlu0 %v6939_v26  ;;  %v9919_v5 = vpop.f32.mrf.mxu0  ;;  %v10407_v26 = vld [vmem:[#allocation7 + $0x3c0] sm:$0xff]  }
0x3d28   : > { %6738 = vadd.xlane.f32.xlu0 %v6737_v4 }
0x3dad   : > { %v6941_v31 = vpop.xlane.xlu0 %6940 }
0x3dae   : > { %v6942_v25 = vsub.f32 %v6938_v32, %v6941_v31  ;;  %v10405_v32 = vld [vmem:[#allocation7 + $0x3d0] sm:$0xff]  }
0x3db0   : > { %v6943_v28 = vmul.f32 1.442695, %v6942_v25 }
0x3db1   : > { %v6739_v45 = vpop.xlane.xlu0 %6738 }
0x3db2   : > { %10534 = vpow2.f32 %v6943_v28 }
0x3db3   : > { %10536 = vrcp.f32 %v6739_v45  ;;  %v10564_v45 = vld [vmem:[#allocation8 + $0x8] sm:$0xff] }
0x3db4   : > { %v7126_v33 = vrot.slane %v10564_v45, %v11784_v23  ;;  %v10424_v45 = vld [vmem:[%s12981_s22 + $0x38] sm:$0xff]  }
0x3dbf   : > { %v10535_v37 = vpop.eup %10534 }
0x3dc0   : > { %v10537_v52 = vpop.eup %10536  ;;  %v6945_v53 = vsel %vm1397_vm9, %v10535_v37, 0.0 }
0x3dc1   : > { %v6741_v15 = vmul.f32 %v10537_v52, %v10533_v54  ;;  %6946 = vadd.xlane.f32.xlu0 %v6945_v53 }
0x3dc3   : > { %v6744_v34 = vpack.c.bf16 %v6741_v15, %v6741_v15 }
0x3dc5   : > { %9897 = vmatmul.mubr.msk.bf16.vlgmr.msra.gmra.mxu1 %vm1397_vm9, %v6744_v34 }
0x3dc6   : > { %9921 = vmatpush3.bf16.msra.mxu1 %v6957_v56  ;;  %9922 = vmatprep.mubr.msk.bf16.mxu1 %vm10897_vm0, %v10896_v0 }
0x3dc7   : > { %9926 = vmatprep.subr.bf16.mxu1 %v10896_v0 }
0x3e4a   : > { %v6947_v12 = vpop.xlane.xlu0 %6946 }
0x3e4b   : > { %10538 = vrcp.f32 %v6947_v12  ;;  %v10408_v12 = vld [vmem:[%s12975_s16 + $0x78] sm:$0xff]  }
0x3e58   : > { %v10539_v17 = vpop.eup %10538 }
0x3e59   : > { %v6949_v55 = vmul.f32 %v10539_v17, %v10535_v37  ;;  %v10409_v17 = vld [vmem:[%s12975_s16 + $0x70] sm:$0xff]  }
0x3e5b   : > { %v6952_v3 = vpack.c.bf16 %v6949_v55, %v6949_v55 }
0x3e5d   : > { %9923 = vmatmul.mubr.msk.bf16.vlgmr.msra.gmra.mxu1 %vm1397_vm9, %v6952_v3 }
0x3e5e   : > { %9927 = vmatpush3.bf16.msra.mxu1 %v12659_v47  ;;  %9942 = vmatprep.mubr.msk.bf16.mxu1 %vm10897_vm0, %v10896_v0  ;;  %v7000_v47 = vmul.f32 %v11399_v19, %v12705_v6 }
0x3e5f   : > { %9928 = vmatprep.subr.bf16.mxu1 %v10896_v0 }
0x3e62   : > { %9929 = vmatpush3.bf16.msra.mxu1 %v12661_v60  ;;  %v7001_v60 = vpack.c.bf16 %v7000_v47, %v7000_v47 }
0x3e63   : > { %9930 = vmatprep.subr.bf16.mxu1 %v10896_v0 }
0x3e66   : > { %9931 = vmatpush3.bf16.msra.mxu1 %v12667_v29 }
0x3e67   : > { %9932 = vmatprep.subr.bf16.mxu1 %v10896_v0 }
0x3e6a   : > { %9933 = vmatpush3.bf16.msra.mxu1 %v12673_v43 }
0x3e6b   : > { %9934 = vmatprep.subr.bf16.mxu1 %v10896_v0 }
0x3e6e   : > { %9935 = vmatpush3.bf16.msra.mxu1 %v12679_v36 }
0x3e6f   : > { %9936 = vmatprep.subr.bf16.mxu1 %v10896_v0 }
0x3e72   : > { %9937 = vmatpush3.bf16.msra.mxu1 %v12685_v59 }
0x3e73   : > { %9938 = vmatprep.subr.bf16.mxu1 %v10896_v0 }
0x3e76   : > { %9939 = vmatpush3.bf16.msra.mxu1 %v12652_v24 }
0x3e77   : > { %9940 = vmatprep.subr.bf16.mxu1 %v10896_v0 }
0x3e7a   : > { %9941 = vmatpush3.bf16.msra.mxu1 %v12648_v9 }
0x3e7b   : > { %9972 = vmatprep.subr.bf16.mxu1 %v10896_v0 }
0x3e7d   : > { %9943 = vmatmul.mubr.bf16.vlgmr.msra.gmra.mxu1 %v7001_v60  ;;  %v10410_v60 = vld [vmem:[%s12975_s16 + $0x68] sm:$0xff]  }
0x3e7e   : > { %9988 = vmatprep.mubr.msk.bf16.mxu1 %vm10897_vm0, %v10896_v0  ;;  %9973 = vmatpush3.bf16.msra.mxu1 %v10408_v12  ;;  %v10430_v12 = vld [vmem:[%s12981_s22 + $0x8] sm:$0xff]  }
0x3e7f   : > { %9974 = vmatprep.subr.bf16.mxu1 %v10896_v0 }
0x3e82   : > { %9975 = vmatpush3.bf16.msra.mxu1 %v10409_v17  ;;  %v10431_v17 = vld [vmem:[%s12981_s22] sm:$0xff]  }
0x3e83   : > { %9976 = vmatprep.subr.bf16.mxu1 %v10896_v0 }
0x3e85   : > { %v6889_v29 = vpop.f32.mrf.mxu1 }
0x3e86   : > { %v6890_v24 = vadd.f32 %v6889_v29, %v12767_v61  ;;  %9977 = vmatpush3.bf16.msra.mxu1 %v10410_v60  ;;  %v10411_v29 = vld [vmem:[%s12975_s16 + $0x60] sm:$0xff]  }
0x3e87   : > { %v9898_v43 = vpop.f32.mrf.mxu1  ;;  %9978 = vmatprep.subr.bf16.mxu1 %v10896_v0 }
0x3e88   : > { %v10412_v43 = vld [vmem:[%s12975_s16 + $0x58] sm:$0xff]  }
0x3e89   : > { %v6892_v36 = vpop.f32.mrf.mxu1 }
0x3e8a   : > { %9979 = vmatpush3.bf16.msra.mxu1 %v10411_v29  ;;  %v10413_v36 = vld [vmem:[%s12975_s16 + $0x50] sm:$0xff]   ;;  %v7482_v29 = vrot.slane %v12634_v13, %v11601_v41 }
0x3e8b   : > { %v9899_v59 = vpop.f32.mrf.mxu1  ;;  %9980 = vmatprep.subr.bf16.mxu1 %v10896_v0 }
0x3e8c   : > { %v10414_v59 = vld [vmem:[%s12975_s16 + $0x48] sm:$0xff]  }
0x3e8e   : > { %9981 = vmatpush3.bf16.msra.mxu1 %v10412_v43 }
0x3e8f   : > { %9982 = vmatprep.subr.bf16.mxu1 %v10896_v0 }
0x3e92   : > { %9983 = vmatpush3.bf16.msra.mxu1 %v10413_v36 }
0x3e93   : > { %9984 = vmatprep.subr.bf16.mxu1 %v10896_v0 }
0x3e96   : > { %9985 = vmatpush3.bf16.msra.mxu1 %v10414_v59 }
0x3e97   : > { %9986 = vmatprep.subr.bf16.mxu1 %v10896_v0 }
0x3f1d   : > { %v6993_v39 = vpop.f32.mrf.mxu1 }
0x3f1e   : > { %v6999_v20 = vadd.f32 %v6993_v39, %v6890_v24  ;;  %v10415_v24 = vld [vmem:[%s12975_s16 + $0x40] sm:$0xff]   ;;  %v10416_v39 = vld [vmem:[#allocation11 + $0x78] sm:$0xff]  }
0x3f1f   : > { %v9924_v19 = vpop.f32.mrf.mxu1  ;;  %9987 = vmatpush3.bf16.msra.mxu1 %v10415_v24 }
0x3f20   : > { %10012 = vmatprep.subr.bf16.mxu1 %v10896_v0  ;;  %v10418_v19 = vld [vmem:[#allocation11 + $0x68] sm:$0xff]  }
0x3f21   : > { %v6996_v6 = vpop.f32.mrf.mxu1 }
0x3f22   : > { %v10419_v6 = vld [vmem:[#allocation11 + $0x60] sm:$0xff]  }
0x3f23   : > { %v9925_v7 = vpop.f32.mrf.mxu1 }
0x3f24   : > { %v10420_v7 = vld [vmem:[#allocation11 + $0x58] sm:$0xff]  }
0x3f3d   : > { %v7036_v62 = vpop.f32.mrf.mxu1 }
0x3f3e   : > { %v7042_v9 = vmul.f32 %v12728_v18, %v7036_v62  ;;  %v10421_v62 = vld [vmem:[#allocation11 + $0x50] sm:$0xff]  }
0x3f3f   : > { %v9944_v2 = vpop.f32.mrf.mxu1 }
0x3f40   : > { %v7043_v8 = vadd.f32 %v12732_v58, %v7042_v9  ;;  %v10401_v58 = vld [vmem:[#allocation7 + $0x3f0] sm:$0xff]  }
0x3f41   : > { %v7039_v46 = vpop.f32.mrf.mxu1 }
0x3f42   : > { %v7044_v42 = vsel %vm1397_vm9, %v7043_v8, -inf  ;;  %v7232_v46 = vrot.slane %v12630_v30, %v11638_v27 }
0x3f43   : > { %7045 = vmax.xlane.f32.xlu0 %v7044_v42  ;;  %v9945_v48 = vpop.f32.mrf.mxu1 }
0x3fcc   : > { %v7046_v49 = vpop.xlane.xlu0 %7045 }
0x3fcd   : > { %v7047_v22 = vsub.f32 %v7043_v8, %v7046_v49  ;;  %v7237_v49 = vrot.slane %v12634_v13, %v11638_v27 }
0x3fcf   : > { %v7048_v57 = vmul.f32 1.442695, %v7047_v22 }
0x3fd1   : > { %10540 = vpow2.f32 %v7048_v57 }
0x3fde   : > { %v10541_v61 = vpop.eup %10540 }
0x3fdf   : > { %v7050_v50 = vsel %vm1397_vm9, %v10541_v61, 0.0 }
0x3fe0   : > { %7051 = vadd.xlane.f32.xlu0 %v7050_v50  ;;  %v10422_v50 = vld [vmem:[#allocation11 + $0x48] sm:$0xff]  }
0x4069   : > { %v7052_v51 = vpop.xlane.xlu0 %7051 }
0x406a   : > { %10542 = vrcp.f32 %v7052_v51  ;;  %v10423_v51 = vld [vmem:[#allocation11 + $0x40] sm:$0xff]  }
0x4077   : > { %v10543_v1 = vpop.eup %10542 }
0x4078   : > { %v7054_v18 = vmul.f32 %v10543_v1, %v10541_v61  ;;  %v10565_v1 = vld [vmem:[#allocation10] sm:$0x3] }
0x407a   : > { %v7057_v38 = vpack.c.bf16 %v7054_v18, %v7054_v18  ;;  %v7277_v18 = vrot.slane %v10565_v1, %v11229_v21 }
0x407c   : > { %9949 = vmatmul.mubr.msk.bf16.vlgmr.msra.gmra.mxu0 %vm1397_vm9, %v7057_v38 }
0x407d   : > { %9953 = vmatpush3.bf16.msra.mxu0 %v10400_v14  ;;  %9968 = vmatprep.mubr.msk.bf16.mxu0 %vm10897_vm0, %v10896_v0 }
0x407e   : > { %9954 = vmatprep.subr.bf16.mxu0 %v10896_v0 }
0x4081   : > { %9955 = vmatpush3.bf16.msra.mxu0 %v10401_v58 }
0x4082   : > { %9956 = vmatprep.subr.bf16.mxu0 %v10896_v0 }
0x4085   : > { %9957 = vmatpush3.bf16.msra.mxu0 %v10402_v10 }
0x4086   : > { %9958 = vmatprep.subr.bf16.mxu0 %v10896_v0 }
0x4089   : > { %9959 = vmatpush3.bf16.msra.mxu0 %v10403_v11 }
0x408a   : > { %9960 = vmatprep.subr.bf16.mxu0 %v10896_v0 }
0x408d   : > { %9961 = vmatpush3.bf16.msra.mxu0 %v10404_v16 }
0x408e   : > { %9962 = vmatprep.subr.bf16.mxu0 %v10896_v0 }
0x4091   : > { %9963 = vmatpush3.bf16.msra.mxu0 %v10405_v32  ;;  %v10566_v32 = vld [vmem:[#allocation13] sm:$0x3] }
0x4092   : > { %9964 = vmatprep.subr.bf16.mxu0 %v10896_v0 }
0x4095   : > { %9965 = vmatpush3.bf16.msra.mxu0 %v10406_v40  ;;  %v7371_v40 = vrot.slane %v10566_v32, %v11229_v21 }
0x4096   : > { %9966 = vmatprep.subr.bf16.mxu0 %v10896_v0 }
0x4099   : > { %9967 = vmatpush3.bf16.msra.mxu0 %v10407_v26 }
0x409a   : > { %9992 = vmatprep.subr.bf16.mxu0 %v10896_v0 }
0x413c   : > { %v7098_v54 = vpop.f32.mrf.mxu0 }
0x413d   : > { %v7104_v5 = vadd.f32 %v7098_v54, %v6999_v20  ;;  %v10417_v20 = vld [vmem:[#allocation11 + $0x70] sm:$0xff]  }
0x413e   : > { %v9950_v4 = vpop.f32.mrf.mxu0 }
0x413f   : > { %v7105_v31 = vpack.c.bf16 %v7104_v5, %v7104_v5 }
0x4140   : > { %v7101_v25 = vpop.f32.mrf.mxu0 }
0x4141   : > { %9969 = vmatmul.mubr.bf16.vlgmr.msra.gmra.mxu0 %v7105_v31 }
0x4142   : > { %v9951_v28 = vpop.f32.mrf.mxu0  ;;  %10008 = vmatprep.mubr.msk.bf16.mxu0 %vm10897_vm0, %v10896_v0  ;;  %9993 = vmatpush3.bf16.msra.mxu0 %v10416_v39 }
0x4143   : > { %9994 = vmatprep.subr.bf16.mxu0 %v10896_v0 }
0x4146   : > { %9995 = vmatpush3.bf16.msra.mxu0 %v10417_v20 }
0x4147   : > { %9996 = vmatprep.subr.bf16.mxu0 %v10896_v0 }
0x414a   : > { %9997 = vmatpush3.bf16.msra.mxu0 %v10418_v19 }
0x414b   : > { %9998 = vmatprep.subr.bf16.mxu0 %v10896_v0 }
0x414e   : > { %9999 = vmatpush3.bf16.msra.mxu0 %v10419_v6 }
0x414f   : > { %10000 = vmatprep.subr.bf16.mxu0 %v10896_v0 }
0x4152   : > { %10001 = vmatpush3.bf16.msra.mxu0 %v10420_v7 }
0x4153   : > { %10002 = vmatprep.subr.bf16.mxu0 %v10896_v0 }
0x4156   : > { %10003 = vmatpush3.bf16.msra.mxu0 %v10421_v62 }
0x4157   : > { %10004 = vmatprep.subr.bf16.mxu0 %v10896_v0 }
0x415a   : > { %10005 = vmatpush3.bf16.msra.mxu0 %v10422_v50 }
0x415b   : > { %10006 = vmatprep.subr.bf16.mxu0 %v10896_v0 }
0x415e   : > { %10007 = vmatpush3.bf16.msra.mxu0 %v10423_v51 }
0x4201   : > { %v7209_v37 = vpop.f32.mrf.mxu0 }
0x4202   : > { %v7210_v52 = vadd.f32 %v7209_v37, %v7126_v33  ;;  %v10425_v33 = vld [vmem:[%s12981_s22 + $0x30] sm:$0xff]  }
0x4203   : > { %v9970_v53 = vpop.f32.mrf.mxu0 }
0x4204   : > { %v7215_v15 = vadd.f32 %v7210_v52, %v12638_v63 }
0x4205   : > { %v7212_v35 = vpop.f32.mrf.mxu0 }
0x4206   : > { %v7216_v34 = vmul.f32 %v11465_v44, %v7215_v15  ;;  %v10426_v35 = vld [vmem:[%s12981_s22 + $0x28] sm:$0xff]  }
0x4207   : > { %v9971_v56 = vpop.f32.mrf.mxu0 }
0x4208   : > { %7217 = vadd.xlane.f32.xlu0 %v7216_v34  ;;  %v10427_v34 = vld [vmem:[%s12981_s22 + $0x20] sm:$0xff]   ;;  %v10429_v56 = vld [vmem:[%s12981_s22 + $0x10] sm:$0xff]  }
0x4291   : > { %v7218_v23 = vpop.xlane.xlu0 %7217 }
0x4292   : > { %v7219_v63 = vmul.f32 0.03125, %v7218_v23 }
0x4294   : > { %v7220_v55 = vsub.f32 %v7215_v15, %v7219_v63 }
0x4296   : > { %v7221_v3 = vmul.f32 %v11465_v44, %v7220_v55 }
0x4298   : > { %v7222_v47 = vmul.f32 %v7221_v3, %v7221_v3 }
0x429a   : > { %7223 = vadd.xlane.f32.xlu0 %v7222_v47 }
0x4323   : > { %v7224_v9 = vpop.xlane.xlu0 %7223 }
0x4324   : > { %v7225_v2 = vmul.f32 0.03125, %v7224_v9 }
0x4326   : > { %v7226_v8 = vadd.f32 1e-05, %v7225_v2 }
0x4328   : > { %10544 = vrsqrt.f32 %v7226_v8 }
0x4335   : > { %v10545_v42 = vpop.eup %10544 }
0x4336   : > { %v7228_v48 = vmul.f32 %v10545_v42, %v7221_v3  ;;  %v7477_v3 = vrot.slane %v12630_v30, %v11601_v41 }
0x4338   : > { %v7233_v22 = vmul.f32 %v7232_v46, %v7228_v48 }
0x433a   : > { %v7238_v57 = vadd.f32 %v7237_v49, %v7233_v22 }
0x433c   : > { %v7273_v61 = vpack.c.bf16 %v7238_v57, %v7238_v57 }
0x433e   : > { %9989 = vmatmul.mubr.bf16.vlgmr.msra.gmra.mxu1 %v7273_v61 }
0x433f   : > { %10028 = vmatprep.mubr.msk.bf16.mxu1 %vm10897_vm0, %v10896_v0  ;;  %10013 = vmatpush3.bf16.msra.mxu1 %v10424_v45 }
0x4340   : > { %10014 = vmatprep.subr.bf16.mxu1 %v10896_v0 }
0x4343   : > { %10015 = vmatpush3.bf16.msra.mxu1 %v10425_v33 }
0x4344   : > { %10016 = vmatprep.subr.bf16.mxu1 %v10896_v0 }
0x4347   : > { %10017 = vmatpush3.bf16.msra.mxu1 %v10426_v35 }
0x4348   : > { %10018 = vmatprep.subr.bf16.mxu1 %v10896_v0 }
0x434b   : > { %10019 = vmatpush3.bf16.msra.mxu1 %v10427_v34 }
0x434c   : > { %10020 = vmatprep.subr.bf16.mxu1 %v10896_v0 }
0x43fe   : > { %v7360_v14 = vpop.f32.mrf.mxu1 }
0x43ff   : > { %v7361_v38 = vadd.f32 %v7360_v14, %v7277_v18 }
0x4400   : > { %v9990_v58 = vpop.f32.mrf.mxu1 }
0x4401   : > { %v7366_v27 = vmax.f32 %v7361_v38, 0.0 }
0x4402   : > { %v7363_v10 = vpop.f32.mrf.mxu1 }
0x4403   : > { %v7367_v11 = vpack.c.bf16 %v7366_v27, %v7366_v27 }
0x4404   : > { %v9991_v16 = vpop.f32.mrf.mxu1 }
0x4405   : > { %10009 = vmatmul.mubr.bf16.vlgmr.msra.gmra.mxu0 %v7367_v11 }
0x44c5   : > { %v7454_v26 = vpop.f32.mrf.mxu0 }
0x44c6   : > { %v7455_v54 = vadd.f32 %v7454_v26, %v7371_v40 }
0x44c7   : > { %v10010_v5 = vpop.f32.mrf.mxu0 }
0x44c8   : > { %v7460_v4 = vadd.f32 %v7455_v54, %v7238_v57 }
0x44c9   : > { %v7457_v31 = vpop.f32.mrf.mxu0 }
0x44ca   : > { %v7461_v25 = vmul.f32 %v11465_v44, %v7460_v4 }
0x44cb   : > { %v10011_v28 = vpop.f32.mrf.mxu0 }
0x44cc   : > { %7462 = vadd.xlane.f32.xlu0 %v7461_v25 }
0x4555   : > { %v7463_v21 = vpop.xlane.xlu0 %7462 }
0x4556   : > { %v7464_v37 = vmul.f32 0.03125, %v7463_v21 }
0x4558   : > { %v7465_v52 = vsub.f32 %v7460_v4, %v7464_v37 }
0x455a   : > { %v7466_v53 = vmul.f32 %v11465_v44, %v7465_v52  ;;  %v10428_v44 = vld [vmem:[%s12981_s22 + $0x18] sm:$0xff]  }
0x455b   : > { %10021 = vmatpush3.bf16.msra.mxu1 %v10428_v44 }
0x455c   : > { %v7467_v15 = vmul.f32 %v7466_v53, %v7466_v53  ;;  %10022 = vmatprep.subr.bf16.mxu1 %v10896_v0 }
0x455e   : > { %7468 = vadd.xlane.f32.xlu0 %v7467_v15 }
0x455f   : > { %10023 = vmatpush3.bf16.msra.mxu1 %v10429_v56 }
0x4560   : > { %10024 = vmatprep.subr.bf16.mxu1 %v10896_v0 }
0x4563   : > { %10025 = vmatpush3.bf16.msra.mxu1 %v10430_v12 }
0x4564   : > { %10026 = vmatprep.subr.bf16.mxu1 %v10896_v0  ;;  %v8174_v0 = vld [vmem:[%s12982_s23] ss:$0 sm:$0xff] }
0x4567   : > { %10027 = vmatpush3.bf16.msra.mxu1 %v10431_v17 }
0x45e7   : > { %v7469_v23 = vpop.xlane.xlu0 %7468 }
0x45e8   : > { %v7470_v63 = vmul.f32 0.03125, %v7469_v23 }
0x45ea   : > { %v7471_v55 = vadd.f32 1e-05, %v7470_v63 }
0x45ec   : > { %10546 = vrsqrt.f32 %v7471_v55 }
0x45f9   : > { %v10547_v47 = vpop.eup %10546 }
0x45fa   : > { %v7473_v60 = vmul.f32 %v10547_v47, %v7466_v53 }
0x45fc   : > { %v7478_v43 = vmul.f32 %v7477_v3, %v7473_v60 }
0x45fe   : > { %v7483_v36 = vadd.f32 %v7482_v29, %v7478_v43 }
0x4600   : > { %v7484_v59 = vpack.c.bf16 %v7483_v36, %v7483_v36 }
0x4602   : > { %10029 = vmatmul.mubr.bf16.vlgmr.msra.gmra.mxu1 %v7484_v59 }
0x46c2   : > { %v7590_v30 = vpop.f32.mrf.mxu1 }
0x46c3   : > { %v7591_v24 = vadd.f32 %v8174_v0, %v7590_v30 }
0x46c4   : > { %v10030_v41 = vpop.f32.mrf.mxu1 }
0x46c5   : > { %7596 = vst [vmem:[%s910_s27] sm:$0xff] %v7591_v24 }
0x46c6   : > { %v7593_v13 = vpop.f32.mrf.mxu1 }
0x46c7   : > { %10814 = shalt.err (!%p10811_p3)
}
0x46c8   : > { %s10815_s11 = scalar_lea.hbm %s12918_s5, 128  ;;  %s10819_s2 = scalar_lea.hbm %s13040_s30, 256 }
0x46c9   : > { %p10816_p12 = scmp.ne.s32.totalorder %s12918_s5, %s10815_s11  ;;  %p10820_p8 = scmp.lt.s32.totalorder %s12918_s5, %s13040_s30 }
0x46ca   : > { %p10821_p11 = scmp.lt.s32.totalorder %s10819_s2, %s10815_s11 }
0x46cb   : > { %p10817_p4 = pnand %p10816_p12, %p13041_p9 }
0x46cc   : > { %p10822_p0 = por %p10821_p11, %p10820_p8 }
0x46cd   : > { %p10818_p7 = pneg %p10817_p4 }
0x46cf   : > { %p10823_p1 = pnand %p10822_p0, %p10818_p7 }
0x46d1   : > { %10826 = shalt.err (!%p10823_p1)
}
0x46d2   : > { %10068 = dma.vmem_to_hbm [thread:$0]  (%p13041_p9), %s12920_s0, 128, %s12918_s5, %s7598_s28   ;;  %v10031_v39 = vpop.f32.mrf.mxu1 }
0x46d3 PF: > { %s13042_s29 = sld [smem:[#allocation26_spill]] }
0x46d4   : > { %s13043_s25 = sld [smem:[#allocation24_spill]] }
0x46d5   : > { %s13044_s24 = sld [smem:[#allocation29_spill]] }
0x46d9   : > { %p10120_p5 = scmp.ge.s32.totalorder %s13042_s29, 2 }
0x46da   : > { %s7623_s8 = sand.u32 1, %s13043_s25  }
0x46db   : > { %p13045_p6 = scmp.ne.s32.totalorder %s13044_s24, 0  ;;  %s7624_s27 = scalar_lea.sflag [#allocation4], %s7623_s8 }
0x46dd   : > { %p10099_p13 = pnand %p10120_p5, %p13045_p6 }
0x46df   : > { %p10100_p10 = pneg %p10099_p13 }
0x46e1   : > { %10864 = dma.done.wait (%p10100_p10), %s7624_s27, 128  }
0x46e2   : > { %10866 = vsyncadd (%p10100_p10), %s7624_s27, 4294967168  ;;  %s13046_s28 = sld [smem:[#allocation27_spill]]  ;;  %s13049_s5 = smov %s10873_s26 }
0x46e3   : > { %s13047_s11 = sld [smem:[#allocation25_spill]] }
0x46e4   : > { %s13048_s27 = sld [smem:[#allocation28_spill]] }
0x46e8   : > { %p39_p2 = scmp.ge.s32.totalorder %s13046_s28, 4  }
0x46e9   : > { %s13050_s26 = smov %s13047_s11 }
0x46ea   :  { %41 = sbr.rel (!%p39_p2) target bundleno = 20 (0x14), region = 229 }
0x46ef   :  { %7629 = vsyncpa [#allocation3], 1 }
0x46f0   :  { %7631 = vsyncpa [#allocation3 + $0x1], 1 }
0x46f1   :  { %7632 = vsyncpa [#allocation6], 1 }
0x46f2   :  { %7633 = vsyncpa [#allocation9], 1 }
0x46f3   :  { %7634 = vsyncpa [#allocation12], 1 }
0x46f4   :  { %7635 = vsyncpa [#allocation15], 1 }
0x46f5   :  { %7636 = vsyncpa [#allocation4], 1 }
0x46f6   :  { %7638 = vsyncpa [#allocation4 + $0x1], 1 }

</bundles_post_ra>
